<compile_context>
chip_gen: v5e
topology: v5e:2x2
jax: 0.10.0
libtpu: 0.0.40
codegen_flags: <defaults>
</compile_context>

<pallas_src>
import math
import functools

import jax
import jax.numpy as jnp
from jax import lax
from jax.experimental import pallas as pl
from jax.experimental.pallas import tpu as pltpu

# PointNet(dim=3): time_dim = 12, layer widths 3->64->128->256->128->64->3
TIME_DIM = 12
HALF_DIM = TIME_DIM // 2
TIME_PAD = 16  # per-layer slot in the packed time-MLP tensors (tile aligned)
LAYER_DIMS = [(3, 64), (64, 128), (128, 256), (256, 128), (128, 64), (64, 3)]
N_LAYERS = len(LAYER_DIMS)
_EMB_LOG_SCALE = math.log(10000.0) / (HALF_DIM - 1)


def _round16(n):
    return ((n + 15) // 16) * 16


# Row offsets of each layer's folded (dout, ...) block inside the packed
# block-diagonal FW / FB buffers (dout padded up to a multiple of 16 so all
# in-kernel slices stay sublane aligned).
_FW_OFFSETS = []
_off = 0
for _din, _dout in LAYER_DIMS:
    _FW_OFFSETS.append(_off)
    _off += _round16(_dout)
_FW_TOTAL = _off  # 656


def _gelu_exact(x):
    # nn.GELU() default = exact erf formulation.
    return 0.5 * x * (1.0 + lax.erf(x * (1.0 / math.sqrt(2.0))))


def pointnet_kernel(t_ref, x_ref, tw1_ref, tb1_ref, fwbd_ref, fb_ref,
                    w0_ref, w1_ref, w2_ref, w3_ref, w4_ref, w5_ref, o_ref):
    w_refs = (w0_ref, w1_ref, w2_ref, w3_ref, w4_ref, w5_ref)

    # ---- Fused sinusoidal time embedding: (12, bm), lane-dense ------------
    # rows 0..5 -> sin(f_k * t), rows 6..11 -> cos(f_k * t) = sin(f_k*t + pi/2)
    t = t_ref[...]                                             # f32 (1, bm)
    row = lax.broadcasted_iota(jnp.int32, (TIME_DIM, 1), 0)    # (12, 1)
    k = jnp.where(row < HALF_DIM, row, row - HALF_DIM).astype(jnp.float32)
    freqs = jnp.exp(k * (-_EMB_LOG_SCALE))                     # f32 (12, 1)
    phase = (row >= HALF_DIM).astype(jnp.float32) * (0.5 * math.pi)
    emb = jnp.sin(freqs * t + phase)                           # f32 (12, bm), EUP
    emb_b = emb.astype(jnp.bfloat16)

    # ---- Batched time-MLP stage 1 for all six layers: one dot + GELU ------
    #   (96, 12) @ (12, bm) -> (96, bm); bias add + exact-erf GELU in f32.
    h = jnp.dot(tw1_ref[...], emb_b, preferred_element_type=jnp.float32)
    h = _gelu_exact(h + tb1_ref[...])                          # f32 (96, bm)
    h_b = h.astype(jnp.bfloat16)

    # ---- Block-diagonal fold: all six time contributions in ONE matmul ----
    #   c[off_l:off_l+dout] = (W_l @ t2w_l) h_l + (W_l @ t2b_l + b_l)
    c = jnp.dot(fwbd_ref[...], h_b, preferred_element_type=jnp.float32)
    c = c + fb_ref[...]                                        # f32 (656, bm)

    # ---- Main point MLP: relu(W_l x + c_l), a single MXU dot per layer ----
    x_b = x_ref[...]                                           # bf16 (3, bm)
    act = None
    for l, (din, dout) in enumerate(LAYER_DIMS):
        off = _FW_OFFSETS[l]
        acc = jnp.dot(w_refs[l][...], x_b, preferred_element_type=jnp.float32)
        act = jnp.maximum(acc + c[off:off + dout, :], 0.0)     # f32 (dout, bm)
        x_b = act.astype(jnp.bfloat16)

    o_ref[...] = act.astype(o_ref.dtype)


def init_params(key):
    """Per-layer params in PyTorch layout: weight (out, in), bias (out,)."""
    params = []
    for l, (din, dout) in enumerate(LAYER_DIMS):
        ks = jax.random.split(jax.random.fold_in(key, l), 6)
        params.append(dict(
            t1w=jax.random.normal(ks[0], (TIME_DIM, TIME_DIM), jnp.float32)
                * (1.0 / math.sqrt(TIME_DIM)),
            t1b=jax.random.normal(ks[1], (TIME_DIM,), jnp.float32) * 0.02,
            t2w=jax.random.normal(ks[2], (din, TIME_DIM), jnp.float32)
                * (1.0 / math.sqrt(TIME_DIM)),
            t2b=jax.random.normal(ks[3], (din,), jnp.float32) * 0.02,
            W=jax.random.normal(ks[4], (dout, din), jnp.float32)
              * math.sqrt(2.0 / din),
            b=jax.random.normal(ks[5], (dout,), jnp.float32) * 0.02,
        ))
    return params


def pack_params(params):
    """One-time packing/folding of params (hoisted out of the forward path).

    Folds t_emb into the main linear:
        relu(W (x + t2w h + t2b) + b) = relu(W x + (W t2w) h + (W t2b + b))
    and lays the (W t2w) blocks out as a block-diagonal (656, 96) matrix so the
    kernel can apply all six time contributions with a single matmul.
    """
    tw1p = jnp.zeros((TIME_PAD * N_LAYERS, TIME_DIM), jnp.float32)
    tb1p = jnp.zeros((TIME_PAD * N_LAYERS, 1), jnp.float32)
    fwbd = jnp.zeros((_FW_TOTAL, TIME_PAD * N_LAYERS), jnp.float32)
    fbp = jnp.zeros((_FW_TOTAL, 1), jnp.float32)
    ws = []
    for l, (din, dout) in enumerate(LAYER_DIMS):
        p = params[l]
        t1w = p["t1w"].astype(jnp.float32)     # (12, 12)
        t1b = p["t1b"].astype(jnp.float32)     # (12,)
        t2w = p["t2w"].astype(jnp.float32)     # (din, 12)
        t2b = p["t2b"].astype(jnp.float32)     # (din,)
        W = p["W"].astype(jnp.float32)         # (dout, din)
        b = p["b"].astype(jnp.float32)         # (dout,)

        r0 = TIME_PAD * l
        tw1p = tw1p.at[r0:r0 + TIME_DIM, :].set(t1w)
        tb1p = tb1p.at[r0:r0 + TIME_DIM, 0].set(t1b)

        o0 = _FW_OFFSETS[l]
        fwbd = fwbd.at[o0:o0 + dout, r0:r0 + TIME_DIM].set(W @ t2w)
        fbp = fbp.at[o0:o0 + dout, 0].set(W @ t2b + b)
        ws.append(W.astype(jnp.bfloat16))
    return (tw1p.astype(jnp.bfloat16), tb1p,
            fwbd.astype(jnp.bfloat16), fbp, tuple(ws))


def _choose_bm(B, max_bm=2048):
    """Largest 128-multiple tile (<= max_bm) preferring >= 4 grid steps (v7x),
    falling back to >= 2, then 1.  Cap keeps the (656, bm) f32 time tensor +
    activations comfortably under the 32 MiB scoped VMEM on all generations."""
    b128 = max(128, ((B + 127) // 128) * 128)
    for min_grid in (4, 2, 1):
        for bm in (2048, 1024, 512, 256, 128):
            if bm <= max_bm and b128 >= min_grid * bm:
                return bm
    return 128


@functools.partial(jax.jit, static_argnames=("bm",))
def pointnet_forward(x, t, packed, *, bm=None):
    """x: (B, 3) f32, t: (B,) f32, packed: output of pack_params()."""
    B = x.shape[0]
    if bm is None:
        bm = _choose_bm(B)
    Bp = ((B + bm - 1) // bm) * bm
    if Bp != B:
        x = jnp.pad(x, ((0, Bp - B), (0, 0)))
        t = jnp.pad(t, (0, Bp - B))

    # Lane-dense layout: points on the 128-lane axis.
    x_t = x.T.astype(jnp.bfloat16)                       # (3, Bp) bf16
    t_r = t.astype(jnp.float32)[None, :]                 # (1, Bp) f32
    tw1p, tb1p, fwbd, fbp, ws = packed

    grid = (Bp // bm,)

    def const_spec(shape):
        return pl.BlockSpec(shape, lambda i: (0, 0))

    in_specs = [
        pl.BlockSpec((1, bm), lambda i: (0, i)),          # t   (1, Bp)
        pl.BlockSpec((3, bm), lambda i: (0, i)),          # x   (3, Bp)
        const_spec(tw1p.shape),                           # packed time-MLP W1
        const_spec(tb1p.shape),                           # packed time-MLP b1
        const_spec(fwbd.shape),                           # block-diag (W @ t2w)
        const_spec(fbp.shape),                            # folded (W @ t2b + b)
    ] + [const_spec(w.shape) for w in ws]                 # main layer weights
    out_specs = pl.BlockSpec((3, bm), lambda i: (0, i))

    out_t = pl.pallas_call(
        pointnet_kernel,
        out_shape=jax.ShapeDtypeStruct((3, Bp), jnp.float32),
        grid_spec=pltpu.PrefetchScalarGridSpec(
            num_scalar_prefetch=0,
            grid=grid,
            in_specs=in_specs,
            out_specs=out_specs,
        ),
        compiler_params=pltpu.CompilerParams(
            dimension_semantics=("parallel",),
            vmem_limit_bytes=32 * 1024 * 1024,
        ),
    )(t_r, x_t, tw1p, tb1p, fwbd, fbp, *ws)

    return out_t.T[:B]   # back to (B, 3) to match the PyTorch module


def sinusoidal_pos_emb(t, dim):
    half_dim = dim // 2
    c = math.log(10000.0) / (half_dim - 1)
    freqs = jnp.exp(jnp.arange(half_dim, dtype=jnp.float32) * -c)
    e = t[:, None] * freqs[None, :]
    return jnp.concatenate([jnp.sin(e), jnp.cos(e)], axis=1)


def pointnet_reference(x, t, params):
    """Pure-JAX f32 reference reproducing the PyTorch forward semantics."""
    emb = sinusoidal_pos_emb(t.astype(jnp.float32), TIME_DIM)   # (B, 12)
    h_x = x.astype(jnp.float32)
    for l, (din, dout) in enumerate(LAYER_DIMS):
        p = params[l]
        h = _gelu_exact(emb @ p["t1w"].T + p["t1b"])
        t_emb = h @ p["t2w"].T + p["t2b"]
        h_x = h_x + t_emb
        h_x = jnp.maximum(h_x @ p["W"].T + p["b"], 0.0)
    return h_x  # residual=False


if __name__ == "__main__":
    key = jax.random.PRNGKey(0)
    kx, kt, kp = jax.random.split(key, 3)

    B = 2048                     # number of points; bm auto-chosen (512 -> grid 4)
    x = jax.random.normal(kx, (B, 3), jnp.float32)
    t = jax.random.uniform(kt, (B,), jnp.float32, 0.0, 1000.0)
    params = init_params(kp)

    packed = pack_params(params)             # packed ONCE, outside the forward path
    out = pointnet_forward(x, t, packed)
    out = jax.block_until_ready(out)

    ref = pointnet_reference(x, t, params)
    assert out.shape == (B, 3)
    max_err = float(jnp.max(jnp.abs(out - ref)))
    # bf16 MXU operands (f32 accumulation) -> relaxed tolerance vs f32 reference.
    assert jnp.allclose(out, ref, rtol=5e-2, atol=5e-2), (
        f"mismatch vs reference (max abs err {max_err:.3e})")

    print("KERNEL_OK")
</pallas_src>

<mosaic_0001>
module attributes {stable_mosaic.version = 11 : i64} {
  func.func @pointnet_kernel(%arg0: i32, %arg1: memref<1x512xf32, #tpu.memory_space<vmem>>, %arg2: memref<3x512xbf16, #tpu.memory_space<vmem>>, %arg3: memref<96x12xbf16, #tpu.memory_space<vmem>>, %arg4: memref<96x1xf32, #tpu.memory_space<vmem>>, %arg5: memref<656x96xbf16, #tpu.memory_space<vmem>>, %arg6: memref<656x1xf32, #tpu.memory_space<vmem>>, %arg7: memref<64x3xbf16, #tpu.memory_space<vmem>>, %arg8: memref<128x64xbf16, #tpu.memory_space<vmem>>, %arg9: memref<256x128xbf16, #tpu.memory_space<vmem>>, %arg10: memref<128x256xbf16, #tpu.memory_space<vmem>>, %arg11: memref<64x128xbf16, #tpu.memory_space<vmem>>, %arg12: memref<3x64xbf16, #tpu.memory_space<vmem>>, %arg13: memref<3x512xf32, #tpu.memory_space<vmem>>) attributes {dimension_semantics = [#tpu.dimension_semantics<parallel>], iteration_bounds = array<i64: 4>, scalar_prefetch = 0 : i64, scratch_operands = 0 : i64, tpu.core_type = #tpu.core_type<tc>, window_params = [{transform_indices = @transform_0, window_bounds = array<i64: 1, 512>}, {transform_indices = @transform_1, window_bounds = array<i64: 3, 512>}, {pipeline_mode = #tpu.pipeline_mode<synchronous>, transform_indices = @transform_2, window_bounds = array<i64: 96, 12>}, {pipeline_mode = #tpu.pipeline_mode<synchronous>, transform_indices = @transform_3, window_bounds = array<i64: 96, 1>}, {pipeline_mode = #tpu.pipeline_mode<synchronous>, transform_indices = @transform_4, window_bounds = array<i64: 656, 96>}, {pipeline_mode = #tpu.pipeline_mode<synchronous>, transform_indices = @transform_5, window_bounds = array<i64: 656, 1>}, {pipeline_mode = #tpu.pipeline_mode<synchronous>, transform_indices = @transform_6, window_bounds = array<i64: 64, 3>}, {pipeline_mode = #tpu.pipeline_mode<synchronous>, transform_indices = @transform_7, window_bounds = array<i64: 128, 64>}, {pipeline_mode = #tpu.pipeline_mode<synchronous>, transform_indices = @transform_8, window_bounds = array<i64: 256, 128>}, {pipeline_mode = #tpu.pipeline_mode<synchronous>, transform_indices = @transform_9, window_bounds = array<i64: 128, 256>}, {pipeline_mode = #tpu.pipeline_mode<synchronous>, transform_indices = @transform_10, window_bounds = array<i64: 64, 128>}, {pipeline_mode = #tpu.pipeline_mode<synchronous>, transform_indices = @transform_11, window_bounds = array<i64: 3, 64>}, {transform_indices = @transform_12, window_bounds = array<i64: 3, 512>}]} {
    %c0 = arith.constant 0 : index
    %c0_0 = arith.constant 0 : index
    %0 = vector.load %arg1[%c0, %c0_0] : memref<1x512xf32, #tpu.memory_space<vmem>>, vector<1x512xf32>
    %1 = tpu.iota {dimensions = array<i32: 0>} : vector<12x1xi32>
    %c6_i32 = arith.constant 6 : i32
    %2 = vector.broadcast %c6_i32 : i32 to vector<12x1xi32>
    %3 = arith.cmpi slt, %1, %2 : vector<12x1xi32>
    %c6_i32_1 = arith.constant 6 : i32
    %4 = vector.broadcast %c6_i32_1 : i32 to vector<12x1xi32>
    %5 = arith.subi %1, %4 : vector<12x1xi32>
    %6 = arith.select %3, %1, %5 : vector<12x1xi1>, vector<12x1xi32>
    %7 = arith.sitofp %6 : vector<12x1xi32> to vector<12x1xf32>
    %cst = arith.constant -1.84206808 : f32
    %8 = vector.broadcast %cst : f32 to vector<12x1xf32>
    %9 = arith.mulf %7, %8 : vector<12x1xf32>
    %10 = math.exp %9 : vector<12x1xf32>
    %c6_i32_2 = arith.constant 6 : i32
    %11 = vector.broadcast %c6_i32_2 : i32 to vector<12x1xi32>
    %12 = arith.cmpi sge, %1, %11 : vector<12x1xi32>
    %13 = arith.extui %12 : vector<12x1xi1> to vector<12x1xi32>
    %14 = arith.sitofp %13 : vector<12x1xi32> to vector<12x1xf32>
    %cst_3 = arith.constant 1.57079637 : f32
    %15 = vector.broadcast %cst_3 : f32 to vector<12x1xf32>
    %16 = arith.mulf %14, %15 : vector<12x1xf32>
    %17 = vector.broadcast %10 : vector<12x1xf32> to vector<12x512xf32>
    %18 = vector.broadcast %0 : vector<1x512xf32> to vector<12x512xf32>
    %19 = arith.mulf %17, %18 : vector<12x512xf32>
    %20 = vector.broadcast %16 : vector<12x1xf32> to vector<12x512xf32>
    %21 = arith.addf %19, %20 : vector<12x512xf32>
    %22 = math.sin %21 : vector<12x512xf32>
    %23 = arith.truncf %22 : vector<12x512xf32> to vector<12x512xbf16>
    %c0_4 = arith.constant 0 : index
    %c0_5 = arith.constant 0 : index
    %24 = vector.load %arg3[%c0_4, %c0_5] : memref<96x12xbf16, #tpu.memory_space<vmem>>, vector<96x12xbf16>
    %cst_6 = arith.constant dense<0.000000e+00> : vector<96x512xf32>
    %25 = tpu.matmul %24, %23, %cst_6 {dimension_numbers = #tpu.dot_dimension_numbers<[1], [0], [0], [1], [0, 0, 1, 1], [], []>} : vector<96x12xbf16>, vector<12x512xbf16>, vector<96x512xf32> -> vector<96x512xf32>
    %c0_7 = arith.constant 0 : index
    %c0_8 = arith.constant 0 : index
    %26 = vector.load %arg4[%c0_7, %c0_8] : memref<96x1xf32, #tpu.memory_space<vmem>>, vector<96x1xf32>
    %27 = vector.broadcast %26 : vector<96x1xf32> to vector<96x512xf32>
    %28 = arith.addf %25, %27 : vector<96x512xf32>
    %cst_9 = arith.constant 5.000000e-01 : f32
    %29 = vector.broadcast %cst_9 : f32 to vector<96x512xf32>
    %30 = arith.mulf %29, %28 : vector<96x512xf32>
    %cst_10 = arith.constant 0.707106769 : f32
    %31 = vector.broadcast %cst_10 : f32 to vector<96x512xf32>
    %32 = arith.mulf %28, %31 : vector<96x512xf32>
    %33 = math.erf %32 : vector<96x512xf32>
    %cst_11 = arith.constant 1.000000e+00 : f32
    %34 = vector.broadcast %cst_11 : f32 to vector<96x512xf32>
    %35 = arith.addf %34, %33 : vector<96x512xf32>
    %36 = arith.mulf %30, %35 : vector<96x512xf32>
    %37 = arith.truncf %36 : vector<96x512xf32> to vector<96x512xbf16>
    %c0_12 = arith.constant 0 : index
    %c0_13 = arith.constant 0 : index
    %38 = vector.load %arg5[%c0_12, %c0_13] : memref<656x96xbf16, #tpu.memory_space<vmem>>, vector<656x96xbf16>
    %cst_14 = arith.constant dense<0.000000e+00> : vector<656x512xf32>
    %39 = tpu.matmul %38, %37, %cst_14 {dimension_numbers = #tpu.dot_dimension_numbers<[1], [0], [0], [1], [0, 0, 1, 1], [], []>} : vector<656x96xbf16>, vector<96x512xbf16>, vector<656x512xf32> -> vector<656x512xf32>
    %c0_15 = arith.constant 0 : index
    %c0_16 = arith.constant 0 : index
    %40 = vector.load %arg6[%c0_15, %c0_16] : memref<656x1xf32, #tpu.memory_space<vmem>>, vector<656x1xf32>
    %41 = vector.broadcast %40 : vector<656x1xf32> to vector<656x512xf32>
    %42 = arith.addf %39, %41 : vector<656x512xf32>
    %c0_17 = arith.constant 0 : index
    %c0_18 = arith.constant 0 : index
    %43 = vector.load %arg2[%c0_17, %c0_18] : memref<3x512xbf16, #tpu.memory_space<vmem>>, vector<3x512xbf16>
    %c0_19 = arith.constant 0 : index
    %c0_20 = arith.constant 0 : index
    %44 = vector.load %arg7[%c0_19, %c0_20] : memref<64x3xbf16, #tpu.memory_space<vmem>>, vector<64x3xbf16>
    %cst_21 = arith.constant dense<0.000000e+00> : vector<64x512xf32>
    %45 = tpu.matmul %44, %43, %cst_21 {dimension_numbers = #tpu.dot_dimension_numbers<[1], [0], [0], [1], [0, 0, 1, 1], [], []>} : vector<64x3xbf16>, vector<3x512xbf16>, vector<64x512xf32> -> vector<64x512xf32>
    %46 = vector.extract_strided_slice %42 {offsets = [0, 0], sizes = [64, 512], strides = [1, 1]} : vector<656x512xf32> to vector<64x512xf32>
    %47 = arith.addf %45, %46 : vector<64x512xf32>
    %cst_22 = arith.constant 0.000000e+00 : f32
    %48 = vector.broadcast %cst_22 : f32 to vector<64x512xf32>
    %49 = arith.maximumf %47, %48 : vector<64x512xf32>
    %50 = arith.truncf %49 : vector<64x512xf32> to vector<64x512xbf16>
    %c0_23 = arith.constant 0 : index
    %c0_24 = arith.constant 0 : index
    %51 = vector.load %arg8[%c0_23, %c0_24] : memref<128x64xbf16, #tpu.memory_space<vmem>>, vector<128x64xbf16>
    %cst_25 = arith.constant dense<0.000000e+00> : vector<128x512xf32>
    %52 = tpu.matmul %51, %50, %cst_25 {dimension_numbers = #tpu.dot_dimension_numbers<[1], [0], [0], [1], [0, 0, 1, 1], [], []>} : vector<128x64xbf16>, vector<64x512xbf16>, vector<128x512xf32> -> vector<128x512xf32>
    %53 = vector.extract_strided_slice %42 {offsets = [64, 0], sizes = [128, 512], strides = [1, 1]} : vector<656x512xf32> to vector<128x512xf32>
    %54 = arith.addf %52, %53 : vector<128x512xf32>
    %cst_26 = arith.constant 0.000000e+00 : f32
    %55 = vector.broadcast %cst_26 : f32 to vector<128x512xf32>
    %56 = arith.maximumf %54, %55 : vector<128x512xf32>
    %57 = arith.truncf %56 : vector<128x512xf32> to vector<128x512xbf16>
    %c0_27 = arith.constant 0 : index
    %c0_28 = arith.constant 0 : index
    %58 = vector.load %arg9[%c0_27, %c0_28] : memref<256x128xbf16, #tpu.memory_space<vmem>>, vector<256x128xbf16>
    %cst_29 = arith.constant dense<0.000000e+00> : vector<256x512xf32>
    %59 = tpu.matmul %58, %57, %cst_29 {dimension_numbers = #tpu.dot_dimension_numbers<[1], [0], [0], [1], [0, 0, 1, 1], [], []>} : vector<256x128xbf16>, vector<128x512xbf16>, vector<256x512xf32> -> vector<256x512xf32>
    %60 = vector.extract_strided_slice %42 {offsets = [192, 0], sizes = [256, 512], strides = [1, 1]} : vector<656x512xf32> to vector<256x512xf32>
    %61 = arith.addf %59, %60 : vector<256x512xf32>
    %cst_30 = arith.constant 0.000000e+00 : f32
    %62 = vector.broadcast %cst_30 : f32 to vector<256x512xf32>
    %63 = arith.maximumf %61, %62 : vector<256x512xf32>
    %64 = arith.truncf %63 : vector<256x512xf32> to vector<256x512xbf16>
    %c0_31 = arith.constant 0 : index
    %c0_32 = arith.constant 0 : index
    %65 = vector.load %arg10[%c0_31, %c0_32] : memref<128x256xbf16, #tpu.memory_space<vmem>>, vector<128x256xbf16>
    %cst_33 = arith.constant dense<0.000000e+00> : vector<128x512xf32>
    %66 = tpu.matmul %65, %64, %cst_33 {dimension_numbers = #tpu.dot_dimension_numbers<[1], [0], [0], [1], [0, 0, 1, 1], [], []>} : vector<128x256xbf16>, vector<256x512xbf16>, vector<128x512xf32> -> vector<128x512xf32>
    %67 = vector.extract_strided_slice %42 {offsets = [448, 0], sizes = [128, 512], strides = [1, 1]} : vector<656x512xf32> to vector<128x512xf32>
    %68 = arith.addf %66, %67 : vector<128x512xf32>
    %cst_34 = arith.constant 0.000000e+00 : f32
    %69 = vector.broadcast %cst_34 : f32 to vector<128x512xf32>
    %70 = arith.maximumf %68, %69 : vector<128x512xf32>
    %71 = arith.truncf %70 : vector<128x512xf32> to vector<128x512xbf16>
    %c0_35 = arith.constant 0 : index
    %c0_36 = arith.constant 0 : index
    %72 = vector.load %arg11[%c0_35, %c0_36] : memref<64x128xbf16, #tpu.memory_space<vmem>>, vector<64x128xbf16>
    %cst_37 = arith.constant dense<0.000000e+00> : vector<64x512xf32>
    %73 = tpu.matmul %72, %71, %cst_37 {dimension_numbers = #tpu.dot_dimension_numbers<[1], [0], [0], [1], [0, 0, 1, 1], [], []>} : vector<64x128xbf16>, vector<128x512xbf16>, vector<64x512xf32> -> vector<64x512xf32>
    %74 = vector.extract_strided_slice %42 {offsets = [576, 0], sizes = [64, 512], strides = [1, 1]} : vector<656x512xf32> to vector<64x512xf32>
    %75 = arith.addf %73, %74 : vector<64x512xf32>
    %cst_38 = arith.constant 0.000000e+00 : f32
    %76 = vector.broadcast %cst_38 : f32 to vector<64x512xf32>
    %77 = arith.maximumf %75, %76 : vector<64x512xf32>
    %78 = arith.truncf %77 : vector<64x512xf32> to vector<64x512xbf16>
    %c0_39 = arith.constant 0 : index
    %c0_40 = arith.constant 0 : index
    %79 = vector.load %arg12[%c0_39, %c0_40] : memref<3x64xbf16, #tpu.memory_space<vmem>>, vector<3x64xbf16>
    %cst_41 = arith.constant dense<0.000000e+00> : vector<3x512xf32>
    %80 = tpu.matmul %79, %78, %cst_41 {dimension_numbers = #tpu.dot_dimension_numbers<[1], [0], [0], [1], [0, 0, 1, 1], [], []>} : vector<3x64xbf16>, vector<64x512xbf16>, vector<3x512xf32> -> vector<3x512xf32>
    %81 = vector.extract_strided_slice %42 {offsets = [640, 0], sizes = [3, 512], strides = [1, 1]} : vector<656x512xf32> to vector<3x512xf32>
    %82 = arith.addf %80, %81 : vector<3x512xf32>
    %cst_42 = arith.constant 0.000000e+00 : f32
    %83 = vector.broadcast %cst_42 : f32 to vector<3x512xf32>
    %84 = arith.maximumf %82, %83 : vector<3x512xf32>
    %c0_43 = arith.constant 0 : index
    %c0_44 = arith.constant 0 : index
    %85 = vector.load %arg13[%c0_43, %c0_44] : memref<3x512xf32, #tpu.memory_space<vmem>>, vector<3x512xf32>
    tpu.vector_store %arg13[%c0_43, %c0_44], %84 {strides = array<i32>} : memref<3x512xf32, #tpu.memory_space<vmem>>, vector<3x512xf32>,
    return
  }
  func.func @transform_0(%arg0: i32) -> (i32, i32) {
    %c0_i32 = arith.constant 0 : i32
    %c0_i32_0 = arith.constant 0 : i32
    return %c0_i32, %arg0 : i32, i32
  }
  func.func @transform_1(%arg0: i32) -> (i32, i32) {
    %c0_i32 = arith.constant 0 : i32
    %c0_i32_0 = arith.constant 0 : i32
    return %c0_i32, %arg0 : i32, i32
  }
  func.func @transform_2(%arg0: i32) -> (i32, i32) {
    %c0_i32 = arith.constant 0 : i32
    %c0_i32_0 = arith.constant 0 : i32
    %c0_i32_1 = arith.constant 0 : i32
    return %c0_i32, %c0_i32_0 : i32, i32
  }
  func.func @transform_3(%arg0: i32) -> (i32, i32) {
    %c0_i32 = arith.constant 0 : i32
    %c0_i32_0 = arith.constant 0 : i32
    %c0_i32_1 = arith.constant 0 : i32
    return %c0_i32, %c0_i32_0 : i32, i32
  }
  func.func @transform_4(%arg0: i32) -> (i32, i32) {
    %c0_i32 = arith.constant 0 : i32
    %c0_i32_0 = arith.constant 0 : i32
    %c0_i32_1 = arith.constant 0 : i32
    return %c0_i32, %c0_i32_0 : i32, i32
  }
  func.func @transform_5(%arg0: i32) -> (i32, i32) {
    %c0_i32 = arith.constant 0 : i32
    %c0_i32_0 = arith.constant 0 : i32
    %c0_i32_1 = arith.constant 0 : i32
    return %c0_i32, %c0_i32_0 : i32, i32
  }
  func.func @transform_6(%arg0: i32) -> (i32, i32) {
    %c0_i32 = arith.constant 0 : i32
    %c0_i32_0 = arith.constant 0 : i32
    %c0_i32_1 = arith.constant 0 : i32
    return %c0_i32, %c0_i32_0 : i32, i32
  }
  func.func @transform_7(%arg0: i32) -> (i32, i32) {
    %c0_i32 = arith.constant 0 : i32
    %c0_i32_0 = arith.constant 0 : i32
    %c0_i32_1 = arith.constant 0 : i32
    return %c0_i32, %c0_i32_0 : i32, i32
  }
  func.func @transform_8(%arg0: i32) -> (i32, i32) {
    %c0_i32 = arith.constant 0 : i32
    %c0_i32_0 = arith.constant 0 : i32
    %c0_i32_1 = arith.constant 0 : i32
    return %c0_i32, %c0_i32_0 : i32, i32
  }
  func.func @transform_9(%arg0: i32) -> (i32, i32) {
    %c0_i32 = arith.constant 0 : i32
    %c0_i32_0 = arith.constant 0 : i32
    %c0_i32_1 = arith.constant 0 : i32
    return %c0_i32, %c0_i32_0 : i32, i32
  }
  func.func @transform_10(%arg0: i32) -> (i32, i32) {
    %c0_i32 = arith.constant 0 : i32
    %c0_i32_0 = arith.constant 0 : i32
    %c0_i32_1 = arith.constant 0 : i32
    return %c0_i32, %c0_i32_0 : i32, i32
  }
  func.func @transform_11(%arg0: i32) -> (i32, i32) {
    %c0_i32 = arith.constant 0 : i32
    %c0_i32_0 = arith.constant 0 : i32
    %c0_i32_1 = arith.constant 0 : i32
    return %c0_i32, %c0_i32_0 : i32, i32
  }
  func.func @transform_12(%arg0: i32) -> (i32, i32) {
    %c0_i32 = arith.constant 0 : i32
    %c0_i32_0 = arith.constant 0 : i32
    return %c0_i32, %arg0 : i32, i32
  }
}

</mosaic_0001>

<bundles_post_ra>
// kernel: pointnet_forward.1
= control target key start
LH: loop header
LB: loop body
LE: loop exit
PB: predicated region body
PF: predicated region fallthrough
CT: control target
= control target key end

     0   :  { %s15732_s0 = inlined_call_operand.vmem [shape: f32[1,2048], index: 0, kind: input, shape index: {}]   ;;  %s15733_s1 = inlined_call_operand.vmem [shape: bf16[3,2048], index: 1, kind: input, shape index: {}]   ;;  %s15734_s2 = inlined_call_operand.vmem [shape: bf16[96,12], index: 2, kind: input, shape index: {}]   ;;  %s15735_s3 = inlined_call_operand.vmem [shape: f32[96,1], index: 3, kind: input, shape index: {}]   ;;  %s15736_s4 = inlined_call_operand.vmem [shape: bf16[656,96], index: 4, kind: input, shape index: {}]   ;;  %s15737_s5 = inlined_call_operand.vmem [shape: f32[656,1], index: 5, kind: input, shape index: {}]   ;;  %s15738_s6 = inlined_call_operand.vmem [shape: bf16[64,3], index: 6, kind: input, shape index: {}]   ;;  %s15739_s7 = inlined_call_operand.vmem [shape: bf16[128,64], index: 7, kind: input, shape index: {}]   ;;  %s15740_s8 = inlined_call_operand.vmem [shape: bf16[256,128], index: 8, kind: input, shape index: {}]   ;;  %s15741_s9 = inlined_call_operand.vmem [shape: bf16[128,256], index: 9, kind: input, shape index: {}]   ;;  %s15742_s10 = inlined_call_operand.vmem [shape: bf16[64,128], index: 10, kind: input, shape index: {}]   ;;  %s15743_s11 = inlined_call_operand.vmem [shape: bf16[3,64], index: 11, kind: input, shape index: {}]   ;;  %s15744_s12 = inlined_call_operand.hbm [shape: f32[3,2048], index: 12, kind: output, shape index: {}]  }
   0x1   :  { %15920 = sst [smem:[#allocation366_spill]] %s15732_s0 }
   0x2   :  { %17 = vsyncpa [#allocation3], 0 }
   0x3   :  { %19 = vsyncpa [#allocation3 + $0x1], 0  ;;  %s9227_s21 = smov 0   ;;  %s9229_s22 = smov 0  }
   0x4   :  { %s9231_s23 = smov 0   ;;  %s9233_s24 = smov 0  }
   0x5 LB: > { %s9248_s25 = sadd.s32 4294967295, %s9151_s24   ;;  %s8133_s26 = sadd.s32 4294967294, %s9151_s24   ;;  %s9151_s24 = sphi %s9233_s24, %s17112_s24   ;;  %s9147_s23 = sphi %s9231_s23, %s17111_s23   ;;  %s9143_s22 = sphi %s9229_s22, %s17110_s22   ;;  %s9139_s21 = sphi %s9227_s21, %s17109_s21  }
   0x6   : > { %s9252_s27 = sadd.s32 1, %s9151_s24   ;;  %s294_s28 = sadd.s32 1, %s9147_s23 }
   0x7   : > { %s291_s29 = ssub.s32 %s9151_s24, %s9252_s27  ;;  %p304_p0 = scmp.ne.s32.totalorder %s9147_s23, %s9143_s22 }
   0x8   : > { %p292_p1 = scmp.eq.s32.totalorder %s291_s29, 0  ;;  %p305_p2 = scmp.eq.s32.totalorder %s9248_s25, 3 }
   0x9   : > { %p310_p3 = scmp.ne.s32.totalorder %s9143_s22, %s9139_s21  ;;  %p311_p4 = scmp.eq.s32.totalorder %s8133_s26, 3 }
   0xa   : > { %s9263_s30 = scalar_select %p292_p1, %s9147_s23, %s294_s28  }
   0xb   : > { %p9265_p5 = por %p305_p2, %p304_p0  ;;  %p9269_p6 = por %p311_p4, %p310_p3 }
   0xc   : > { %15921 = sst [smem:[#allocation5_spill]] %s9263_s30  ;;  %p8136_p7 = scmp.ge.s32.totalorder %s9151_s24, 1 }
   0xd   : > { %p376_p8 = scmp.lt.s32.totalorder %s9151_s24, 5 }
   0xf   : > { %p377_p9 = pnand %p8136_p7, %p376_p8 }
  0x11   : > { %380 = sbr.rel (%p377_p9) target bundleno = 3334 (0xd06), region = 68 }
  0x16   : > { %v1750_v0 = vld [vmem:[%s15735_s3 + $0x40] sm:$0xff]  ;;  %v1752_v1 = vld [vmem:[%s15735_s3 + $0x50] sm:$0xff]  ;;  %s8138_s19 = sshll.u32 %s9248_s25, 2  ;;  %v436_v2 = vlaneseq  ;;  %v9153_v3 = vmov 0   ;;  %v1751_v10 = vld [vmem:[%s15735_s3 + $0x48] sm:$0xff]  ;;  %s15924_s0 = sld [smem:[#allocation366_spill]] }
  0x17   : > { %8986 = vset.pattern.permute.xlu1 %v9153_v3  ;;  %8985 = vset.pattern.permute.xlu0 %v9153_v3  ;;  %v1748_v4 = vld [vmem:[%s15735_s3 + $0x30] sm:$0xff]  ;;  %p423_p10 = scmp.lt.s32.totalorder %s8138_s19, 15  ;;  %v1753_v11 = vld [vmem:[%s15735_s3 + $0x58] sm:$0xff]  ;;  %v1747_v20 = vld [vmem:[%s15735_s3 + $0x28] sm:$0xff]  ;;  %v9154_v22 = vmov 0.0   ;;  %s8936_s16 = sshll.u32 %s9248_s25, 4 }
  0x18   : > { %1796 = vperm.xlu1 %8986, %v1750_v0   ;;  %1806 = vperm.xlu0 %8985, %v1752_v1   ;;  %v437_v5 = vshrl.u32 %v436_v2, 7  ;;  %v1749_v14 = vld [vmem:[%s15735_s3 + $0x38] sm:$0xff]  ;;  %v1746_v21 = vld [vmem:[%s15735_s3 + $0x20] sm:$0xff]  ;;  %v1744_v26 = vld [vmem:[%s15735_s3 + $0x10] sm:$0xff]  ;;  %s8060_s18 = scalar_lea.hbm %s15744_s12, %s8936_s16  ;;  %s9109_s17 = scalar_lea.hbm %s15744_s12, 64 }
  0x19   : > { %8987 = vset.pattern.permute.xlu2 %v9153_v3  ;;  %s17114_s19 = smov (!%p423_p10, %s8138_s19), 15  ;;  %v1742_v35 = vld [vmem:[%s15735_s3] sm:$0xff]  ;;  %v1745_v36 = vld [vmem:[%s15735_s3 + $0x18] sm:$0xff]  ;;  %v1743_v41 = vld [vmem:[%s15735_s3 + $0x8] sm:$0xff]  ;;  %s8064_s26 = sshll.u32 %s8060_s18, 4  ;;  %s8065_s26 = int_to_ptr.hbm [resolvable:$true] %s8064_s26 }
  0x1a   : > { %1786 = vperm.xlu2 %8987, %v1748_v4   ;;  %v438_v6 = vadd.s32 8, %v437_v5  ;;  %vm439_vm0 = vcmp.lt.s32.totalorder %v437_v5, 6  ;;  %v8141_v7 = vadd.s32 4294967290, %v437_v5  ;;  %vm453_vm1 = vcmp.ge.s32.totalorder %v437_v5, 6  ;;  %v4257_v53 = vld [vmem:[%s15737_s5 + $0x38] sm:$0xff]  ;;  %v4256_v54 = vld [vmem:[%s15737_s5 + $0x30] sm:$0xff] }
  0x1b   : > { %v8143_v23 = vsel %vm453_vm1, 1.0, %v9154_v22  ;;  %v4254_v57 = vld [vmem:[%s15737_s5 + $0x20] sm:$0xff]  ;;  %v9155_v4 = vmov 683565275   ;;  %v4255_v22 = vld [vmem:[%s15737_s5 + $0x28] sm:$0xff]  ;;  %s8140_s20 = sshll.u32 %s17114_s19, 1 }
  0x1c   : > { %v8142_v8 = vadd.s32 4294967290, %v438_v6  ;;  %v443_v9 = vsel %vm439_vm0, %v437_v5, %v8141_v7  ;;  %s9303_s30 = scalar_lea.vmem %s15924_s0, %s17114_s19  ;;  %v9319_v27 = vmul.f32 1.5707964, %v8143_v23  ;;  %v9156_v6 = vmov 2475754826   ;;  %s431_s15 = scalar_lea.vmem %s15733_s1, %s8140_s20 }
  0x1d   : > { %v445_v12 = vcvt.s32.f32 %v443_v9  ;;  %v9306_v19 = vld [vmem:[%s9303_s30] sm:$0xf]  ;;  %s419_s19 = sand.u32 1, %s9143_s22   ;;  %s9103_s28 = sshra.s32 %s8065_s26, 4  ;;  %s9104_s28 = int_to_ptr.hbm [resolvable:$true] %s9103_s28 }
  0x1e   : > { %v446_v13 = vcvt.s32.f32 %v8142_v8  ;;  %v462_v24 = vperm.slane %v9306_v19, 0  ;;  %v463_v25 = vperm.slane %v9306_v19, 1  ;;  %v9157_v8 = vmov 2131351028   ;;  %s8137_s29 = sshll.u32 %s419_s19, 4  ;;  %s8049_s25 = scalar_lea.sflag [#allocation3], %s419_s19 }
  0x1f   : > { %v447_v15 = vmul.f32 -1.8420681, %v445_v12  ;;  %v9159_v12 = vmov 920167782   ;;  %p9110_p0 = scmp.lt.s32.totalorder %s9104_s28, %s15744_s12 }
  0x20   : > { %1801 = vperm.xlu1 %8986, %v1751_v10   ;;  %1811 = vperm.xlu0 %8985, %v1753_v11   ;;  %v448_v16 = vmul.f32 -1.8420681, %v446_v13  ;;  %v9158_v10 = vmov 2102212464  }
  0x21   : > { %v449_v17 = vmul.f32 1.442695, %v447_v15 }
  0x22   : > { %1791 = vperm.xlu2 %8987, %v1749_v14   ;;  %v451_v18 = vmul.f32 1.442695, %v448_v16 }
  0x23   : > { %8988 = vpow2.f32 %v449_v17 }
  0x24   : > { %8990 = vpow2.f32 %v451_v18 }
  0x28   : > { %1781 = vperm.xlu1 %8986, %v1747_v20   ;;  %1776 = vperm.xlu0 %8985, %v1746_v21   ;;  %v4252_v21 = vld [vmem:[%s15737_s5 + $0x10] sm:$0xff] }
  0x29   : > { %v9321_v28 = vpop.eup %8988 }
  0x2a   : > { %v9323_v29 = vpop.eup %8990  ;;  %1766 = vperm.xlu2 %8987, %v1744_v26   ;;  %v470_v30 = vmul.f32 %v9321_v28, %v462_v24  ;;  %v471_v31 = vmul.f32 %v9321_v28, %v463_v25 }
  0x2b   : > { %v474_v32 = vmul.f32 %v9323_v29, %v462_v24  ;;  %v9160_v24 = vmov 1326507024  }
  0x2c   : > { %v9331_v33 = vadd.f32 %v470_v30, %v9319_v27  ;;  %v9334_v34 = vadd.f32 %v471_v31, %v9319_v27 }
  0x2d   : > { %v9342_v37 = vadd.f32 1.5707964, %v474_v32 }
  0x2e   : > { %v486_v38 = vand.u32 2147483647, %v9331_v33  ;;  %v489_v39 = vand.u32 2139095040, %v9331_v33  ;;  %v644_v40 = vand.u32 2139095040, %v9334_v34 }
  0x2f   : > { %v1106_v42 = vand.u32 2147483647, %v9342_v37  ;;  %v1109_v43 = vand.u32 2139095040, %v9342_v37 }
  0x30   : > { %1756 = vperm.xlu1 %8986, %v1742_v35   ;;  %1771 = vperm.xlu0 %8985, %v1745_v36   ;;  %v490_v44 = vshrl.u32 %v489_v39, 23  ;;  %v493_v45 = vand.u32 8388607, %v486_v38  ;;  %v645_v47 = vshrl.u32 %v644_v40, 23  ;;  %v4253_v36 = vld [vmem:[%s15737_s5 + $0x18] sm:$0xff] }
  0x31   : > { %v1110_v46 = vshrl.u32 %v1109_v43, 23  ;;  %v1113_v51 = vand.u32 8388607, %v1106_v42 }
  0x32   : > { %1761 = vperm.xlu2 %8987, %v1743_v41   ;;  %v8144_v48 = vadd.s32 4294967169, %v490_v44  ;;  %v494_v49 = vor.u32 8388608, %v493_v45  ;;  %v8147_v56 = vadd.s32 4294967169, %v645_v47 }
  0x33   : > { %v8156_v50 = vadd.s32 4294967169, %v1110_v46  ;;  %v1114_v60 = vor.u32 8388608, %v1113_v51 }
  0x34   : > { %v496_v52 = vadd.s32 1, %v8144_v48  ;;  %v9365_v59 = vshll.u32 %v494_v49, 8  ;;  %v9371_v1 = vadd.s32 1, %v8147_v56 }
  0x35   : > { %v1116_v55 = vadd.s32 1, %v8156_v50  ;;  %v9379_v15 = vshll.u32 %v1114_v60, 8 }
  0x36   : > { %vm497_vm2 = vcmp.gt.s32.totalorder %v496_v52, 0  ;;  %v535_v14 = vand.u32 65535, %v9365_v59  ;;  %v536_v20 = vshrl.u32 %v9365_v59, 16  ;;  %vm652_vm9 = vcmp.gt.s32.totalorder %v9371_v1, 0 }
  0x37   : > { %v498_v58 = vsel %vm497_vm2, %v496_v52, 0  ;;  %vm1117_vm3 = vcmp.gt.s32.totalorder %v1116_v55, 0 }
  0x38   : > { %4369 = vperm.xlu1 %8986, %v4257_v53   ;;  %4364 = vperm.xlu0 %8985, %v4256_v54   ;;  %v500_v61 = vand.u32 31, %v498_v58  ;;  %v1118_v62 = vsel %vm1117_vm3, %v1116_v55, 0  ;;  %v9367_v63 = vshrl.u32 %v498_v58, 5 }
  0x39   : > { %v9369_v0 = vand.u32 31, %v1118_v62  ;;  %v9408_v45 = vshrl.u32 %v1118_v62, 5 }
  0x3a   : > { %4354 = vperm.xlu2 %8987, %v4254_v57   ;;  %v501_v2 = vsub.s32 32, %v500_v61  ;;  %v503_v5 = vshll.u32 %v9155_v4, %v500_v61  ;;  %v506_v7 = vshll.u32 %v9156_v6, %v500_v61  ;;  %v509_v9 = vshll.u32 %v9157_v8, %v500_v61 }
  0x3b   : > { %v512_v11 = vshll.u32 %v9158_v10, %v500_v61  ;;  %v515_v13 = vshll.u32 %v9159_v12, %v500_v61  ;;  %vm518_vm4 = vcmp.lt.s32.totalorder %v9367_v63, 1  ;;  %vm521_vm5 = vcmp.lt.s32.totalorder %v9367_v63, 4 }
  0x3c   : > { %v504_v16 = vshrl.u32 %v9156_v6, %v501_v2  ;;  %v507_v17 = vshrl.u32 %v9157_v8, %v501_v2  ;;  %v510_v18 = vshrl.u32 %v9158_v10, %v501_v2  ;;  %v513_v23 = vshrl.u32 %v9159_v12, %v501_v2 }
  0x3d   : > { %v516_v26 = vshrl.u32 %v9160_v24, %v501_v2  ;;  %v9396_v35 = vsub.s32 32, %v9369_v0  ;;  %v502_v39 = vshrl.u32 %v9155_v4, %v501_v2  ;;  %vm520_vm6 = vcmp.lt.s32.totalorder %v9367_v63, 3  ;;  %v4251_v2 = vld [vmem:[%s15737_s5 + $0x8] sm:$0xff] }
  0x3e   : > { %v505_v30 = vor.u32 %v504_v16, %v503_v5  ;;  %v508_v31 = vor.u32 %v507_v17, %v506_v7  ;;  %v511_v32 = vor.u32 %v510_v18, %v509_v9  ;;  %v514_v40 = vor.u32 %v513_v23, %v512_v11  ;;  %v4250_v5 = vld [vmem:[%s15737_s5] sm:$0xff] }
  0x3f   : > { %v517_v41 = vor.u32 %v516_v26, %v515_v13  ;;  %vm519_vm7 = vcmp.lt.s32.totalorder %v9367_v63, 2  ;;  %v1123_v48 = vshll.u32 %v9155_v4, %v9369_v0  ;;  %v1126_v49 = vshll.u32 %v9156_v6, %v9369_v0 }
  0x40   : > { %4344 = vperm.xlu1 %8986, %v4252_v21   ;;  %4359 = vperm.xlu0 %8985, %v4255_v22   ;;  %v526_v43 = vsel %vm518_vm4, %v505_v30, %v508_v31  ;;  %v530_v44 = vsel %vm518_vm4, %v508_v31, %v511_v32  ;;  %v527_v46 = vsel %vm521_vm5, %v514_v40, 920167782  ;;  %v523_v50 = vsel %vm521_vm5, %v511_v32, 2102212464  ;;  %v4272_v22 = vld [vmem:[%s15737_s5 + $0xb0] sm:$0xff] }
  0x41   : > { %v531_v47 = vsel %vm521_vm5, %v517_v41, 1326507024  ;;  %v528_v51 = vsel %vm520_vm6, %v511_v32, %v527_v46  ;;  %v1124_v53 = vshrl.u32 %v9156_v6, %v9396_v35  ;;  %v9428_v54 = vsel %vm518_vm4, %v502_v39, %v505_v30 }
  0x42   : > { %4349 = vperm.xlu2 %8987, %v4253_v36   ;;  %v532_v52 = vsel %vm520_vm6, %v514_v40, %v531_v47  ;;  %v529_v55 = vsel %vm519_vm7, %v526_v43, %v528_v51  ;;  %v1127_v57 = vshrl.u32 %v9157_v8, %v9396_v35  ;;  %v524_v7 = vsel %vm520_vm6, %v508_v31, %v523_v50 }
  0x43   : > { %v533_v56 = vsel %vm519_vm7, %v530_v44, %v532_v52  ;;  %v559_v61 = vand.u32 65535, %v529_v55  ;;  %v560_v62 = vshrl.u32 %v529_v55, 16  ;;  %v9444_v9 = vor.u32 %v1124_v53, %v1123_v48  ;;  %v4270_v55 = vld [vmem:[%s15737_s5 + $0xa0] sm:$0xff] }
  0x44   : > { %v537_v58 = vand.u32 65535, %v533_v56  ;;  %v538_v60 = vshrl.u32 %v533_v56, 16  ;;  %v9446_v11 = vor.u32 %v1127_v57, %v1126_v49  ;;  %v1129_v13 = vshll.u32 %v9157_v8, %v9369_v0  ;;  %v4273_v56 = vld [vmem:[%s15737_s5 + $0xb8] sm:$0xff] }
  0x45   : > { %v1130_v21 = vshrl.u32 %v9158_v10, %v9396_v35  ;;  %v561_v26 = vmul.u32 %v559_v61, %v535_v14  ;;  %v562_v30 = vmul.u32 %v560_v62, %v535_v14  ;;  %v563_v31 = vmul.u32 %v559_v61, %v536_v20 }
  0x46   : > { %v539_v16 = vmul.u32 %v537_v58, %v535_v14  ;;  %v540_v17 = vmul.u32 %v538_v60, %v535_v14  ;;  %v541_v18 = vmul.u32 %v537_v58, %v536_v20  ;;  %v542_v23 = vmul.u32 %v538_v60, %v536_v20 }
  0x47   : > { %v564_v40 = vmul.u32 %v560_v62, %v536_v20  ;;  %v565_v43 = vshll.u32 %v562_v30, 16  ;;  %v566_v44 = vshrl.u32 %v562_v30, 16  ;;  %v567_v46 = vshll.u32 %v563_v31, 16 }
  0x48   : > { %4339 = vperm.xlu1 %8986, %v4251_v2   ;;  %4334 = vperm.xlu0 %8985, %v4250_v5   ;;  %v543_v32 = vshll.u32 %v540_v17, 16  ;;  %v544_v36 = vshrl.u32 %v540_v17, 16  ;;  %v545_v39 = vshll.u32 %v541_v18, 16  ;;  %v546_v41 = vshrl.u32 %v541_v18, 16  ;;  %v4271_v5 = vld [vmem:[%s15737_s5 + $0xa8] sm:$0xff] }
  0x49   : > { %v568_v48 = vshrl.u32 %v563_v31, 16  ;;  %v1132_v49 = vshll.u32 %v9158_v10, %v9369_v0  ;;  %vm569_vm10 = vc.u32 %v561_v26, %v565_v43  ;;  %v571_v50 = vadd.s32 %v565_v43, %v561_v26 }
  0x4a   : > { %4444 = vperm.xlu2 %8987, %v4272_v22   ;;  %vm547_vm8 = vc.u32 %v539_v16, %v543_v32  ;;  %v549_v47 = vadd.s32 %v543_v32, %v539_v16  ;;  %v1133_v20 = vshrl.u32 %v9159_v12, %v9396_v35  ;;  %v570_v52 = vsel %vm569_vm10, 1, %v9153_v3 }
  0x4b   : > { %v548_v14 = vsel %vm547_vm8, 1, %v9153_v3  ;;  %v1135_v53 = vshll.u32 %v9159_v12, %v9369_v0  ;;  %v572_v58 = vadd.s32 %v570_v52, %v564_v40  ;;  %vm573_vm12 = vc.u32 %v571_v50, %v567_v46 }
  0x4c   : > { %v550_v51 = vadd.s32 %v548_v14, %v542_v23  ;;  %vm551_vm11 = vc.u32 %v549_v47, %v545_v39  ;;  %v1131_v60 = vor.u32 %v1130_v21, %v1129_v13  ;;  %v574_v62 = vsel %vm573_vm12, 1, %v9153_v3 }
  0x4d   : > { %v552_v57 = vsel %vm551_vm11, 1, %v9153_v3  ;;  %v1134_v2 = vor.u32 %v1133_v20, %v1132_v49  ;;  %v1136_v0 = vshrl.u32 %v9160_v24, %v9396_v35  ;;  %v9477_v16 = vadd.s32 %v571_v50, %v567_v46  ;;  %v4268_v46 = vld [vmem:[%s15737_s5 + $0x90] sm:$0xff] }
  0x4e   : > { %v554_v61 = vadd.s32 %v552_v57, %v550_v51  ;;  %v576_v17 = vadd.s32 %v574_v62, %v572_v58  ;;  %vm1138_vm13 = vcmp.lt.s32.totalorder %v9408_v45, 1  ;;  %vm1140_vm14 = vcmp.lt.s32.totalorder %v9408_v45, 3  ;;  %v4266_v51 = vld [vmem:[%s15737_s5 + $0x80] sm:$0xff] }
  0x4f   : > { %v1137_v18 = vor.u32 %v1136_v0, %v1135_v53  ;;  %vm1139_vm15 = vcmp.lt.s32.totalorder %v9408_v45, 2  ;;  %vm1141_vm0 = vcmp.lt.s32.totalorder %v9408_v45, 4  ;;  %v525_v21 = vsel %vm519_vm7, %v9428_v54, %v524_v7 }
  0x50   : > { %4434 = vperm.xlu1 %8986, %v4270_v55   ;;  %4449 = vperm.xlu0 %8985, %v4273_v56   ;;  %v555_v13 = vadd.s32 %v554_v61, %v544_v36  ;;  %v577_v22 = vadd.s32 %v576_v17, %v566_v44  ;;  %v1146_v23 = vsel %vm1138_vm13, %v9444_v9, %v9446_v11  ;;  %v1147_v26 = vsel %vm1141_vm0, %v1134_v2, 920167782  ;;  %v4269_v44 = vld [vmem:[%s15737_s5 + $0x98] sm:$0xff] }
  0x51   : > { %v1148_v31 = vsel %vm1140_vm14, %v1131_v60, %v1147_v26  ;;  %v1150_v63 = vsel %vm1138_vm13, %v9446_v11, %v1131_v60  ;;  %v1156_v54 = vshrl.u32 %v9379_v15, 16  ;;  %v1151_v36 = vsel %vm1141_vm0, %v1137_v18, 1326507024 }
  0x52   : > { %4439 = vperm.xlu2 %8987, %v4271_v5   ;;  %v9492_v30 = vadd.s32 %v555_v13, %v546_v41  ;;  %v578_v7 = vadd.s32 %v577_v22, %v568_v48  ;;  %v1149_v32 = vsel %vm1139_vm15, %v1146_v23, %v1148_v31  ;;  %v1155_v39 = vand.u32 65535, %v9379_v15  ;;  %v4264_v31 = vld [vmem:[%s15737_s5 + $0x70] sm:$0xff] }
  0x53   : > { %v579_v40 = vmul.u32 %v9365_v59, %v525_v21  ;;  %v1152_v41 = vsel %vm1140_vm14, %v1134_v2, %v1151_v36  ;;  %v1179_v43 = vand.u32 65535, %v1149_v32  ;;  %v1180_v59 = vshrl.u32 %v1149_v32, 16 }
  0x54   : > { %vm581_vm1 = vc.u32 %v9492_v30, %v9477_v16  ;;  %v582_v47 = vadd.s32 1, %v578_v7  ;;  %v1153_v48 = vsel %vm1139_vm15, %v1150_v63, %v1152_v41  ;;  %v9521_v49 = vsel %vm652_vm9, %v9371_v1, 0  ;;  %v4267_v63 = vld [vmem:[%s15737_s5 + $0x88] sm:$0xff] }
  0x55   : > { %v1157_v14 = vand.u32 65535, %v1153_v48  ;;  %v1158_v50 = vshrl.u32 %v1153_v48, 16  ;;  %v1183_v20 = vmul.u32 %v1179_v43, %v1156_v54  ;;  %v1122_v53 = vshrl.u32 %v9155_v4, %v9396_v35 }
  0x56   : > { %v583_v52 = vsel %vm581_vm1, %v582_v47, %v578_v7  ;;  %v1182_v55 = vmul.u32 %v1180_v59, %v1155_v39  ;;  %v1181_v57 = vmul.u32 %v1179_v43, %v1155_v39  ;;  %v9529_v58 = vand.u32 31, %v9521_v49 }
  0x57   : > { %v584_v56 = vadd.s32 %v583_v52, %v579_v40  ;;  %v1143_v1 = vsel %vm1141_vm0, %v1131_v60, 2102212464  ;;  %v1159_v61 = vmul.u32 %v1157_v14, %v1155_v39  ;;  %v1160_v62 = vmul.u32 %v1158_v50, %v1155_v39  ;;  %v4265_v39 = vld [vmem:[%s15737_s5 + $0x78] sm:$0xff] }
  0x58   : > { %4429 = vperm.xlu1 %8986, %v4269_v44   ;;  %4424 = vperm.xlu0 %8985, %v4268_v46   ;;  %v1161_v2 = vmul.u32 %v1157_v14, %v1156_v54  ;;  %v1184_v5 = vmul.u32 %v1180_v59, %v1156_v54  ;;  %v1185_v17 = vshll.u32 %v1182_v55, 16  ;;  %v1187_v13 = vshll.u32 %v1183_v20, 16 }
  0x59   : > { %v585_v0 = vadd.s32 536870912, %v584_v56  ;;  %v1142_v35 = vsel %vm1138_vm13, %v1122_v53, %v9444_v9  ;;  %v1162_v18 = vmul.u32 %v1158_v50, %v1156_v54  ;;  %v1163_v21 = vshll.u32 %v1160_v62, 16 }
  0x5a   : > { %4414 = vperm.xlu2 %8987, %v4266_v51   ;;  %v1165_v22 = vshll.u32 %v1161_v2, 16  ;;  %v1144_v60 = vsel %vm1140_vm14, %v9446_v11, %v1143_v1  ;;  %vm1189_vm2 = vc.u32 %v1181_v57, %v1185_v17  ;;  %v1191_v26 = vadd.s32 %v1185_v17, %v1181_v57  ;;  %v4263_v1 = vld [vmem:[%s15737_s5 + $0x68] sm:$0xff] }
  0x5b   : > { %v9536_v23 = vshrl.u32 %v585_v0, 30  ;;  %vm1167_vm3 = vc.u32 %v1159_v61, %v1163_v21  ;;  %v1169_v9 = vadd.s32 %v1163_v21, %v1159_v61  ;;  %v1186_v54 = vshrl.u32 %v1182_v55, 16  ;;  %v4262_v61 = vld [vmem:[%s15737_s5 + $0x60] sm:$0xff] }
  0x5c   : > { %v1190_v7 = vsel %vm1189_vm2, 1, %v9153_v3  ;;  %v1168_v36 = vsel %vm1167_vm3, 1, %v9153_v3  ;;  %vm1193_vm4 = vc.u32 %v1191_v26, %v1187_v13  ;;  %v1164_v40 = vshrl.u32 %v1160_v62, 16 }
  0x5d   : > { %v587_v32 = vshll.u32 %v9536_v23, 30  ;;  %v1192_v11 = vadd.s32 %v1190_v7, %v1184_v5  ;;  %v1170_v41 = vadd.s32 %v1168_v36, %v1162_v18  ;;  %vm1171_vm5 = vc.u32 %v1169_v9, %v1165_v22  ;;  %v4260_v18 = vld [vmem:[%s15737_s5 + $0x50] sm:$0xff] }
  0x5e   : > { %v1194_v43 = vsel %vm1193_vm4, 1, %v9153_v3  ;;  %v1172_v46 = vsel %vm1171_vm5, 1, %v9153_v3  ;;  %v1188_v47 = vshrl.u32 %v1183_v20, 16  ;;  %v1145_v59 = vsel %vm1139_vm15, %v1142_v35, %v1144_v60 }
  0x5f   : > { %v9554_v44 = vsub.s32 %v584_v56, %v587_v32  ;;  %v1196_v48 = vadd.s32 %v1194_v43, %v1192_v11  ;;  %v1166_v14 = vshrl.u32 %v1161_v2, 16  ;;  %v1174_v50 = vadd.s32 %v1172_v46, %v1170_v41 }
  0x60   : > { %4404 = vperm.xlu1 %8986, %v4264_v31   ;;  %4419 = vperm.xlu0 %8985, %v4267_v63   ;;  %v9562_v53 = vsub.s32 32, %v9529_v58  ;;  %v9564_v56 = vadd.s32 %v1191_v26, %v1187_v13  ;;  %v9570_v45 = vmul.f32 %v9323_v29, %v463_v25  ;;  %v1199_v0 = vmul.u32 %v9379_v15, %v1145_v59 }
  0x61   : > { %vm589_vm6 = vcmp.lt.s32.totalorder %v9554_v44, 0  ;;  %v590_v51 = vsub.s32 0, %v9554_v44  ;;  %v1197_v52 = vadd.s32 %v1196_v48, %v1186_v54  ;;  %v1175_v55 = vadd.s32 %v1174_v50, %v1164_v40 }
  0x62   : > { %4409 = vperm.xlu2 %8987, %v4265_v39   ;;  %v641_v5 = vand.u32 2147483647, %v9334_v34  ;;  %v580_v17 = vadd.s32 %v9477_v16, %v9492_v30  ;;  %v661_v13 = vshll.u32 %v9156_v6, %v9529_v58  ;;  %v662_v35 = vshrl.u32 %v9157_v8, %v9562_v53 }
  0x63   : > { %v591_v20 = vsel %vm589_vm6, %v590_v51, %v9554_v44  ;;  %v1198_v57 = vadd.s32 %v1197_v52, %v1188_v47  ;;  %v9578_v2 = vadd.s32 %v1175_v55, %v1166_v14  ;;  %v667_v15 = vshll.u32 %v9158_v10, %v9529_v58  ;;  %v4259_v52 = vld [vmem:[%s15737_s5 + $0x48] sm:$0xff] }
  0x64   : > { %v592_v62 = vclz %v591_v20  ;;  %v668_v16 = vshrl.u32 %v9159_v12, %v9562_v53  ;;  %v670_v22 = vshll.u32 %v9159_v12, %v9529_v58  ;;  %v671_v60 = vshrl.u32 %v9160_v24, %v9562_v53 }
  0x65   : > { %v1202_v25 = vadd.s32 1, %v1198_v57  ;;  %vm1201_vm7 = vc.u32 %v9578_v2, %v9564_v56  ;;  %v664_v31 = vshll.u32 %v9157_v8, %v9529_v58  ;;  %v665_v63 = vshrl.u32 %v9158_v10, %v9562_v53 }
  0x66   : > { %v8145_v21 = vadd.s32 4294967294, %v592_v62  ;;  %v648_v54 = vand.u32 8388607, %v641_v5  ;;  %v9608_v7 = vshrl.u32 %v9521_v49, 5  ;;  %v658_v32 = vshll.u32 %v9155_v4, %v9529_v58  ;;  %v4258_v49 = vld [vmem:[%s15737_s5 + $0x40] sm:$0xff]  ;;  %v4261_v58 = vld [vmem:[%s15737_s5 + $0x58] sm:$0xff] }
  0x67   : > { %v1203_v30 = vsel %vm1201_vm7, %v1202_v25, %v1198_v57  ;;  %v659_v41 = vshrl.u32 %v9156_v6, %v9562_v53  ;;  %v9615_v43 = vor.u32 %v662_v35, %v661_v13  ;;  %v669_v46 = vor.u32 %v668_v16, %v667_v15 }
  0x68   : > { %4399 = vperm.xlu1 %8986, %v4263_v1   ;;  %4394 = vperm.xlu0 %8985, %v4262_v61   ;;  %vm8146_vm8 = vcmp.lt.s32.totalorder %v8145_v21, 0  ;;  %v1204_v26 = vadd.s32 %v1203_v30, %v1199_v0  ;;  %v672_v47 = vor.u32 %v671_v60, %v670_v22  ;;  %v666_v14 = vor.u32 %v665_v63, %v664_v31  ;;  %v4288_v31 = vld [vmem:[%s15737_s5 + $0x130] sm:$0xff] }
  0x69   : > { %v595_v9 = vsel %vm8146_vm8, 0, %v8145_v21  ;;  %v610_v50 = vsub.s32 4, %v9536_v23  ;;  %v649_v51 = vor.u32 8388608, %v648_v54  ;;  %vm673_vm9 = vcmp.lt.s32.totalorder %v9608_v7, 1 }
  0x6a   : > { %4384 = vperm.xlu2 %8987, %v4260_v18   ;;  %v596_v36 = vsub.s32 32, %v595_v9  ;;  %v597_v11 = vshll.u32 %v9554_v44, %v595_v9  ;;  %v600_v39 = vsub.s32 4294967266, %v595_v9  ;;  %v1205_v40 = vadd.s32 536870912, %v1204_v26 }
  0x6b   : > { %vm676_vm10 = vcmp.lt.s32.totalorder %v9608_v7, 4  ;;  %vm675_vm11 = vcmp.lt.s32.totalorder %v9608_v7, 3  ;;  %v9633_v1 = vor.u32 %v659_v41, %v658_v32  ;;  %vm674_vm12 = vcmp.lt.s32.totalorder %v9608_v7, 2 }
  0x6c   : > { %v598_v48 = vshrl.u32 %v580_v17, %v596_v36  ;;  %v601_v59 = vadd.s32 127, %v600_v39  ;;  %v9623_v44 = vshrl.u32 %v1205_v40, 30  ;;  %v682_v61 = vsel %vm676_vm10, %v669_v46, 920167782  ;;  %v4304_v40 = vld [vmem:[%s15737_s5 + $0x1b0] sm:$0xff] }
  0x6d   : > { %v686_v62 = vsel %vm676_vm10, %v672_v47, 1326507024  ;;  %v685_v13 = vsel %vm673_vm9, %v9615_v43, %v666_v14  ;;  %vm9647_vm13 = vcmp.le.f32.partialorder %v486_v38, 0.7853982  ;;  %vm488_vm14 = vcmp.lt.s32.totalorder %v9331_v33, 0 }
  0x6e   : > { %v599_v55 = vor.u32 %v598_v48, %v597_v11  ;;  %v602_v20 = vshll.u32 %v601_v59, 23  ;;  %v1207_v57 = vshll.u32 %v9623_v44, 30  ;;  %v687_v18 = vsel %vm675_vm11, %v669_v46, %v686_v62  ;;  %v4286_v62 = vld [vmem:[%s15737_s5 + $0x120] sm:$0xff] }
  0x6f   : > { %v9654_v21 = vshll.u32 %v649_v51, 8  ;;  %v611_v16 = vsel %vm488_vm14, %v610_v50, %v9536_v23  ;;  %v681_v38 = vsel %vm673_vm9, %v9633_v1, %v9615_v43  ;;  %v683_v22 = vsel %vm675_vm11, %v666_v14, %v682_v61  ;;  %v4289_v23 = vld [vmem:[%s15737_s5 + $0x138] sm:$0xff] }
  0x70   : > { %4374 = vperm.xlu1 %8986, %v4258_v49   ;;  %4389 = vperm.xlu0 %8985, %v4261_v58   ;;  %v603_v0 = vor.u32 4788187, %v602_v20  ;;  %v606_v17 = vcvt.s32.f32 %v599_v55  ;;  %v9640_v25 = vsub.s32 %v1204_v26, %v1207_v57  ;;  %v688_v60 = vsel %vm674_vm12, %v685_v13, %v687_v18 }
  0x71   : > { %v690_v26 = vand.u32 65535, %v9654_v21  ;;  %v9678_v54 = vshrl.u32 %v9654_v21, 16  ;;  %v692_v32 = vand.u32 65535, %v688_v60  ;;  %v613_v36 = vsel %vm9647_vm13, 0, %v611_v16 }
  0x72   : > { %4379 = vperm.xlu2 %8987, %v4259_v52   ;;  %v604_v15 = vand.u32 2147483647, %v603_v0  ;;  %vm1209_vm15 = vcmp.lt.s32.totalorder %v9640_v25, 0  ;;  %v1210_v30 = vsub.s32 0, %v9640_v25  ;;  %v693_v39 = vshrl.u32 %v688_v60, 16  ;;  %v4305_v0 = vld [vmem:[%s15737_s5 + $0x1b8] sm:$0xff] }
  0x73   : > { %v1200_v46 = vadd.s32 %v9564_v56, %v9578_v2  ;;  %v9688_v47 = vadd.f32 1.5707964, %v9570_v45  ;;  %v9692_v49 = vshrl.u32 %v9155_v4, %v9562_v53  ;;  %v684_v48 = vsel %vm674_vm12, %v681_v38, %v683_v22 }
  0x74   : > { %v607_v63 = vmul.f32 %v606_v17, %v604_v15  ;;  %v1211_v9 = vsel %vm1209_vm15, %v1210_v30, %v9640_v25  ;;  %v694_v59 = vmul.u32 %v692_v32, %v690_v26  ;;  %v9696_v50 = vmul.u32 %v693_v39, %v690_v26 }
  0x75   : > { %v1212_v11 = vclz %v1211_v9  ;;  %v630_v56 = vadd.s32 3, %v613_v36  ;;  %v9702_v45 = vsel %vm676_vm10, %v666_v14, 2102212464  ;;  %v9705_v53 = vmul.u32 %v692_v32, %v9678_v54  ;;  %v4285_v36 = vld [vmem:[%s15737_s5 + $0x118] sm:$0xff] }
  0x76   : > { %v608_v41 = vxor.u32 2147483648, %v607_v63  ;;  %v698_v52 = vshll.u32 %v9696_v50, 16  ;;  %v714_v55 = vand.u32 65535, %v684_v48  ;;  %v697_v14 = vmul.u32 %v693_v39, %v9678_v54 }
  0x77   : > { %v8157_v58 = vadd.s32 4294967294, %v1212_v11  ;;  %v715_v61 = vshrl.u32 %v684_v48, 16  ;;  %vm1108_vm2 = vcmp.lt.s32.totalorder %v9342_v37, 0  ;;  %v1230_v16 = vsub.s32 4, %v9623_v44 }
  0x78   : > { %4529 = vperm.xlu1 %8986, %v4289_v23   ;;  %4524 = vperm.xlu0 %8985, %v4288_v31   ;;  %v609_v51 = vsel %vm488_vm14, %v608_v41, %v607_v63  ;;  %vm702_vm1 = vc.u32 %v694_v59, %v698_v52  ;;  %v700_v30 = vshll.u32 %v9705_v53, 16  ;;  %v716_v23 = vmul.u32 %v714_v55, %v690_v26 }
  0x79   : > { %v9710_v2 = vsel %vm9647_vm13, %v9331_v33, %v609_v51  ;;  %vm8158_vm0 = vcmp.lt.s32.totalorder %v8157_v58, 0  ;;  %v703_v60 = vsel %vm702_vm1, 1, %v9153_v3  ;;  %v704_v9 = vadd.s32 %v698_v52, %v694_v59 }
  0x7a   : > { %4604 = vperm.xlu2 %8987, %v4304_v40   ;;  %v614_v20 = vmul.f32 %v9710_v2, %v9710_v2  ;;  %v1215_v57 = vsel %vm8158_vm0, 0, %v8157_v58  ;;  %v705_v32 = vadd.s32 %v703_v60, %v697_v14  ;;  %vm9733_vm3 = vcmp.le.f32.partialorder %v1106_v42, 0.7853982 }
  0x7b   : > { %v1216_v17 = vsub.s32 32, %v1215_v57  ;;  %v1217_v13 = vshll.u32 %v9640_v25, %v1215_v57  ;;  %v1220_v35 = vsub.s32 4294967266, %v1215_v57  ;;  %v4287_v25 = vld [vmem:[%s15737_s5 + $0x128] sm:$0xff]  ;;  %v717_v40 = vmul.u32 %v715_v61, %v690_v26 }
  0x7c   : > { %v615_v18 = vmul.f32 -0.001358992, %v614_v20  ;;  %v622_v15 = vmul.f32 -0.00019511016, %v614_v20  ;;  %v9738_v41 = vmul.u32 %v714_v55, %v9678_v54  ;;  %v699_v48 = vshrl.u32 %v9696_v50, 16 }
  0x7d   : > { %v1218_v38 = vshrl.u32 %v1200_v46, %v1216_v17  ;;  %v1221_v22 = vadd.s32 127, %v1220_v35  ;;  %vm706_vm4 = vc.u32 %v704_v9, %v700_v30  ;;  %v719_v52 = vmul.u32 %v715_v61, %v9678_v54  ;;  %v5922_v17 = vld [vmem:[%s431_s15] sm:$0xff]  ;;  %v4303_v35 = vld [vmem:[%s15737_s5 + $0x1a8] sm:$0xff]  ;;  %s421_s15 = scalar_lea.vmem [#allocation2], %s8137_s29  ;;  %s9105_s29 = scalar_lea.hbm %s9104_s28, 16 }
  0x7e   : > { %v616_v31 = vadd.f32 0.041655596, %v615_v18  ;;  %v623_v63 = vadd.f32 0.008332121, %v622_v15  ;;  %v707_v51 = vsel %vm706_vm4, 1, %v9153_v3  ;;  %v720_v14 = vshll.u32 %v717_v40, 16  ;;  %p9106_p11 = scmp.ne.s32.totalorder %s9104_s28, %s9105_s29  ;;  %p9111_p1 = scmp.lt.s32.totalorder %s9109_s17, %s9105_s29 }
  0x7f   : > { %v1219_v11 = vor.u32 %v1218_v38, %v1217_v13  ;;  %v1222_v39 = vshll.u32 %v1221_v22, 23  ;;  %v709_v55 = vadd.s32 %v707_v51, %v705_v32  ;;  %v677_v50 = vsel %vm673_vm9, %v9692_v49, %v9633_v1  ;;  %v4302_v54 = vld [vmem:[%s15737_s5 + $0x1a0] sm:$0xff]  ;;  %5952 = vst [vmem:[#allocation1] ss:$4 sm:$0xff] %v5922_v17  ;;  %v4284_v38 = vld [vmem:[%s15737_s5 + $0x110] sm:$0xff]  ;;  %s8062_s20 = sshll.u32 %s421_s15, 4  ;;  %s8063_s20 = int_to_ptr.vmem [resolvable:$true] %s8062_s20 }
  0x80   : > { %4514 = vperm.xlu1 %8986, %v4286_v62   ;;  %4609 = vperm.xlu0 %8985, %v4305_v0   ;;  %v617_v46 = vmul.f32 %v616_v31, %v614_v20  ;;  %v624_v58 = vmul.f32 %v623_v63, %v614_v20  ;;  %v9746_v62 = vand.u32 3, %v630_v56  ;;  %v722_v13 = vshll.u32 %v9738_v41, 16  ;;  %p9107_p12 = pnand %p9106_p11, %p9265_p5  ;;  %p9112_p2 = por %p9111_p1, %p9110_p0 }
  0x81   : > { %v1223_v42 = vor.u32 4788187, %v1222_v39  ;;  %v1226_v59 = vcvt.s32.f32 %v1219_v11  ;;  %v679_v18 = vsel %vm675_vm11, %v9615_v43, %v9702_v45  ;;  %vm724_vm5 = vc.u32 %v716_v23, %v720_v14 }
  0x82   : > { %4519 = vperm.xlu2 %8987, %v4287_v25   ;;  %v618_v26 = vadd.f32 -0.4999988, %v617_v46  ;;  %v625_v57 = vadd.f32 -0.16666654, %v624_v58  ;;  %v1231_v49 = vsel %vm1108_vm2, %v1230_v16, %v9623_v44  ;;  %v725_v15 = vsel %vm724_vm5, 1, %v9153_v3  ;;  %v4300_v46 = vld [vmem:[%s15737_s5 + $0x190] sm:$0xff]  ;;  %p9108_p13 = pneg %p9107_p12 }
  0x83   : > { %v1224_v0 = vand.u32 2147483647, %v1223_v42  ;;  %v726_v30 = vadd.s32 %v720_v14, %v716_v23  ;;  %v701_v22 = vshrl.u32 %v9705_v53, 16  ;;  %v710_v60 = vadd.s32 %v709_v55, %v699_v48 }
  0x84   : > { %v619_v61 = vmul.f32 %v618_v26, %v614_v20  ;;  %v626_v56 = vmul.f32 %v625_v57, %v614_v20  ;;  %v727_v25 = vadd.s32 %v725_v15, %v719_v52  ;;  %v721_v45 = vshrl.u32 %v717_v40, 16  ;;  %p9113_p3 = pnand %p9112_p2, %p9108_p13 }
  0x85   : > { %v1227_v1 = vmul.f32 %v1226_v59, %v1224_v0  ;;  %vm728_vm6 = vc.u32 %v726_v30, %v722_v13  ;;  %v1264_v31 = vand.u32 2139095040, %v9688_v47  ;;  %v1233_v23 = vsel %vm9733_vm3, 0, %v1231_v49 }
  0x86   : > { %v627_v20 = vadd.f32 1.0, %v626_v56  ;;  %v620_v44 = vadd.f32 1.0, %v619_v61  ;;  %v729_v63 = vsel %vm728_vm6, 1, %v9153_v3  ;;  %vm633_vm7 = vcmp.eq.s32.totalorder %v9746_v62, 0 }
  0x87   : > { %v1228_v43 = vxor.u32 2147483648, %v1227_v1  ;;  %v723_v9 = vshrl.u32 %v9738_v41, 16  ;;  %v731_v32 = vadd.s32 %v729_v63, %v727_v25  ;;  %v9787_v39 = vadd.s32 %v726_v30, %v722_v13 }
  0x88   : > { %4599 = vperm.xlu1 %8986, %v4303_v35   ;;  %4594 = vperm.xlu0 %8985, %v4302_v54   ;;  %v628_v16 = vmul.f32 %v627_v20, %v9710_v2  ;;  %v9785_v2 = vadd.s32 %v710_v60, %v701_v22  ;;  %v1265_v40 = vshrl.u32 %v1264_v31, 23  ;;  %v1250_v48 = vadd.s32 3, %v1233_v23 }
  0x89   : > { %v1229_v53 = vsel %vm1108_vm2, %v1228_v43, %v1227_v1  ;;  %v680_v41 = vsel %vm674_vm12, %v677_v50, %v679_v18  ;;  %v732_v42 = vadd.s32 %v731_v32, %v721_v45  ;;  %v637_v51 = vxor.u32 2147483648, %v620_v44 }
  0x8a   : > { %4504 = vperm.xlu2 %8987, %v4284_v38   ;;  %v9783_v11 = vsel %vm9733_vm3, %v9342_v37, %v1229_v53  ;;  %v634_v59 = vxor.u32 2147483648, %v628_v16  ;;  %v1261_v52 = vand.u32 2147483647, %v9688_v47  ;;  %v8159_v26 = vadd.s32 4294967169, %v1265_v40 }
  0x8b   : > { %v1234_v58 = vmul.f32 %v9783_v11, %v9783_v11  ;;  %vm636_vm8 = vcmp.eq.s32.totalorder %v9746_v62, 2  ;;  %v733_v14 = vadd.s32 %v732_v42, %v723_v9  ;;  %vm632_vm9 = vcmp.lt.s32.totalorder %v9746_v62, 2 }
  0x8c   : > { %v734_v7 = vmul.u32 %v9654_v21, %v680_v41  ;;  %vm736_vm10 = vc.u32 %v9785_v2, %v9787_v39  ;;  %v1271_v0 = vadd.s32 1, %v8159_v26  ;;  %v1251_v13 = vand.u32 3, %v1250_v48 }
  0x8d   : > { %v1235_v57 = vmul.f32 -0.001358992, %v1234_v58  ;;  %v1242_v55 = vmul.f32 -0.00019511016, %v1234_v58  ;;  %v737_v35 = vadd.s32 1, %v733_v14  ;;  %v635_v54 = vsel %vm633_vm7, %v620_v44, %v634_v59 }
  0x8e   : > { %v638_v61 = vsel %vm636_vm8, %v637_v51, %v628_v16  ;;  %v1268_v56 = vand.u32 8388607, %v1261_v52  ;;  %vm1272_vm11 = vcmp.gt.s32.totalorder %v1271_v0, 0  ;;  %vm629_vm12 = vweird.f32 %v9331_v33 }
  0x8f   : > { %v1236_v17 = vadd.f32 0.041655596, %v1235_v57  ;;  %v1243_v50 = vadd.f32 0.008332121, %v1242_v55  ;;  %v738_v1 = vsel %vm736_vm10, %v737_v35, %v733_v14  ;;  %v1273_v49 = vsel %vm1272_vm11, %v1271_v0, 0 }
  0x90   : > { %4584 = vperm.xlu1 %8986, %v4300_v46   ;;  %4509 = vperm.xlu0 %8985, %v4285_v36   ;;  %v739_v15 = vadd.s32 %v738_v1, %v734_v7  ;;  %v1275_v30 = vand.u32 31, %v1273_v49  ;;  %vm1252_vm13 = vcmp.lt.s32.totalorder %v1251_v13, 2  ;;  %vm1253_vm14 = vcmp.eq.s32.totalorder %v1251_v13, 0 }
  0x91   : > { %v1237_v18 = vmul.f32 %v1236_v17, %v1234_v58  ;;  %v1244_v21 = vmul.f32 %v1243_v50, %v1234_v58  ;;  %vm1256_vm15 = vcmp.eq.s32.totalorder %v1251_v13, 2  ;;  %v639_v22 = vsel %vm632_vm9, %v635_v54, %v638_v61 }
  0x92   : > { %vm1249_vm0 = vweird.f32 %v9342_v37  ;;  %v740_v60 = vadd.s32 536870912, %v739_v15  ;;  %v1269_v25 = vor.u32 8388608, %v1268_v56  ;;  %v9813_v43 = vsub.s32 32, %v1275_v30 }
  0x93   : > { %v1238_v38 = vadd.f32 -0.4999988, %v1237_v18  ;;  %v1245_v20 = vadd.f32 -0.16666654, %v1244_v21  ;;  %v9815_v44 = vshrl.u32 %v1273_v49, 5  ;;  %v1278_v16 = vshll.u32 %v9155_v4, %v1275_v30 }
  0x94   : > { %v9818_v23 = vshrl.u32 %v740_v60, 30  ;;  %v1279_v63 = vshrl.u32 %v9156_v6, %v9813_v43  ;;  %v1281_v62 = vshll.u32 %v9156_v6, %v1275_v30  ;;  %v1282_v53 = vshrl.u32 %v9157_v8, %v9813_v43 }
  0x95   : > { %v1239_v45 = vmul.f32 %v1238_v38, %v1234_v58  ;;  %v1246_v31 = vmul.f32 %v1245_v20, %v1234_v58  ;;  %v1287_v40 = vshll.u32 %v9158_v10, %v1275_v30  ;;  %v1288_v46 = vshrl.u32 %v9159_v12, %v9813_v43 }
  0x96   : > { %v742_v58 = vshll.u32 %v9818_v23, 30  ;;  %v1284_v48 = vshll.u32 %v9157_v8, %v1275_v30  ;;  %v1285_v41 = vshrl.u32 %v9158_v10, %v9813_v43  ;;  %v464_v42 = vperm.slane %v9306_v19, 2 }
  0x97   : > { %v1240_v9 = vadd.f32 1.0, %v1239_v45  ;;  %v1247_v32 = vadd.f32 1.0, %v1246_v31  ;;  %v640_v36 = vsel %vm629_vm12, nan, %v639_v22  ;;  %v9836_v26 = vor.u32 %v1279_v63, %v1278_v16 }
  0x98   : > { %v743_v57 = vsub.s32 %v739_v15, %v742_v58  ;;  %v9838_v55 = vor.u32 %v1282_v53, %v1281_v62  ;;  %v1290_v14 = vshll.u32 %v9159_v12, %v1275_v30  ;;  %v1291_v7 = vshrl.u32 %v9160_v24, %v9813_v43 }
  0x99   : > { %v1248_v59 = vmul.f32 %v1247_v32, %v9783_v11  ;;  %v1257_v51 = vxor.u32 2147483648, %v1240_v9  ;;  %v1289_v19 = vor.u32 %v1288_v46, %v1287_v40  ;;  %vm1293_vm1 = vcmp.lt.s32.totalorder %v9815_v44, 1 }
  0x9a   : > { %vm744_vm2 = vcmp.lt.s32.totalorder %v743_v57, 0  ;;  %v745_v33 = vsub.s32 0, %v743_v57  ;;  %v1286_v11 = vor.u32 %v1285_v41, %v1284_v48  ;;  %v9845_v50 = vshll.u32 %v1269_v25, 8 }
  0x9b   : > { %v1254_v0 = vxor.u32 2147483648, %v1248_v59  ;;  %v1258_v17 = vsel %vm1256_vm15, %v1257_v51, %v1248_v59  ;;  %v1292_v54 = vor.u32 %v1291_v7, %v1290_v14  ;;  %vm1295_vm3 = vcmp.lt.s32.totalorder %v9815_v44, 3 }
  0x9c   : > { %vm1296_vm4 = vcmp.lt.s32.totalorder %v9815_v44, 4  ;;  %v746_v56 = vsel %vm744_vm2, %v745_v33, %v743_v57  ;;  %vm1294_vm5 = vcmp.lt.s32.totalorder %v9815_v44, 2  ;;  %v1301_v18 = vsel %vm1293_vm1, %v9836_v26, %v9838_v55 }
  0x9d   : > { %v1255_v35 = vsel %vm1253_vm14, %v1240_v9, %v1254_v0  ;;  %vm1863_vm6 = vcmask 1045504   ;;  %v747_v1 = vclz %v746_v56  ;;  %v1302_v49 = vsel %vm1296_vm4, %v1289_v19, 920167782 }
  0x9e   : > { %v1259_v61 = vsel %vm1252_vm13, %v1255_v35, %v1258_v17  ;;  %v1303_v13 = vsel %vm1295_vm3, %v1286_v11, %v1302_v49  ;;  %v472_v30 = vmul.f32 %v9321_v28, %v464_v42  ;;  %v735_v38 = vadd.s32 %v9787_v39, %v9785_v2 }
  0x9f   : > { %v1260_v21 = vsel %vm1249_vm0, nan, %v1259_v61  ;;  %v8148_v20 = vadd.s32 4294967294, %v747_v1  ;;  %v1304_v22 = vsel %vm1294_vm5, %v1301_v18, %v1303_v13  ;;  %v1305_v37 = vsel %vm1293_vm1, %v9838_v55, %v1286_v11 }
  0xa0   : > { %v1726_v15 = vpack.c.bf16 %v1260_v21, %v640_v36  ;;  %v1306_v25 = vsel %vm1296_vm4, %v1292_v54, 1326507024  ;;  %v1310_v45 = vand.u32 65535, %v9845_v50  ;;  %v476_v31 = vmul.f32 %v9323_v29, %v464_v42 }
  0xa1   : > { %vm8149_vm7 = vcmp.lt.s32.totalorder %v8148_v20, 0  ;;  %v1307_v2 = vsel %vm1295_vm3, %v1289_v19, %v1306_v25  ;;  %v1311_v39 = vshrl.u32 %v9845_v50, 16  ;;  %v1334_v16 = vand.u32 65535, %v1304_v22 }
  0xa2   : > { %v1865_v60 = vsel %vm1863_vm6, %v1726_v15, 0  ;;  %v750_v63 = vsel %vm8149_vm7, 0, %v8148_v20  ;;  %v1308_v62 = vsel %vm1294_vm5, %v1305_v37, %v1307_v2  ;;  %v1335_v53 = vshrl.u32 %v1304_v22, 16 }
  0xa3   : > { %1883 = vmatpush.bf16.msra.mxu0 %v1865_v60  ;;  %v9881_v9 = vadd.f32 %v472_v30, %v9319_v27  ;;  %v751_v32 = vsub.s32 32, %v750_v63  ;;  %v752_v40 = vshll.u32 %v743_v57, %v750_v63  ;;  %v755_v46 = vsub.s32 4294967266, %v750_v63 }
  0xa4   : > { %v1312_v58 = vand.u32 65535, %v1308_v62  ;;  %v765_v48 = vsub.s32 4, %v9818_v23  ;;  %v1277_v41 = vshrl.u32 %v9155_v4, %v9813_v43  ;;  %v1313_v42 = vshrl.u32 %v1308_v62, 16 }
  0xa5   : > { %v9886_v36 = vadd.f32 1.5707964, %v476_v31  ;;  %v753_v59 = vshrl.u32 %v735_v38, %v751_v32  ;;  %v756_v51 = vadd.s32 127, %v755_v46  ;;  %v1336_v7 = vmul.u32 %v1334_v16, %v1310_v45 }
  0xa6   : > { %v1316_v14 = vmul.u32 %v1312_v58, %v1311_v39  ;;  %vm643_vm8 = vcmp.lt.s32.totalorder %v9334_v34, 0  ;;  %v1314_v0 = vmul.u32 %v1312_v58, %v1310_v45  ;;  %v1315_v17 = vmul.u32 %v1313_v42, %v1310_v45 }
  0xa7   : > { %v1337_v19 = vmul.u32 %v1335_v53, %v1310_v45  ;;  %v1338_v57 = vmul.u32 %v1334_v16, %v1311_v39  ;;  %v754_v33 = vor.u32 %v753_v59, %v752_v40  ;;  %v757_v35 = vshll.u32 %v756_v51, 23 }
  0xa8   : > { %v1298_v54 = vsel %vm1296_vm4, %v1286_v11, 2102212464  ;;  %v1317_v61 = vmul.u32 %v1313_v42, %v1311_v39  ;;  %v1318_v43 = vshll.u32 %v1315_v17, 16  ;;  %v1320_v56 = vshll.u32 %v1316_v14, 16 }
  0xa9   : > { %v1339_v18 = vmul.u32 %v1335_v53, %v1311_v39  ;;  %v1340_v21 = vshll.u32 %v1337_v19, 16  ;;  %v758_v1 = vor.u32 4788187, %v757_v35  ;;  %v761_v49 = vcvt.s32.f32 %v754_v33 }
  0xaa   : > { %v1297_v15 = vsel %vm1293_vm1, %v1277_v41, %v9836_v26  ;;  %v1342_v13 = vshll.u32 %v1338_v57, 16  ;;  %v1299_v30 = vsel %vm1295_vm3, %v9838_v55, %v1298_v54  ;;  %vm1322_vm9 = vc.u32 %v1314_v0, %v1318_v43 }
  0xab   : > { %v1324_v38 = vadd.s32 %v1318_v43, %v1314_v0  ;;  %vm1344_vm10 = vc.u32 %v1336_v7, %v1340_v21  ;;  %v759_v11 = vand.u32 2147483647, %v758_v1  ;;  %v1323_v20 = vsel %vm1322_vm9, 1, %v9153_v3 }
  0xac   : > { %v1345_v22 = vsel %vm1344_vm10, 1, %v9153_v3  ;;  %v1346_v37 = vadd.s32 %v1340_v21, %v1336_v7  ;;  %v1319_v60 = vshrl.u32 %v1315_v17, 16  ;;  %v1325_v25 = vadd.s32 %v1323_v20, %v1317_v61 }
  0xad   : > { %vm1326_vm11 = vc.u32 %v1324_v38, %v1320_v56  ;;  %v1347_v45 = vadd.s32 %v1345_v22, %v1339_v18  ;;  %v762_v31 = vmul.f32 %v761_v49, %v759_v11  ;;  %v1341_v2 = vshrl.u32 %v1337_v19, 16 }
  0xae   : > { %v1327_v26 = vsel %vm1326_vm11, 1, %v9153_v3  ;;  %vm1348_vm12 = vc.u32 %v1346_v37, %v1342_v13  ;;  %v1321_v39 = vshrl.u32 %v1316_v14, 16  ;;  %v799_v63 = vand.u32 2139095040, %v9881_v9 }
  0xaf   : > { %v1329_v55 = vadd.s32 %v1327_v26, %v1325_v25  ;;  %v1349_v16 = vsel %vm1348_vm12, 1, %v9153_v3  ;;  %vm9904_vm13 = vcmp.le.f32.partialorder %v641_v5, 0.7853982  ;;  %v763_v53 = vxor.u32 2147483648, %v762_v31 }
  0xb0   : > { %v1343_v32 = vshrl.u32 %v1338_v57, 16  ;;  %v1351_v40 = vadd.s32 %v1349_v16, %v1347_v45  ;;  %v1350_v58 = vadd.s32 %v1346_v37, %v1342_v13  ;;  %v796_v41 = vand.u32 2147483647, %v9881_v9 }
  0xb1   : > { %v1330_v46 = vadd.s32 %v1329_v55, %v1319_v60  ;;  %v800_v42 = vshrl.u32 %v799_v63, 23  ;;  %v764_v59 = vsel %vm643_vm8, %v763_v53, %v762_v31  ;;  %v766_v51 = vsel %vm643_vm8, %v765_v48, %v9818_v23 }
  0xb2   : > { %v1300_v5 = vsel %vm1294_vm5, %v1297_v15, %v1299_v30  ;;  %v1352_v14 = vadd.s32 %v1351_v40, %v1341_v2  ;;  %v9919_v7 = vsel %vm9904_vm13, %v9334_v34, %v764_v59  ;;  %v1419_v19 = vand.u32 2139095040, %v9886_v36 }
  0xb3   : > { %v1331_v0 = vadd.s32 %v1330_v46, %v1321_v39  ;;  %v8150_v17 = vadd.s32 4294967169, %v800_v42  ;;  %v769_v57 = vmul.f32 %v9919_v7, %v9919_v7  ;;  %v1354_v35 = vmul.u32 %v9845_v50, %v1300_v5 }
  0xb4   : > { %v1353_v33 = vadd.s32 %v1352_v14, %v1343_v32  ;;  %v768_v44 = vsel %vm9904_vm13, 0, %v766_v51  ;;  %v803_v43 = vand.u32 8388607, %v796_v41  ;;  %v1420_v56 = vshrl.u32 %v1419_v19, 23 }
  0xb5   : > { %vm1356_vm14 = vc.u32 %v1331_v0, %v1350_v58  ;;  %v806_v23 = vadd.s32 1, %v8150_v17  ;;  %v770_v48 = vmul.f32 -0.001358992, %v769_v57  ;;  %v777_v54 = vmul.f32 -0.00019511016, %v769_v57 }
  0xb6   : > { %v1357_v61 = vadd.s32 1, %v1353_v33  ;;  %v785_v15 = vadd.s32 3, %v768_v44  ;;  %v1416_v30 = vand.u32 2147483647, %v9886_v36  ;;  %v804_v22 = vor.u32 8388608, %v803_v43 }
  0xb7   : > { %vm807_vm15 = vcmp.gt.s32.totalorder %v806_v23, 0  ;;  %v771_v18 = vadd.f32 0.041655596, %v770_v48  ;;  %v778_v21 = vadd.f32 0.008332121, %v777_v54  ;;  %v8162_v60 = vadd.s32 4294967169, %v1420_v56 }
  0xb8   : > { %v1358_v1 = vsel %vm1356_vm14, %v1357_v61, %v1353_v33  ;;  %v808_v49 = vsel %vm807_vm15, %v806_v23, 0  ;;  %v9930_v31 = vand.u32 3, %v785_v15  ;;  %v9935_v39 = vand.u32 8388607, %v1416_v30 }
  0xb9   : > { %v1359_v13 = vadd.s32 %v1358_v1, %v1354_v35  ;;  %v810_v50 = vand.u32 31, %v808_v49  ;;  %v772_v38 = vmul.f32 %v771_v18, %v769_v57  ;;  %v779_v11 = vmul.f32 %v778_v21, %v769_v57 }
  0xba   : > { %v9940_v32 = vshrl.u32 %v808_v49, 5  ;;  %v9942_v40 = vshll.u32 %v804_v22, 8  ;;  %v1426_v46 = vadd.s32 1, %v8162_v60  ;;  %vm1263_vm0 = vcmp.lt.s32.totalorder %v9688_v47, 0 }
  0xbb   : > { %v1360_v20 = vadd.s32 536870912, %v1359_v13  ;;  %v811_v37 = vsub.s32 32, %v810_v50  ;;  %v773_v25 = vadd.f32 -0.4999988, %v772_v38  ;;  %v780_v45 = vadd.f32 -0.16666654, %v779_v11 }
  0xbc   : > { %v813_v2 = vshll.u32 %v9155_v4, %v810_v50  ;;  %v816_v63 = vshll.u32 %v9156_v6, %v810_v50  ;;  %v819_v59 = vshll.u32 %v9157_v8, %v810_v50  ;;  %v822_v5 = vshll.u32 %v9158_v10, %v810_v50 }
  0xbd   : > { %v1361_v26 = vshrl.u32 %v1360_v20, 30  ;;  %v781_v55 = vmul.f32 %v780_v45, %v769_v57  ;;  %v814_v16 = vshrl.u32 %v9156_v6, %v811_v37  ;;  %v817_v62 = vshrl.u32 %v9157_v8, %v811_v37 }
  0xbe   : > { %v774_v42 = vmul.f32 %v773_v25, %v769_v57  ;;  %v820_v51 = vshrl.u32 %v9158_v10, %v811_v37  ;;  %v1355_v14 = vadd.s32 %v1350_v58, %v1331_v0  ;;  %v823_v19 = vshrl.u32 %v9159_v12, %v811_v37 }
  0xbf   : > { %v1362_v53 = vshll.u32 %v1361_v26, 30  ;;  %v825_v33 = vshll.u32 %v9159_v12, %v810_v50  ;;  %v782_v35 = vadd.f32 1.0, %v781_v55  ;;  %v815_v23 = vor.u32 %v814_v16, %v813_v2 }
  0xc0   : > { %v818_v44 = vor.u32 %v817_v62, %v816_v63  ;;  %v826_v57 = vshrl.u32 %v9160_v24, %v811_v37  ;;  %vm791_vm1 = vcmp.eq.s32.totalorder %v9930_v31, 2  ;;  %v824_v54 = vor.u32 %v823_v19, %v822_v5 }
  0xc1   : > { %v9948_v17 = vsub.s32 %v1359_v13, %v1362_v53  ;;  %vm828_vm3 = vcmp.lt.s32.totalorder %v9940_v32, 1  ;;  %v775_v58 = vadd.f32 1.0, %v774_v42  ;;  %vm788_vm4 = vcmp.eq.s32.totalorder %v9930_v31, 0 }
  0xc2   : > { %vm9960_vm5 = vcmp.le.f32.partialorder %v1261_v52, 0.7853982  ;;  %v1385_v61 = vsub.s32 4, %v1361_v26  ;;  %v821_v43 = vor.u32 %v820_v51, %v819_v59  ;;  %vm1427_vm7 = vcmp.gt.s32.totalorder %v1426_v46, 0 }
  0xc3   : > { %vm1364_vm2 = vcmp.lt.s32.totalorder %v9948_v17, 0  ;;  %v1365_v48 = vsub.s32 0, %v9948_v17  ;;  %v827_v18 = vor.u32 %v826_v57, %v825_v33  ;;  %vm830_vm8 = vcmp.lt.s32.totalorder %v9940_v32, 3 }
  0xc4   : > { %vm831_vm9 = vcmp.lt.s32.totalorder %v9940_v32, 4  ;;  %v783_v21 = vmul.f32 %v782_v35, %v9919_v7  ;;  %vm829_vm10 = vcmp.lt.s32.totalorder %v9940_v32, 2  ;;  %v836_v52 = vsel %vm828_vm3, %v815_v23, %v818_v44 }
  0xc5   : > { %v1366_v56 = vsel %vm1364_vm2, %v1365_v48, %v9948_v17  ;;  %v837_v49 = vsel %vm831_vm9, %v824_v54, 920167782  ;;  %v845_v15 = vand.u32 65535, %v9942_v40  ;;  %v846_v13 = vshrl.u32 %v9942_v40, 16 }
  0xc6   : > { %v1367_v1 = vclz %v1366_v56  ;;  %v9975_v50 = vsel %vm1427_vm7, %v1426_v46, 0  ;;  %v812_v11 = vshrl.u32 %v9155_v4, %v811_v37  ;;  %v838_v7 = vsel %vm830_vm8, %v821_v43, %v837_v49 }
  0xc7   : > { %v840_v20 = vsel %vm828_vm3, %v818_v44, %v821_v43  ;;  %v792_v22 = vxor.u32 2147483648, %v775_v58  ;;  %v9984_v60 = vsel %vm1263_vm0, %v1385_v61, %v1361_v26  ;;  %v839_v25 = vsel %vm829_vm10, %v836_v52, %v838_v7 }
  0xc8   : > { %v8160_v38 = vadd.s32 4294967294, %v1367_v1  ;;  %v841_v45 = vsel %vm831_vm9, %v827_v18, 1326507024  ;;  %v789_v2 = vxor.u32 2147483648, %v783_v21  ;;  %v833_v37 = vsel %vm831_vm9, %v821_v43, 2102212464 }
  0xc9   : > { %v842_v55 = vsel %vm830_vm8, %v824_v54, %v841_v45  ;;  %v869_v26 = vand.u32 65535, %v839_v25  ;;  %v870_v62 = vshrl.u32 %v839_v25, 16  ;;  %v1388_v51 = vsel %vm9960_vm5, 0, %v9984_v60 }
  0xca   : > { %vm8161_vm11 = vcmp.lt.s32.totalorder %v8160_v38, 0  ;;  %v843_v63 = vsel %vm829_vm10, %v840_v20, %v842_v55  ;;  %v832_v5 = vsel %vm828_vm3, %v812_v11, %v815_v23  ;;  %v834_v19 = vsel %vm830_vm8, %v818_v44, %v833_v37 }
  0xcb   : > { %v1370_v16 = vsel %vm8161_vm11, 0, %v8160_v38  ;;  %v847_v59 = vand.u32 65535, %v843_v63  ;;  %v848_v33 = vshrl.u32 %v843_v63, 16  ;;  %vm787_vm12 = vcmp.lt.s32.totalorder %v9930_v31, 2 }
  0xcc   : > { %v1371_v53 = vsub.s32 32, %v1370_v16  ;;  %v1372_v46 = vshll.u32 %v9948_v17, %v1370_v16  ;;  %v1375_v42 = vsub.s32 4294967266, %v1370_v16  ;;  %v793_v35 = vsel %vm791_vm1, %v792_v22, %v783_v21 }
  0xcd   : > { %v851_v48 = vmul.u32 %v847_v59, %v846_v13  ;;  %v790_v54 = vsel %vm788_vm4, %v775_v58, %v789_v2  ;;  %v849_v61 = vmul.u32 %v847_v59, %v845_v15  ;;  %v850_v43 = vmul.u32 %v848_v33, %v845_v15 }
  0xce   : > { %v1373_v57 = vshrl.u32 %v1355_v14, %v1371_v53  ;;  %v1376_v17 = vadd.s32 127, %v1375_v42  ;;  %v872_v56 = vmul.u32 %v870_v62, %v845_v15  ;;  %v10011_v44 = vsel %vm829_vm10, %v832_v5, %v834_v19 }
  0xcf   : > { %v871_v1 = vmul.u32 %v869_v26, %v845_v15  ;;  %v852_v52 = vmul.u32 %v848_v33, %v846_v13  ;;  %v853_v49 = vshll.u32 %v850_v43, 16  ;;  %v855_v38 = vshll.u32 %v851_v48, 16 }
  0xd0   : > { %v1374_v18 = vor.u32 %v1373_v57, %v1372_v46  ;;  %v1377_v23 = vshll.u32 %v1376_v17, 23  ;;  %v873_v21 = vmul.u32 %v869_v26, %v846_v13  ;;  %v874_v7 = vmul.u32 %v870_v62, %v846_v13 }
  0xd1   : > { %v875_v20 = vshll.u32 %v872_v56, 16  ;;  %v854_v22 = vshrl.u32 %v850_v43, 16  ;;  %vm857_vm13 = vc.u32 %v849_v61, %v853_v49  ;;  %v859_v58 = vadd.s32 %v853_v49, %v849_v61 }
  0xd2   : > { %v1378_v14 = vor.u32 4788187, %v1377_v23  ;;  %v1381_v11 = vcvt.s32.f32 %v1374_v18  ;;  %v877_v60 = vshll.u32 %v873_v21, 16  ;;  %v858_v45 = vsel %vm857_vm13, 1, %v9153_v3 }
  0xd3   : > { %vm879_vm14 = vc.u32 %v871_v1, %v875_v20  ;;  %v881_v32 = vadd.s32 %v875_v20, %v871_v1  ;;  %v860_v2 = vadd.s32 %v858_v45, %v852_v52  ;;  %vm861_vm15 = vc.u32 %v859_v58, %v855_v38 }
  0xd4   : > { %v1379_v25 = vand.u32 2147483647, %v1378_v14  ;;  %v876_v15 = vshrl.u32 %v872_v56, 16  ;;  %v880_v37 = vsel %vm879_vm14, 1, %v9153_v3  ;;  %v862_v16 = vsel %vm861_vm15, 1, %v9153_v3 }
  0xd5   : > { %v882_v63 = vadd.s32 %v880_v37, %v874_v7  ;;  %vm883_vm1 = vc.u32 %v881_v32, %v877_v60  ;;  %v856_v13 = vshrl.u32 %v851_v48, 16  ;;  %v864_v26 = vadd.s32 %v862_v16, %v860_v2 }
  0xd6   : > { %v1382_v55 = vmul.f32 %v1381_v11, %v1379_v25  ;;  %v884_v62 = vsel %vm883_vm1, 1, %v9153_v3  ;;  %v1430_v53 = vand.u32 31, %v9975_v50  ;;  %vm784_vm2 = vweird.f32 %v9334_v34 }
  0xd7   : > { %v878_v42 = vshrl.u32 %v873_v21, 16  ;;  %v886_v59 = vadd.s32 %v884_v62, %v882_v63  ;;  %v1424_v5 = vor.u32 8388608, %v9935_v39  ;;  %v794_v19 = vsel %vm787_vm12, %v790_v54, %v793_v35 }
  0xd8   : > { %v1383_v46 = vxor.u32 2147483648, %v1382_v55  ;;  %v865_v33 = vadd.s32 %v864_v26, %v854_v22  ;;  %v10022_v57 = vadd.s32 %v881_v32, %v877_v60  ;;  %v10024_v17 = vsub.s32 32, %v1430_v53 }
  0xd9   : > { %v1405_v61 = vadd.s32 3, %v1388_v51  ;;  %v887_v43 = vadd.s32 %v886_v59, %v876_v15  ;;  %v889_v56 = vmul.u32 %v9942_v40, %v10011_v44  ;;  %v10036_v31 = vshrl.u32 %v9975_v50, 5 }
  0xda   : > { %v1384_v48 = vsel %vm1263_vm0, %v1383_v46, %v1382_v55  ;;  %v10033_v18 = vadd.s32 %v865_v33, %v856_v13  ;;  %v1436_v35 = vshll.u32 %v9156_v6, %v1430_v53  ;;  %v1439_v1 = vshll.u32 %v9157_v8, %v1430_v53 }
  0xdb   : > { %v1387_v39 = vsel %vm9960_vm5, %v9688_v47, %v1384_v48  ;;  %v888_v23 = vadd.s32 %v887_v43, %v878_v42  ;;  %v1442_v51 = vshll.u32 %v9158_v10, %v1430_v53  ;;  %v1437_v40 = vshrl.u32 %v9157_v8, %v10024_v17 }
  0xdc   : > { %v1389_v54 = vmul.f32 %v1387_v39, %v1387_v39  ;;  %vm891_vm0 = vc.u32 %v10033_v18, %v10022_v57  ;;  %v1440_v0 = vshrl.u32 %v9158_v10, %v10024_v17  ;;  %v1443_v50 = vshrl.u32 %v9159_v12, %v10024_v17 }
  0xdd   : > { %v10049_v49 = vand.u32 3, %v1405_v61  ;;  %v892_v38 = vadd.s32 1, %v888_v23  ;;  %v1433_v21 = vshll.u32 %v9155_v4, %v1430_v53  ;;  %v1434_v14 = vshrl.u32 %v9156_v6, %v10024_v17 }
  0xde   : > { %v1390_v44 = vmul.f32 -0.001358992, %v1389_v54  ;;  %v1397_v52 = vmul.f32 -0.00019511016, %v1389_v54  ;;  %v1445_v11 = vshll.u32 %v9159_v12, %v1430_v53  ;;  %v1446_v7 = vshrl.u32 %v9160_v24, %v10024_v17 }
  0xdf   : > { %v893_v58 = vsel %vm891_vm0, %v892_v38, %v888_v23  ;;  %v1444_v60 = vor.u32 %v1443_v50, %v1442_v51  ;;  %v10057_v45 = vor.u32 %v1437_v40, %v1436_v35  ;;  %v10059_v32 = vor.u32 %v1440_v0, %v1439_v1 }
  0xe0   : > { %v1391_v20 = vadd.f32 0.041655596, %v1390_v44  ;;  %v1398_v22 = vadd.f32 0.008332121, %v1397_v52  ;;  %v894_v25 = vadd.s32 %v893_v58, %v889_v56  ;;  %vm1451_vm3 = vcmp.lt.s32.totalorder %v10036_v31, 4 }
  0xe1   : > { %v1447_v37 = vor.u32 %v1446_v7, %v1445_v11  ;;  %vm1448_vm4 = vcmp.lt.s32.totalorder %v10036_v31, 1  ;;  %v10065_v55 = vsel %vm784_vm2, nan, %v794_v19  ;;  %v10067_v63 = vor.u32 %v1434_v14, %v1433_v21 }
  0xe2   : > { %v1392_v2 = vmul.f32 %v1391_v20, %v1389_v54  ;;  %v1399_v15 = vmul.f32 %v1398_v22, %v1389_v54  ;;  %v895_v16 = vadd.s32 536870912, %v894_v25  ;;  %vm1450_vm5 = vcmp.lt.s32.totalorder %v10036_v31, 3 }
  0xe3   : > { %v1457_v62 = vsel %vm1451_vm3, %v1444_v60, 920167782  ;;  %vm1404_vm7 = vweird.f32 %v9688_v47  ;;  %vm1407_vm8 = vcmp.lt.s32.totalorder %v10049_v49, 2  ;;  %vm1449_vm9 = vcmp.lt.s32.totalorder %v10036_v31, 2 }
  0xe4   : > { %v1393_v13 = vadd.f32 -0.4999988, %v1392_v2  ;;  %v1400_v26 = vadd.f32 -0.16666654, %v1399_v15  ;;  %v10074_v53 = vshrl.u32 %v895_v16, 30  ;;  %v1460_v34 = vsel %vm1448_vm4, %v10057_v45, %v10059_v32 }
  0xe5   : > { %v1461_v59 = vsel %vm1451_vm3, %v1447_v37, 1326507024  ;;  %v10083_v19 = vshll.u32 %v1424_v5, 8  ;;  %v1456_v48 = vsel %vm1448_vm4, %v10067_v63, %v10057_v45  ;;  %v1458_v61 = vsel %vm1450_vm5, %v10059_v32, %v1457_v62 }
  0xe6   : > { %v1394_v46 = vmul.f32 %v1393_v13, %v1389_v54  ;;  %v1401_v42 = vmul.f32 %v1400_v26, %v1389_v54  ;;  %v897_v33 = vshll.u32 %v10074_v53, 30  ;;  %v1462_v43 = vsel %vm1450_vm5, %v1444_v60, %v1461_v59  ;;  %v9088_v26 = vld [vmem:[%s9303_s30] sm:$0xf] }
  0xe7   : > { %v1463_v5 = vsel %vm1449_vm9, %v1460_v34, %v1462_v43  ;;  %v1465_v54 = vand.u32 65535, %v10083_v19  ;;  %vm1411_vm10 = vcmp.eq.s32.totalorder %v10049_v49, 2  ;;  %v1466_v1 = vshrl.u32 %v10083_v19, 16 }
  0xe8   : > { %v1395_v56 = vadd.f32 1.0, %v1394_v46  ;;  %v1402_v35 = vadd.f32 1.0, %v1401_v42  ;;  %v898_v23 = vsub.s32 %v894_v25, %v897_v33  ;;  %v1467_v51 = vand.u32 65535, %v1463_v5 }
  0xe9   : > { %v1459_v50 = vsel %vm1449_vm9, %v1456_v48, %v1458_v61  ;;  %v1468_v44 = vshrl.u32 %v1463_v5, 16  ;;  %vm1408_vm11 = vcmp.eq.s32.totalorder %v10049_v49, 0  ;;  %v890_v16 = vadd.s32 %v10022_v57, %v10033_v18 }
  0xea   : > { %v1403_v40 = vmul.f32 %v1402_v35, %v1387_v39  ;;  %v1412_v0 = vxor.u32 2147483648, %v1395_v56  ;;  %vm899_vm12 = vcmp.lt.s32.totalorder %v898_v23, 0  ;;  %v900_v52 = vsub.s32 0, %v898_v23 }
  0xeb   : > { %v10103_v38 = vmul.u32 %v1467_v51, %v1466_v1  ;;  %v1469_v11 = vmul.u32 %v1467_v51, %v1465_v54  ;;  %v1470_v7 = vmul.u32 %v1468_v44, %v1465_v54  ;;  %v1472_v22 = vmul.u32 %v1468_v44, %v1466_v1 }
  0xec   : > { %v1409_v21 = vxor.u32 2147483648, %v1403_v40  ;;  %v1413_v14 = vsel %vm1411_vm10, %v1412_v0, %v1403_v40  ;;  %v901_v20 = vsel %vm899_vm12, %v900_v52, %v898_v23  ;;  %v1489_v58 = vand.u32 65535, %v1459_v50 }
  0xed   : > { %v1490_v39 = vshrl.u32 %v1459_v50, 16  ;;  %v902_v25 = vclz %v901_v20  ;;  %v1473_v2 = vshll.u32 %v1470_v7, 16  ;;  %v1475_v15 = vshll.u32 %v10103_v38, 16 }
  0xee   : > { %v1410_v60 = vsel %vm1408_vm11, %v1395_v56, %v1409_v21  ;;  %v1432_v13 = vshrl.u32 %v9155_v4, %v10024_v17  ;;  %v465_v62 = vperm.slane %v9088_v26, 3  ;;  %v1474_v33 = vshrl.u32 %v1470_v7, 16 }
  0xef   : > { %v1414_v37 = vsel %vm1407_vm8, %v1410_v60, %v1413_v14  ;;  %v8151_v46 = vadd.s32 4294967294, %v902_v25  ;;  %vm1477_vm13 = vc.u32 %v1469_v11, %v1473_v2  ;;  %v1479_v42 = vadd.s32 %v1473_v2, %v1469_v11 }
  0xf0   : > { %v1415_v34 = vsel %vm1404_vm7, nan, %v1414_v37  ;;  %v1478_v49 = vsel %vm1477_vm13, 1, %v9153_v3  ;;  %v1492_v48 = vmul.u32 %v1490_v39, %v1465_v54  ;;  %v1491_v57 = vmul.u32 %v1489_v58, %v1465_v54 }
  0xf1   : > { %v1727_v59 = vpack.c.bf16 %v1415_v34, %v10065_v55  ;;  %vm8152_vm14 = vcmp.lt.s32.totalorder %v8151_v46, 0  ;;  %v1480_v61 = vadd.s32 %v1478_v49, %v1472_v22  ;;  %vm1481_vm15 = vc.u32 %v1479_v42, %v1475_v15 }
  0xf2   : > { %v905_v18 = vsel %vm8152_vm14, 0, %v8151_v46  ;;  %v1482_v43 = vsel %vm1481_vm15, 1, %v9153_v3  ;;  %v1493_v47 = vmul.u32 %v1489_v58, %v1466_v1  ;;  %v1494_v55 = vmul.u32 %v1490_v39, %v1466_v1 }
  0xf3   : > { %v1868_v17 = vsel %vm1863_vm6, %v1727_v59, 0  ;;  %v906_v56 = vsub.s32 32, %v905_v18  ;;  %v907_v35 = vshll.u32 %v898_v23, %v905_v18  ;;  %v910_v5 = vsub.s32 4294967266, %v905_v18 }
  0xf4   : > { %1922 = vmatpush.bf16.msra.mxu1 %v1868_v17  ;;  %v1484_v51 = vadd.s32 %v1482_v43, %v1480_v61  ;;  %v1495_v40 = vshll.u32 %v1492_v48, 16  ;;  %v473_v0 = vmul.f32 %v9321_v28, %v465_v62  ;;  %v1452_v54 = vsel %vm1448_vm4, %v1432_v13, %v10067_v63 }
  0xf5   : > { %v908_v50 = vshrl.u32 %v890_v16, %v906_v56  ;;  %v911_v44 = vadd.s32 127, %v910_v5  ;;  %v1453_v52 = vsel %vm1451_vm3, %v10059_v32, 2102212464  ;;  %v1476_v21 = vshrl.u32 %v10103_v38, 16 }
  0xf6   : > { %v1497_v14 = vshll.u32 %v1493_v47, 16  ;;  %vm1499_vm1 = vc.u32 %v1491_v57, %v1495_v40  ;;  %v1501_v23 = vadd.s32 %v1495_v40, %v1491_v57  ;;  %v1485_v7 = vadd.s32 %v1484_v51, %v1474_v33 }
  0xf7   : > { %v909_v11 = vor.u32 %v908_v50, %v907_v35  ;;  %v912_v1 = vshll.u32 %v911_v44, 23  ;;  %v1500_v28 = vsel %vm1499_vm1, 1, %v9153_v3  ;;  %v1454_v20 = vsel %vm1450_vm5, %v10057_v45, %v1453_v52 }
  0xf8   : > { %v1496_v22 = vshrl.u32 %v1492_v48, 16  ;;  %v1502_v63 = vadd.s32 %v1500_v28, %v1494_v55  ;;  %vm1503_vm2 = vc.u32 %v1501_v23, %v1497_v14  ;;  %v477_v38 = vmul.f32 %v9323_v29, %v465_v62 }
  0xf9   : > { %v913_v58 = vor.u32 4788187, %v912_v1  ;;  %v916_v39 = vcvt.s32.f32 %v909_v11  ;;  %v1504_v32 = vsel %vm1503_vm2, 1, %v9153_v3  ;;  %v920_v60 = vsub.s32 4, %v10074_v53 }
  0xfa   : > { %v1498_v25 = vshrl.u32 %v1493_v47, 16  ;;  %v1506_v2 = vadd.s32 %v1504_v32, %v1502_v63  ;;  %v10135_v15 = vadd.f32 %v473_v0, %v9319_v27  ;;  %v1486_v16 = vadd.s32 %v1485_v7, %v1476_v21 }
  0xfb   : > { %v914_v37 = vand.u32 2147483647, %v913_v58  ;;  %v1505_v13 = vadd.s32 %v1501_v23, %v1497_v14  ;;  %v1455_v45 = vsel %vm1449_vm9, %v1452_v54, %v1454_v20  ;;  %vm798_vm0 = vcmp.lt.s32.totalorder %v9881_v9, 0 }
  0xfc   : > { %v1507_v26 = vadd.s32 %v1506_v2, %v1496_v22  ;;  %v954_v34 = vand.u32 2139095040, %v10135_v15  ;;  %v10141_v29 = vadd.f32 1.5707964, %v477_v38  ;;  %v921_v62 = vsel %vm798_vm0, %v920_v60, %v10074_v53 }
  0xfd   : > { %v917_v46 = vmul.f32 %v916_v39, %v914_v37  ;;  %v951_v27 = vand.u32 2147483647, %v10135_v15  ;;  %vm797_vm3 = vcmp.le.f32.partialorder %v796_v41, 0.7853982  ;;  %v1509_v31 = vmul.u32 %v10083_v19, %v1455_v45 }
  0xfe   : > { %v1508_v42 = vadd.s32 %v1507_v26, %v1498_v25  ;;  %v955_v59 = vshrl.u32 %v954_v34, 23  ;;  %vm1511_vm4 = vc.u32 %v1486_v16, %v1505_v13  ;;  %v923_v57 = vsel %vm797_vm3, 0, %v921_v62 }
  0xff   : > { %v918_v33 = vxor.u32 2147483648, %v917_v46  ;;  %v1574_v17 = vand.u32 2139095040, %v10141_v29  ;;  %v958_v43 = vand.u32 8388607, %v951_v27  ;;  %v940_v19 = vadd.s32 3, %v923_v57 }
 0x100   : > { %v1512_v49 = vadd.s32 1, %v1508_v42  ;;  %v8153_v48 = vadd.s32 4294967169, %v955_v59  ;;  %v1571_v50 = vand.u32 2147483647, %v10141_v29  ;;  %v1510_v7 = vadd.s32 %v1505_v13, %v1486_v16 }
 0x101   : > { %v919_v61 = vsel %vm798_vm0, %v918_v33, %v917_v46  ;;  %v959_v40 = vor.u32 8388608, %v958_v43  ;;  %v1575_v44 = vshrl.u32 %v1574_v17, 23  ;;  %v10157_v14 = vand.u32 3, %v940_v19 }
 0x102   : > { %v10150_v18 = vsel %vm797_vm3, %v9881_v9, %v919_v61  ;;  %v1513_v53 = vsel %vm1511_vm4, %v1512_v49, %v1508_v42  ;;  %v961_v47 = vadd.s32 1, %v8153_v48  ;;  %vm1418_vm7 = vcmp.lt.s32.totalorder %v9886_v36, 0 }
 0x103   : > { %v924_v41 = vmul.f32 %v10150_v18, %v10150_v18  ;;  %v1514_v56 = vadd.s32 %v1513_v53, %v1509_v31  ;;  %v10162_v22 = vshll.u32 %v959_v40, 8  ;;  %v8165_v63 = vadd.s32 4294967169, %v1575_v44 }
 0x104   : > { %vm962_vm5 = vcmp.gt.s32.totalorder %v961_v47, 0  ;;  %v10166_v58 = vand.u32 8388607, %v1571_v50  ;;  %vm10175_vm8 = vcmp.le.f32.partialorder %v1416_v30, 0.7853982  ;;  %vm946_vm11 = vcmp.eq.s32.totalorder %v10157_v14, 2 }
 0x105   : > { %v925_v35 = vmul.f32 -0.001358992, %v924_v41  ;;  %v932_v5 = vmul.f32 -0.00019511016, %v924_v41  ;;  %v1515_v51 = vadd.s32 536870912, %v1514_v56  ;;  %v963_v55 = vsel %vm962_vm5, %v961_v47, 0 }
 0x106   : > { %v965_v0 = vand.u32 31, %v963_v55  ;;  %v10160_v20 = vshrl.u32 %v963_v55, 5  ;;  %v10183_v42 = vand.u32 65535, %v10162_v22  ;;  %v1581_v59 = vadd.s32 1, %v8165_v63 }
 0x107   : > { %v926_v54 = vadd.f32 0.041655596, %v925_v35  ;;  %v933_v52 = vadd.f32 0.008332121, %v932_v5  ;;  %v1516_v21 = vshrl.u32 %v1515_v51, 30  ;;  %vm943_vm14 = vcmp.eq.s32.totalorder %v10157_v14, 0 }
 0x108   : > { %v966_v23 = vsub.s32 32, %v965_v0  ;;  %v968_v60 = vshll.u32 %v9155_v4, %v965_v0  ;;  %v971_v2 = vshll.u32 %v9156_v6, %v965_v0  ;;  %v974_v16 = vshll.u32 %v9157_v8, %v965_v0 }
 0x109   : > { %v927_v11 = vmul.f32 %v926_v54, %v924_v41  ;;  %v934_v1 = vmul.f32 %v933_v52, %v924_v41  ;;  %v1517_v28 = vshll.u32 %v1516_v21, 30  ;;  %v977_v46 = vshll.u32 %v9158_v10, %v965_v0 }
 0x10a   : > { %v969_v25 = vshrl.u32 %v9156_v6, %v966_v23  ;;  %v972_v37 = vshrl.u32 %v9157_v8, %v966_v23  ;;  %v975_v34 = vshrl.u32 %v9158_v10, %v966_v23  ;;  %v978_v62 = vshrl.u32 %v9159_v12, %v966_v23 }
 0x10b   : > { %v928_v39 = vadd.f32 -0.4999988, %v927_v11  ;;  %v935_v32 = vadd.f32 -0.16666654, %v934_v1  ;;  %v1518_v38 = vsub.s32 %v1514_v56, %v1517_v28  ;;  %v1540_v48 = vsub.s32 4, %v1516_v21 }
 0x10c   : > { %v979_v61 = vor.u32 %v978_v62, %v977_v46  ;;  %v980_v57 = vshll.u32 %v9159_v12, %v965_v0  ;;  %v981_v17 = vshrl.u32 %v9160_v24, %v966_v23  ;;  %v970_v53 = vor.u32 %v969_v25, %v968_v60 }
 0x10d   : > { %v936_v13 = vmul.f32 %v935_v32, %v924_v41  ;;  %vm1519_vm9 = vcmp.lt.s32.totalorder %v1518_v38, 0  ;;  %v1520_v26 = vsub.s32 0, %v1518_v38  ;;  %v929_v33 = vmul.f32 %v928_v39, %v924_v41 }
 0x10e   : > { %v973_v43 = vor.u32 %v972_v37, %v971_v2  ;;  %v976_v47 = vor.u32 %v975_v34, %v974_v16  ;;  %vm986_vm10 = vcmp.lt.s32.totalorder %v10160_v20, 4  ;;  %vm983_vm12 = vcmp.lt.s32.totalorder %v10160_v20, 1 }
 0x10f   : > { %v937_v31 = vadd.f32 1.0, %v936_v13  ;;  %v1521_v49 = vsel %vm1519_vm9, %v1520_v26, %v1518_v38  ;;  %vm985_vm13 = vcmp.lt.s32.totalorder %v10160_v20, 3  ;;  %v1001_v41 = vshrl.u32 %v10162_v22, 16 }
 0x110   : > { %v1522_v30 = vclz %v1521_v49  ;;  %v930_v19 = vadd.f32 1.0, %v929_v33  ;;  %v1541_v5 = vsel %vm1418_vm7, %v1540_v48, %v1516_v21  ;;  %v967_v51 = vshrl.u32 %v9155_v4, %v966_v23 }
 0x111   : > { %v938_v35 = vmul.f32 %v937_v31, %v10150_v18  ;;  %v982_v55 = vor.u32 %v981_v17, %v980_v57  ;;  %v992_v40 = vsel %vm986_vm10, %v979_v61, 920167782  ;;  %vm1582_vm1 = vcmp.gt.s32.totalorder %v1581_v59, 0 }
 0x112   : > { %v8163_v56 = vadd.s32 4294967294, %v1522_v30  ;;  %vm984_vm2 = vcmp.lt.s32.totalorder %v10160_v20, 2  ;;  %v991_v44 = vsel %vm983_vm12, %v970_v53, %v973_v43  ;;  %v993_v18 = vsel %vm985_vm13, %v976_v47, %v992_v40 }
 0x113   : > { %v1543_v23 = vsel %vm10175_vm8, 0, %v1541_v5  ;;  %v944_v11 = vxor.u32 2147483648, %v938_v35  ;;  %v947_v1 = vxor.u32 2147483648, %v930_v19  ;;  %v987_v28 = vsel %vm983_vm12, %v967_v51, %v970_v53 }
 0x114   : > { %vm8164_vm15 = vcmp.lt.s32.totalorder %v8163_v56, 0  ;;  %v988_v63 = vsel %vm986_vm10, %v976_v47, 2102212464  ;;  %v994_v60 = vsel %vm984_vm2, %v991_v44, %v993_v18  ;;  %v1560_v25 = vadd.s32 3, %v1543_v23 }
 0x115   : > { %v1525_v0 = vsel %vm8164_vm15, 0, %v8163_v56  ;;  %v996_v2 = vsel %vm986_vm10, %v982_v55, 1326507024  ;;  %v1024_v37 = vand.u32 65535, %v994_v60  ;;  %v1025_v16 = vshrl.u32 %v994_v60, 16 }
 0x116   : > { %v1526_v54 = vsub.s32 32, %v1525_v0  ;;  %v1527_v52 = vshll.u32 %v1518_v38, %v1525_v0  ;;  %v1530_v21 = vsub.s32 4294967266, %v1525_v0  ;;  %v995_v38 = vsel %vm983_vm12, %v973_v43, %v976_v47 }
 0x117   : > { %v989_v34 = vsel %vm985_vm13, %v973_v43, %v988_v63  ;;  %v1026_v62 = vmul.u32 %v1024_v37, %v10183_v42  ;;  %v1027_v33 = vmul.u32 %v1025_v16, %v10183_v42  ;;  %v1028_v31 = vmul.u32 %v1024_v37, %v1001_v41 }
 0x118   : > { %v1528_v39 = vshrl.u32 %v1510_v7, %v1526_v54  ;;  %v1531_v32 = vadd.s32 127, %v1530_v21  ;;  %v997_v7 = vsel %vm985_vm13, %v979_v61, %v996_v2  ;;  %v10226_v17 = vsel %vm946_vm11, %v947_v1, %v938_v35 }
 0x119   : > { %v998_v46 = vsel %vm984_vm2, %v995_v38, %v997_v7  ;;  %v10230_v53 = vsel %vm984_vm2, %v987_v28, %v989_v34  ;;  %v1030_v61 = vshll.u32 %v1027_v33, 16  ;;  %v1583_v43 = vsel %vm1582_vm1, %v1581_v59, 0 }
 0x11a   : > { %v1529_v13 = vor.u32 %v1528_v39, %v1527_v52  ;;  %v1532_v26 = vshll.u32 %v1531_v32, 23  ;;  %v1002_v30 = vand.u32 65535, %v998_v46  ;;  %v1003_v57 = vshrl.u32 %v998_v46, 16 }
 0x11b   : > { %v10235_v47 = vsel %vm943_vm14, %v930_v19, %v944_v11  ;;  %v10237_v5 = vand.u32 3, %v1560_v25  ;;  %v1032_v51 = vshll.u32 %v1028_v31, 16  ;;  %v1029_v0 = vmul.u32 %v1025_v16, %v1001_v41 }
 0x11c   : > { %v1533_v49 = vor.u32 4788187, %v1532_v26  ;;  %v1536_v48 = vcvt.s32.f32 %v1529_v13  ;;  %v1004_v55 = vmul.u32 %v1002_v30, %v10183_v42  ;;  %v1005_v35 = vmul.u32 %v1003_v57, %v10183_v42 }
 0x11d   : > { %v1006_v40 = vmul.u32 %v1002_v30, %v1001_v41  ;;  %vm1034_vm0 = vc.u32 %v1026_v62, %v1030_v61  ;;  %v1036_v44 = vadd.s32 %v1030_v61, %v1026_v62  ;;  %v1585_v18 = vand.u32 31, %v1583_v43 }
 0x11e   : > { %v1534_v56 = vand.u32 2147483647, %v1533_v49  ;;  %v1007_v54 = vmul.u32 %v1003_v57, %v1001_v41  ;;  %v1008_v59 = vshll.u32 %v1005_v35, 16  ;;  %v1031_v21 = vshrl.u32 %v1027_v33, 16 }
 0x11f   : > { %v1010_v52 = vshll.u32 %v1006_v40, 16  ;;  %v1033_v23 = vshrl.u32 %v1028_v31, 16  ;;  %v1035_v11 = vsel %vm1034_vm0, 1, %v9153_v3  ;;  %vm1038_vm3 = vc.u32 %v1036_v44, %v1032_v51 }
 0x120   : > { %v1537_v20 = vmul.f32 %v1536_v48, %v1534_v56  ;;  %vm1012_vm4 = vc.u32 %v1004_v55, %v1008_v59  ;;  %v1014_v1 = vadd.s32 %v1008_v59, %v1004_v55  ;;  %v1037_v28 = vadd.s32 %v1035_v11, %v1029_v0 }
 0x121   : > { %v1039_v42 = vsel %vm1038_vm3, 1, %v9153_v3  ;;  %v1009_v39 = vshrl.u32 %v1005_v35, 16  ;;  %v1013_v32 = vsel %vm1012_vm4, 1, %v9153_v3  ;;  %v10246_v41 = vsub.s32 32, %v1585_v18 }
 0x122   : > { %v1538_v19 = vxor.u32 2147483648, %v1537_v20  ;;  %v1015_v38 = vadd.s32 %v1013_v32, %v1007_v54  ;;  %vm1016_vm5 = vc.u32 %v1014_v1, %v1010_v52  ;;  %v1041_v25 = vadd.s32 %v1039_v42, %v1037_v28 }
 0x123   : > { %vm942_vm9 = vcmp.lt.s32.totalorder %v10157_v14, 2  ;;  %v1011_v37 = vshrl.u32 %v1006_v40, 16  ;;  %v1017_v16 = vsel %vm1016_vm5, 1, %v9153_v3  ;;  %v10257_v13 = vadd.s32 %v1036_v44, %v1032_v51 }
 0x124   : > { %v1539_v63 = vsel %vm1418_vm7, %v1538_v19, %v1537_v20  ;;  %v1019_v26 = vadd.s32 %v1017_v16, %v1015_v38  ;;  %v1042_v34 = vadd.s32 %v1041_v25, %v1031_v21  ;;  %v1588_v7 = vshll.u32 %v9155_v4, %v1585_v18 }
 0x125   : > { %v10251_v60 = vsel %vm10175_vm8, %v9886_v36, %v1539_v63  ;;  %v1589_v45 = vshrl.u32 %v9156_v6, %v10246_v41  ;;  %v1591_v33 = vshll.u32 %v9156_v6, %v1585_v18  ;;  %v1592_v31 = vshrl.u32 %v9157_v8, %v10246_v41 }
 0x126   : > { %v1544_v2 = vmul.f32 %v10251_v60, %v10251_v60  ;;  %v1020_v49 = vadd.s32 %v1019_v26, %v1009_v39  ;;  %v1043_v48 = vadd.s32 %v1042_v34, %v1033_v23  ;;  %v1594_v30 = vshll.u32 %v9157_v8, %v1585_v18 }
 0x127   : > { %v1595_v57 = vshrl.u32 %v9158_v10, %v10246_v41  ;;  %v1597_v51 = vshll.u32 %v9158_v10, %v1585_v18  ;;  %v1598_v55 = vshrl.u32 %v9159_v12, %v10246_v41  ;;  %v1044_v6 = vmul.u32 %v10162_v22, %v10230_v53 }
 0x128   : > { %v1545_v46 = vmul.f32 -0.001358992, %v1544_v2  ;;  %v1552_v62 = vmul.f32 -0.00019511016, %v1544_v2  ;;  %v10271_v35 = vadd.s32 %v1020_v49, %v1011_v37  ;;  %v1047_v40 = vadd.s32 1, %v1043_v48 }
 0x129   : > { %v10275_v0 = vshrl.u32 %v1583_v43, 5  ;;  %v1600_v44 = vshll.u32 %v9159_v12, %v1585_v18  ;;  %v1601_v54 = vshrl.u32 %v9160_v24, %v10246_v41  ;;  %vm939_vm7 = vweird.f32 %v9881_v9 }
 0x12a   : > { %v1546_v61 = vadd.f32 0.041655596, %v1545_v46  ;;  %v1553_v56 = vadd.f32 0.008332121, %v1552_v62  ;;  %vm1046_vm8 = vc.u32 %v10271_v35, %v10257_v13  ;;  %v10283_v10 = vor.u32 %v1589_v45, %v1588_v7 }
 0x12b   : > { %v10285_v59 = vor.u32 %v1592_v31, %v1591_v33  ;;  %v1599_v22 = vor.u32 %v1598_v55, %v1597_v51  ;;  %v1048_v52 = vsel %vm1046_vm8, %v1047_v40, %v1043_v48  ;;  %v10287_v21 = vor.u32 %v1595_v57, %v1594_v30 }
 0x12c   : > { %v1547_v20 = vmul.f32 %v1546_v61, %v1544_v2  ;;  %v1554_v8 = vmul.f32 %v1553_v56, %v1544_v2  ;;  %v1049_v19 = vadd.s32 %v1048_v52, %v1044_v6  ;;  %vm1603_vm10 = vcmp.lt.s32.totalorder %v10275_v0, 1 }
 0x12d   : > { %vm1605_vm11 = vcmp.lt.s32.totalorder %v10275_v0, 3  ;;  %vm1606_vm12 = vcmp.lt.s32.totalorder %v10275_v0, 4  ;;  %v1579_v18 = vor.u32 8388608, %v10166_v58  ;;  %v1602_v23 = vor.u32 %v1601_v54, %v1600_v44 }
 0x12e   : > { %v1548_v53 = vadd.f32 -0.4999988, %v1547_v20  ;;  %v1555_v43 = vadd.f32 -0.16666654, %v1554_v8  ;;  %v949_v11 = vsel %vm942_vm9, %v10235_v47, %v10226_v17  ;;  %v1050_v1 = vadd.s32 536870912, %v1049_v19 }
 0x12f   : > { %vm1604_vm13 = vcmp.lt.s32.totalorder %v10275_v0, 2  ;;  %v1612_v28 = vsel %vm1606_vm12, %v1599_v22, 920167782  ;;  %v1611_v39 = vsel %vm1603_vm10, %v10283_v10, %v10285_v59  ;;  %vm1562_vm14 = vcmp.lt.s32.totalorder %v10237_v5, 2 }
 0x130   : > { %v1549_v12 = vmul.f32 %v1548_v53, %v1544_v2  ;;  %v1556_v24 = vmul.f32 %v1555_v43, %v1544_v2  ;;  %v1613_v58 = vsel %vm1605_vm11, %v10287_v21, %v1612_v28  ;;  %vm1566_vm15 = vcmp.eq.s32.totalorder %v10237_v5, 2 }
 0x131   : > { %v10309_v14 = vshrl.u32 %v1050_v1, 30  ;;  %v1615_v17 = vsel %vm1603_vm10, %v10285_v59, %v10287_v21  ;;  %v1616_v38 = vsel %vm1606_vm12, %v1602_v23, 1326507024  ;;  %v10318_v25 = vshll.u32 %v1579_v18, 8 }
 0x132   : > { %v1550_v42 = vadd.f32 1.0, %v1549_v12  ;;  %v1557_v63 = vadd.f32 1.0, %v1556_v24  ;;  %vm1563_vm1 = vcmp.eq.s32.totalorder %v10237_v5, 0  ;;  %v1614_v37 = vsel %vm1604_vm13, %v1611_v39, %v1613_v58 }
 0x133   : > { %v1052_v2 = vshll.u32 %v10309_v14, 30  ;;  %v1617_v16 = vsel %vm1605_vm11, %v1599_v22, %v1616_v38  ;;  %v1620_v7 = vand.u32 65535, %v10318_v25  ;;  %vm1559_vm2 = vweird.f32 %v9886_v36 }
 0x134   : > { %v1558_v47 = vmul.f32 %v1557_v63, %v10251_v60  ;;  %v1567_v32 = vxor.u32 2147483648, %v1550_v42  ;;  %v1618_v60 = vsel %vm1604_vm13, %v1615_v17, %v1617_v16  ;;  %v1621_v46 = vshrl.u32 %v10318_v25, 16 }
 0x135   : > { %v1053_v45 = vsub.s32 %v1049_v19, %v1052_v2  ;;  %v1622_v62 = vand.u32 65535, %v1618_v60  ;;  %v950_v33 = vsel %vm939_vm7, nan, %v949_v11  ;;  %v1623_v49 = vshrl.u32 %v1618_v60, 16 }
 0x136   : > { %v1564_v26 = vxor.u32 2147483648, %v1558_v47  ;;  %v1568_v34 = vsel %vm1566_vm15, %v1567_v32, %v1558_v47  ;;  %v1645_v48 = vshrl.u32 %v1614_v37, 16  ;;  %v1644_v40 = vand.u32 65535, %v1614_v37 }
 0x137   : > { %vm1054_vm0 = vcmp.lt.s32.totalorder %v1053_v45, 0  ;;  %v1055_v57 = vsub.s32 0, %v1053_v45  ;;  %v1624_v56 = vmul.u32 %v1622_v62, %v1620_v7  ;;  %v1625_v51 = vmul.u32 %v1623_v49, %v1620_v7 }
 0x138   : > { %v1565_v31 = vsel %vm1563_vm1, %v1550_v42, %v1564_v26  ;;  %v1626_v55 = vmul.u32 %v1622_v62, %v1621_v46  ;;  %v1647_v20 = vmul.u32 %v1645_v48, %v1620_v7  ;;  %v1627_v44 = vmul.u32 %v1623_v49, %v1621_v46 }
 0x139   : > { %v1569_v30 = vsel %vm1562_vm14, %v1565_v31, %v1568_v34  ;;  %v1056_v6 = vsel %vm1054_vm0, %v1055_v57, %v1053_v45  ;;  %v1628_v9 = vshll.u32 %v1625_v51, 16  ;;  %v1646_v52 = vmul.u32 %v1644_v40, %v1620_v7 }
 0x13a   : > { %v1570_v61 = vsel %vm1559_vm2, nan, %v1569_v30  ;;  %v1057_v8 = vclz %v1056_v6  ;;  %v1630_v54 = vshll.u32 %v1626_v55, 16  ;;  %v1648_v19 = vmul.u32 %v1644_v40, %v1621_v46 }
 0x13b   : > { %v1728_v36 = vpack.c.bf16 %v1570_v61, %v950_v33  ;;  %vm1632_vm3 = vc.u32 %v1624_v56, %v1628_v9  ;;  %v1634_v5 = vadd.s32 %v1628_v9, %v1624_v56  ;;  %v1650_v12 = vshll.u32 %v1647_v20, 16 }
 0x13c   : > { %v8154_v53 = vadd.s32 4294967294, %v1057_v8  ;;  %v1633_v43 = vsel %vm1632_vm3, 1, %v9153_v3  ;;  %v1045_v24 = vadd.s32 %v10257_v13, %v10271_v35  ;;  %v1629_v11 = vshrl.u32 %v1625_v51, 16 }
 0x13d   : > { %v1871_v22 = vsel %vm1863_vm6, %v1728_v36, 0  ;;  %v1635_v18 = vadd.s32 %v1633_v43, %v1627_v44  ;;  %vm1636_vm5 = vc.u32 %v1634_v5, %v1630_v54  ;;  %v1649_v28 = vmul.u32 %v1645_v48, %v1621_v46 }
 0x13e   : > { %1961 = vmatpush.bf16.msra.mxu2 %v1871_v22  ;;  %vm8155_vm4 = vcmp.lt.s32.totalorder %v8154_v53, 0  ;;  %v1637_v1 = vsel %vm1636_vm5, 1, %v9153_v3  ;;  %v1652_v17 = vshll.u32 %v1648_v19, 16  ;;  %vm1654_vm9 = vc.u32 %v1646_v52, %v1650_v12 }
 0x13f   : > { %v1060_v23 = vsel %vm8155_vm4, 0, %v8154_v53  ;;  %v1639_v58 = vadd.s32 %v1637_v1, %v1635_v18  ;;  %v1587_v38 = vshrl.u32 %v9155_v4, %v10246_v41  ;;  %v1655_v13 = vsel %vm1654_vm9, 1, %v9153_v3 }
 0x140   : > { %v1061_v42 = vsub.s32 32, %v1060_v23  ;;  %v1062_v63 = vshll.u32 %v1053_v45, %v1060_v23  ;;  %v1065_v39 = vsub.s32 4294967266, %v1060_v23  ;;  %v1608_v35 = vsel %vm1606_vm12, %v10287_v21, 2102212464 }
 0x141   : > { %v1656_v2 = vadd.s32 %v1650_v12, %v1646_v52  ;;  %v1657_v37 = vadd.s32 %v1655_v13, %v1649_v28  ;;  %v1631_v34 = vshrl.u32 %v1626_v55, 16  ;;  %v1640_v60 = vadd.s32 %v1639_v58, %v1629_v11  ;;  %v4301_v13 = vld [vmem:[%s15737_s5 + $0x198] sm:$0xff] }
 0x142   : > { %v1063_v47 = vshrl.u32 %v1045_v24, %v1061_v42  ;;  %v1066_v32 = vadd.s32 127, %v1065_v39  ;;  %v1651_v7 = vshrl.u32 %v1647_v20, 16  ;;  %v1607_v46 = vsel %vm1603_vm10, %v1587_v38, %v10283_v10  ;;  %4589 = vperm.xlu2 %8987, %v4301_v13   ;;  %v4277_v13 = vld [vmem:[%s15737_s5 + $0xd8] sm:$0xff] }
 0x143   : > { %vm1658_vm7 = vc.u32 %v1656_v2, %v1652_v17  ;;  %v1609_v4 = vsel %vm1605_vm11, %v10285_v59, %v1608_v35  ;;  %v1653_v21 = vshrl.u32 %v1648_v19, 16  ;;  %v1641_v49 = vadd.s32 %v1640_v60, %v1631_v34  ;;  %v10379_v35 = vld [vmem:[%s15734_s2] sm:$0xff] }
 0x144   : > { %v1064_v16 = vor.u32 %v1063_v47, %v1062_v63  ;;  %v1067_v26 = vshll.u32 %v1066_v32, 23  ;;  %v1659_v41 = vsel %vm1658_vm7, 1, %v9153_v3  ;;  %v1660_v48 = vadd.s32 %v1656_v2, %v1652_v17  ;;  %v4282_v34 = vld [vmem:[%s15737_s5 + $0x100] sm:$0xff] }
 0x145   : > { %v1661_v62 = vadd.s32 %v1659_v41, %v1657_v37  ;;  %v1610_v30 = vsel %vm1604_vm13, %v1607_v46, %v1609_v4  ;;  %vm953_vm10 = vcmp.lt.s32.totalorder %v10135_v15, 0  ;;  %vm10359_vm11 = vcmp.le.f32.partialorder %v951_v27, 0.7853982  ;;  %4494 = vperm.xlu0 %8985, %v4282_v34   ;;  %v4298_v41 = vld [vmem:[%s15737_s5 + $0x180] sm:$0xff]  ;;  %v8844_v34 = vld [vmem:[%s15734_s2 + $0x18] sm:$0xff] }
 0x146   : > { %v1068_v45 = vor.u32 4788187, %v1067_v26  ;;  %v1071_v31 = vcvt.s32.f32 %v1064_v16  ;;  %v1664_v10 = vmul.u32 %v10318_v25, %v1610_v30  ;;  %vm1666_vm8 = vc.u32 %v1641_v49, %v1660_v48  ;;  %v4283_v26 = vld [vmem:[%s15737_s5 + $0x108] sm:$0xff] }
 0x147   : > { %v1662_v57 = vadd.s32 %v1661_v62, %v1651_v7  ;;  %v1665_v5 = vadd.s32 %v1660_v48, %v1641_v49  ;;  %v1075_v17 = vsub.s32 4, %v10309_v14  ;;  %vm1844_vm14 = vcmask 97280   ;;  %4499 = vperm.xlu1 %8986, %v4283_v26   ;;  %v4280_v48 = vld [vmem:[%s15737_s5 + $0xf0] sm:$0xff]  ;;  %v4299_v30 = vld [vmem:[%s15737_s5 + $0x188] sm:$0xff] }
 0x148   : > { %v1069_v33 = vand.u32 2147483647, %v1068_v45  ;;  %8192 = vmatmul.msk.bf16.vlgmr.msra.gmra.mxu0 %vm1844_vm14, %v10379_v35  ;;  %8198 = vmatmul.msk.bf16.vlgmr.msra.gmra.mxu1 %vm1844_vm14, %v10379_v35  ;;  %vm1573_vm15 = vcmp.lt.s32.totalorder %v10141_v29, 0  ;;  %vm10399_vm1 = vcmp.le.f32.partialorder %v1571_v50, 0.7853982  ;;  %vm1094_vm5 = vweird.f32 %v10135_v15  ;;  %v4275_v26 = vld [vmem:[%s15737_s5 + $0xc8] sm:$0xff] }
 0x149   : > { %v1663_v61 = vadd.s32 %v1662_v57, %v1653_v21  ;;  %v1076_v37 = vsel %vm953_vm10, %v1075_v17, %v10309_v14  ;;  %8204 = vmatmul.msk.bf16.vlgmr.msra.gmra.mxu2 %vm1844_vm14, %v10379_v35  ;;  %v4320_v14 = vld [vmem:[%s15737_s5 + $0x230] sm:$0xff] }
 0x14a   : > { %v1072_v56 = vmul.f32 %v1071_v31, %v1069_v33  ;;  %v1078_v46 = vsel %vm10359_vm11, 0, %v1076_v37  ;;  %4574 = vperm.xlu2 %8987, %v4298_v41   ;;  %v4292_v37 = vld [vmem:[%s15737_s5 + $0x150] sm:$0xff]  ;;  %v8845_v41 = vld [vmem:[%s15734_s2 + $0x20] sm:$0xff] }
 0x14b   : > { %v1667_v51 = vadd.s32 1, %v1663_v61  ;;  %v1095_v49 = vadd.s32 3, %v1078_v46  ;;  %v4321_v46 = vld [vmem:[%s15737_s5 + $0x238] sm:$0xff] }
 0x14c   : > { %v1073_v59 = vxor.u32 2147483648, %v1072_v56 }
 0x14d   : > { %v1668_v55 = vsel %vm1666_vm8, %v1667_v51, %v1663_v61  ;;  %4579 = vperm.xlu0 %8985, %v4299_v30   ;;  %vm1714_vm8 = vweird.f32 %v10141_v29  ;;  %v4311_v30 = vld [vmem:[%s15737_s5 + $0x1e8] sm:$0xff] }
 0x14e   : > { %v1669_v36 = vadd.s32 %v1668_v55, %v1664_v10  ;;  %v1074_v0 = vsel %vm953_vm10, %v1073_v59, %v1072_v56 }
 0x14f   : > { %v10368_v25 = vsel %vm10359_vm11, %v10135_v15, %v1074_v0  ;;  %4484 = vperm.xlu1 %8986, %v4280_v48   ;;  %v8846_v48 = vld [vmem:[%s15734_s2 + $0x28] sm:$0xff] }
 0x150   : > { %v1670_v3 = vadd.s32 536870912, %v1669_v36  ;;  %v1079_v44 = vmul.f32 %v10368_v25, %v10368_v25 }
 0x152   : > { %v1671_v40 = vshrl.u32 %v1670_v3, 30  ;;  %v1087_v22 = vmul.f32 -0.00019511016, %v1079_v44  ;;  %v1080_v19 = vmul.f32 -0.001358992, %v1079_v44 }
 0x154   : > { %v1672_v20 = vshll.u32 %v1671_v40, 30  ;;  %v1088_v43 = vadd.f32 0.008332121, %v1087_v22  ;;  %v1081_v28 = vadd.f32 0.041655596, %v1080_v19  ;;  %v1695_v16 = vsub.s32 4, %v1671_v40 }
 0x156   : > { %v1673_v8 = vsub.s32 %v1669_v36, %v1672_v20  ;;  %v1089_v1 = vmul.f32 %v1088_v43, %v1079_v44  ;;  %v1082_v32 = vmul.f32 %v1081_v28, %v1079_v44  ;;  %v1696_v21 = vsel %vm1573_vm15, %v1695_v16, %v1671_v40  ;;  %v4281_v40 = vld [vmem:[%s15737_s5 + $0xf8] sm:$0xff]  ;;  %v10426_v20 = vld [vmem:[%s15734_s2 + $0x8] sm:$0xff] }
 0x157   : > { %v1698_v57 = vsel %vm10399_vm1, 0, %v1696_v21  ;;  %v1096_v36 = vand.u32 3, %v1095_v49  ;;  %4489 = vperm.xlu2 %8987, %v4281_v40   ;;  %v4293_v16 = vld [vmem:[%s15737_s5 + $0x158] sm:$0xff]  ;;  %v4327_v40 = vld [vmem:[%s15737_s5 + $0x268] sm:$0xff] }
 0x158   : > { %vm1674_vm12 = vcmp.lt.s32.totalorder %v1673_v8, 0  ;;  %v1675_v9 = vsub.s32 0, %v1673_v8  ;;  %v1090_v47 = vadd.f32 -0.16666654, %v1089_v1  ;;  %v1083_v60 = vadd.f32 -0.4999988, %v1082_v32  ;;  %8193 = vmatmul.msk.bf16.gmra.mxu0 %vm1844_vm14, %v10426_v20  ;;  %8199 = vmatmul.msk.bf16.gmra.mxu1 %vm1844_vm14, %v10426_v20 }
 0x159   : > { %v1715_v3 = vadd.s32 3, %v1698_v57  ;;  %vm1098_vm2 = vcmp.eq.s32.totalorder %v1096_v36, 0  ;;  %vm1101_vm0 = vcmp.eq.s32.totalorder %v1096_v36, 2  ;;  %vm1097_vm3 = vcmp.lt.s32.totalorder %v1096_v36, 2  ;;  %8205 = vmatmul.msk.bf16.gmra.mxu2 %vm1844_vm14, %v10426_v20  ;;  %v8843_v32 = vld [vmem:[%s15734_s2 + $0x10] sm:$0xff]  ;;  %v4317_v21 = vld [vmem:[%s15737_s5 + $0x218] sm:$0xff] }
 0x15a   : > { %v1676_v27 = vsel %vm1674_vm12, %v1675_v9, %v1673_v8  ;;  %v1091_v7 = vmul.f32 %v1090_v47, %v1079_v44  ;;  %v1084_v50 = vmul.f32 %v1083_v60, %v1079_v44  ;;  %v4291_v60 = vld [vmem:[%s15737_s5 + $0x148] sm:$0xff]  ;;  %v4313_v49 = vld [vmem:[%s15737_s5 + $0x1f8] sm:$0xff]  ;;  %v4310_v57 = vld [vmem:[%s15737_s5 + $0x1e0] sm:$0xff] }
 0x15b   : > { %v1677_v54 = vclz %v1676_v27  ;;  %v1716_v27 = vand.u32 3, %v1715_v3  ;;  %v4328_v36 = vld [vmem:[%s15737_s5 + $0x270] sm:$0xff]  ;;  %v4326_v3 = vld [vmem:[%s15737_s5 + $0x260] sm:$0xff] }
 0x15c   : > { %v1092_v33 = vadd.f32 1.0, %v1091_v7  ;;  %v1085_v10 = vadd.f32 1.0, %v1084_v50  ;;  %v4290_v7 = vld [vmem:[%s15737_s5 + $0x140] sm:$0xff] }
 0x15d   : > { %v8166_v53 = vadd.s32 4294967294, %v1677_v54  ;;  %vm1721_vm4 = vcmp.eq.s32.totalorder %v1716_v27, 2  ;;  %vm1718_vm9 = vcmp.eq.s32.totalorder %v1716_v27, 0  ;;  %vm1717_vm7 = vcmp.lt.s32.totalorder %v1716_v27, 2  ;;  %v4314_v50 = vld [vmem:[%s15737_s5 + $0x200] sm:$0xff] }
 0x15e   : > { %v1093_v51 = vmul.f32 %v1092_v33, %v10368_v25  ;;  %v1102_v44 = vxor.u32 2147483648, %v1085_v10  ;;  %v4312_v33 = vld [vmem:[%s15737_s5 + $0x1f0] sm:$0xff] }
 0x15f   : > { %vm8167_vm13 = vcmp.lt.s32.totalorder %v8166_v53, 0 }
 0x160   : > { %v1680_v52 = vsel %vm8167_vm13, 0, %v8166_v53  ;;  %v4297_v53 = vld [vmem:[%s15737_s5 + $0x178] sm:$0xff] }
 0x161   : > { %v1681_v12 = vsub.s32 32, %v1680_v52  ;;  %v1682_v24 = vshll.u32 %v1673_v8, %v1680_v52  ;;  %v1685_v18 = vsub.s32 4294967266, %v1680_v52  ;;  %v1099_v8 = vxor.u32 2147483648, %v1093_v51  ;;  %4569 = vperm.xlu1 %8986, %v4297_v53   ;;  %v10598_v53 = vpop.permute.xlu0 %1806 }
 0x162   : > { %v1103_v52 = vsel %vm1101_vm0, %v1102_v44, %v1093_v51  ;;  %v4307_v51 = vld [vmem:[%s15737_s5 + $0x1c8] sm:$0xff] }
 0x163   : > { %v1683_v23 = vshrl.u32 %v1665_v5, %v1681_v12  ;;  %v1686_v11 = vadd.s32 127, %v1685_v18  ;;  %v4296_v5 = vld [vmem:[%s15737_s5 + $0x170] sm:$0xff]  ;;  %v1100_v43 = vsel %vm1098_vm2, %v1085_v10, %v1099_v8  ;;  %v4309_v10 = vld [vmem:[%s15737_s5 + $0x1d8] sm:$0xff]  ;;  %v4323_v44 = vld [vmem:[%s15737_s5 + $0x248] sm:$0xff] }
 0x164   : > { %4564 = vperm.xlu0 %8985, %v4296_v5   ;;  %v4325_v8 = vld [vmem:[%s15737_s5 + $0x258] sm:$0xff] }
 0x165   : > { %v1684_v42 = vor.u32 %v1683_v23, %v1682_v24  ;;  %v1687_v63 = vshll.u32 %v1686_v11, 23  ;;  %v4278_v23 = vld [vmem:[%s15737_s5 + $0xe0] sm:$0xff]  ;;  %v1104_v11 = vsel %vm1097_vm3, %v1100_v43, %v1103_v52 }
 0x166   : > { %4474 = vperm.xlu2 %8987, %v4278_v23  }
 0x167   : > { %v1688_v39 = vor.u32 4788187, %v1687_v63  ;;  %v1691_v58 = vcvt.s32.f32 %v1684_v42  ;;  %v4294_v42 = vld [vmem:[%s15737_s5 + $0x160] sm:$0xff]  ;;  %v4279_v63 = vld [vmem:[%s15737_s5 + $0xe8] sm:$0xff] }
 0x168   : > { %8194 = vmatmul.msk.bf16.gmra.mxu0 %vm1844_vm14, %v8843_v32  ;;  %8200 = vmatmul.msk.bf16.gmra.mxu1 %vm1844_vm14, %v8843_v32 }
 0x169   : > { %v1689_v38 = vand.u32 2147483647, %v1688_v39  ;;  %v1105_v39 = vsel %vm1094_vm5, nan, %v1104_v11  ;;  %4554 = vperm.xlu1 %8986, %v4294_v42   ;;  %8206 = vmatmul.msk.bf16.gmra.mxu2 %vm1844_vm14, %v8843_v32 }
 0x16b   : > { %v1692_v2 = vmul.f32 %v1691_v58, %v1689_v38 }
 0x16c   : > { %4479 = vperm.xlu0 %8985, %v4279_v63  }
 0x16d   : > { %v1693_v45 = vxor.u32 2147483648, %v1692_v2 }
 0x16f   : > { %v1694_v4 = vsel %vm1573_vm15, %v1693_v45, %v1692_v2  ;;  %v4276_v2 = vld [vmem:[%s15737_s5 + $0xd0] sm:$0xff]  ;;  %v4318_v45 = vld [vmem:[%s15737_s5 + $0x220] sm:$0xff] }
 0x170   : > { %v1697_v62 = vsel %vm10399_vm1, %v10141_v29, %v1694_v4  ;;  %v4295_v29 = vld [vmem:[%s15737_s5 + $0x168] sm:$0xff] }
 0x171   : > { %v1699_v31 = vmul.f32 %v1697_v62, %v1697_v62  ;;  %4559 = vperm.xlu2 %8987, %v4295_v29   ;;  %4469 = vperm.xlu1 %8986, %v4277_v13   ;;  %v4319_v4 = vld [vmem:[%s15737_s5 + $0x228] sm:$0xff] }
 0x173   : > { %v1700_v61 = vmul.f32 -0.001358992, %v1699_v31  ;;  %v1707_v56 = vmul.f32 -0.00019511016, %v1699_v31 }
 0x174   : > { %4464 = vperm.xlu0 %8985, %v4276_v2  }
 0x175   : > { %v1701_v55 = vadd.f32 0.041655596, %v1700_v61  ;;  %v1708_v59 = vadd.f32 0.008332121, %v1707_v56  ;;  %v4308_v61 = vld [vmem:[%s15737_s5 + $0x1d0] sm:$0xff]  ;;  %v4306_v56 = vld [vmem:[%s15737_s5 + $0x1c0] sm:$0xff] }
 0x177   : > { %v1702_v6 = vmul.f32 %v1701_v55, %v1699_v31  ;;  %v1709_v0 = vmul.f32 %v1708_v59, %v1699_v31  ;;  %v10557_v55 = vpop.permute.xlu1 %1796  ;;  %v4329_v59 = vld [vmem:[%s15737_s5 + $0x278] sm:$0xff] }
 0x178   : > { %8195 = vmatmul.msk.bf16.gmra.mxu0 %vm1844_vm14, %v8844_v34  ;;  %8201 = vmatmul.msk.bf16.gmra.mxu1 %vm1844_vm14, %v8844_v34 }
 0x179   : > { %v1703_v25 = vadd.f32 -0.4999988, %v1702_v6  ;;  %v1710_v9 = vadd.f32 -0.16666654, %v1709_v0  ;;  %4544 = vperm.xlu2 %8987, %v4292_v37   ;;  %8207 = vmatmul.msk.bf16.gmra.mxu2 %vm1844_vm14, %v8844_v34  ;;  %v10569_v6 = vpop.permute.xlu2 %1786  ;;  %v4324_v0 = vld [vmem:[%s15737_s5 + $0x250] sm:$0xff] }
 0x17b   : > { %v1704_v54 = vmul.f32 %v1703_v25, %v1699_v31  ;;  %v1711_v22 = vmul.f32 %v1710_v9, %v1699_v31  ;;  %v4315_v31 = vld [vmem:[%s15737_s5 + $0x208] sm:$0xff]  ;;  %v4322_v25 = vld [vmem:[%s15737_s5 + $0x240] sm:$0xff] }
 0x17c   : > { %4549 = vperm.xlu0 %8985, %v4293_v16  }
 0x17d   : > { %v1705_v19 = vadd.f32 1.0, %v1704_v54  ;;  %v1712_v12 = vadd.f32 1.0, %v1711_v22  ;;  %v4330_v54 = vld [vmem:[%s15737_s5 + $0x280] sm:$0xff] }
 0x17f   : > { %v1713_v24 = vmul.f32 %v1712_v12, %v1697_v62  ;;  %v1722_v18 = vxor.u32 2147483648, %v1705_v19  ;;  %v4316_v62 = vld [vmem:[%s15737_s5 + $0x210] sm:$0xff] }
 0x181   : > { %v1719_v1 = vxor.u32 2147483648, %v1713_v24  ;;  %v1723_v28 = vsel %vm1721_vm4, %v1722_v18, %v1713_v24  ;;  %4459 = vperm.xlu2 %8987, %v4275_v26   ;;  %v10588_v9 = vpop.permute.xlu2 %1791 }
 0x183   : > { %v1720_v58 = vsel %vm1718_vm9, %v1705_v19, %v1719_v1 }
 0x184   : > { %v1724_v17 = vsel %vm1717_vm7, %v1720_v58, %v1723_v28  ;;  %4534 = vperm.xlu0 %8985, %v4290_v7   ;;  %v10620_v28 = vpop.permute.xlu0 %1811 }
 0x185   : > { %v1725_v15 = vsel %vm1714_vm8, nan, %v1724_v17 }
 0x186   : > { %v1729_v47 = vpack.c.bf16 %v1725_v15, %v1105_v39 }
 0x188   : > { %v1874_v38 = vsel %vm1863_vm6, %v1729_v47, 0  ;;  %8196 = vmatmul.msk.bf16.gmra.mxu0 %vm1844_vm14, %v8845_v41  ;;  %8202 = vmatmul.msk.bf16.gmra.mxu1 %vm1844_vm14, %v8845_v41 }
 0x189   : > { %2000 = vmatpush.bf16.msra.mxu3 %v1874_v38  ;;  %4684 = vperm.xlu2 %8987, %v4320_v14   ;;  %v10596_v22 = vpop.permute.xlu2 %1766 }
 0x18a   : > { %8208 = vmatmul.msk.bf16.gmra.mxu2 %vm1844_vm14, %v8845_v41 }
 0x18c   : > { %8210 = vmatmul.msk.bf16.vlgmr.msra.gmra.mxu3 %vm1844_vm14, %v10379_v35  ;;  %v4274_v35 = vld [vmem:[%s15737_s5 + $0xc0] sm:$0xff]  ;;  %4689 = vperm.xlu0 %8985, %v4321_v46   ;;  %v10652_v7 = vpop.permute.xlu0 %1776 }
 0x18d   : > { %4454 = vperm.xlu1 %8986, %v4274_v35  }
 0x191   : > { %4679 = vperm.xlu2 %8987, %v4319_v4   ;;  %v10618_v1 = vpop.permute.xlu2 %1761 }
 0x194   : > { %4664 = vperm.xlu0 %8985, %v4316_v62  }
 0x195   : > { %4539 = vperm.xlu1 %8986, %v4291_v60  }
 0x198   : > { %8197 = vmatmul.msk.bf16.gmra.mxu0 %vm1844_vm14, %v8846_v48  ;;  %8203 = vmatmul.msk.bf16.gmra.mxu1 %vm1844_vm14, %v8846_v48 }
 0x199   : > { %4654 = vperm.xlu2 %8987, %v4314_v50  }
 0x19a   : > { %8209 = vmatmul.msk.bf16.gmra.mxu2 %vm1844_vm14, %v8846_v48 }
 0x19c   : > { %8211 = vmatmul.msk.bf16.gmra.mxu3 %vm1844_vm14, %v10426_v20  ;;  %4659 = vperm.xlu0 %8985, %v4315_v31   ;;  %v10577_v20 = vpop.permute.xlu1 %1801 }
 0x19d   : > { %4674 = vperm.xlu1 %8986, %v4318_v45  }
 0x1a1   : > { %4649 = vperm.xlu2 %8987, %v4313_v49  }
 0x1a4   : > { %4634 = vperm.xlu0 %8985, %v4310_v57   ;;  %v10591_v27 = vpop.permute.xlu1 %1781 }
 0x1a5   : > { %4669 = vperm.xlu1 %8986, %v4317_v21  }
 0x1a9   : > { %4624 = vperm.xlu2 %8987, %v4308_v61  }
 0x1ac   : > { %8212 = vmatmul.msk.bf16.gmra.mxu3 %vm1844_vm14, %v8843_v32  ;;  %4629 = vperm.xlu0 %8985, %v4309_v10   ;;  %v10600_v5 = vpop.permute.xlu1 %1756 }
 0x1ad   : > { %4644 = vperm.xlu1 %8986, %v4312_v33  }
 0x1b1   : > { %4619 = vperm.xlu2 %8987, %v4307_v51  }
 0x1b4   : > { %4724 = vperm.xlu0 %8985, %v4328_v36  }
 0x1b5   : > { %4639 = vperm.xlu1 %8986, %v4311_v30  }
 0x1b9   : > { %4714 = vperm.xlu2 %8987, %v4326_v3  }
 0x1bc   : > { %8213 = vmatmul.msk.bf16.gmra.mxu3 %vm1844_vm14, %v8844_v34  ;;  %4719 = vperm.xlu0 %8985, %v4327_v40  }
 0x1bd   : > { %4614 = vperm.xlu1 %8986, %v4306_v56  }
 0x1c1   : > { %4709 = vperm.xlu2 %8987, %v4325_v8  }
 0x1c4   : > { %4694 = vperm.xlu0 %8985, %v4322_v25  }
 0x1c5   : > { %4729 = vperm.xlu1 %8986, %v4329_v59   ;;  %v1885_v43 = vpop.f32.mrf.mxu0  ;;  %v1924_v52 = vpop.f32.mrf.mxu1 }
 0x1c6   : > { %v10603_v19 = vadd.f32 %v1885_v43, %v10600_v5  ;;  %v10606_v12 = vadd.f32 %v1924_v52, %v10600_v5 }
 0x1c8   : > { %v10609_v24 = vmul.f32 0.70710677, %v10603_v19  ;;  %v10612_v18 = vmul.f32 0.70710677, %v10606_v12 }
 0x1c9   : > { %4734 = vperm.xlu2 %8987, %v4330_v54  }
 0x1ca   : > { %v2128_v23 = vmul.f32 %v10609_v24, %v10609_v24  ;;  %v2168_v11 = vmul.f32 %v10612_v18, %v10612_v18 }
 0x1cc   : > { %8214 = vmatmul.msk.bf16.gmra.mxu3 %vm1844_vm14, %v8845_v41  ;;  %v1963_v42 = vpop.f32.mrf.mxu2  ;;  %v10625_v17 = vmin.f32 %v2128_v23, 16.0  ;;  %v10627_v15 = vmin.f32 %v2168_v11, 16.0 }
 0x1cd   : > { %4704 = vperm.xlu1 %8986, %v4324_v0   ;;  %v10623_v63 = vadd.f32 %v1963_v42, %v10600_v5  ;;  %v1887_v39 = vpop.f32.mrf.mxu0  ;;  %v1926_v58 = vpop.f32.mrf.mxu1 }
 0x1ce   : > { %15940 = vst [vmem:[#allocation7_spill] sm:$0xff] %v10625_v17  ;;  %v10630_v47 = vadd.f32 %v1887_v39, %v10618_v1  ;;  %v10633_v29 = vadd.f32 %v1926_v58, %v10618_v1  ;;  %v2130_v2 = vmul.f32 2.1237322e-06, %v10625_v17  ;;  %v2170_v37 = vmul.f32 2.1237322e-06, %v10627_v15 }
 0x1cf   : > { %15939 = vst [vmem:[#allocation6_spill] sm:$0xff] %v10623_v63  ;;  %v10639_v38 = vmul.f32 0.70710677, %v10623_v63 }
 0x1d0   : > { %15941 = vst [vmem:[#allocation8_spill] sm:$0xff] %v10627_v15  ;;  %v10636_v32 = vmul.f32 0.70710677, %v10630_v47  ;;  %v10642_v13 = vmul.f32 0.70710677, %v10633_v29 }
 0x1d1   : > { %15942 = vst [vmem:[#allocation9_spill] sm:$0xff] %v10639_v38  ;;  %v2208_v26 = vmul.f32 %v10639_v38, %v10639_v38  ;;  %v2131_v14 = vadd.f32 0.00028619796, %v2130_v2  ;;  %v2171_v45 = vadd.f32 0.00028619796, %v2170_v37 }
 0x1d2   : > { %v2288_v35 = vmul.f32 %v10636_v32, %v10636_v32  ;;  %v2328_v16 = vmul.f32 %v10642_v13, %v10642_v13 }
 0x1d3   : > { %v10667_v33 = vmin.f32 %v2208_v26, 16.0  ;;  %v2132_v31 = vmul.f32 %v2131_v14, %v10625_v17  ;;  %v2172_v49 = vmul.f32 %v2171_v45, %v10627_v15 }
 0x1d4   : > { %v10657_v4 = vmin.f32 %v2288_v35, 16.0  ;;  %v10662_v21 = vmin.f32 %v2328_v16, 16.0  ;;  %v1965_v62 = vpop.f32.mrf.mxu2 }
 0x1d5   : > { %4699 = vperm.xlu1 %8986, %v4323_v44   ;;  %v1890_v34 = vpop.f32.mrf.mxu0  ;;  %v1929_v60 = vpop.f32.mrf.mxu1  ;;  %15945 = vst [vmem:[#allocation12_spill] sm:$0xff] %v10667_v33  ;;  %v2210_v30 = vmul.f32 2.1237322e-06, %v10667_v33  ;;  %v2133_v59 = vadd.f32 0.0036580483, %v2132_v31 }
 0x1d6   : > { %v10655_v46 = vadd.f32 %v1890_v34, %v10596_v22  ;;  %15943 = vst [vmem:[#allocation10_spill] sm:$0xff] %v10657_v4  ;;  %v10660_v41 = vadd.f32 %v1929_v60, %v10596_v22  ;;  %v2290_v57 = vmul.f32 2.1237322e-06, %v10657_v4  ;;  %v2330_v56 = vmul.f32 2.1237322e-06, %v10662_v21  ;;  %v10685_v44 = vpop.permute.xlu0 %1771 }
 0x1d7   : > { %15944 = vst [vmem:[#allocation11_spill] sm:$0xff] %v10662_v21  ;;  %v2173_v36 = vadd.f32 0.0036580483, %v2172_v49  ;;  %v2211_v0 = vadd.f32 0.00028619796, %v2210_v30  ;;  %v2134_v52 = vmul.f32 %v2133_v59, %v10625_v17  ;;  %v10707_v30 = vadd.f32 %v1965_v62, %v10618_v1 }
 0x1d8   : > { %v10665_v50 = vmul.f32 0.70710677, %v10655_v46  ;;  %v10676_v61 = vmul.f32 0.70710677, %v10660_v41  ;;  %v2291_v40 = vadd.f32 0.00028619796, %v2290_v57 }
 0x1d9   : > { %v2331_v25 = vadd.f32 0.00028619796, %v2330_v56  ;;  %v2174_v42 = vmul.f32 %v2173_v36, %v10627_v15  ;;  %v2212_v39 = vmul.f32 %v2211_v0, %v10667_v33  ;;  %v2135_v34 = vadd.f32 0.05243302, %v2134_v52  ;;  %15948 = vst [vmem:[#allocation15_spill] sm:$0xff] %v10707_v30 }
 0x1da   : > { %v2488_v51 = vmul.f32 %v10676_v61, %v10676_v61  ;;  %v2292_v58 = vmul.f32 %v2291_v40, %v10657_v4  ;;  %v10725_v52 = vmul.f32 0.70710677, %v10707_v30 }
 0x1db   : > { %v2332_v37 = vmul.f32 %v2331_v25, %v10662_v21  ;;  %v2175_v45 = vadd.f32 0.05243302, %v2174_v42  ;;  %v2213_v31 = vadd.f32 0.0036580483, %v2212_v39  ;;  %v2136_v59 = vmul.f32 %v2135_v34, %v10625_v17 }
 0x1dc   : > { %8215 = vmatmul.msk.bf16.gmra.mxu3 %vm1844_vm14, %v8846_v48  ;;  %v2448_v48 = vmul.f32 %v10665_v50, %v10665_v50  ;;  %v10683_v8 = vmin.f32 %v2488_v51, 16.0  ;;  %v1968_v11 = vpop.f32.mrf.mxu2  ;;  %v2293_v49 = vadd.f32 0.0036580483, %v2292_v58  ;;  %15949 = vst [vmem:[#allocation16_spill] sm:$0xff] %v10725_v52 }
 0x1dd   : > { %v1892_v3 = vpop.f32.mrf.mxu0  ;;  %v1931_v2 = vpop.f32.mrf.mxu1  ;;  %v10701_v60 = vadd.f32 %v1968_v11, %v10596_v22  ;;  %v2176_v40 = vmul.f32 %v2175_v45, %v10627_v15  ;;  %v2214_v62 = vmul.f32 %v2213_v31, %v10667_v33 }
 0x1de   : > { %v10679_v10 = vmin.f32 %v2448_v48, 16.0  ;;  %15947 = vst [vmem:[#allocation14_spill] sm:$0xff] %v10683_v8  ;;  %v10689_v43 = vadd.f32 %v1892_v3, %v10685_v44  ;;  %v2490_v23 = vmul.f32 2.1237322e-06, %v10683_v8  ;;  %v10704_v14 = vadd.f32 %v1931_v2, %v10685_v44 }
 0x1df   : > { %v2333_v48 = vadd.f32 0.0036580483, %v2332_v37  ;;  %v10715_v3 = vmul.f32 0.70710677, %v10701_v60  ;;  %v2294_v25 = vmul.f32 %v2293_v49, %v10657_v4  ;;  %v2137_v2 = vadd.f32 0.18741608, %v2136_v59 }
 0x1e0   : > { %15946 = vst [vmem:[#allocation13_spill] sm:$0xff] %v10679_v10  ;;  %v2450_v54 = vmul.f32 2.1237322e-06, %v10679_v10  ;;  %v2491_v16 = vadd.f32 0.00028619796, %v2490_v23 }
 0x1e1   : > { %v10698_v26 = vmul.f32 0.70710677, %v10689_v43  ;;  %v10718_v0 = vmul.f32 0.70710677, %v10704_v14  ;;  %v2528_v37 = vmul.f32 %v10715_v3, %v10715_v3  ;;  %v2215_v34 = vadd.f32 0.05243302, %v2214_v62 }
 0x1e2   : > { %v2451_v35 = vadd.f32 0.00028619796, %v2450_v54  ;;  %v2492_v56 = vmul.f32 %v2491_v16, %v10683_v8  ;;  %v2334_v54 = vmul.f32 %v2333_v48, %v10662_v21  ;;  %v2177_v16 = vadd.f32 0.18741608, %v2176_v40 }
 0x1e3   : > { %v2608_v51 = vmul.f32 %v10698_v26, %v10698_v26  ;;  %v2295_v45 = vadd.f32 0.05243302, %v2294_v25  ;;  %v2368_v48 = vmul.f32 %v10725_v52, %v10725_v52  ;;  %v10748_v40 = vmul.f32 0.5, %v10603_v19 }
 0x1e4   : > { %v2452_v57 = vmul.f32 %v2451_v35, %v10679_v10  ;;  %v1970_v23 = vpop.f32.mrf.mxu2  ;;  %v2493_v42 = vadd.f32 0.0036580483, %v2492_v56  ;;  %v2648_v35 = vmul.f32 %v10718_v0, %v10718_v0  ;;  %v2335_v49 = vadd.f32 0.05243302, %v2334_v54 }
 0x1e5   : > { %v10727_v39 = vmin.f32 %v2608_v51, 16.0  ;;  %v10730_v58 = vadd.f32 %v1970_v23, %v10685_v44  ;;  %15952 = vst [vmem:[#allocation19_spill] sm:$0xff] %v10748_v40  ;;  %v10751_v62 = vmul.f32 0.5, %v10606_v12  ;;  %v2138_v54 = vmul.f32 %v2137_v2, %v10625_v17 }
 0x1e6   : > { %v2453_v11 = vadd.f32 0.0036580483, %v2452_v57  ;;  %v2494_v56 = vmul.f32 %v2493_v42, %v10683_v8  ;;  %v10755_v25 = vmin.f32 %v2648_v35, 16.0  ;;  %v2178_v23 = vmul.f32 %v2177_v16, %v10627_v15 }
 0x1e7   : > { %15950 = vst [vmem:[#allocation17_spill] sm:$0xff] %v10727_v39  ;;  %v2610_v51 = vmul.f32 2.1237322e-06, %v10727_v39  ;;  %v10745_v59 = vmul.f32 0.70710677, %v10730_v58  ;;  %v2296_v42 = vmul.f32 %v2295_v45, %v10657_v4  ;;  %v2336_v19 = vmul.f32 %v2335_v49, %v10662_v21 }
 0x1e8   : > { %v2454_v57 = vmul.f32 %v2453_v11, %v10679_v10  ;;  %15953 = vst [vmem:[#allocation20_spill] sm:$0xff] %v10751_v62  ;;  %v2216_v11 = vmul.f32 %v2215_v34, %v10667_v33  ;;  %v10765_v12 = vmin.f32 %v2368_v48, 16.0  ;;  %v2495_v35 = vadd.f32 0.05243302, %v2494_v56 }
 0x1e9   : > { %15955 = vst [vmem:[#allocation22_spill] sm:$0xff] %v10755_v25  ;;  %v2611_v52 = vadd.f32 0.00028619796, %v2610_v51  ;;  %v2688_v2 = vmul.f32 %v10745_v59, %v10745_v59  ;;  %v10771_v16 = vmul.f32 0.5, %v10630_v47  ;;  %v10774_v34 = vmul.f32 0.5, %v10633_v29 }
 0x1ea   : > { %15957 = vst [vmem:[#allocation24_spill] sm:$0xff] %v10765_v12  ;;  %v2455_v63 = vadd.f32 0.05243302, %v2454_v57  ;;  %v2370_v45 = vmul.f32 2.1237322e-06, %v10765_v12  ;;  %v2496_v47 = vmul.f32 %v2495_v35, %v10683_v8  ;;  %v10786_v15 = vmul.f32 0.5, %v10655_v46 }
 0x1eb   : > { %15958 = vst [vmem:[#allocation25_spill] sm:$0xff] %v10771_v16  ;;  %v2650_v49 = vmul.f32 2.1237322e-06, %v10755_v25  ;;  %v2139_v48 = vadd.f32 1.1283791, %v2138_v54  ;;  %v2612_v29 = vmul.f32 %v2611_v52, %v10727_v39  ;;  %v10789_v54 = vmul.f32 0.5, %v10660_v41 }
 0x1ec   : > { %15959 = vst [vmem:[#allocation26_spill] sm:$0xff] %v10774_v34  ;;  %v2217_v38 = vadd.f32 0.18741608, %v2216_v11  ;;  %v2297_v56 = vadd.f32 0.18741608, %v2296_v42  ;;  %v2456_v40 = vmul.f32 %v2455_v63, %v10679_v10  ;;  %v10783_v34 = vmin.f32 %v2688_v2, 16.0 }
 0x1ed   : > { %v2337_v51 = vadd.f32 0.18741608, %v2336_v19  ;;  %v2371_v16 = vadd.f32 0.00028619796, %v2370_v45  ;;  %15961 = vst [vmem:[#allocation28_spill] sm:$0xff] %v10786_v15  ;;  %v10792_v42 = vmul.f32 %v2139_v48, %v10609_v24 }
 0x1ee   : > { %15960 = vst [vmem:[#allocation27_spill] sm:$0xff] %v10783_v34  ;;  %v2651_v11 = vadd.f32 0.00028619796, %v2650_v49  ;;  %v2218_v63 = vmul.f32 %v2217_v38, %v10667_v33  ;;  %v2690_v52 = vmul.f32 2.1237322e-06, %v10783_v34  ;;  %v2298_v41 = vmul.f32 %v2297_v56, %v10657_v4 }
 0x1ef   : > { %15962 = vst [vmem:[#allocation29_spill] sm:$0xff] %v10789_v54  ;;  %v2338_v2 = vmul.f32 %v2337_v51, %v10662_v21  ;;  %v2457_v24 = vadd.f32 0.18741608, %v2456_v40  ;;  %v2497_v45 = vadd.f32 0.18741608, %v2496_v47  ;;  %v10816_v56 = vmul.f32 0.5, %v10689_v43 }
 0x1f0   : > { %15963 = vst [vmem:[#allocation30_spill] sm:$0xff] %v10792_v42  ;;  %v2613_v49 = vadd.f32 0.0036580483, %v2612_v29  ;;  %v2691_v40 = vadd.f32 0.00028619796, %v2690_v52 }
 0x1f1   : > { %15969 = vst [vmem:[#allocation36_spill] sm:$0xff] %v10816_v56  ;;  %v2299_v51 = vadd.f32 1.1283791, %v2298_v41  ;;  %v2498_v52 = vmul.f32 %v2497_v45, %v10683_v8  ;;  %v10846_v45 = vmul.f32 0.5, %v10701_v60 }
 0x1f3   : > { %15976 = vst [vmem:[#allocation43_spill] sm:$0xff] %v10846_v45  ;;  %v10877_v45 = vmul.f32 0.5, %v10730_v58 }
 0x1f5   : > { %15980 = vst [vmem:[#allocation47_spill] sm:$0xff] %v10877_v45 }
 0x20f   : > { %v2002_v36 = vpop.f32.mrf.mxu3 }
 0x210   : > { %v10737_v31 = vadd.f32 %v2002_v36, %v10600_v5  ;;  %v10753_v36 = vmin.f32 %v2528_v37, 16.0 }
 0x212   : > { %15951 = vst [vmem:[#allocation18_spill] sm:$0xff] %v10737_v31  ;;  %v10762_v30 = vmul.f32 0.70710677, %v10737_v31  ;;  %v2530_v37 = vmul.f32 2.1237322e-06, %v10753_v36 }
 0x213   : > { %15954 = vst [vmem:[#allocation21_spill] sm:$0xff] %v10753_v36  ;;  %v2179_v31 = vadd.f32 1.1283791, %v2178_v23 }
 0x214   : > { %15956 = vst [vmem:[#allocation23_spill] sm:$0xff] %v10762_v30  ;;  %v2248_v57 = vmul.f32 %v10762_v30, %v10762_v30  ;;  %v2531_v62 = vadd.f32 0.00028619796, %v2530_v37  ;;  %v2614_v30 = vmul.f32 %v2613_v49, %v10727_v39 }
 0x215   : > { %v10800_v37 = vmul.f32 %v2179_v31, %v10612_v18  ;;  %v2652_v18 = vmul.f32 %v2651_v11, %v10755_v25  ;;  %v1895_v31 = vpop.f32.mrf.mxu0  ;;  %v2339_v11 = vadd.f32 1.1283791, %v2338_v2 }
 0x216   : > { %v10802_v46 = vmin.f32 %v2248_v57, 16.0  ;;  %v2532_v35 = vmul.f32 %v2531_v62, %v10753_v36  ;;  %v10813_v57 = vadd.f32 1.1283791, %v2218_v63  ;;  %v10819_v62 = vmul.f32 0.5, %v10704_v14 }
 0x217   : > { %v2004_v5 = vpop.f32.mrf.mxu3  ;;  %15965 = vst [vmem:[#allocation32_spill] sm:$0xff] %v10800_v37  ;;  %v2458_v63 = vmul.f32 %v2457_v24, %v10679_v10  ;;  %v1896_v43 = vadd.f32 %v1895_v31, %v10652_v7  ;;  %v2653_v41 = vadd.f32 0.0036580483, %v2652_v18  ;;  %v10840_v24 = vmul.f32 %v2299_v51, %v10636_v32 }
 0x218   : > { %15966 = vst [vmem:[#allocation33_spill] sm:$0xff] %v10802_v46  ;;  %v2250_v38 = vmul.f32 2.1237322e-06, %v10802_v46  ;;  %v10822_v47 = vadd.f32 %v2004_v5, %v10618_v1  ;;  %v2692_v5 = vmul.f32 %v2691_v40, %v10783_v34  ;;  %v2499_v40 = vadd.f32 1.1283791, %v2498_v52 }
 0x219   : > { %15968 = vst [vmem:[#allocation35_spill] sm:$0xff] %v10813_v57  ;;  %v2459_v18 = vadd.f32 1.1283791, %v2458_v63  ;;  %v2654_v32 = vmul.f32 %v2653_v41, %v10755_v25  ;;  %v10855_v51 = vmul.f32 0.70710677, %v1896_v43 }
 0x21a   : > { %15970 = vst [vmem:[#allocation37_spill] sm:$0xff] %v10819_v62  ;;  %v2251_v57 = vadd.f32 0.00028619796, %v2250_v38  ;;  %v10843_v49 = vmul.f32 0.70710677, %v10822_v47 }
 0x21b   : > { %15971 = vst [vmem:[#allocation38_spill] sm:$0xff] %v10822_v47  ;;  %v2768_v63 = vmul.f32 %v10855_v51, %v10855_v51  ;;  %v10910_v21 = vmul.f32 %v2459_v18, %v10665_v50 }
 0x21c   : > { %15974 = vst [vmem:[#allocation41_spill] sm:$0xff] %v10840_v24  ;;  %v2252_v31 = vmul.f32 %v2251_v57, %v10802_v46  ;;  %v10866_v57 = vmul.f32 0.5, %v1896_v43 }
 0x21d   : > { %15975 = vst [vmem:[#allocation42_spill] sm:$0xff] %v10843_v49 }
 0x21e   : > { %15979 = vst [vmem:[#allocation46_spill] sm:$0xff] %v10866_v57  ;;  %v2253_v47 = vadd.f32 0.0036580483, %v2252_v31 }
 0x21f   : > { %v2007_v23 = vpop.f32.mrf.mxu3  ;;  %15986 = vst [vmem:[#allocation53_spill] sm:$0xff] %v10910_v21 }
 0x220   : > { %v10796_v19 = vadd.f32 %v2007_v23, %v10596_v22  ;;  %v2372_v22 = vmul.f32 %v2371_v16, %v10765_v12  ;;  %v2533_v16 = vadd.f32 0.0036580483, %v2532_v35  ;;  %v1934_v23 = vpop.f32.mrf.mxu1 }
 0x221   : > { %v10837_v2 = vadd.f32 %v1934_v23, %v10652_v7  ;;  %v2693_v23 = vadd.f32 0.0036580483, %v2692_v5 }
 0x222   : > { %15964 = vst [vmem:[#allocation31_spill] sm:$0xff] %v10796_v19  ;;  %v10810_v48 = vmul.f32 0.70710677, %v10796_v19  ;;  %v2373_v14 = vadd.f32 0.0036580483, %v2372_v22  ;;  %v2534_v38 = vmul.f32 %v2533_v16, %v10753_v36  ;;  %v10850_v22 = vmul.f32 %v2339_v11, %v10642_v13 }
 0x223   : > { %v10862_v13 = vmul.f32 0.70710677, %v10837_v2 }
 0x224   : > { %15967 = vst [vmem:[#allocation34_spill] sm:$0xff] %v10810_v48  ;;  %v2568_v29 = vmul.f32 %v10810_v48, %v10810_v48  ;;  %v2374_v60 = vmul.f32 %v2373_v14, %v10765_v12  ;;  %v2535_v11 = vadd.f32 0.05243302, %v2534_v38  ;;  %v10879_v38 = vmin.f32 %v2768_v63, 16.0 }
 0x225   : > { %15977 = vst [vmem:[#allocation44_spill] sm:$0xff] %v10850_v22  ;;  %v2808_v14 = vmul.f32 %v10862_v13, %v10862_v13 }
 0x226   : > { %v10830_v1 = vmin.f32 %v2568_v29, 16.0  ;;  %v1973_v29 = vpop.f32.mrf.mxu2  ;;  %15981 = vst [vmem:[#allocation48_spill] sm:$0xff] %v10879_v38  ;;  %v2375_v48 = vadd.f32 0.05243302, %v2374_v60  ;;  %v2536_v58 = vmul.f32 %v2535_v11, %v10753_v36 }
 0x227   : > { %v2009_v19 = vpop.f32.mrf.mxu3  ;;  %v10874_v5 = vadd.f32 %v1973_v29, %v10652_v7  ;;  %v1897_v29 = vpop.f32.mrf.mxu0 }
 0x228   : > { %15972 = vst [vmem:[#allocation39_spill] sm:$0xff] %v10830_v1  ;;  %v10834_v35 = vadd.f32 %v2009_v19, %v10685_v44  ;;  %v2570_v44 = vmul.f32 2.1237322e-06, %v10830_v1  ;;  %v2615_v19 = vadd.f32 0.05243302, %v2614_v30  ;;  %v2408_v30 = vmul.f32 %v10843_v49, %v10843_v49 }
 0x229   : > { %v2694_v49 = vmul.f32 %v2693_v23, %v10783_v34  ;;  %v10887_v22 = vmul.f32 0.70710677, %v10874_v5 }
 0x22a   : > { %15973 = vst [vmem:[#allocation40_spill] sm:$0xff] %v10834_v35  ;;  %v10859_v16 = vmul.f32 0.70710677, %v10834_v35  ;;  %v2571_v52 = vadd.f32 0.00028619796, %v2570_v44  ;;  %v2616_v41 = vmul.f32 %v2615_v19, %v10727_v39  ;;  %v10884_v19 = vmin.f32 %v2808_v14, 16.0 }
 0x22b   : > { %v2655_v35 = vadd.f32 0.05243302, %v2654_v32  ;;  %v10889_v31 = vmin.f32 %v2408_v30, 16.0  ;;  %v2770_v32 = vmul.f32 2.1237322e-06, %v10879_v38  ;;  %v10902_v30 = vadd.f32 %v1897_v29, %v10591_v27  ;;  %v1936_v29 = vpop.f32.mrf.mxu1 }
 0x22c   : > { %15978 = vst [vmem:[#allocation45_spill] sm:$0xff] %v10859_v16  ;;  %v2728_v44 = vmul.f32 %v10859_v16, %v10859_v16  ;;  %v2572_v63 = vmul.f32 %v2571_v52, %v10830_v1  ;;  %v2810_v23 = vmul.f32 2.1237322e-06, %v10884_v19  ;;  %v2848_v16 = vmul.f32 %v10887_v22, %v10887_v22 }
 0x22d   : > { %15982 = vst [vmem:[#allocation49_spill] sm:$0xff] %v10884_v19  ;;  %v2617_v45 = vadd.f32 0.18741608, %v2616_v41  ;;  %v2656_v37 = vmul.f32 %v2655_v35, %v10755_v25  ;;  %v2771_v60 = vadd.f32 0.00028619796, %v2770_v32  ;;  %v10916_v35 = vmul.f32 %v2499_v40, %v10676_v61 }
 0x22e   : > { %15983 = vst [vmem:[#allocation50_spill] sm:$0xff] %v10889_v31  ;;  %v2695_v11 = vadd.f32 0.05243302, %v2694_v49  ;;  %v10904_v33 = vmin.f32 %v2728_v44, 16.0  ;;  %v2811_v24 = vadd.f32 0.00028619796, %v2810_v23 }
 0x22f   : > { %v2012_v43 = vpop.f32.mrf.mxu3  ;;  %v10906_v52 = vmin.f32 %v2848_v16, 16.0  ;;  %v2410_v42 = vmul.f32 2.1237322e-06, %v10889_v31  ;;  %15987 = vst [vmem:[#allocation54_spill] sm:$0xff] %v10916_v35  ;;  %v2618_v16 = vmul.f32 %v2617_v45, %v10727_v39  ;;  %v2772_v32 = vmul.f32 %v2771_v60, %v10879_v38 }
 0x230   : > { %v10898_v14 = vadd.f32 %v2012_v43, %v10652_v7  ;;  %15984 = vst [vmem:[#allocation51_spill] sm:$0xff] %v10904_v33  ;;  %v2537_v7 = vadd.f32 0.18741608, %v2536_v58  ;;  %v2573_v43 = vadd.f32 0.0036580483, %v2572_v63  ;;  %v2254_v58 = vmul.f32 %v2253_v47, %v10802_v46 }
 0x231   : > { %15985 = vst [vmem:[#allocation52_spill] sm:$0xff] %v10906_v52  ;;  %v2730_v49 = vmul.f32 2.1237322e-06, %v10904_v33  ;;  %v2850_v44 = vmul.f32 2.1237322e-06, %v10906_v52  ;;  %v2696_v40 = vmul.f32 %v2695_v11, %v10783_v34  ;;  %v2812_v63 = vmul.f32 %v2811_v24, %v10884_v19 }
 0x232   : > { %v10913_v41 = vmul.f32 0.70710677, %v10898_v14  ;;  %v10925_v18 = vmul.f32 0.70710677, %v10902_v30  ;;  %v2657_v61 = vadd.f32 0.18741608, %v2656_v37  ;;  %v10935_v60 = vadd.f32 %v1936_v29, %v10591_v27  ;;  %v1975_v37 = vpop.f32.mrf.mxu2 }
 0x233   : > { %v2851_v23 = vadd.f32 0.00028619796, %v2850_v44  ;;  %v2411_v54 = vadd.f32 0.00028619796, %v2410_v42  ;;  %v2538_v4 = vmul.f32 %v2537_v7, %v10753_v36  ;;  %v2574_v35 = vmul.f32 %v2573_v43, %v10830_v1 }
 0x234   : > { %v2888_v50 = vmul.f32 %v10913_v41, %v10913_v41  ;;  %v2928_v45 = vmul.f32 %v10925_v18, %v10925_v18  ;;  %v2731_v47 = vadd.f32 0.00028619796, %v2730_v49  ;;  %v10940_v11 = vmul.f32 %v2375_v48, %v10765_v12 }
 0x235   : > { %v2619_v24 = vadd.f32 1.1283791, %v2618_v16  ;;  %v2773_v44 = vadd.f32 0.0036580483, %v2772_v32  ;;  %v2658_v46 = vmul.f32 %v2657_v61, %v10755_v25  ;;  %v2697_v56 = vadd.f32 0.18741608, %v2696_v40 }
 0x236   : > { %v10930_v62 = vmin.f32 %v2888_v50, 16.0  ;;  %15989 = vst [vmem:[#allocation56_spill] sm:$0xff] %v10940_v11  ;;  %v2813_v15 = vadd.f32 0.0036580483, %v2812_v63  ;;  %v10944_v29 = vmin.f32 %v2928_v45, 16.0  ;;  %v2852_v42 = vmul.f32 %v2851_v23, %v10906_v52 }
 0x237   : > { %v10948_v43 = vmul.f32 0.70710677, %v10935_v60  ;;  %v10951_v49 = vadd.f32 %v1975_v37, %v10591_v27  ;;  %v2539_v48 = vadd.f32 1.1283791, %v2538_v4  ;;  %v2575_v16 = vadd.f32 0.05243302, %v2574_v35 }
 0x238   : > { %15988 = vst [vmem:[#allocation55_spill] sm:$0xff] %v10930_v62  ;;  %v2890_v50 = vmul.f32 2.1237322e-06, %v10930_v62  ;;  %v2732_v32 = vmul.f32 %v2731_v47, %v10904_v33  ;;  %v2930_v11 = vmul.f32 2.1237322e-06, %v10944_v29  ;;  %v10958_v40 = vmul.f32 %v2411_v54, %v10889_v31 }
 0x239   : > { %15990 = vst [vmem:[#allocation57_spill] sm:$0xff] %v10944_v29  ;;  %v10955_v61 = vadd.f32 0.05243302, %v2254_v58  ;;  %v2774_v63 = vmul.f32 %v2773_v44, %v10879_v38  ;;  %v2968_v23 = vmul.f32 %v10948_v43, %v10948_v43  ;;  %v2659_v45 = vadd.f32 1.1283791, %v2658_v46 }
 0x23a   : > { %v2891_v7 = vadd.f32 0.00028619796, %v2890_v50  ;;  %15992 = vst [vmem:[#allocation59_spill] sm:$0xff] %v10958_v40  ;;  %v2698_v37 = vmul.f32 %v2697_v56, %v10783_v34  ;;  %v2814_v4 = vmul.f32 %v2813_v15, %v10884_v19  ;;  %v2931_v35 = vadd.f32 0.00028619796, %v2930_v11  ;;  %v1939_v40 = vpop.f32.mrf.mxu1 }
 0x23b   : > { %15991 = vst [vmem:[#allocation58_spill] sm:$0xff] %v10955_v61  ;;  %v2853_v50 = vadd.f32 0.0036580483, %v2852_v42  ;;  %v10966_v12 = vmin.f32 %v2968_v23, 16.0  ;;  %v10969_v58 = vmul.f32 0.70710677, %v10951_v49  ;;  %v10972_v54 = vmul.f32 %v2539_v48, %v10715_v3 }
 0x23c   : > { %v2892_v47 = vmul.f32 %v2891_v7, %v10930_v62  ;;  %v2576_v44 = vmul.f32 %v2575_v16, %v10830_v1  ;;  %v10976_v46 = vmul.f32 %v2619_v24, %v10698_v26  ;;  %v2733_v56 = vadd.f32 0.0036580483, %v2732_v32  ;;  %v2014_v7 = vpop.f32.mrf.mxu3  ;;  %v1900_v26 = vpop.f32.mrf.mxu0 }
 0x23d   : > { %15993 = vst [vmem:[#allocation60_spill] sm:$0xff] %v10966_v12  ;;  %v2775_v61 = vadd.f32 0.05243302, %v2774_v63  ;;  %v2932_v15 = vmul.f32 %v2931_v35, %v10944_v29  ;;  %v2970_v11 = vmul.f32 2.1237322e-06, %v10966_v12  ;;  %v3008_v42 = vmul.f32 %v10969_v58, %v10969_v58 }
 0x23e   : > { %15994 = vst [vmem:[#allocation61_spill] sm:$0xff] %v10972_v54  ;;  %v10983_v23 = vmul.f32 %v2659_v45, %v10718_v0  ;;  %v2699_v3 = vadd.f32 1.1283791, %v2698_v37  ;;  %v10986_v48 = vmul.f32 0.5, %v10837_v2  ;;  %v2815_v16 = vadd.f32 0.05243302, %v2814_v4 }
 0x23f   : > { %15995 = vst [vmem:[#allocation62_spill] sm:$0xff] %v10976_v46  ;;  %v2854_v24 = vmul.f32 %v2853_v50, %v10906_v52  ;;  %v2893_v32 = vadd.f32 0.0036580483, %v2892_v47  ;;  %v2971_v63 = vadd.f32 0.00028619796, %v2970_v11  ;;  %v10989_v35 = vmin.f32 %v3008_v42, 16.0 }
 0x240   : > { %15996 = vst [vmem:[#allocation63_spill] sm:$0xff] %v10983_v23  ;;  %v2577_v31 = vadd.f32 0.18741608, %v2576_v44  ;;  %v2734_v54 = vmul.f32 %v2733_v56, %v10904_v33  ;;  %v10993_v34 = vmul.f32 0.5, %v10874_v5  ;;  %v10996_v0 = vadd.f32 %v2014_v7, %v10591_v27 }
 0x241   : > { %15997 = vst [vmem:[#allocation64_spill] sm:$0xff] %v10986_v48  ;;  %v2776_v2 = vmul.f32 %v2775_v61, %v10879_v38  ;;  %v2933_v45 = vadd.f32 0.0036580483, %v2932_v15  ;;  %v3010_v37 = vmul.f32 2.1237322e-06, %v10989_v35  ;;  %v11001_v4 = vadd.f32 %v1900_v26, %v10569_v6  ;;  %v1978_v26 = vpop.f32.mrf.mxu2 }
 0x242   : > { %15998 = vst [vmem:[#allocation65_spill] sm:$0xff] %v10989_v35  ;;  %v11004_v50 = vmul.f32 %v2699_v3, %v10745_v59  ;;  %v2816_v47 = vmul.f32 %v2815_v16, %v10884_v19  ;;  %v11008_v44 = vmul.f32 0.5, %v10898_v14  ;;  %v11011_v5 = vadd.f32 %v1939_v40, %v10569_v6 }
 0x243   : > { %15999 = vst [vmem:[#allocation66_spill] sm:$0xff] %v10993_v34  ;;  %v2855_v27 = vadd.f32 0.05243302, %v2854_v24  ;;  %v2894_v61 = vmul.f32 %v2893_v32, %v10930_v62  ;;  %v2972_v56 = vmul.f32 %v2971_v63, %v10966_v12  ;;  %v3011_v15 = vadd.f32 0.00028619796, %v3010_v37 }
 0x244   : > { %16000 = vst [vmem:[#allocation67_spill] sm:$0xff] %v10996_v0  ;;  %v2578_v11 = vmul.f32 %v2577_v31, %v10830_v1  ;;  %v2735_v42 = vadd.f32 0.05243302, %v2734_v54  ;;  %v11017_v59 = vmul.f32 0.5, %v10902_v30  ;;  %v11020_v7 = vmul.f32 0.70710677, %v10996_v0  ;;  %v2017_v37 = vpop.f32.mrf.mxu3  ;;  %v1902_v36 = vpop.f32.mrf.mxu0 }
 0x245   : > { %16001 = vst [vmem:[#allocation68_spill] sm:$0xff] %v11004_v50  ;;  %v2777_v14 = vadd.f32 0.18741608, %v2776_v2  ;;  %v2934_v3 = vmul.f32 %v2933_v45, %v10944_v29  ;;  %v3012_v40 = vmul.f32 %v3011_v15, %v10989_v35  ;;  %v11025_v16 = vmul.f32 0.70710677, %v11001_v4 }
 0x246   : > { %16002 = vst [vmem:[#allocation69_spill] sm:$0xff] %v11008_v44  ;;  %v2817_v24 = vadd.f32 0.18741608, %v2816_v47  ;;  %v11028_v32 = vmul.f32 0.5, %v10935_v60  ;;  %v3048_v31 = vmul.f32 %v11020_v7, %v11020_v7  ;;  %v11033_v30 = vmul.f32 0.70710677, %v11011_v5 }
 0x247   : > { %16003 = vst [vmem:[#allocation70_spill] sm:$0xff] %v11017_v59  ;;  %v2856_v54 = vmul.f32 %v2855_v27, %v10906_v52  ;;  %v2895_v63 = vadd.f32 0.05243302, %v2894_v61  ;;  %v2973_v2 = vadd.f32 0.0036580483, %v2972_v56  ;;  %v3088_v45 = vmul.f32 %v11025_v16, %v11025_v16 }
 0x248   : > { %16004 = vst [vmem:[#allocation71_spill] sm:$0xff] %v11020_v7  ;;  %v3013_v15 = vadd.f32 0.0036580483, %v3012_v40  ;;  %v11038_v50 = vmin.f32 %v3048_v31, 16.0  ;;  %v3128_v60 = vmul.f32 %v11033_v30, %v11033_v30  ;;  %v11043_v47 = vadd.f32 %v1978_v26, %v10569_v6 }
 0x249   : > { %16005 = vst [vmem:[#allocation72_spill] sm:$0xff] %v11028_v32  ;;  %v11045_v1 = vadd.f32 1.1283791, %v2578_v11  ;;  %v2778_v44 = vmul.f32 %v2777_v14, %v10879_v38  ;;  %v2935_v27 = vadd.f32 0.05243302, %v2934_v3  ;;  %v11048_v61 = vmin.f32 %v3088_v45, 16.0 }
 0x24a   : > { %16006 = vst [vmem:[#allocation73_spill] sm:$0xff] %v11038_v50  ;;  %v11051_v56 = vmul.f32 0.5, %v10951_v49  ;;  %v3050_v40 = vmul.f32 2.1237322e-06, %v11038_v50  ;;  %v11054_v31 = vmin.f32 %v3128_v60, 16.0  ;;  %v11057_v0 = vadd.f32 %v2017_v37, %v10569_v6 }
 0x24b   : > { %16007 = vst [vmem:[#allocation74_spill] sm:$0xff] %v11045_v1  ;;  %v2857_v26 = vadd.f32 0.18741608, %v2856_v54  ;;  %v2896_v11 = vmul.f32 %v2895_v63, %v10930_v62  ;;  %v2974_v1 = vmul.f32 %v2973_v2, %v10966_v12  ;;  %v3090_v14 = vmul.f32 2.1237322e-06, %v11048_v61 }
 0x24c   : > { %16008 = vst [vmem:[#allocation75_spill] sm:$0xff] %v11051_v56  ;;  %v2818_v3 = vmul.f32 %v2817_v24, %v10884_v19  ;;  %v3014_v49 = vmul.f32 %v3013_v15, %v10989_v35  ;;  %v3130_v45 = vmul.f32 2.1237322e-06, %v11054_v31  ;;  %v11066_v60 = vmul.f32 0.70710677, %v11043_v47 }
 0x24d   : > { %v2779_v56 = vadd.f32 1.1283791, %v2778_v44  ;;  %v2936_v6 = vmul.f32 %v2935_v27, %v10944_v29  ;;  %v3091_v37 = vadd.f32 0.00028619796, %v3090_v14  ;;  %v11070_v54 = vadd.f32 %v1902_v36, %v10588_v9 }
 0x24e   : > { %v3051_v63 = vadd.f32 0.00028619796, %v3050_v40  ;;  %v3131_v2 = vadd.f32 0.00028619796, %v3130_v45  ;;  %v3168_v34 = vmul.f32 %v11066_v60, %v11066_v60  ;;  %v11075_v24 = vmul.f32 0.70710677, %v11057_v0  ;;  %v1941_v40 = vpop.f32.mrf.mxu1 }
 0x24f   : > { %v2858_v15 = vmul.f32 %v2857_v26, %v10906_v52  ;;  %v2897_v7 = vadd.f32 0.18741608, %v2896_v11  ;;  %v2975_v23 = vadd.f32 0.05243302, %v2974_v1  ;;  %v3092_v44 = vmul.f32 %v3091_v37, %v11048_v61 }
 0x250   : > { %v3015_v17 = vadd.f32 0.05243302, %v3014_v49  ;;  %v3132_v27 = vmul.f32 %v3131_v2, %v11054_v31  ;;  %v11080_v14 = vmin.f32 %v3168_v34, 16.0  ;;  %v3208_v36 = vmul.f32 %v11075_v24, %v11075_v24 }
 0x251   : > { %v11085_v45 = vmul.f32 %v2735_v42, %v10904_v33  ;;  %v2937_v46 = vadd.f32 0.18741608, %v2936_v6  ;;  %v3093_v21 = vadd.f32 0.0036580483, %v3092_v44  ;;  %v11088_v26 = vmul.f32 0.70710677, %v11070_v54 }
 0x252   : > { %16009 = vst [vmem:[#allocation76_spill] sm:$0xff] %v11080_v14  ;;  %v3052_v1 = vmul.f32 %v3051_v63, %v11038_v50  ;;  %v3133_v11 = vadd.f32 0.0036580483, %v3132_v27  ;;  %v3170_v49 = vmul.f32 2.1237322e-06, %v11080_v14  ;;  %v11092_v37 = vmin.f32 %v3208_v36, 16.0  ;;  %v1980_v27 = vpop.f32.mrf.mxu2 }
 0x253   : > { %16010 = vst [vmem:[#allocation77_spill] sm:$0xff] %v11085_v45  ;;  %v2819_v34 = vadd.f32 1.1283791, %v2818_v3  ;;  %v3094_v2 = vmul.f32 %v3093_v21, %v11048_v61  ;;  %v3248_v52 = vmul.f32 %v11088_v26, %v11088_v26  ;;  %v11098_v42 = vadd.f32 %v1941_v40, %v10588_v9 }
 0x254   : > { %16011 = vst [vmem:[#allocation78_spill] sm:$0xff] %v11092_v37  ;;  %v2859_v6 = vadd.f32 1.1283791, %v2858_v15  ;;  %v2976_v44 = vmul.f32 %v2975_v23, %v10966_v12  ;;  %v3016_v33 = vmul.f32 %v3015_v17, %v10989_v35  ;;  %v3210_v63 = vmul.f32 2.1237322e-06, %v11092_v37 }
 0x255   : > { %v11104_v36 = vmul.f32 %v2779_v56, %v10855_v51  ;;  %v2898_v3 = vmul.f32 %v2897_v7, %v10930_v62  ;;  %v3171_v21 = vadd.f32 0.00028619796, %v3170_v49  ;;  %v11107_v45 = vmin.f32 %v3248_v52, 16.0 }
 0x256   : > { %v2938_v25 = vmul.f32 %v2937_v46, %v10944_v29  ;;  %v3053_v40 = vadd.f32 0.0036580483, %v3052_v1  ;;  %v3095_v32 = vadd.f32 0.05243302, %v3094_v2  ;;  %v3134_v15 = vmul.f32 %v3133_v11, %v11054_v31 }
 0x257   : > { %16012 = vst [vmem:[#allocation79_spill] sm:$0xff] %v11104_v36  ;;  %v3211_v23 = vadd.f32 0.00028619796, %v3210_v63  ;;  %v3250_v17 = vmul.f32 2.1237322e-06, %v11107_v45  ;;  %v11116_v51 = vadd.f32 %v1980_v27, %v10588_v9  ;;  %v11119_v7 = vmul.f32 %v2819_v34, %v10862_v13 }
 0x258   : > { %v11113_v48 = vmul.f32 0.70710677, %v11098_v42  ;;  %v11122_v52 = vmul.f32 %v2859_v6, %v10887_v22  ;;  %v2977_v46 = vadd.f32 0.18741608, %v2976_v44  ;;  %v3017_v56 = vadd.f32 0.18741608, %v3016_v33 }
 0x259   : > { %16013 = vst [vmem:[#allocation80_spill] sm:$0xff] %v11119_v7  ;;  %v2899_v1 = vadd.f32 1.1283791, %v2898_v3  ;;  %v11125_v11 = vmul.f32 0.5, %v11001_v4  ;;  %v3172_v49 = vmul.f32 %v3171_v21, %v11080_v14  ;;  %v2939_v63 = vadd.f32 1.1283791, %v2938_v25 }
 0x25a   : > { %16014 = vst [vmem:[#allocation81_spill] sm:$0xff] %v11122_v52  ;;  %v3288_v2 = vmul.f32 %v11113_v48, %v11113_v48  ;;  %v3054_v27 = vmul.f32 %v3053_v40, %v11038_v50  ;;  %v3096_v13 = vmul.f32 %v3095_v32, %v11048_v61  ;;  %v3135_v34 = vadd.f32 0.05243302, %v3134_v15  ;;  %v1905_v52 = vpop.f32.mrf.mxu0 }
 0x25b   : > { %16015 = vst [vmem:[#allocation82_spill] sm:$0xff] %v11125_v11  ;;  %v3212_v22 = vmul.f32 %v3211_v23, %v11092_v37  ;;  %v3251_v6 = vadd.f32 0.00028619796, %v3250_v17  ;;  %v11136_v33 = vmul.f32 0.70710677, %v11116_v51  ;;  %v2978_v4 = vmul.f32 %v2977_v46, %v10966_v12  ;;  %v2019_v17 = vpop.f32.mrf.mxu3 }
 0x25c   : > { %v11133_v44 = vmin.f32 %v3288_v2, 16.0  ;;  %v3018_v3 = vmul.f32 %v3017_v56, %v10989_v35  ;;  %v11141_v21 = vmul.f32 0.5, %v11011_v5  ;;  %v11144_v25 = vmul.f32 0.5, %v11043_v47 }
 0x25d   : > { %v11147_v32 = vmul.f32 %v2899_v1, %v10913_v41  ;;  %v3173_v40 = vadd.f32 0.0036580483, %v3172_v49  ;;  %v3328_v23 = vmul.f32 %v11136_v33, %v11136_v33  ;;  %v11153_v46 = vmul.f32 %v2939_v63, %v10925_v18 }
 0x25e   : > { %16016 = vst [vmem:[#allocation83_spill] sm:$0xff] %v11133_v44  ;;  %v3290_v15 = vmul.f32 2.1237322e-06, %v11133_v44  ;;  %v3055_v56 = vadd.f32 0.05243302, %v3054_v27  ;;  %v3136_v5 = vmul.f32 %v3135_v34, %v11054_v31  ;;  %v3252_v62 = vmul.f32 %v3251_v6, %v11107_v45 }
 0x25f   : > { %16017 = vst [vmem:[#allocation84_spill] sm:$0xff] %v11141_v21  ;;  %v3097_v2 = vadd.f32 0.18741608, %v3096_v13  ;;  %v3213_v47 = vadd.f32 0.0036580483, %v3212_v22  ;;  %v11157_v1 = vmin.f32 %v3328_v23, 16.0  ;;  %v3174_v18 = vmul.f32 %v3173_v40, %v11080_v14 }
 0x260   : > { %16018 = vst [vmem:[#allocation85_spill] sm:$0xff] %v11144_v25  ;;  %v3291_v41 = vadd.f32 0.00028619796, %v3290_v15  ;;  %v2979_v49 = vadd.f32 1.1283791, %v2978_v4  ;;  %v11160_v35 = vmul.f32 0.5, %v11057_v0  ;;  %v11163_v25 = vadd.f32 %v2019_v17, %v10588_v9  ;;  %v1944_v9 = vpop.f32.mrf.mxu1 }
 0x261   : > { %16019 = vst [vmem:[#allocation86_spill] sm:$0xff] %v11147_v32  ;;  %v3019_v32 = vadd.f32 1.1283791, %v3018_v3  ;;  %v3330_v27 = vmul.f32 2.1237322e-06, %v11157_v1  ;;  %v11169_v13 = vadd.f32 %v1905_v52, %v10557_v55  ;;  %v3056_v34 = vmul.f32 %v3055_v56, %v11038_v50 }
 0x262   : > { %16020 = vst [vmem:[#allocation87_spill] sm:$0xff] %v11153_v46  ;;  %v3292_v63 = vmul.f32 %v3291_v41, %v11133_v44  ;;  %v3137_v22 = vadd.f32 0.18741608, %v3136_v5  ;;  %v11173_v6 = vmul.f32 0.5, %v11070_v54  ;;  %v11176_v0 = vmul.f32 0.70710677, %v11163_v25  ;;  %v1907_v8 = vpop.f32.mrf.mxu0 }
 0x263   : > { %16021 = vst [vmem:[#allocation88_spill] sm:$0xff] %v11157_v1  ;;  %v3098_v4 = vmul.f32 %v3097_v2, %v11048_v61  ;;  %v3214_v3 = vmul.f32 %v3213_v47, %v11092_v37  ;;  %v3253_v40 = vadd.f32 0.0036580483, %v3252_v62  ;;  %v3331_v15 = vadd.f32 0.00028619796, %v3330_v27 }
 0x264   : > { %16022 = vst [vmem:[#allocation89_spill] sm:$0xff] %v11160_v35  ;;  %v11181_v23 = vmul.f32 %v2979_v49, %v10948_v43  ;;  %v11184_v52 = vmul.f32 %v3019_v32, %v10969_v58  ;;  %v3368_v54 = vmul.f32 %v11176_v0, %v11176_v0  ;;  %v11189_v17 = vmul.f32 0.70710677, %v11169_v13  ;;  %v1983_v32 = vpop.f32.mrf.mxu2 }
 0x265   : > { %16023 = vst [vmem:[#allocation90_spill] sm:$0xff] %v11163_v25  ;;  %v3175_v56 = vadd.f32 0.05243302, %v3174_v18  ;;  %v3293_v5 = vadd.f32 0.0036580483, %v3292_v63  ;;  %v3332_v2 = vmul.f32 %v3331_v15, %v11157_v1  ;;  %v11193_v47 = vadd.f32 %v1944_v9, %v10557_v55  ;;  %v2022_v15 = vpop.f32.mrf.mxu3 }
 0x266   : > { %16024 = vst [vmem:[#allocation91_spill] sm:$0xff] %v11173_v6  ;;  %v3057_v62 = vadd.f32 0.18741608, %v3056_v34  ;;  %v11196_v43 = vmul.f32 0.5, %v11098_v42  ;;  %v11198_v41 = vmin.f32 %v3368_v54, 16.0  ;;  %v3408_v58 = vmul.f32 %v11189_v17, %v11189_v17 }
 0x267   : > { %16025 = vst [vmem:[#allocation92_spill] sm:$0xff] %v11176_v0  ;;  %v3099_v49 = vadd.f32 1.1283791, %v3098_v4  ;;  %v3138_v27 = vmul.f32 %v3137_v22, %v11054_v31  ;;  %v3215_v18 = vadd.f32 0.05243302, %v3214_v3  ;;  %v3254_v63 = vmul.f32 %v3253_v40, %v11107_v45 }
 0x268   : > { %16026 = vst [vmem:[#allocation93_spill] sm:$0xff] %v11181_v23  ;;  %v11205_v9 = vmul.f32 0.5, %v11116_v51  ;;  %v3370_v34 = vmul.f32 2.1237322e-06, %v11198_v41  ;;  %v11208_v42 = vmin.f32 %v3408_v58, 16.0  ;;  %v3294_v4 = vmul.f32 %v3293_v5, %v11133_v44 }
 0x269   : > { %16027 = vst [vmem:[#allocation94_spill] sm:$0xff] %v11184_v52  ;;  %v11211_v54 = vmul.f32 0.70710677, %v11193_v47  ;;  %v3176_v52 = vmul.f32 %v3175_v56, %v11080_v14  ;;  %v3333_v35 = vadd.f32 0.0036580483, %v3332_v2  ;;  %v11216_v22 = vadd.f32 %v1983_v32, %v10557_v55 }
 0x26a   : > { %16028 = vst [vmem:[#allocation95_spill] sm:$0xff] %v11196_v43  ;;  %v3371_v3 = vadd.f32 0.00028619796, %v3370_v34  ;;  %v3410_v40 = vmul.f32 2.1237322e-06, %v11208_v42  ;;  %v11222_v58 = vadd.f32 %v2022_v15, %v10557_v55  ;;  %v11225_v25 = vmul.f32 %v3057_v62, %v11038_v50  ;;  %v1946_v50 = vpop.f32.mrf.mxu1 }
 0x26b   : > { %16029 = vst [vmem:[#allocation96_spill] sm:$0xff] %v11198_v41  ;;  %v3448_v51 = vmul.f32 %v11211_v54, %v11211_v54  ;;  %v3216_v56 = vmul.f32 %v3215_v18, %v11092_v37  ;;  %v3255_v5 = vadd.f32 0.05243302, %v3254_v63  ;;  %v11229_v2 = vmul.f32 %v3099_v49, %v11025_v16 }
 0x26c   : > { %16030 = vst [vmem:[#allocation97_spill] sm:$0xff] %v11205_v9  ;;  %v3139_v9 = vadd.f32 1.1283791, %v3138_v27  ;;  %v3411_v32 = vadd.f32 0.00028619796, %v3410_v40  ;;  %v3334_v15 = vmul.f32 %v3333_v35, %v11157_v1  ;;  %v3372_v27 = vmul.f32 %v3371_v3, %v11198_v41 }
 0x26d   : > { %16031 = vst [vmem:[#allocation98_spill] sm:$0xff] %v11225_v25  ;;  %v11231_v34 = vmin.f32 %v3448_v51, 16.0  ;;  %v11234_v23 = vmul.f32 0.70710677, %v11216_v22  ;;  %v3177_v39 = vadd.f32 0.18741608, %v3176_v52  ;;  %v11251_v35 = vadd.f32 %v1907_v8, %v10577_v20 }
 0x26e   : > { %16032 = vst [vmem:[#allocation99_spill] sm:$0xff] %v11229_v2  ;;  %v3295_v55 = vadd.f32 0.05243302, %v3294_v4  ;;  %v11238_v62 = vmul.f32 0.70710677, %v11222_v58  ;;  %v3412_v18 = vmul.f32 %v3411_v32, %v11208_v42  ;;  %v11246_v63 = vmul.f32 %v3139_v9, %v11033_v30 }
 0x26f   : > { %v3450_v16 = vmul.f32 2.1237322e-06, %v11231_v34  ;;  %v3488_v49 = vmul.f32 %v11234_v23, %v11234_v23  ;;  %v3217_v40 = vadd.f32 0.18741608, %v3216_v56  ;;  %v3256_v4 = vmul.f32 %v3255_v5, %v11107_v45 }
 0x270   : > { %16033 = vst [vmem:[#allocation100_spill] sm:$0xff] %v11246_v63  ;;  %v3528_v52 = vmul.f32 %v11238_v62, %v11238_v62  ;;  %v3413_v3 = vadd.f32 0.0036580483, %v3412_v18  ;;  %v3178_v25 = vmul.f32 %v3177_v39, %v11080_v14  ;;  %v3296_v7 = vmul.f32 %v3295_v55, %v11133_v44 }
 0x271   : > { %v3451_v51 = vadd.f32 0.00028619796, %v3450_v16  ;;  %v11254_v32 = vmin.f32 %v3488_v49, 16.0  ;;  %v11259_v30 = vmul.f32 0.5, %v11169_v13  ;;  %v3335_v56 = vadd.f32 0.05243302, %v3334_v15 }
 0x272   : > { %v11261_v9 = vmin.f32 %v3528_v52, 16.0  ;;  %v3373_v59 = vadd.f32 0.0036580483, %v3372_v27  ;;  %v3218_v18 = vmul.f32 %v3217_v40, %v11092_v37  ;;  %v11268_v49 = vmul.f32 0.70710677, %v11251_v35  ;;  %v1985_v27 = vpop.f32.mrf.mxu2 }
 0x273   : > { %16034 = vst [vmem:[#allocation101_spill] sm:$0xff] %v11254_v32  ;;  %v3452_v8 = vmul.f32 %v3451_v51, %v11231_v34  ;;  %v3490_v5 = vmul.f32 2.1237322e-06, %v11254_v32  ;;  %v11271_v39 = vadd.f32 %v1946_v50, %v10577_v20  ;;  %v3257_v13 = vadd.f32 0.18741608, %v3256_v4 }
 0x274   : > { %16035 = vst [vmem:[#allocation102_spill] sm:$0xff] %v11261_v9  ;;  %v3530_v16 = vmul.f32 2.1237322e-06, %v11261_v9  ;;  %v3414_v55 = vmul.f32 %v3413_v3, %v11208_v42  ;;  %v3179_v57 = vadd.f32 1.1283791, %v3178_v25  ;;  %v3568_v40 = vmul.f32 %v11268_v49, %v11268_v49 }
 0x275   : > { %v3453_v52 = vadd.f32 0.0036580483, %v3452_v8  ;;  %v3491_v15 = vadd.f32 0.00028619796, %v3490_v5  ;;  %v3297_v51 = vadd.f32 0.18741608, %v3296_v7  ;;  %v3336_v10 = vmul.f32 %v3335_v56, %v11157_v1 }
 0x276   : > { %v3531_v46 = vadd.f32 0.00028619796, %v3530_v16  ;;  %v3374_v36 = vmul.f32 %v3373_v59, %v11198_v41  ;;  %v11281_v3 = vmin.f32 %v3568_v40, 16.0  ;;  %v11284_v8 = vmul.f32 0.70710677, %v11271_v39 }
 0x277   : > { %v3454_v37 = vmul.f32 %v3453_v52, %v11231_v34  ;;  %v3492_v50 = vmul.f32 %v3491_v15, %v11254_v32  ;;  %v11287_v7 = vadd.f32 %v1985_v27, %v10577_v20  ;;  %v3219_v25 = vadd.f32 1.1283791, %v3218_v18 }
 0x278   : > { %v3532_v4 = vmul.f32 %v3531_v46, %v11261_v9  ;;  %v3258_v5 = vmul.f32 %v3257_v13, %v11107_v45  ;;  %v3415_v56 = vadd.f32 0.05243302, %v3414_v55  ;;  %v11291_v59 = vmul.f32 %v3179_v57, %v11066_v60  ;;  %v2024_v60 = vpop.f32.mrf.mxu3 }
 0x279   : > { %v3455_v16 = vadd.f32 0.05243302, %v3454_v37  ;;  %v3493_v52 = vadd.f32 0.0036580483, %v3492_v50  ;;  %v3570_v15 = vmul.f32 2.1237322e-06, %v11281_v3  ;;  %v3608_v46 = vmul.f32 %v11284_v8, %v11284_v8 }
 0x27a   : > { %16036 = vst [vmem:[#allocation103_spill] sm:$0xff] %v11291_v59  ;;  %v3298_v40 = vmul.f32 %v3297_v51, %v11133_v44  ;;  %v3337_v0 = vadd.f32 0.18741608, %v3336_v10  ;;  %v3375_v14 = vadd.f32 0.05243302, %v3374_v36  ;;  %v11298_v18 = vmul.f32 0.5, %v11193_v47 }
 0x27b   : > { %v3533_v27 = vadd.f32 0.0036580483, %v3532_v4  ;;  %v3571_v13 = vadd.f32 0.00028619796, %v3570_v15  ;;  %v11300_v55 = vmin.f32 %v3608_v46, 16.0  ;;  %v11306_v37 = vmul.f32 %v3219_v25, %v11075_v24  ;;  %v1910_v15 = vpop.f32.mrf.mxu0 }
 0x27c   : > { %v11303_v57 = vmul.f32 0.70710677, %v11287_v7  ;;  %v3259_v50 = vadd.f32 1.1283791, %v3258_v5  ;;  %v3416_v59 = vmul.f32 %v3415_v56, %v11208_v42  ;;  %v3456_v10 = vmul.f32 %v3455_v16, %v11231_v34 }
 0x27d   : > { %16037 = vst [vmem:[#allocation104_spill] sm:$0xff] %v11306_v37  ;;  %v3494_v36 = vmul.f32 %v3493_v52, %v11254_v32  ;;  %v3572_v47 = vmul.f32 %v3571_v13, %v11281_v3  ;;  %v3610_v51 = vmul.f32 2.1237322e-06, %v11300_v55  ;;  %v3299_v46 = vadd.f32 1.1283791, %v3298_v40 }
 0x27e   : > { %v3648_v4 = vmul.f32 %v11303_v57, %v11303_v57  ;;  %v3338_v12 = vmul.f32 %v3337_v0, %v11157_v1  ;;  %v3376_v24 = vmul.f32 %v3375_v14, %v11198_v41  ;;  %v11318_v25 = vadd.f32 %v2024_v60, %v10577_v20  ;;  %v1949_v60 = vpop.f32.mrf.mxu1 }
 0x27f   : > { %v3534_v5 = vmul.f32 %v3533_v27, %v11261_v9  ;;  %v3573_v56 = vadd.f32 0.0036580483, %v3572_v47  ;;  %v3611_v16 = vadd.f32 0.00028619796, %v3610_v51  ;;  %v11324_v13 = vmul.f32 %v3259_v50, %v11088_v26 }
 0x280   : > { %16038 = vst [vmem:[#allocation105_spill] sm:$0xff] %v11318_v25  ;;  %v11321_v52 = vmin.f32 %v3648_v4, 16.0  ;;  %v3417_v37 = vadd.f32 0.18741608, %v3416_v59  ;;  %v11327_v43 = vmul.f32 0.5, %v11216_v22  ;;  %v11330_v0 = vadd.f32 %v1910_v15, %v10598_v53 }
 0x281   : > { %16040 = vst [vmem:[#allocation107_spill] sm:$0xff] %v11324_v13  ;;  %v3457_v14 = vadd.f32 0.18741608, %v3456_v10  ;;  %v3495_v40 = vadd.f32 0.05243302, %v3494_v36  ;;  %v3612_v20 = vmul.f32 %v3611_v16, %v11300_v55  ;;  %v11335_v47 = vmul.f32 %v3299_v46, %v11113_v48 }
 0x282   : > { %16039 = vst [vmem:[#allocation106_spill] sm:$0xff] %v11321_v52  ;;  %v3650_v27 = vmul.f32 2.1237322e-06, %v11321_v52  ;;  %v3377_v51 = vadd.f32 0.18741608, %v3376_v24  ;;  %v11338_v26 = vmul.f32 0.5, %v11222_v58  ;;  %v3574_v10 = vmul.f32 %v3573_v56, %v11281_v3  ;;  %v1988_v56 = vpop.f32.mrf.mxu2 }
 0x283   : > { %16041 = vst [vmem:[#allocation108_spill] sm:$0xff] %v11327_v43  ;;  %v11341_v22 = vmul.f32 0.70710677, %v11318_v25  ;;  %v3339_v59 = vadd.f32 1.1283791, %v3338_v12  ;;  %v11345_v4 = vmul.f32 0.5, %v11251_v35  ;;  %v11353_v58 = vadd.f32 %v1949_v60, %v10598_v53 }
 0x284   : > { %16042 = vst [vmem:[#allocation109_spill] sm:$0xff] %v11335_v47  ;;  %v3535_v50 = vadd.f32 0.05243302, %v3534_v5  ;;  %v3651_v36 = vadd.f32 0.00028619796, %v3650_v27  ;;  %v3418_v46 = vmul.f32 %v3417_v37, %v11208_v42  ;;  %v3458_v12 = vmul.f32 %v3457_v14, %v11231_v34 }
 0x285   : > { %16043 = vst [vmem:[#allocation110_spill] sm:$0xff] %v11338_v26  ;;  %v3688_v15 = vmul.f32 %v11341_v22, %v11341_v22  ;;  %v11350_v48 = vmul.f32 0.70710677, %v11330_v0  ;;  %v3496_v24 = vmul.f32 %v3495_v40, %v11254_v32  ;;  %v3613_v5 = vadd.f32 0.0036580483, %v3612_v20 }
 0x286   : > { %16044 = vst [vmem:[#allocation111_spill] sm:$0xff] %v11341_v22  ;;  %v3378_v35 = vmul.f32 %v3377_v51, %v11198_v41  ;;  %v3652_v16 = vmul.f32 %v3651_v36, %v11321_v52  ;;  %v11365_v60 = vmul.f32 %v3339_v59, %v11136_v33  ;;  %v3536_v37 = vmul.f32 %v3535_v50, %v11261_v9 }
 0x287   : > { %v11360_v27 = vmin.f32 %v3688_v15, 16.0  ;;  %v3728_v26 = vmul.f32 %v11350_v48, %v11350_v48  ;;  %v3575_v1 = vadd.f32 0.05243302, %v3574_v10  ;;  %v11369_v14 = vmul.f32 0.5, %v11271_v39  ;;  %v2027_v15 = vpop.f32.mrf.mxu3 }
 0x288   : > { %16045 = vst [vmem:[#allocation112_spill] sm:$0xff] %v11365_v60  ;;  %v11375_v51 = vmul.f32 0.70710677, %v11353_v58  ;;  %v11378_v36 = vadd.f32 %v1988_v56, %v10598_v53  ;;  %v3419_v41 = vadd.f32 1.1283791, %v3418_v46  ;;  %v3614_v50 = vmul.f32 %v3613_v5, %v11300_v55 }
 0x289   : > { %16046 = vst [vmem:[#allocation113_spill] sm:$0xff] %v11369_v14  ;;  %v3690_v40 = vmul.f32 2.1237322e-06, %v11360_v27  ;;  %v11372_v20 = vmin.f32 %v3728_v26, 16.0  ;;  %v3459_v33 = vadd.f32 1.1283791, %v3458_v12  ;;  %v3576_v43 = vmul.f32 %v3575_v1, %v11281_v3 }
 0x28a   : > { %v3497_v59 = vadd.f32 0.18741608, %v3496_v24  ;;  %v11381_v10 = vadd.f32 1.1283791, %v3378_v35  ;;  %v3653_v39 = vadd.f32 0.0036580483, %v3652_v16  ;;  %v3768_v26 = vmul.f32 %v11375_v51, %v11375_v51  ;;  %v1912_v35 = vpop.f32.mrf.mxu0 }
 0x28b   : > { %v3730_v60 = vmul.f32 2.1237322e-06, %v11372_v20  ;;  %v3537_v25 = vadd.f32 0.18741608, %v3536_v37  ;;  %v3691_v21 = vadd.f32 0.00028619796, %v3690_v40  ;;  %v11388_v56 = vadd.f32 %v2027_v15, %v10598_v53 }
 0x28c   : > { %16047 = vst [vmem:[#allocation114_spill] sm:$0xff] %v11381_v10  ;;  %v11391_v46 = vmul.f32 0.5, %v11287_v7  ;;  %v11393_v24 = vmin.f32 %v3768_v26, 16.0  ;;  %v11396_v5 = vmul.f32 0.70710677, %v11378_v36  ;;  %v11399_v16 = vmul.f32 %v3419_v41, %v11189_v17  ;;  %v1951_v26 = vpop.f32.mrf.mxu1 }
 0x28d   : > { %v3731_v12 = vadd.f32 0.00028619796, %v3730_v60  ;;  %v11402_v37 = vmul.f32 %v3459_v33, %v11211_v54  ;;  %v3498_v1 = vmul.f32 %v3497_v59, %v11254_v32  ;;  %v3615_v53 = vadd.f32 0.05243302, %v3614_v50 }
 0x28e   : > { %16048 = vst [vmem:[#allocation115_spill] sm:$0xff] %v11391_v46  ;;  %v3654_v40 = vmul.f32 %v3653_v39, %v11321_v52  ;;  %v3770_v60 = vmul.f32 2.1237322e-06, %v11393_v24  ;;  %v3808_v15 = vmul.f32 %v11396_v5, %v11396_v5  ;;  %v3538_v10 = vmul.f32 %v3537_v25, %v11261_v9 }
 0x28f   : > { %v3732_v7 = vmul.f32 %v3731_v12, %v11372_v20  ;;  %v3577_v17 = vadd.f32 0.18741608, %v3576_v43  ;;  %v11412_v41 = vmul.f32 0.70710677, %v11388_v56  ;;  %v11415_v54 = vadd.f32 %v1912_v35, %v10620_v28 }
 0x290   : > { %v3692_v33 = vmul.f32 %v3691_v21, %v11360_v27  ;;  %v3771_v50 = vadd.f32 0.00028619796, %v3770_v60  ;;  %v11418_v39 = vmin.f32 %v3808_v15, 16.0  ;;  %v3499_v12 = vadd.f32 1.1283791, %v3498_v1 }
 0x291   : > { %v3733_v59 = vadd.f32 0.0036580483, %v3732_v7  ;;  %v3616_v46 = vmul.f32 %v3615_v53, %v11300_v55  ;;  %v3848_v47 = vmul.f32 %v11412_v41, %v11412_v41  ;;  %v11424_v43 = vadd.f32 %v1951_v26, %v10620_v28 }
 0x292   : > { %v3655_v25 = vadd.f32 0.05243302, %v3654_v40  ;;  %v3772_v35 = vmul.f32 %v3771_v50, %v11393_v24  ;;  %v3810_v21 = vmul.f32 2.1237322e-06, %v11418_v39  ;;  %v3539_v7 = vadd.f32 1.1283791, %v3538_v10 }
 0x293   : > { %v3734_v19 = vmul.f32 %v3733_v59, %v11372_v20  ;;  %v11430_v60 = vmul.f32 0.5, %v11330_v0  ;;  %v11432_v1 = vmin.f32 %v3848_v47, 16.0  ;;  %v11435_v53 = vmul.f32 0.70710677, %v11415_v54 }
 0x294   : > { %v3578_v15 = vmul.f32 %v3577_v17, %v11281_v3  ;;  %v3693_v26 = vadd.f32 0.0036580483, %v3692_v33  ;;  %v3773_v29 = vadd.f32 0.0036580483, %v3772_v35  ;;  %v3811_v40 = vadd.f32 0.00028619796, %v3810_v21  ;;  %v1990_v17 = vpop.f32.mrf.mxu2 }
 0x295   : > { %v3617_v63 = vadd.f32 0.18741608, %v3616_v46  ;;  %v3850_v59 = vmul.f32 2.1237322e-06, %v11432_v1  ;;  %v3888_v50 = vmul.f32 %v11435_v53, %v11435_v53  ;;  %v11442_v10 = vmul.f32 0.70710677, %v11424_v43 }
 0x296   : > { %v3656_v0 = vmul.f32 %v3655_v25, %v11321_v52  ;;  %v3735_v47 = vadd.f32 0.05243302, %v3734_v19  ;;  %v3774_v38 = vmul.f32 %v3773_v29, %v11393_v24  ;;  %v3812_v6 = vmul.f32 %v3811_v40, %v11418_v39 }
 0x297   : > { %v11448_v33 = vmul.f32 %v3499_v12, %v11234_v23  ;;  %v3851_v46 = vadd.f32 0.00028619796, %v3850_v59  ;;  %v11450_v35 = vmin.f32 %v3888_v50, 16.0  ;;  %v3928_v21 = vmul.f32 %v11442_v10, %v11442_v10  ;;  %v2029_v12 = vpop.f32.mrf.mxu3 }
 0x298   : > { %v3579_v11 = vadd.f32 1.1283791, %v3578_v15  ;;  %v3694_v13 = vmul.f32 %v3693_v26, %v11360_v27  ;;  %v11456_v25 = vmul.f32 0.5, %v11353_v58  ;;  %v3775_v19 = vadd.f32 0.05243302, %v3774_v38 }
 0x299   : > { %16049 = vst [vmem:[#allocation116_spill] sm:$0xff] %v11448_v33  ;;  %v3813_v29 = vadd.f32 0.0036580483, %v3812_v6  ;;  %v3890_v40 = vmul.f32 2.1237322e-06, %v11450_v35  ;;  %v11459_v22 = vmin.f32 %v3928_v21, 16.0  ;;  %v1991_v23 = vadd.f32 %v1990_v17, %v10620_v28 }
 0x29a   : > { %v11463_v59 = vmul.f32 %v3539_v7, %v11238_v62  ;;  %v3618_v50 = vmul.f32 %v3617_v63, %v11300_v55  ;;  %v3657_v15 = vadd.f32 0.18741608, %v3656_v0  ;;  %v3736_v26 = vmul.f32 %v3735_v47, %v11372_v20 }
 0x29b   : > { %v11468_v58 = vmul.f32 0.5, %v11378_v36  ;;  %v3852_v38 = vmul.f32 %v3851_v46, %v11432_v1  ;;  %v3891_v6 = vadd.f32 0.00028619796, %v3890_v40  ;;  %v3930_v21 = vmul.f32 2.1237322e-06, %v11459_v22 }
 0x29c   : > { %16050 = vst [vmem:[#allocation117_spill] sm:$0xff] %v11463_v59  ;;  %v11473_v33 = vmul.f32 %v3579_v11, %v11268_v49  ;;  %v3695_v17 = vadd.f32 0.05243302, %v3694_v13  ;;  %v3776_v62 = vmul.f32 %v3775_v19, %v11393_v24  ;;  %v11477_v7 = vadd.f32 %v2029_v12, %v10620_v28 }
 0x29d   : > { %16051 = vst [vmem:[#allocation118_spill] sm:$0xff] %v11468_v58  ;;  %v3814_v63 = vmul.f32 %v3813_v29, %v11418_v39  ;;  %v3892_v0 = vmul.f32 %v3891_v6, %v11450_v35  ;;  %v3931_v36 = vadd.f32 0.00028619796, %v3930_v21  ;;  %v11481_v47 = vmul.f32 0.70710677, %v1991_v23 }
 0x29e   : > { %16052 = vst [vmem:[#allocation119_spill] sm:$0xff] %v11477_v7  ;;  %v3619_v46 = vadd.f32 1.1283791, %v3618_v50  ;;  %v3658_v40 = vmul.f32 %v3657_v15, %v11321_v52  ;;  %v3737_v59 = vadd.f32 0.18741608, %v3736_v26  ;;  %v11485_v11 = vmul.f32 0.5, %v11388_v56 }
 0x29f   : > { %v3853_v49 = vadd.f32 0.0036580483, %v3852_v38  ;;  %v3893_v13 = vadd.f32 0.0036580483, %v3892_v0  ;;  %v3932_v19 = vmul.f32 %v3931_v36, %v11459_v22  ;;  %v3968_v28 = vmul.f32 %v11481_v47, %v11481_v47 }
 0x2a0   : > { %16053 = vst [vmem:[#allocation120_spill] sm:$0xff] %v11485_v11  ;;  %v3696_v29 = vmul.f32 %v3695_v17, %v11360_v27  ;;  %v3777_v12 = vadd.f32 0.18741608, %v3776_v62  ;;  %v11492_v6 = vmul.f32 0.5, %v11415_v54  ;;  %v11495_v50 = vmul.f32 0.70710677, %v11477_v7 }
 0x2a1   : > { %v3815_v15 = vadd.f32 0.05243302, %v3814_v63  ;;  %v3894_v56 = vmul.f32 %v3893_v13, %v11450_v35  ;;  %v3933_v26 = vadd.f32 0.0036580483, %v3932_v19  ;;  %v11498_v38 = vmin.f32 %v3968_v28, 16.0 }
 0x2a2   : > { %v3659_v21 = vadd.f32 1.1283791, %v3658_v40  ;;  %v3738_v0 = vmul.f32 %v3737_v59, %v11372_v20  ;;  %v4008_v36 = vmul.f32 %v11495_v50, %v11495_v50  ;;  %v3741_v17 = vmul.f32 3.8918573e-05, %v11372_v20 }
 0x2a3   : > { %v3854_v54 = vmul.f32 %v3853_v49, %v11432_v1  ;;  %v3895_v62 = vadd.f32 0.05243302, %v3894_v56  ;;  %v3934_v2 = vmul.f32 %v3933_v26, %v11459_v22  ;;  %v3970_v63 = vmul.f32 2.1237322e-06, %v11498_v38 }
 0x2a4   : > { %v11507_v11 = vadd.f32 0.18741608, %v3696_v29  ;;  %v11510_v13 = vmul.f32 0.5, %v11424_v43  ;;  %v11512_v40 = vmin.f32 %v4008_v36, 16.0  ;;  %v3742_v59 = vadd.f32 0.001143296, %v3741_v17 }
 0x2a5   : > { %v3778_v19 = vmul.f32 %v3777_v12, %v11393_v24  ;;  %v3816_v28 = vmul.f32 %v3815_v15, %v11418_v39  ;;  %v3935_v9 = vadd.f32 0.05243302, %v3934_v2  ;;  %v3971_v52 = vadd.f32 0.00028619796, %v3970_v63 }
 0x2a6   : > { %v11516_v49 = vmul.f32 0.5, %v1991_v23  ;;  %v4010_v56 = vmul.f32 2.1237322e-06, %v11512_v40  ;;  %v3743_v26 = vmul.f32 %v3742_v59, %v11372_v20  ;;  %v3901_v29 = vmul.f32 3.8918573e-05, %v11450_v35 }
 0x2a7   : > { %v3739_v7 = vadd.f32 1.1283791, %v3738_v0  ;;  %v3855_v43 = vadd.f32 0.05243302, %v3854_v54  ;;  %v3896_v36 = vmul.f32 %v3895_v62, %v11450_v35  ;;  %v3972_v17 = vmul.f32 %v3971_v52, %v11498_v38 }
 0x2a8   : > { %16054 = vst [vmem:[#allocation121_spill] sm:$0xff] %v11516_v49  ;;  %v11524_v12 = vmul.f32 %v3619_v46, %v11284_v8  ;;  %v4011_v15 = vadd.f32 0.00028619796, %v4010_v56  ;;  %v3744_v2 = vadd.f32 0.014752088, %v3743_v26  ;;  %v3936_v58 = vmul.f32 %v3935_v9, %v11459_v22 }
 0x2a9   : > { %v3902_v63 = vadd.f32 0.001143296, %v3901_v29  ;;  %v3779_v23 = vadd.f32 1.1283791, %v3778_v19  ;;  %v3817_v49 = vadd.f32 0.18741608, %v3816_v28  ;;  %v3856_v52 = vmul.f32 %v3855_v43, %v11432_v1 }
 0x2aa   : > { %v3973_v32 = vadd.f32 0.0036580483, %v3972_v17  ;;  %v4012_v59 = vmul.f32 %v4011_v15, %v11512_v40  ;;  %v3745_v0 = vmul.f32 %v3744_v2, %v11372_v20  ;;  %v3781_v62 = vmul.f32 3.8918573e-05, %v11393_v24 }
 0x2ab   : > { %v3903_v54 = vmul.f32 %v3902_v63, %v11450_v35  ;;  %v3897_v8 = vadd.f32 0.18741608, %v3896_v36  ;;  %v3941_v56 = vmul.f32 3.8918573e-05, %v11459_v22  ;;  %v11535_v19 = vmul.f32 %v3659_v21, %v11303_v57 }
 0x2ac   : > { %v3974_v46 = vmul.f32 %v3973_v32, %v11498_v38  ;;  %v4013_v9 = vadd.f32 0.0036580483, %v4012_v59  ;;  %v3746_v28 = vadd.f32 0.112945676, %v3745_v0  ;;  %v3818_v29 = vmul.f32 %v3817_v49, %v11418_v39 }
 0x2ad   : > { %16055 = vst [vmem:[#allocation122_spill] sm:$0xff] %v11535_v19  ;;  %v3904_v26 = vadd.f32 0.014752088, %v3903_v54  ;;  %v3937_v17 = vadd.f32 0.18741608, %v3936_v58  ;;  %v3898_v14 = vmul.f32 %v3897_v8, %v11450_v35 }
 0x2ae   : > { %v3975_v15 = vadd.f32 0.05243302, %v3974_v46  ;;  %v3782_v2 = vadd.f32 0.001143296, %v3781_v62  ;;  %v4014_v63 = vmul.f32 %v4013_v9, %v11512_v40  ;;  %v3747_v43 = vmul.f32 %v3746_v28, %v11372_v20 }
 0x2af   : > { %v3905_v36 = vmul.f32 %v3904_v26, %v11450_v35  ;;  %v3942_v32 = vadd.f32 0.001143296, %v3941_v56  ;;  %v3857_v44 = vadd.f32 0.18741608, %v3856_v52  ;;  %v3421_v21 = vmul.f32 3.8918573e-05, %v11208_v42 }
 0x2b0   : > { %v3783_v57 = vmul.f32 %v3782_v2, %v11393_v24  ;;  %v3976_v59 = vmul.f32 %v3975_v15, %v11498_v38  ;;  %v3748_v49 = vadd.f32 0.4994258, %v3747_v43  ;;  %v3819_v54 = vadd.f32 1.1283791, %v3818_v29 }
 0x2b1   : > { %v3906_v58 = vadd.f32 0.112945676, %v3905_v36  ;;  %v3943_v0 = vmul.f32 %v3942_v32, %v11459_v22  ;;  %v3938_v62 = vmul.f32 %v3937_v17, %v11459_v22  ;;  %v3422_v9 = vadd.f32 0.001143296, %v3421_v21 }
 0x2b2   : > { %v3784_v46 = vadd.f32 0.014752088, %v3783_v57  ;;  %v4015_v28 = vadd.f32 0.05243302, %v4014_v63  ;;  %v3749_v52 = vmul.f32 %v3748_v49, %v11372_v20  ;;  %v3858_v26 = vmul.f32 %v3857_v44, %v11432_v1 }
 0x2b3   : > { %v3907_v8 = vmul.f32 %v3906_v58, %v11450_v35  ;;  %v3944_v56 = vadd.f32 0.014752088, %v3943_v0  ;;  %v3899_v2 = vadd.f32 1.1283791, %v3898_v14  ;;  %v3423_v43 = vmul.f32 %v3422_v9, %v11208_v42 }
 0x2b4   : > { %v3785_v15 = vmul.f32 %v3784_v46, %v11393_v24  ;;  %v3977_v36 = vadd.f32 0.18741608, %v3976_v59  ;;  %v11552_v32 = vadd.f32 1.0, %v3749_v52  ;;  %v11557_v63 = vmul.f32 %v11507_v11, %v11360_v27 }
 0x2b5   : > { %v3908_v29 = vadd.f32 0.4994258, %v3907_v8  ;;  %v3945_v17 = vmul.f32 %v3944_v56, %v11459_v22  ;;  %v3424_v57 = vadd.f32 0.014752088, %v3423_v43  ;;  %v3581_v21 = vmul.f32 3.8918573e-05, %v11281_v3 }
 0x2b6   : > { %v3786_v20 = vadd.f32 0.112945676, %v3785_v15  ;;  %v11561_v44 = vmul.f32 %v3739_v7, %v11350_v48  ;;  %v3939_v14 = vadd.f32 1.1283791, %v3938_v62  ;;  %v4016_v49 = vmul.f32 %v4015_v28, %v11512_v40 }
 0x2b7   : > { %8992 = vrcp.f32 %v11552_v32  ;;  %v11566_v59 = vmul.f32 %v3779_v23, %v11375_v51  ;;  %v11569_v58 = vmul.f32 %v3819_v54, %v11396_v5  ;;  %v3909_v11 = vmul.f32 %v3908_v29, %v11450_v35 }
 0x2b8   : > { %v3787_v0 = vmul.f32 %v3786_v20, %v11393_v24  ;;  %v11573_v46 = vadd.f32 1.1283791, %v3858_v26  ;;  %v11576_v48 = vmul.f32 %v3899_v2, %v11435_v53  ;;  %v3946_v7 = vadd.f32 0.112945676, %v3945_v17 }
 0x2b9   : > { %v3425_v62 = vmul.f32 %v3424_v57, %v11208_v42  ;;  %v3978_v9 = vmul.f32 %v3977_v36, %v11498_v38  ;;  %v11580_v28 = vadd.f32 1.0, %v3909_v11  ;;  %v3582_v23 = vadd.f32 0.001143296, %v3581_v21 }
 0x2ba   : > { %v3788_v51 = vadd.f32 0.4994258, %v3787_v0  ;;  %v11583_v5 = vmul.f32 %v3939_v14, %v11442_v10  ;;  %v4017_v35 = vadd.f32 0.18741608, %v4016_v49  ;;  %v3947_v54 = vmul.f32 %v3946_v7, %v11459_v22 }
 0x2bb   : > { %v3426_v52 = vadd.f32 0.112945676, %v3425_v62  ;;  %v3760_v8 = vand.u32 2147483647, %v11552_v32  ;;  %v3762_v53 = vand.u32 2147483648, %v11552_v32  ;;  %8994 = vrcp.f32 %v11580_v28 }
 0x2bc   : > { %v3461_v56 = vmul.f32 3.8918573e-05, %v11231_v34  ;;  %v3789_v2 = vmul.f32 %v3788_v51, %v11393_v24  ;;  %v3948_v15 = vadd.f32 0.4994258, %v3947_v54  ;;  %v3583_v10 = vmul.f32 %v3582_v23, %v11281_v3 }
 0x2bd   : > { %v8993_v26 = vpop.eup %8992  ;;  %v3427_v43 = vmul.f32 %v3426_v52, %v11208_v42  ;;  %v11593_v36 = vadd.f32 1.1283791, %v3978_v9  ;;  %v3920_v17 = vand.u32 2147483647, %v11580_v28  ;;  %v3922_v20 = vand.u32 2147483648, %v11580_v28 }
 0x2be   : > { %v3752_v29 = vmul.f32 %v8993_v26, %v11552_v32  ;;  %v11598_v57 = vadd.f32 1.0, %v3789_v2  ;;  %v3949_v21 = vmul.f32 %v3948_v15, %v11459_v22  ;;  %v3584_v49 = vadd.f32 0.014752088, %v3583_v10 }
 0x2bf   : > { %v3428_v14 = vadd.f32 0.4994258, %v3427_v43  ;;  %v11602_v24 = vmul.f32 %v4017_v35, %v11512_v40  ;;  %vm3756_vm6 = vweird.f32 %v11552_v32  ;;  %vm11605_vm10 = vcmp.eq.f32.partialorder %v3760_v8, 8.507059e+37 }
 0x2c0   : > { %v3753_v11 = vsub.f32 1.0, %v3752_v29  ;;  %vm3757_vm11 = vweird.f32 %v8993_v26  ;;  %v3763_v7 = vor.u32 1.1754944e-38, %v3762_v53  ;;  %8996 = vrcp.f32 %v11598_v57 }
 0x2c1   : > { %v3462_v62 = vadd.f32 0.001143296, %v3461_v56  ;;  %v8995_v9 = vpop.eup %8994  ;;  %v11610_v22 = vadd.f32 1.0, %v3949_v21  ;;  %v3429_v23 = vmul.f32 %v3428_v14, %v11208_v42  ;;  %v3585_v35 = vmul.f32 %v3584_v49, %v11281_v3  ;;  %vm3758_vm14 = vmor %vm3756_vm6, %vm3757_vm11 }
 0x2c2   : > { %v3754_v51 = vmul.f32 %v8993_v26, %v3753_v11  ;;  %v3912_v54 = vmul.f32 %v8995_v9, %v11580_v28  ;;  %vm3916_vm12 = vweird.f32 %v11580_v28  ;;  %vm11616_vm13 = vcmp.eq.f32.partialorder %v3920_v17, 8.507059e+37 }
 0x2c3   : > { %v3923_v8 = vor.u32 1.1754944e-38, %v3922_v20  ;;  %v3800_v56 = vand.u32 2147483647, %v11598_v57  ;;  %8998 = vrcp.f32 %v11610_v22  ;;  %v3621_v2 = vmul.f32 3.8918573e-05, %v11300_v55 }
 0x2c4   : > { %v3755_v53 = vadd.f32 %v8993_v26, %v3754_v51  ;;  %v3913_v42 = vsub.f32 1.0, %v3912_v54  ;;  %v3802_v15 = vand.u32 2147483648, %v11598_v57  ;;  %v11627_v43 = vadd.f32 1.0, %v3429_v23 }
 0x2c5   : > { %v3586_v10 = vadd.f32 0.112945676, %v3585_v35  ;;  %vm3917_vm15 = vweird.f32 %v8995_v9  ;;  %vm3796_vm1 = vweird.f32 %v11598_v57  ;;  %v3962_v17 = vand.u32 2147483648, %v11610_v22 }
 0x2c6   : > { %v3759_v29 = vsel %vm3758_vm14, %v8993_v26, %v3755_v53  ;;  %v3463_v20 = vmul.f32 %v3462_v62, %v11231_v34  ;;  %v8997_v21 = vpop.eup %8996  ;;  %v3914_v32 = vmul.f32 %v8995_v9, %v3913_v42  ;;  %v3960_v49 = vand.u32 2147483647, %v11610_v22  ;;  %vm3918_vm3 = vmor %vm3916_vm12, %vm3917_vm15 }
 0x2c7   : > { %v3764_v14 = vsel %vm11605_vm10, %v3763_v7, %v3759_v29  ;;  %9000 = vrcp.f32 %v11627_v43  ;;  %v3792_v26 = vmul.f32 %v8997_v21, %v11598_v57  ;;  %vm11638_vm2 = vcmp.eq.f32.partialorder %v3800_v56, 8.507059e+37 }
 0x2c8   : > { %v3765_v11 = vmul.f32 %v3764_v14, %v11561_v44  ;;  %v3622_v23 = vadd.f32 0.001143296, %v3621_v2  ;;  %v3915_v35 = vadd.f32 %v8995_v9, %v3914_v32  ;;  %v3803_v62 = vor.u32 1.1754944e-38, %v3802_v15 }
 0x2c9   : > { %vm3956_vm0 = vweird.f32 %v11610_v22  ;;  %v3587_v0 = vmul.f32 %v3586_v10, %v11281_v3  ;;  %v8999_v7 = vpop.eup %8998  ;;  %v3793_v44 = vsub.f32 1.0, %v3792_v26  ;;  %v3963_v53 = vor.u32 1.1754944e-38, %v3962_v17 }
 0x2ca   : > { %v8256_v54 = vclamps-f32 %v3765_v11, 1.0  ;;  %v3464_v42 = vadd.f32 0.014752088, %v3463_v20  ;;  %v3919_v56 = vsel %vm3918_vm3, %v8995_v9, %v3915_v35  ;;  %vm3797_vm4 = vweird.f32 %v8997_v21 }
 0x2cb   : > { %v3952_v29 = vmul.f32 %v8999_v7, %v11610_v22  ;;  %vm11648_vm5 = vcmp.eq.f32.partialorder %v3960_v49, 8.507059e+37  ;;  %v3440_v15 = vand.u32 2147483647, %v11627_v43  ;;  %v3924_v10 = vsel %vm11616_vm13, %v3923_v8, %v3919_v56  ;;  %vm3798_vm8 = vmor %vm3796_vm1, %vm3797_vm4 }
 0x2cc   : > { %v3794_v14 = vmul.f32 %v8997_v21, %v3793_v44  ;;  %vm3436_vm9 = vweird.f32 %v11627_v43  ;;  %v3442_v28 = vand.u32 2147483648, %v11627_v43  ;;  %v3623_v17 = vmul.f32 %v3622_v23, %v11300_v55 }
 0x2cd   : > { %v9001_v9 = vpop.eup %9000  ;;  %v3925_v20 = vmul.f32 %v3924_v10, %v11576_v48  ;;  %v3953_v32 = vsub.f32 1.0, %v3952_v29  ;;  %v3588_v49 = vadd.f32 0.4994258, %v3587_v0  ;;  %v3465_v11 = vmul.f32 %v3464_v42, %v11231_v34 }
 0x2ce   : > { %v4088_v26 = vadd.f32 1.0, %v8256_v54  ;;  %v3795_v35 = vadd.f32 %v8997_v21, %v3794_v14  ;;  %vm3957_vm7 = vweird.f32 %v8999_v7  ;;  %v3432_v52 = vmul.f32 %v9001_v9, %v11627_v43 }
 0x2cf   : > { %v8260_v8 = vclamps-f32 %v3925_v20, 1.0  ;;  %v3954_v44 = vmul.f32 %v8999_v7, %v3953_v32  ;;  %v3589_v23 = vmul.f32 %v3588_v49, %v11281_v3  ;;  %v3466_v56 = vadd.f32 0.112945676, %v3465_v11  ;;  %vm3958_vm10 = vmor %vm3956_vm0, %vm3957_vm7 }
 0x2d0   : > { %v3799_v19 = vsel %vm3798_vm8, %v8997_v21, %v3795_v35  ;;  %v3433_v48 = vsub.f32 1.0, %v3432_v52  ;;  %vm3437_vm6 = vweird.f32 %v9001_v9  ;;  %v3624_v0 = vadd.f32 0.014752088, %v3623_v17 }
 0x2d1   : > { %v4092_v29 = vadd.f32 1.0, %v8260_v8  ;;  %v3804_v54 = vsel %vm11638_vm2, %v3803_v62, %v3799_v19  ;;  %v3955_v42 = vadd.f32 %v8999_v7, %v3954_v44  ;;  %v11667_v10 = vadd.f32 1.0, %v3589_v23  ;;  %vm3438_vm11 = vmor %vm3436_vm9, %vm3437_vm6 }
 0x2d2   : > { %v3805_v14 = vmul.f32 %v3804_v54, %v11566_v59  ;;  %v3434_v57 = vmul.f32 %v9001_v9, %v3433_v48  ;;  %v3467_v3 = vmul.f32 %v3466_v56, %v11231_v34  ;;  %v3625_v21 = vmul.f32 %v3624_v0, %v11300_v55 }
 0x2d3   : > { %v4136_v17 = vmul.f32 %v4088_v26, %v11430_v60  ;;  %v4140_v20 = vmul.f32 %v4092_v29, %v11492_v6  ;;  %v3959_v51 = vsel %vm3958_vm10, %v8999_v7, %v3955_v42  ;;  %9002 = vrcp.f32 %v11667_v10 }
 0x2d4   : > { %v8257_v19 = vclamps-f32 %v3805_v14, 1.0  ;;  %v3964_v59 = vsel %vm11648_vm5, %v3963_v53, %v3959_v51  ;;  %v3435_v62 = vadd.f32 %v9001_v9, %v3434_v57  ;;  %v3443_v32 = vor.u32 1.1754944e-38, %v3442_v28 }
 0x2d5   : > { %v4164_v22 = vpack.c.bf16 %v4140_v20, %v4136_v17  ;;  %v3965_v49 = vmul.f32 %v3964_v59, %v11583_v5  ;;  %v3468_v11 = vadd.f32 0.4994258, %v3467_v3  ;;  %v3821_v60 = vmul.f32 3.8918573e-05, %v11418_v39 }
 0x2d6   : > { %v11686_v6 = vadd.f32 1.1283791, %v11602_v24  ;;  %v3439_v7 = vsel %vm3438_vm11, %v9001_v9, %v3435_v62  ;;  %vm3441_vm12 = vcmp.eq.f32.partialorder %v3440_v15, 8.507059e+37  ;;  %v3626_v26 = vadd.f32 0.112945676, %v3625_v21 }
 0x2d7   : > { %5072 = vmatpush.bf16.msrb.mxu0 %v4164_v22  ;;  %v8261_v53 = vclamps-f32 %v3965_v49, 1.0  ;;  %v4089_v2 = vadd.f32 1.0, %v8257_v19  ;;  %v3444_v28 = vsel %vm3441_vm12, %v3443_v32, %v3439_v7  ;;  %v3469_v35 = vmul.f32 %v3468_v11, %v11231_v34 }
 0x2d8   : > { %v3445_v5 = vmul.f32 %v3444_v28, %v11399_v16  ;;  %vm3596_vm13 = vweird.f32 %v11667_v10  ;;  %v3600_v43 = vand.u32 2147483647, %v11667_v10  ;;  %v3627_v52 = vmul.f32 %v3626_v26, %v11300_v55 }
 0x2d9   : > { %v9003_v8 = vpop.eup %9002  ;;  %v4093_v24 = vadd.f32 1.0, %v8261_v53  ;;  %v11693_v44 = vadd.f32 1.0, %v3469_v35  ;;  %v3822_v15 = vadd.f32 0.001143296, %v3821_v60  ;;  %v3981_v9 = vmul.f32 3.8918573e-05, %v11498_v38 }
 0x2da   : > { %v8248_v23 = vclamps-f32 %v3445_v5, 1.0  ;;  %v3592_v56 = vmul.f32 %v9003_v8, %v11667_v10  ;;  %v3602_v34 = vand.u32 2147483648, %v11667_v10  ;;  %v3628_v48 = vadd.f32 0.4994258, %v3627_v52 }
 0x2db   : > { %v4137_v16 = vmul.f32 %v4089_v2, %v11456_v25  ;;  %v4141_v0 = vmul.f32 %v4093_v24, %v11510_v13  ;;  %9004 = vrcp.f32 %v11693_v44  ;;  %v3861_v29 = vmul.f32 3.8918573e-05, %v11432_v1 }
 0x2dc   : > { %v3593_v54 = vsub.f32 1.0, %v3592_v56  ;;  %vm3597_vm14 = vweird.f32 %v9003_v8  ;;  %vm11702_vm15 = vcmp.eq.f32.partialorder %v3600_v43, 8.507059e+37  ;;  %v3629_v14 = vmul.f32 %v3628_v48, %v11300_v55 }
 0x2dd   : > { %v4165_v57 = vpack.c.bf16 %v4141_v0, %v4137_v16  ;;  %v4080_v3 = vadd.f32 1.0, %v8248_v23  ;;  %v3823_v21 = vmul.f32 %v3822_v15, %v11418_v39  ;;  %v3982_v17 = vadd.f32 0.001143296, %v3981_v9  ;;  %vm3598_vm2 = vmor %vm3596_vm13, %vm3597_vm14 }
 0x2de   : > { %v3594_v25 = vmul.f32 %v9003_v8, %v3593_v54  ;;  %v3480_v13 = vand.u32 2147483647, %v11693_v44  ;;  %v3482_v20 = vand.u32 2147483648, %v11693_v44  ;;  %v11710_v51 = vadd.f32 1.0, %v3629_v14 }
 0x2df   : > { %5285 = vmatpush.bf16.msrb.mxu1 %v4165_v57  ;;  %v3603_v19 = vor.u32 1.1754944e-38, %v3602_v34  ;;  %v3824_v59 = vadd.f32 0.014752088, %v3823_v21  ;;  %v3983_v62 = vmul.f32 %v3982_v17, %v11498_v38  ;;  %v3862_v32 = vadd.f32 0.001143296, %v3861_v29 }
 0x2e0   : > { %v3595_v22 = vadd.f32 %v9003_v8, %v3594_v25  ;;  %vm3476_vm1 = vweird.f32 %v11693_v44  ;;  %9006 = vrcp.f32 %v11710_v51  ;;  %v4021_v55 = vmul.f32 3.8918573e-05, %v11512_v40 }
 0x2e1   : > { %v9005_v49 = vpop.eup %9004  ;;  %v4128_v11 = vmul.f32 %v4080_v3, %v11259_v30  ;;  %v3825_v60 = vmul.f32 %v3824_v59, %v11418_v39  ;;  %v3984_v7 = vadd.f32 0.014752088, %v3983_v62  ;;  %v3863_v26 = vmul.f32 %v3862_v32, %v11432_v1 }
 0x2e2   : > { %v3599_v53 = vsel %vm3598_vm2, %v9003_v8, %v3595_v22  ;;  %v3472_v2 = vmul.f32 %v9005_v49, %v11693_v44  ;;  %vm11723_vm0 = vcmp.eq.f32.partialorder %v3480_v13, 8.507059e+37  ;;  %v3483_v35 = vor.u32 1.1754944e-38, %v3482_v20 }
 0x2e3   : > { %v3640_v5 = vand.u32 2147483647, %v11710_v51  ;;  %v3604_v10 = vsel %vm11702_vm15, %v3603_v19, %v3599_v53  ;;  %v3642_v30 = vand.u32 2147483648, %v11710_v51  ;;  %v3826_v43 = vadd.f32 0.112945676, %v3825_v60 }
 0x2e4   : > { %v3985_v52 = vmul.f32 %v3984_v7, %v11498_v38  ;;  %v3605_v24 = vmul.f32 %v3604_v10, %v11473_v33  ;;  %v3473_v8 = vsub.f32 1.0, %v3472_v2  ;;  %v3864_v15 = vadd.f32 0.014752088, %v3863_v26 }
 0x2e5   : > { %v4022_v9 = vadd.f32 0.001143296, %v4021_v55  ;;  %vm3477_vm3 = vweird.f32 %v9005_v49  ;;  %v3827_v23 = vmul.f32 %v3826_v43, %v11418_v39  ;;  %v3101_v34 = vmul.f32 3.8918573e-05, %v11048_v61 }
 0x2e6   : > { %v3986_v56 = vadd.f32 0.112945676, %v3985_v52  ;;  %v9007_v48 = vpop.eup %9006  ;;  %v8252_v16 = vclamps-f32 %v3605_v24, 1.0  ;;  %v3474_v0 = vmul.f32 %v9005_v49, %v3473_v8  ;;  %v3865_v29 = vmul.f32 %v3864_v15, %v11432_v1  ;;  %vm3478_vm5 = vmor %vm3476_vm1, %vm3477_vm3 }
 0x2e7   : > { %v4023_v54 = vmul.f32 %v4022_v9, %v11512_v40  ;;  %v3632_v42 = vmul.f32 %v9007_v48, %v11710_v51  ;;  %vm3637_vm4 = vweird.f32 %v9007_v48  ;;  %v3828_v33 = vadd.f32 0.4994258, %v3827_v23 }
 0x2e8   : > { %v3987_v14 = vmul.f32 %v3986_v56, %v11498_v38  ;;  %v4084_v57 = vadd.f32 1.0, %v8252_v16  ;;  %v3475_v3 = vadd.f32 %v9005_v49, %v3474_v0  ;;  %v3866_v21 = vadd.f32 0.112945676, %v3865_v29 }
 0x2e9   : > { %v4024_v17 = vadd.f32 0.014752088, %v4023_v54  ;;  %v3633_v25 = vsub.f32 1.0, %v3632_v42  ;;  %v3829_v13 = vmul.f32 %v3828_v33, %v11418_v39  ;;  %v3102_v19 = vadd.f32 0.001143296, %v3101_v34 }
 0x2ea   : > { %v3988_v20 = vadd.f32 0.4994258, %v3987_v14  ;;  %v4132_v59 = vmul.f32 %v4084_v57, %v11345_v4  ;;  %v3479_v62 = vsel %vm3478_vm5, %v9005_v49, %v3475_v3  ;;  %v3867_v32 = vmul.f32 %v3866_v21, %v11432_v1  ;;  %v16070_v57 = vld [vmem:[#allocation113_spill] sm:$0xff] }
 0x2eb   : > { %v4025_v22 = vmul.f32 %v4024_v17, %v11512_v40  ;;  %v3484_v55 = vsel %vm11723_vm0, %v3483_v35, %v3479_v62  ;;  %v3634_v60 = vmul.f32 %v9007_v48, %v3633_v25  ;;  %v11748_v7 = vadd.f32 1.0, %v3829_v13 }
 0x2ec   : > { %v3989_v44 = vmul.f32 %v3988_v20, %v11498_v38  ;;  %v4160_v26 = vpack.c.bf16 %v4132_v59, %v4128_v11  ;;  %v3485_v39 = vmul.f32 %v3484_v55, %v11402_v37  ;;  %v3868_v53 = vadd.f32 0.4994258, %v3867_v32 }
 0x2ed   : > { %v4026_v2 = vadd.f32 0.112945676, %v4025_v22  ;;  %v3635_v10 = vadd.f32 %v9007_v48, %v3634_v60  ;;  %vm3636_vm9 = vweird.f32 %v11710_v51  ;;  %vm3641_vm7 = vcmp.eq.f32.partialorder %v3640_v5, 8.507059e+37 }
 0x2ee   : > { %9008 = vrcp.f32 %v11748_v7  ;;  %5073 = vmatpush.bf16.msrb.mxu0 %v4160_v26  ;;  %v8249_v4 = vclamps-f32 %v3485_v39, 1.0  ;;  %vm3638_vm8 = vmor %vm3636_vm9, %vm3637_vm4  ;;  %v3643_v49 = vor.u32 1.1754944e-38, %v3642_v30  ;;  %v11755_v28 = vadd.f32 1.0, %v3989_v44 }
 0x2ef   : > { %v3869_v38 = vmul.f32 %v3868_v53, %v11432_v1  ;;  %v3639_v11 = vsel %vm3638_vm8, %v9007_v48, %v3635_v10  ;;  %v4027_v37 = vmul.f32 %v4026_v2, %v11512_v40  ;;  %v3103_v35 = vmul.f32 %v3102_v19, %v11048_v61 }
 0x2f0   : > { %v3261_v43 = vmul.f32 3.8918573e-05, %v11107_v45  ;;  %v3644_v51 = vsel %vm3641_vm7, %v3643_v49, %v3639_v11  ;;  %v3840_v5 = vand.u32 2147483647, %v11748_v7  ;;  %v3842_v52 = vand.u32 2147483648, %v11748_v7 }
 0x2f1   : > { %9010 = vrcp.f32 %v11755_v28  ;;  %v11766_v30 = vmul.f32 %v11573_v46, %v11412_v41  ;;  %v11770_v1 = vmul.f32 %v11593_v36, %v11481_v47  ;;  %v3645_v24 = vmul.f32 %v3644_v51, %v11524_v12 }
 0x2f2   : > { %v4081_v8 = vadd.f32 1.0, %v8249_v4  ;;  %v11775_v15 = vmul.f32 %v11686_v6, %v11495_v50  ;;  %v11777_v9 = vadd.f32 1.0, %v3869_v38  ;;  %v4028_v23 = vadd.f32 0.4994258, %v4027_v37 }
 0x2f3   : > { %v3104_v56 = vadd.f32 0.014752088, %v3103_v35  ;;  %v8253_v48 = vclamps-f32 %v3645_v24, 1.0  ;;  %vm3836_vm6 = vweird.f32 %v11748_v7  ;;  %v4000_v41 = vand.u32 2147483647, %v11755_v28 }
 0x2f4   : > { %v9009_v34 = vpop.eup %9008  ;;  %v3262_v46 = vadd.f32 0.001143296, %v3261_v43  ;;  %vm11782_vm10 = vcmp.eq.f32.partialorder %v3840_v5, 8.507059e+37  ;;  %v3843_v36 = vor.u32 1.1754944e-38, %v3842_v52  ;;  %9012 = vrcp.f32 %v11777_v9  ;;  %v16075_v52 = vld [vmem:[#allocation83_spill] sm:$0xff] }
 0x2f5   : > { %v3832_v47 = vmul.f32 %v9009_v34, %v11748_v7  ;;  %v4085_v50 = vadd.f32 1.0, %v8253_v48  ;;  %v4129_v6 = vmul.f32 %v4081_v8, %v11298_v18  ;;  %vm3996_vm11 = vweird.f32 %v11755_v28 }
 0x2f6   : > { %v4002_v16 = vand.u32 2147483648, %v11755_v28  ;;  %v4029_v0 = vmul.f32 %v4028_v23, %v11512_v40  ;;  %v3105_v42 = vmul.f32 %v3104_v56, %v11048_v61  ;;  %v3263_v33 = vmul.f32 %v3262_v46, %v11107_v45 }
 0x2f7   : > { %v9011_v29 = vpop.eup %9010  ;;  %v3833_v54 = vsub.f32 1.0, %v3832_v47  ;;  %v3141_v14 = vmul.f32 3.8918573e-05, %v11054_v31  ;;  %v4133_v3 = vmul.f32 %v4085_v50, %v16070_v57  ;;  %vm3837_vm12 = vweird.f32 %v9009_v34 }
 0x2f8   : > { %v3992_v21 = vmul.f32 %v9011_v29, %v11755_v28  ;;  %vm11796_vm13 = vcmp.eq.f32.partialorder %v4000_v41, 8.507059e+37  ;;  %v3880_v40 = vand.u32 2147483647, %v11777_v9  ;;  %v11801_v25 = vadd.f32 1.0, %v4029_v0  ;;  %vm3838_vm14 = vmor %vm3836_vm6, %vm3837_vm12 }
 0x2f9   : > { %v3834_v17 = vmul.f32 %v9009_v34, %v3833_v54  ;;  %v3106_v13 = vadd.f32 0.112945676, %v3105_v42  ;;  %v4161_v20 = vpack.c.bf16 %v4133_v3, %v4129_v6  ;;  %v3882_v59 = vand.u32 2147483648, %v11777_v9  ;;  %v16076_v54 = vld [vmem:[#allocation101_spill] sm:$0xff] }
 0x2fa   : > { %v3993_v19 = vsub.f32 1.0, %v3992_v21  ;;  %v3264_v62 = vadd.f32 0.014752088, %v3263_v33  ;;  %v9013_v32 = vpop.eup %9012  ;;  %v4003_v55 = vor.u32 1.1754944e-38, %v4002_v16  ;;  %9014 = vrcp.f32 %v11801_v25 }
 0x2fb   : > { %v3835_v22 = vadd.f32 %v9009_v34, %v3834_v17  ;;  %v3142_v60 = vadd.f32 0.001143296, %v3141_v14  ;;  %5286 = vmatpush.bf16.msrb.mxu1 %v4161_v20  ;;  %vm3997_vm15 = vweird.f32 %v9011_v29  ;;  %v3872_v26 = vmul.f32 %v9013_v32, %v11777_v9  ;;  %v16077_v17 = vld [vmem:[#allocation118_spill] sm:$0xff] }
 0x2fc   : > { %v3994_v44 = vmul.f32 %v9011_v29, %v3993_v19  ;;  %vm3876_vm1 = vweird.f32 %v11777_v9  ;;  %vm11810_vm2 = vcmp.eq.f32.partialorder %v3880_v40, 8.507059e+37  ;;  %v3107_v2 = vmul.f32 %v3106_v13, %v11048_v61  ;;  %vm3998_vm0 = vmor %vm3996_vm11, %vm3997_vm15  ;;  %v16078_v13 = vld [vmem:[#allocation121_spill] sm:$0xff] }
 0x2fd   : > { %v3839_v39 = vsel %vm3838_vm14, %v9009_v34, %v3835_v22  ;;  %v3265_v10 = vmul.f32 %v3264_v62, %v11107_v45  ;;  %v3873_v49 = vsub.f32 1.0, %v3872_v26  ;;  %v3883_v38 = vor.u32 1.1754944e-38, %v3882_v59 }
 0x2fe   : > { %v3844_v4 = vsel %vm11782_vm10, %v3843_v36, %v3839_v39  ;;  %v3995_v7 = vadd.f32 %v9011_v29, %v3994_v44  ;;  %v3108_v37 = vadd.f32 0.4994258, %v3107_v2  ;;  %v3143_v43 = vmul.f32 %v3142_v60, %v11054_v31  ;;  %v16079_v2 = vld [vmem:[#allocation119_spill] sm:$0xff] }
 0x2ff   : > { %v3845_v11 = vmul.f32 %v3844_v4, %v11569_v58  ;;  %v3266_v35 = vadd.f32 0.112945676, %v3265_v10  ;;  %v3874_v5 = vmul.f32 %v9013_v32, %v3873_v49  ;;  %vm3877_vm3 = vweird.f32 %v9013_v32 }
 0x300   : > { %v3999_v51 = vsel %vm3998_vm0, %v9011_v29, %v3995_v7  ;;  %vm4036_vm4 = vweird.f32 %v11801_v25  ;;  %v3301_v24 = vmul.f32 3.8918573e-05, %v16075_v52  ;;  %v9015_v8 = vpop.eup %9014  ;;  %v3109_v58 = vmul.f32 %v3108_v37, %v11048_v61  ;;  %vm3878_vm5 = vmor %vm3876_vm1, %vm3877_vm3 }
 0x301   : > { %v8258_v23 = vclamps-f32 %v3845_v11, 1.0  ;;  %v4004_v56 = vsel %vm11796_vm13, %v4003_v55, %v3999_v51  ;;  %v3267_v28 = vmul.f32 %v3266_v35, %v11107_v45  ;;  %v3875_v48 = vadd.f32 %v9013_v32, %v3874_v5 }
 0x302   : > { %v4005_v34 = vmul.f32 %v4004_v56, %v11770_v1  ;;  %v4032_v41 = vmul.f32 %v9015_v8, %v11801_v25  ;;  %v4042_v46 = vand.u32 2147483648, %v11801_v25  ;;  %v11833_v12 = vadd.f32 1.0, %v3109_v58 }
 0x303   : > { %v4090_v47 = vadd.f32 1.0, %v8258_v23  ;;  %v3268_v36 = vadd.f32 0.4994258, %v3267_v28  ;;  %v3144_v50 = vadd.f32 0.014752088, %v3143_v43  ;;  %v3879_v16 = vsel %vm3878_vm5, %v9013_v32, %v3875_v48  ;;  %v16082_v43 = vld [vmem:[#allocation106_spill] sm:$0xff] }
 0x304   : > { %v8262_v6 = vclamps-f32 %v4005_v34, 1.0  ;;  %v4033_v61 = vsub.f32 1.0, %v4032_v41  ;;  %v3302_v0 = vadd.f32 0.001143296, %v3301_v24  ;;  %v3884_v1 = vsel %vm11810_vm2, %v3883_v38, %v3879_v16 }
 0x305   : > { %v4040_v29 = vand.u32 2147483647, %v11801_v25  ;;  %9016 = vrcp.f32 %v11833_v12  ;;  %v3501_v42 = vmul.f32 3.8918573e-05, %v16076_v54  ;;  %v3885_v9 = vmul.f32 %v3884_v1, %v11766_v30 }
 0x306   : > { %v4094_v33 = vadd.f32 1.0, %v8262_v6  ;;  %v4034_v14 = vmul.f32 %v9015_v8, %v4033_v61  ;;  %vm4037_vm9 = vweird.f32 %v9015_v8  ;;  %v4043_v57 = vor.u32 1.1754944e-38, %v4042_v46  ;;  %v16083_v46 = vld [vmem:[#allocation102_spill] sm:$0xff] }
 0x307   : > { %v3269_v3 = vmul.f32 %v3268_v36, %v11107_v45  ;;  %v3145_v21 = vmul.f32 %v3144_v50, %v11054_v31  ;;  %v3303_v18 = vmul.f32 %v3302_v0, %v16075_v52  ;;  %v4138_v40 = vmul.f32 %v4090_v47, %v16077_v17  ;;  %vm4038_vm7 = vmor %vm4036_vm4, %vm4037_vm9  ;;  %v16084_v36 = vld [vmem:[#allocation120_spill] sm:$0xff] }
 0x308   : > { %v4142_v20 = vmul.f32 %v4094_v33, %v16078_v13  ;;  %v4035_v19 = vadd.f32 %v9015_v8, %v4034_v14  ;;  %v3120_v59 = vand.u32 2147483647, %v11833_v12  ;;  %v8259_v62 = vclamps-f32 %v3885_v9, 1.0 }
 0x309   : > { %v11849_v30 = vadd.f32 1.0, %v3269_v3  ;;  %v3146_v32 = vadd.f32 0.112945676, %v3145_v21  ;;  %v3304_v22 = vadd.f32 0.014752088, %v3303_v18  ;;  %vm4041_vm8 = vcmp.eq.f32.partialorder %v4040_v29, 8.507059e+37 }
 0x30a   : > { %v4166_v45 = vpack.c.bf16 %v4142_v20, %v4138_v40  ;;  %v4039_v55 = vsel %vm4038_vm7, %v9015_v8, %v4035_v19  ;;  %v3502_v60 = vadd.f32 0.001143296, %v3501_v42  ;;  %v11852_v26 = vadd.f32 1.1283791, %v11557_v63  ;;  %v16085_v21 = vld [vmem:[#allocation99_spill] sm:$0xff] }
 0x30b   : > { %v9017_v44 = vpop.eup %9016  ;;  %v4044_v39 = vsel %vm4041_vm8, %v4043_v57, %v4039_v55  ;;  %v3122_v53 = vand.u32 2147483648, %v11833_v12  ;;  %9018 = vrcp.f32 %v11849_v30  ;;  %v2079_v25 = vmul.f32 0.5, %v16079_v2 }
 0x30c   : > { %5498 = vmatpush.bf16.msrb.mxu2 %v4166_v45  ;;  %v4045_v10 = vmul.f32 %v4044_v39, %v11775_v15  ;;  %v3112_v4 = vmul.f32 %v9017_v44, %v11833_v12  ;;  %vm3116_vm6 = vweird.f32 %v11833_v12  ;;  %v4091_v7 = vadd.f32 1.0, %v8259_v62 }
 0x30d   : > { %vm11860_vm10 = vcmp.eq.f32.partialorder %v3120_v59, 8.507059e+37  ;;  %v3147_v63 = vmul.f32 %v3146_v32, %v11054_v31  ;;  %v3305_v38 = vmul.f32 %v3304_v22, %v16075_v52  ;;  %v3503_v35 = vmul.f32 %v3502_v60, %v16076_v54 }
 0x30e   : > { %v8263_v11 = vclamps-f32 %v4045_v10, 1.0  ;;  %v3113_v37 = vsub.f32 1.0, %v3112_v4  ;;  %v3661_v51 = vmul.f32 3.8918573e-05, %v16082_v43  ;;  %vm3117_vm11 = vweird.f32 %v9017_v44 }
 0x30f   : > { %v3123_v15 = vor.u32 1.1754944e-38, %v3122_v53  ;;  %v3148_v5 = vadd.f32 0.4994258, %v3147_v63  ;;  %v3306_v24 = vadd.f32 0.112945676, %v3305_v38  ;;  %v4139_v50 = vmul.f32 %v4091_v7, %v16084_v36  ;;  %vm3118_vm12 = vmor %vm3116_vm6, %vm3117_vm11  ;;  %v16086_v53 = vld [vmem:[#allocation111_spill] sm:$0xff] }
 0x310   : > { %v4095_v8 = vadd.f32 1.0, %v8263_v11  ;;  %v3114_v23 = vmul.f32 %v9017_v44, %v3113_v37  ;;  %v3504_v56 = vadd.f32 0.014752088, %v3503_v35  ;;  %v3662_v58 = vadd.f32 0.001143296, %v3661_v51  ;;  %v16087_v7 = vld [vmem:[#allocation107_spill] sm:$0xff] }
 0x311   : > { %v9019_v28 = vpop.eup %9018  ;;  %v3280_v34 = vand.u32 2147483647, %v11849_v30  ;;  %v3149_v48 = vmul.f32 %v3148_v5, %v11054_v31  ;;  %v3307_v41 = vmul.f32 %v3306_v24, %v16075_v52  ;;  %v3541_v47 = vmul.f32 3.8918573e-05, %v16083_v46  ;;  %v16090_v36 = vld [vmem:[#allocation82_spill] sm:$0xff] }
 0x312   : > { %v4143_v6 = vmul.f32 %v4095_v8, %v2079_v25  ;;  %v3115_v16 = vadd.f32 %v9017_v44, %v3114_v23  ;;  %v3272_v61 = vmul.f32 %v9019_v28, %v11849_v30  ;;  %v3505_v29 = vmul.f32 %v3504_v56, %v16076_v54 }
 0x313   : > { %v11877_v0 = vadd.f32 1.0, %v3149_v48  ;;  %v3308_v1 = vadd.f32 0.4994258, %v3307_v41  ;;  %v3663_v31 = vmul.f32 %v3662_v58, %v16082_v43  ;;  %v3542_v14 = vadd.f32 0.001143296, %v3541_v47 }
 0x314   : > { %v4167_v42 = vpack.c.bf16 %v4143_v6, %v4139_v50  ;;  %v3119_v33 = vsel %vm3118_vm12, %v9017_v44, %v3115_v16  ;;  %v3273_v9 = vsub.f32 1.0, %v3272_v61  ;;  %v3282_v3 = vand.u32 2147483648, %v11849_v30  ;;  %v16091_v6 = vld [vmem:[#allocation91_spill] sm:$0xff] }
 0x315   : > { %v3124_v57 = vsel %vm11860_vm10, %v3123_v15, %v3119_v33  ;;  %9020 = vrcp.f32 %v11877_v0  ;;  %v3701_v12 = vmul.f32 3.8918573e-05, %v11360_v27  ;;  %vm3277_vm13 = vweird.f32 %v9019_v28 }
 0x316   : > { %5711 = vmatpush.bf16.msrb.mxu3 %v4167_v42  ;;  %v3125_v18 = vmul.f32 %v3124_v57, %v16085_v21  ;;  %v3274_v17 = vmul.f32 %v9019_v28, %v3273_v9  ;;  %v3309_v40 = vmul.f32 %v3308_v1, %v16075_v52  ;;  %vm3276_vm14 = vweird.f32 %v11849_v30  ;;  %v16094_v57 = vld [vmem:[#allocation48_spill] sm:$0xff] }
 0x317   : > { %v3506_v13 = vadd.f32 0.112945676, %v3505_v29  ;;  %v3664_v20 = vadd.f32 0.014752088, %v3663_v31  ;;  %v3543_v19 = vmul.f32 %v3542_v14, %v16083_v46  ;;  %vm3281_vm15 = vcmp.eq.f32.partialorder %v3280_v34, 8.507059e+37  ;;  %vm3278_vm1 = vmor %vm3276_vm14, %vm3277_vm13 }
 0x318   : > { %v3275_v59 = vadd.f32 %v9019_v28, %v3274_v17  ;;  %v3160_v62 = vand.u32 2147483647, %v11877_v0  ;;  %v11891_v32 = vadd.f32 1.0, %v3309_v40  ;;  %v8240_v22 = vclamps-f32 %v3125_v18, 1.0 }
 0x319   : > { %v3283_v45 = vor.u32 1.1754944e-38, %v3282_v3  ;;  %v3507_v55 = vmul.f32 %v3506_v13, %v16076_v54  ;;  %v3665_v60 = vmul.f32 %v3664_v20, %v16082_v43  ;;  %v3544_v30 = vadd.f32 0.014752088, %v3543_v19  ;;  %v16096_v19 = vld [vmem:[#allocation57_spill] sm:$0xff] }
 0x31a   : > { %v3279_v52 = vsel %vm3278_vm1, %v9019_v28, %v3275_v59  ;;  %9022 = vrcp.f32 %v11891_v32  ;;  %v3702_v44 = vadd.f32 0.001143296, %v3701_v12  ;;  %v11898_v2 = vmul.f32 %v11852_v26, %v16086_v53 }
 0x31b   : > { %v9021_v39 = vpop.eup %9020  ;;  %v3284_v25 = vsel %vm3281_vm15, %v3283_v45, %v3279_v52  ;;  %v3162_v10 = vand.u32 2147483648, %v11877_v0  ;;  %v3508_v4 = vadd.f32 0.4994258, %v3507_v55  ;;  %vm3156_vm2 = vweird.f32 %v11877_v0 }
 0x31c   : > { %v3285_v49 = vmul.f32 %v3284_v25, %v16087_v7  ;;  %v3152_v63 = vmul.f32 %v9021_v39, %v11877_v0  ;;  %vm11904_vm0 = vcmp.eq.f32.partialorder %v3160_v62, 8.507059e+37  ;;  %v4072_v11 = vadd.f32 1.0, %v8240_v22  ;;  %v16095_v0 = vld [vmem:[#allocation100_spill] sm:$0xff]  ;;  %v16098_v7 = vld [vmem:[#allocation109_spill] sm:$0xff] }
 0x31d   : > { %v3320_v37 = vand.u32 2147483647, %v11891_v32  ;;  %v3509_v26 = vmul.f32 %v3508_v4, %v16076_v54  ;;  %v3666_v35 = vadd.f32 0.112945676, %v3665_v60  ;;  %v3545_v5 = vmul.f32 %v3544_v30, %v16083_v46  ;;  %v16097_v4 = vld [vmem:[#allocation49_spill] sm:$0xff] }
 0x31e   : > { %v8244_v51 = vclamps-f32 %v3285_v49, 1.0  ;;  %v3153_v15 = vsub.f32 1.0, %v3152_v63  ;;  %v3703_v24 = vmul.f32 %v3702_v44, %v11360_v27  ;;  %vm3157_vm3 = vweird.f32 %v9021_v39 }
 0x31f   : > { %v3163_v8 = vor.u32 1.1754944e-38, %v3162_v10  ;;  %v11912_v23 = vadd.f32 1.0, %v3509_v26  ;;  %v3667_v56 = vmul.f32 %v3666_v35, %v16082_v43  ;;  %v3546_v48 = vadd.f32 0.112945676, %v3545_v5  ;;  %vm3158_vm9 = vmor %vm3156_vm2, %vm3157_vm3 }
 0x320   : > { %v9023_v58 = vpop.eup %9022  ;;  %v4076_v28 = vadd.f32 1.0, %v8244_v51  ;;  %v3154_v34 = vmul.f32 %v9021_v39, %v3153_v15  ;;  %v3704_v41 = vadd.f32 0.014752088, %v3703_v24  ;;  %vm3316_vm4 = vweird.f32 %v11891_v32 }
 0x321   : > { %v3312_v54 = vmul.f32 %v9023_v58, %v11891_v32  ;;  %v3322_v47 = vand.u32 2147483648, %v11891_v32  ;;  %9024 = vrcp.f32 %v11912_v23  ;;  %v4120_v50 = vmul.f32 %v4072_v11, %v16090_v36 }
 0x322   : > { %v4124_v16 = vmul.f32 %v4076_v28, %v16091_v6  ;;  %v3155_v61 = vadd.f32 %v9021_v39, %v3154_v34  ;;  %vm11921_vm5 = vcmp.eq.f32.partialorder %v3320_v37, 8.507059e+37  ;;  %v3668_v31 = vadd.f32 0.4994258, %v3667_v56  ;;  %v16111_v6 = vld [vmem:[#allocation108_spill] sm:$0xff] }
 0x323   : > { %v3313_v29 = vsub.f32 1.0, %v3312_v54  ;;  %v3547_v42 = vmul.f32 %v3546_v48, %v16083_v46  ;;  %v3705_v33 = vmul.f32 %v3704_v41, %v11360_v27  ;;  %vm3317_vm7 = vweird.f32 %v9023_v58  ;;  %v16101_v48 = vld [vmem:[#allocation84_spill] sm:$0xff] }
 0x324   : > { %v4156_v9 = vpack.c.bf16 %v4124_v16, %v4120_v50  ;;  %v3159_v14 = vsel %vm3158_vm9, %v9021_v39, %v3155_v61  ;;  %v2781_v3 = vmul.f32 3.8918573e-05, %v16094_v57  ;;  %v3669_v18 = vmul.f32 %v3668_v31, %v16082_v43  ;;  %vm3318_vm6 = vmor %vm3316_vm4, %vm3317_vm7  ;;  %v16104_v61 = vld [vmem:[#allocation95_spill] sm:$0xff] }
 0x325   : > { %v3164_v12 = vsel %vm11904_vm0, %v3163_v8, %v3159_v14  ;;  %v3314_v21 = vmul.f32 %v9023_v58, %v3313_v29  ;;  %v3548_v17 = vadd.f32 0.4994258, %v3547_v42  ;;  %v3323_v13 = vor.u32 1.1754944e-38, %v3322_v47  ;;  %v16105_v42 = vld [vmem:[#allocation116_spill] sm:$0xff] }
 0x326   : > { %5074 = vmatpush.bf16.msrb.mxu0 %v4156_v9  ;;  %v3165_v40 = vmul.f32 %v3164_v12, %v16095_v0  ;;  %v3706_v20 = vadd.f32 0.112945676, %v3705_v33  ;;  %v2941_v59 = vmul.f32 3.8918573e-05, %v16096_v19  ;;  %vm3516_vm8 = vweird.f32 %v11912_v23 }
 0x327   : > { %v9025_v62 = vpop.eup %9024  ;;  %v3315_v22 = vadd.f32 %v9023_v58, %v3314_v21  ;;  %v11937_v45 = vadd.f32 1.0, %v3669_v18  ;;  %v3549_v55 = vmul.f32 %v3548_v17, %v16083_v46  ;;  %v2782_v30 = vadd.f32 0.001143296, %v2781_v3 }
 0x328   : > { %v8241_v60 = vclamps-f32 %v3165_v40, 1.0  ;;  %v3512_v43 = vmul.f32 %v9025_v62, %v11912_v23  ;;  %v3707_v52 = vmul.f32 %v3706_v20, %v11360_v27  ;;  %v3520_v39 = vand.u32 2147483647, %v11912_v23  ;;  %v16117_v40 = vld [vmem:[#allocation114_spill] sm:$0xff] }
 0x329   : > { %v3319_v44 = vsel %vm3318_vm6, %v9023_v58, %v3315_v22  ;;  %v3522_v53 = vand.u32 2147483648, %v11912_v23  ;;  %9026 = vrcp.f32 %v11937_v45  ;;  %v2942_v10 = vadd.f32 0.001143296, %v2941_v59 }
 0x32a   : > { %v3324_v46 = vsel %vm11921_vm5, %v3323_v13, %v3319_v44  ;;  %v3513_v25 = vsub.f32 1.0, %v3512_v43  ;;  %v2821_v32 = vmul.f32 3.8918573e-05, %v16097_v4  ;;  %v4073_v63 = vadd.f32 1.0, %v8241_v60  ;;  %v16108_v44 = vld [vmem:[#allocation60_spill] sm:$0xff] }
 0x32b   : > { %v3325_v49 = vmul.f32 %v3324_v46, %v16098_v7  ;;  %v11952_v38 = vadd.f32 1.0, %v3549_v55  ;;  %v3708_v11 = vadd.f32 0.4994258, %v3707_v52  ;;  %vm3517_vm10 = vweird.f32 %v9025_v62 }
 0x32c   : > { %v3514_v37 = vmul.f32 %v9025_v62, %v3513_v25  ;;  %v3680_v26 = vand.u32 2147483647, %v11937_v45  ;;  %v2783_v35 = vmul.f32 %v2782_v30, %v16094_v57  ;;  %vm11956_vm11 = vcmp.eq.f32.partialorder %v3520_v39, 8.507059e+37  ;;  %vm3518_vm13 = vmor %vm3516_vm8, %vm3517_vm10 }
 0x32d   : > { %v8245_v51 = vclamps-f32 %v3325_v49, 1.0  ;;  %v3523_v5 = vor.u32 1.1754944e-38, %v3522_v53  ;;  %9028 = vrcp.f32 %v11952_v38  ;;  %vm3676_vm12 = vweird.f32 %v11937_v45 }
 0x32e   : > { %v3515_v24 = vadd.f32 %v9025_v62, %v3514_v37  ;;  %v3682_v8 = vand.u32 2147483648, %v11937_v45  ;;  %v3709_v56 = vmul.f32 %v3708_v11, %v11360_v27  ;;  %v2784_v58 = vadd.f32 0.014752088, %v2783_v35  ;;  %v16109_v11 = vld [vmem:[#allocation122_spill] sm:$0xff] }
 0x32f   : > { %v9027_v28 = vpop.eup %9026  ;;  %v4077_v34 = vadd.f32 1.0, %v8245_v51  ;;  %v4121_v41 = vmul.f32 %v4073_v63, %v16101_v48  ;;  %v2943_v54 = vmul.f32 %v2942_v10, %v16096_v19  ;;  %v2822_v47 = vadd.f32 0.001143296, %v2821_v32 }
 0x330   : > { %v3519_v36 = vsel %vm3518_vm13, %v9025_v62, %v3515_v24  ;;  %v3672_v50 = vmul.f32 %v9027_v28, %v11937_v45  ;;  %vm11970_vm14 = vcmp.eq.f32.partialorder %v3680_v26, 8.507059e+37  ;;  %v3560_v27 = vand.u32 2147483647, %v11952_v38 }
 0x331   : > { %v3562_v16 = vand.u32 2147483648, %v11952_v38  ;;  %v4125_v1 = vmul.f32 %v4077_v34, %v16104_v61  ;;  %v3524_v23 = vsel %vm11956_vm11, %v3523_v5, %v3519_v36  ;;  %v11979_v29 = vadd.f32 1.0, %v3709_v56 }
 0x332   : > { %v2785_v31 = vmul.f32 %v2784_v58, %v16094_v57  ;;  %v3525_v33 = vmul.f32 %v3524_v23, %v16105_v42  ;;  %v3673_v9 = vsub.f32 1.0, %v3672_v50  ;;  %v2944_v14 = vadd.f32 0.014752088, %v2943_v54 }
 0x333   : > { %v2823_v3 = vmul.f32 %v2822_v47, %v16097_v4  ;;  %v9029_v12 = vpop.eup %9028  ;;  %v4157_v21 = vpack.c.bf16 %v4125_v1, %v4121_v41  ;;  %v3683_v18 = vor.u32 1.1754944e-38, %v3682_v8  ;;  %vm3556_vm15 = vweird.f32 %v11952_v38  ;;  %v16110_v47 = vld [vmem:[#allocation117_spill] sm:$0xff]  ;;  %v16114_v1 = vld [vmem:[#allocation115_spill] sm:$0xff] }
 0x334   : > { %9030 = vrcp.f32 %v11979_v29  ;;  %v3674_v17 = vmul.f32 %v9027_v28, %v3673_v9  ;;  %vm3677_vm1 = vweird.f32 %v9027_v28  ;;  %v3552_v0 = vmul.f32 %v9029_v12, %v11952_v38 }
 0x335   : > { %vm11987_vm2 = vcmp.eq.f32.partialorder %v3560_v27, 8.507059e+37  ;;  %5287 = vmatpush.bf16.msrb.mxu1 %v4157_v21  ;;  %v3563_v13 = vor.u32 1.1754944e-38, %v3562_v16  ;;  %v3720_v20 = vand.u32 2147483647, %v11979_v29  ;;  %v2786_v59 = vadd.f32 0.112945676, %v2785_v31  ;;  %vm3678_vm0 = vmor %vm3676_vm12, %vm3677_vm1 }
 0x336   : > { %v2945_v62 = vmul.f32 %v2944_v14, %v16096_v19  ;;  %v8250_v22 = vclamps-f32 %v3525_v33, 1.0  ;;  %v3675_v55 = vadd.f32 %v9027_v28, %v3674_v17  ;;  %v3553_v60 = vsub.f32 1.0, %v3552_v0  ;;  %v16116_v0 = vld [vmem:[#allocation92_spill] sm:$0xff] }
 0x337   : > { %v2824_v43 = vadd.f32 0.014752088, %v2823_v3  ;;  %vm3557_vm3 = vweird.f32 %v9029_v12  ;;  %v2787_v52 = vmul.f32 %v2786_v59, %v16094_v57  ;;  %v2981_v39 = vmul.f32 3.8918573e-05, %v16108_v44  ;;  %v16115_v3 = vld [vmem:[#allocation76_spill] sm:$0xff] }
 0x338   : > { %v2946_v30 = vadd.f32 0.112945676, %v2945_v62  ;;  %v3679_v53 = vsel %vm3678_vm0, %v9027_v28, %v3675_v55  ;;  %v3554_v46 = vmul.f32 %v9029_v12, %v3553_v60  ;;  %vm3716_vm4 = vweird.f32 %v11979_v29  ;;  %vm3558_vm5 = vmor %vm3556_vm15, %vm3557_vm3 }
 0x339   : > { %v3722_v25 = vand.u32 2147483648, %v11979_v29  ;;  %v2825_v10 = vmul.f32 %v2824_v43, %v16097_v4  ;;  %v3684_v7 = vsel %vm11970_vm14, %v3683_v18, %v3679_v53  ;;  %v2788_v45 = vadd.f32 0.4994258, %v2787_v52  ;;  %v16119_v53 = vld [vmem:[#allocation88_spill] sm:$0xff] }
 0x33a   : > { %v9031_v32 = vpop.eup %9030  ;;  %v2947_v49 = vmul.f32 %v2946_v30, %v16096_v19  ;;  %v2982_v63 = vadd.f32 0.001143296, %v2981_v39  ;;  %v3685_v37 = vmul.f32 %v3684_v7, %v16109_v11  ;;  %v4082_v26 = vadd.f32 1.0, %v8250_v22 }
 0x33b   : > { %v3555_v35 = vadd.f32 %v9029_v12, %v3554_v46  ;;  %v3712_v51 = vmul.f32 %v9031_v32, %v11979_v29  ;;  %v2789_v15 = vmul.f32 %v2788_v45, %v16094_v57  ;;  %v2826_v24 = vadd.f32 0.112945676, %v2825_v10 }
 0x33c   : > { %v2948_v5 = vadd.f32 0.4994258, %v2947_v49  ;;  %v2983_v8 = vmul.f32 %v2982_v63, %v16108_v44  ;;  %v8254_v56 = vclamps-f32 %v3685_v37, 1.0  ;;  %vm3717_vm9 = vweird.f32 %v9031_v32  ;;  %v16122_v37 = vld [vmem:[#allocation110_spill] sm:$0xff] }
 0x33d   : > { %v3559_v58 = vsel %vm3558_vm5, %v9029_v12, %v3555_v35  ;;  %v3713_v28 = vsub.f32 1.0, %v3712_v51  ;;  %v12012_v48 = vadd.f32 1.0, %v2789_v15  ;;  %v2827_v38 = vmul.f32 %v2826_v24, %v16097_v4  ;;  %vm3718_vm8 = vmor %vm3716_vm4, %vm3717_vm9 }
 0x33e   : > { %v3564_v34 = vsel %vm11987_vm2, %v3563_v13, %v3559_v58  ;;  %v2949_v41 = vmul.f32 %v2948_v5, %v16096_v19  ;;  %v4086_v54 = vadd.f32 1.0, %v8254_v56  ;;  %v2984_v50 = vadd.f32 0.014752088, %v2983_v8 }
 0x33f   : > { %v3565_v57 = vmul.f32 %v3564_v34, %v16110_v47  ;;  %v3714_v36 = vmul.f32 %v9031_v32, %v3713_v28  ;;  %v4130_v27 = vmul.f32 %v4082_v26, %v16111_v6  ;;  %vm12018_vm7 = vcmp.eq.f32.partialorder %v3720_v20, 8.507059e+37  ;;  %v16118_v20 = vld [vmem:[#allocation105_spill] sm:$0xff] }
 0x340   : > { %v3723_v61 = vor.u32 1.1754944e-38, %v3722_v25  ;;  %9032 = vrcp.f32 %v12012_v48  ;;  %v4134_v23 = vmul.f32 %v4086_v54, %v16114_v1  ;;  %v12024_v42 = vadd.f32 1.0, %v2949_v41 }
 0x341   : > { %v8251_v31 = vclamps-f32 %v3565_v57, 1.0  ;;  %v3715_v19 = vadd.f32 %v9031_v32, %v3714_v36  ;;  %v2800_v33 = vand.u32 2147483647, %v12012_v48  ;;  %v2828_v9 = vadd.f32 0.4994258, %v2827_v38  ;;  %v16125_v38 = vld [vmem:[#allocation78_spill] sm:$0xff] }
 0x342   : > { %v2985_v14 = vmul.f32 %v2984_v50, %v16108_v44  ;;  %v3181_v12 = vmul.f32 3.8918573e-05, %v16115_v3  ;;  %v4162_v21 = vpack.c.bf16 %v4134_v23, %v4130_v27  ;;  %v2802_v17 = vand.u32 2147483648, %v12012_v48 }
 0x343   : > { %v3719_v18 = vsel %vm3718_vm8, %v9031_v32, %v3715_v19  ;;  %9034 = vrcp.f32 %v12024_v42  ;;  %v12036_v13 = vmul.f32 %v16117_v40, %v16116_v0  ;;  %v2071_v29 = vmul.f32 0.5, %v16118_v20 }
 0x344   : > { %v3724_v59 = vsel %vm12018_vm7, %v3723_v61, %v3719_v18  ;;  %v4083_v62 = vadd.f32 1.0, %v8251_v31  ;;  %5499 = vmatpush.bf16.msrb.mxu2 %v4162_v21  ;;  %v2960_v55 = vand.u32 2147483647, %v12024_v42  ;;  %v2829_v60 = vmul.f32 %v2828_v9, %v16097_v4  ;;  %v16128_v9 = vld [vmem:[#allocation79_spill] sm:$0xff]  ;;  %v16129_v21 = vld [vmem:[#allocation96_spill] sm:$0xff] }
 0x345   : > { %v3725_v22 = vmul.f32 %v3724_v59, %v11898_v2  ;;  %v2986_v43 = vadd.f32 0.112945676, %v2985_v14  ;;  %vm2796_vm6 = vweird.f32 %v12012_v48  ;;  %v2962_v30 = vand.u32 2147483648, %v12024_v42 }
 0x346   : > { %v9033_v52 = vpop.eup %9032  ;;  %v3182_v39 = vadd.f32 0.001143296, %v3181_v12  ;;  %v3341_v46 = vmul.f32 3.8918573e-05, %v16119_v53  ;;  %vm12048_vm10 = vcmp.eq.f32.partialorder %v2800_v33, 8.507059e+37  ;;  %v2803_v2 = vor.u32 1.1754944e-38, %v2802_v17 }
 0x347   : > { %v8255_v25 = vclamps-f32 %v3725_v22, 1.0  ;;  %v2792_v10 = vmul.f32 %v9033_v52, %v12012_v48  ;;  %v12052_v7 = vadd.f32 1.0, %v2829_v60  ;;  %vm2956_vm11 = vweird.f32 %v12024_v42  ;;  %v16130_v22 = vld [vmem:[#allocation13_spill] sm:$0xff] }
 0x348   : > { %v2987_v4 = vmul.f32 %v2986_v43, %v16108_v44  ;;  %v3183_v45 = vmul.f32 %v3182_v39, %v16115_v3  ;;  %v3342_v49 = vadd.f32 0.001143296, %v3341_v46  ;;  %v4131_v26 = vmul.f32 %v4083_v62, %v16122_v37 }
 0x349   : > { %v9035_v63 = vpop.eup %9034  ;;  %v4087_v11 = vadd.f32 1.0, %v8255_v25  ;;  %v2793_v35 = vsub.f32 1.0, %v2792_v10  ;;  %9036 = vrcp.f32 %v12052_v7  ;;  %vm2797_vm12 = vweird.f32 %v9033_v52 }
 0x34a   : > { %v2952_v51 = vmul.f32 %v9035_v63, %v12024_v42  ;;  %vm12060_vm13 = vcmp.eq.f32.partialorder %v2960_v55, 8.507059e+37  ;;  %v2963_v5 = vor.u32 1.1754944e-38, %v2962_v30  ;;  %v2988_v56 = vadd.f32 0.4994258, %v2987_v4  ;;  %vm2798_vm14 = vmor %vm2796_vm6, %vm2797_vm12  ;;  %v16131_v42 = vld [vmem:[#allocation87_spill] sm:$0xff] }
 0x34b   : > { %v4135_v24 = vmul.f32 %v4087_v11, %v2071_v29  ;;  %v2794_v8 = vmul.f32 %v9033_v52, %v2793_v35  ;;  %v3184_v58 = vadd.f32 0.014752088, %v3183_v45  ;;  %v2840_v34 = vand.u32 2147483647, %v12052_v7  ;;  %v16132_v35 = vld [vmem:[#allocation46_spill] sm:$0xff] }
 0x34c   : > { %v2953_v28 = vsub.f32 1.0, %v2952_v51  ;;  %v3343_v41 = vmul.f32 %v3342_v49, %v16119_v53  ;;  %v3221_v54 = vmul.f32 3.8918573e-05, %v16125_v38  ;;  %v2989_v36 = vmul.f32 %v2988_v56, %v16108_v44  ;;  %v16133_v56 = vld [vmem:[#allocation70_spill] sm:$0xff] }
 0x34d   : > { %v4163_v47 = vpack.c.bf16 %v4135_v24, %v4131_v26  ;;  %v2795_v57 = vadd.f32 %v9033_v52, %v2794_v8  ;;  %v3185_v50 = vmul.f32 %v3184_v58, %v16115_v3  ;;  %vm2957_vm15 = vweird.f32 %v9035_v63 }
 0x34e   : > { %v2954_v6 = vmul.f32 %v9035_v63, %v2953_v28  ;;  %vm2836_vm1 = vweird.f32 %v12052_v7  ;;  %v2842_v27 = vand.u32 2147483648, %v12052_v7  ;;  %v12074_v1 = vadd.f32 1.0, %v2989_v36  ;;  %vm2958_vm0 = vmor %vm2956_vm11, %vm2957_vm15  ;;  %v16134_v28 = vld [vmem:[#allocation80_spill] sm:$0xff] }
 0x34f   : > { %v9037_v16 = vpop.eup %9036  ;;  %5712 = vmatpush.bf16.msrb.mxu3 %v4163_v47  ;;  %v2799_v61 = vsel %vm2798_vm14, %v9033_v52, %v2795_v57  ;;  %v3186_v23 = vadd.f32 0.112945676, %v3185_v50  ;;  %v3344_v31 = vadd.f32 0.014752088, %v3343_v41  ;;  %vm12079_vm2 = vcmp.eq.f32.partialorder %v2840_v34, 8.507059e+37 }
 0x350   : > { %v2804_v44 = vsel %vm12048_vm10, %v2803_v2, %v2799_v61  ;;  %v2955_v19 = vadd.f32 %v9035_v63, %v2954_v6  ;;  %v2832_v48 = vmul.f32 %v9037_v16, %v12052_v7  ;;  %9038 = vrcp.f32 %v12074_v1 }
 0x351   : > { %v2805_v14 = vmul.f32 %v2804_v44, %v16128_v9  ;;  %v3222_v12 = vadd.f32 0.001143296, %v3221_v54  ;;  %v3381_v18 = vmul.f32 3.8918573e-05, %v16129_v21  ;;  %v2843_v40 = vor.u32 1.1754944e-38, %v2842_v27 }
 0x352   : > { %v2959_v17 = vsel %vm2958_vm0, %v9035_v63, %v2955_v19  ;;  %v2833_v0 = vsub.f32 1.0, %v2832_v48  ;;  %v3187_v20 = vmul.f32 %v3186_v23, %v16115_v3  ;;  %v3345_v62 = vmul.f32 %v3344_v31, %v16119_v53 }
 0x353   : > { %v8232_v29 = vclamps-f32 %v2805_v14, 1.0  ;;  %v2964_v59 = vsel %vm12060_vm13, %v2963_v5, %v2959_v17  ;;  %v2461_v55 = vmul.f32 3.8918573e-05, %v16130_v22  ;;  %vm2837_vm3 = vweird.f32 %v9037_v16  ;;  %v16139_v17 = vld [vmem:[#allocation17_spill] sm:$0xff] }
 0x354   : > { %v2965_v60 = vmul.f32 %v2964_v59, %v16131_v42  ;;  %v2834_v43 = vmul.f32 %v9037_v16, %v2833_v0  ;;  %v3188_v52 = vadd.f32 0.4994258, %v3187_v20  ;;  %v3346_v39 = vadd.f32 0.112945676, %v3345_v62  ;;  %vm2838_vm5 = vmor %vm2836_vm1, %vm2837_vm3  ;;  %v16140_v59 = vld [vmem:[#allocation14_spill] sm:$0xff] }
 0x355   : > { %v4064_v30 = vadd.f32 1.0, %v8232_v29  ;;  %v3223_v46 = vmul.f32 %v3222_v12, %v16125_v38  ;;  %v3382_v25 = vadd.f32 0.001143296, %v3381_v18  ;;  %vm2996_vm4 = vweird.f32 %v12074_v1 }
 0x356   : > { %v8236_v10 = vclamps-f32 %v2965_v60, 1.0  ;;  %v2835_v32 = vadd.f32 %v9037_v16, %v2834_v43  ;;  %v3000_v2 = vand.u32 2147483647, %v12074_v1  ;;  %v3189_v4 = vmul.f32 %v3188_v52, %v16115_v3  ;;  %v9039_v45 = vpop.eup %9038  ;;  %v16142_v60 = vld [vmem:[#allocation64_spill] sm:$0xff] }
 0x357   : > { %v3002_v49 = vand.u32 2147483648, %v12074_v1  ;;  %v3347_v63 = vmul.f32 %v3346_v39, %v16119_v53  ;;  %v3224_v11 = vadd.f32 0.014752088, %v3223_v46  ;;  %v3383_v37 = vmul.f32 %v3382_v25, %v16129_v21 }
 0x358   : > { %v4068_v26 = vadd.f32 1.0, %v8236_v10  ;;  %v4112_v51 = vmul.f32 %v4064_v30, %v16132_v35  ;;  %v2839_v15 = vsel %vm2838_vm5, %v9037_v16, %v2835_v32  ;;  %v2992_v5 = vmul.f32 %v9039_v45, %v12074_v1  ;;  %v16149_v16 = vld [vmem:[#allocation103_spill] sm:$0xff] }
 0x359   : > { %v2844_v3 = vsel %vm12079_vm2, %v2843_v40, %v2839_v15  ;;  %v3190_v24 = vadd.f32 1.0, %v3189_v4  ;;  %v3348_v8 = vadd.f32 0.4994258, %v3347_v63  ;;  %v3225_v7 = vmul.f32 %v3224_v11, %v16125_v38 }
 0x35a   : > { %v4116_v58 = vmul.f32 %v4068_v26, %v16133_v56  ;;  %v2845_v34 = vmul.f32 %v2844_v3, %v16134_v28  ;;  %v2993_v41 = vsub.f32 1.0, %v2992_v5  ;;  %v3384_v54 = vadd.f32 0.014752088, %v3383_v37  ;;  %v16157_v5 = vld [vmem:[#allocation52_spill] sm:$0xff] }
 0x35b   : > { %vm2997_vm9 = vweird.f32 %v9039_v45  ;;  %9040 = vrcp.f32 %v3190_v24  ;;  %v3200_v47 = vand.u32 2147483647, %v3190_v24  ;;  %v2462_v57 = vadd.f32 0.001143296, %v2461_v55  ;;  %v16141_v55 = vld [vmem:[#allocation93_spill] sm:$0xff] }
 0x35c   : > { %v4152_v36 = vpack.c.bf16 %v4116_v58, %v4112_v51  ;;  %v8233_v50 = vclamps-f32 %v2845_v34, 1.0  ;;  %v2994_v6 = vmul.f32 %v9039_v45, %v2993_v41  ;;  %v3349_v27 = vmul.f32 %v3348_v8, %v16119_v53  ;;  %vm2998_vm8 = vmor %vm2996_vm4, %vm2997_vm9  ;;  %v16147_v8 = vld [vmem:[#allocation72_spill] sm:$0xff]  ;;  %v16148_v58 = vld [vmem:[#allocation22_spill] sm:$0xff] }
 0x35d   : > { %vm12111_vm7 = vcmp.eq.f32.partialorder %v3000_v2, 8.507059e+37  ;;  %v3202_v61 = vand.u32 2147483648, %v3190_v24  ;;  %v3226_v23 = vadd.f32 0.112945676, %v3225_v7  ;;  %v3385_v31 = vmul.f32 %v3384_v54, %v16129_v21 }
 0x35e   : > { %5075 = vmatpush.bf16.msrb.mxu0 %v4152_v36  ;;  %v2995_v44 = vadd.f32 %v9039_v45, %v2994_v6  ;;  %v3003_v19 = vor.u32 1.1754944e-38, %v3002_v49  ;;  %v4065_v48 = vadd.f32 1.0, %v8233_v50  ;;  %v12116_v33 = vadd.f32 1.0, %v3349_v27 }
 0x35f   : > { %vm3196_vm6 = vweird.f32 %v3190_v24  ;;  %v3227_v53 = vmul.f32 %v3226_v23, %v16125_v38  ;;  %v3386_v9 = vadd.f32 0.112945676, %v3385_v31  ;;  %v2463_v14 = vmul.f32 %v2462_v57, %v16130_v22 }
 0x360   : > { %v2999_v12 = vsel %vm2998_vm8, %v9039_v45, %v2995_v44  ;;  %vm12123_vm10 = vcmp.eq.f32.partialorder %v3200_v47, 8.507059e+37  ;;  %9042 = vrcp.f32 %v12116_v33  ;;  %v2621_v0 = vmul.f32 3.8918573e-05, %v16139_v17 }
 0x361   : > { %v9041_v40 = vpop.eup %9040  ;;  %v3004_v1 = vsel %vm12111_vm7, %v3003_v19, %v2999_v12  ;;  %v3203_v20 = vor.u32 1.1754944e-38, %v3202_v61  ;;  %v3228_v29 = vadd.f32 0.4994258, %v3227_v53  ;;  %v2501_v62 = vmul.f32 3.8918573e-05, %v16140_v59 }
 0x362   : > { %v3005_v42 = vmul.f32 %v3004_v1, %v16141_v55  ;;  %v4113_v43 = vmul.f32 %v4065_v48, %v16142_v60  ;;  %v3192_v52 = vmul.f32 %v9041_v40, %v3190_v24  ;;  %v3387_v30 = vmul.f32 %v3386_v9, %v16129_v21 }
 0x363   : > { %vm3197_vm11 = vweird.f32 %v9041_v40  ;;  %v3360_v39 = vand.u32 2147483647, %v12116_v33  ;;  %v3229_v46 = vmul.f32 %v3228_v29, %v16125_v38  ;;  %v2464_v25 = vadd.f32 0.014752088, %v2463_v14 }
 0x364   : > { %v8237_v10 = vclamps-f32 %v3005_v42, 1.0  ;;  %v3193_v32 = vsub.f32 1.0, %v3192_v52  ;;  %v3388_v2 = vadd.f32 0.4994258, %v3387_v30  ;;  %v2622_v4 = vadd.f32 0.001143296, %v2621_v0  ;;  %vm12144_vm13 = vmor %vm3196_vm6, %vm3197_vm11 }
 0x365   : > { %vm3356_vm12 = vweird.f32 %v12116_v33  ;;  %v3362_v45 = vand.u32 2147483648, %v12116_v33  ;;  %v3230_v49 = vadd.f32 1.0, %v3229_v46  ;;  %v2465_v63 = vmul.f32 %v2464_v25, %v16130_v22 }
 0x366   : > { %v9043_v11 = vpop.eup %9042  ;;  %v4069_v37 = vadd.f32 1.0, %v8237_v10  ;;  %v3194_v26 = vmul.f32 %v9041_v40, %v3193_v32  ;;  %v3389_v35 = vmul.f32 %v3388_v2, %v16129_v21  ;;  %v2623_v51 = vmul.f32 %v2622_v4, %v16139_v17 }
 0x367   : > { %v3352_v15 = vmul.f32 %v9043_v11, %v12116_v33  ;;  %vm12149_vm14 = vcmp.eq.f32.partialorder %v3360_v39, 8.507059e+37  ;;  %9044 = vrcp.f32 %v3230_v49  ;;  %v2502_v3 = vadd.f32 0.001143296, %v2501_v62 }
 0x368   : > { %v4117_v7 = vmul.f32 %v4069_v37, %v16147_v8  ;;  %v3195_v56 = vadd.f32 %v9041_v40, %v3194_v26  ;;  %v3240_v21 = vand.u32 2147483647, %v3230_v49  ;;  %v2661_v28 = vmul.f32 3.8918573e-05, %v16148_v58  ;;  %v16158_v8 = vld [vmem:[#allocation85_spill] sm:$0xff] }
 0x369   : > { %v3353_v34 = vsub.f32 1.0, %v3352_v15  ;;  %v12155_v24 = vadd.f32 1.0, %v3389_v35  ;;  %v2466_v41 = vadd.f32 0.112945676, %v2465_v63  ;;  %v2624_v54 = vadd.f32 0.014752088, %v2623_v51 }
 0x36a   : > { %v4153_v47 = vpack.c.bf16 %v4117_v7, %v4113_v43  ;;  %v3199_v57 = vsel %vm12144_vm13, %v9041_v40, %v3195_v56  ;;  %v3363_v36 = vor.u32 1.1754944e-38, %v3362_v45  ;;  %v3242_v50 = vand.u32 2147483648, %v3230_v49  ;;  %v16152_v43 = vld [vmem:[#allocation112_spill] sm:$0xff]  ;;  %v16159_v56 = vld [vmem:[#allocation97_spill] sm:$0xff] }
 0x36b   : > { %v3204_v6 = vsel %vm12123_vm10, %v3203_v20, %v3199_v57  ;;  %v3354_v27 = vmul.f32 %v9043_v11, %v3353_v34  ;;  %vm3357_vm15 = vweird.f32 %v9043_v11  ;;  %9046 = vrcp.f32 %v12155_v24 }
 0x36c   : > { %5288 = vmatpush.bf16.msrb.mxu1 %v4153_v47  ;;  %v3205_v61 = vmul.f32 %v3204_v6, %v16149_v16  ;;  %vm3236_vm1 = vweird.f32 %v3230_v49  ;;  %vm12163_vm2 = vcmp.eq.f32.partialorder %v3240_v21, 8.507059e+37  ;;  %v2467_v31 = vmul.f32 %v2466_v41, %v16130_v22  ;;  %vm3358_vm0 = vmor %vm3356_vm12, %vm3357_vm15  ;;  %v16160_v41 = vld [vmem:[#allocation104_spill] sm:$0xff] }
 0x36d   : > { %v9045_v44 = vpop.eup %9044  ;;  %v3355_v19 = vadd.f32 %v9043_v11, %v3354_v27  ;;  %v2625_v48 = vmul.f32 %v2624_v54, %v16139_v17  ;;  %v2503_v53 = vmul.f32 %v2502_v3, %v16140_v59  ;;  %v2662_v9 = vadd.f32 0.001143296, %v2661_v28 }
 0x36e   : > { %v8242_v14 = vclamps-f32 %v3205_v61, 1.0  ;;  %v3232_v12 = vmul.f32 %v9045_v44, %v3230_v49  ;;  %v3243_v18 = vor.u32 1.1754944e-38, %v3242_v50  ;;  %v3400_v0 = vand.u32 2147483647, %v12155_v24 }
 0x36f   : > { %v3359_v40 = vsel %vm3358_vm0, %v9043_v11, %v3355_v19  ;;  %v3402_v1 = vand.u32 2147483648, %v12155_v24  ;;  %v2468_v20 = vadd.f32 0.4994258, %v2467_v31  ;;  %v2626_v29 = vadd.f32 0.112945676, %v2625_v48  ;;  %v16162_v48 = vld [vmem:[#allocation90_spill] sm:$0xff] }
 0x370   : > { %v3364_v62 = vsel %vm12149_vm14, %v3363_v36, %v3359_v40  ;;  %v3233_v55 = vsub.f32 1.0, %v3232_v12  ;;  %vm3237_vm3 = vweird.f32 %v9045_v44  ;;  %v2504_v42 = vadd.f32 0.014752088, %v2503_v53 }
 0x371   : > { %v9047_v60 = vpop.eup %9046  ;;  %v3365_v52 = vmul.f32 %v3364_v62, %v16152_v43  ;;  %v2469_v33 = vmul.f32 %v2468_v20, %v16130_v22  ;;  %v2627_v30 = vmul.f32 %v2626_v29, %v16139_v17  ;;  %v2663_v39 = vmul.f32 %v2662_v9, %v16148_v58  ;;  %vm12183_vm5 = vmor %vm3236_vm1, %vm3237_vm3  ;;  %v16165_v43 = vld [vmem:[#allocation65_spill] sm:$0xff] }
 0x372   : > { %v4074_v46 = vadd.f32 1.0, %v8242_v14  ;;  %v3234_v25 = vmul.f32 %v9045_v44, %v3233_v55  ;;  %v3392_v10 = vmul.f32 %v9047_v60, %v12155_v24  ;;  %vm3396_vm4 = vweird.f32 %v12155_v24 }
 0x373   : > { %v8246_v32 = vclamps-f32 %v3365_v52, 1.0  ;;  %v12187_v4 = vadd.f32 1.0, %v2469_v33  ;;  %v2628_v45 = vadd.f32 0.4994258, %v2627_v30  ;;  %v2505_v22 = vmul.f32 %v2504_v42, %v16140_v59 }
 0x374   : > { %v3235_v63 = vadd.f32 %v9045_v44, %v3234_v25  ;;  %v3393_v11 = vsub.f32 1.0, %v3392_v10  ;;  %vm12190_vm9 = vcmp.eq.f32.partialorder %v3400_v0, 8.507059e+37  ;;  %v3403_v26 = vor.u32 1.1754944e-38, %v3402_v1 }
 0x375   : > { %v4078_v35 = vadd.f32 1.0, %v8246_v32  ;;  %vm3397_vm7 = vweird.f32 %v9047_v60  ;;  %9048 = vrcp.f32 %v12187_v4  ;;  %v2664_v49 = vadd.f32 0.014752088, %v2663_v39  ;;  %v16168_v32 = vld [vmem:[#allocation89_spill] sm:$0xff] }
 0x376   : > { %v3239_v51 = vsel %vm12183_vm5, %v9045_v44, %v3235_v63  ;;  %v3394_v38 = vmul.f32 %v9047_v60, %v3393_v11  ;;  %v2629_v15 = vmul.f32 %v2628_v45, %v16139_v17  ;;  %v2861_v3 = vmul.f32 3.8918573e-05, %v16157_v5  ;;  %vm3398_vm8 = vmor %vm3396_vm4, %vm3397_vm7  ;;  %v16161_v44 = vld [vmem:[#allocation98_spill] sm:$0xff]  ;;  %v16169_v63 = vld [vmem:[#allocation55_spill] sm:$0xff] }
 0x377   : > { %v4122_v7 = vmul.f32 %v4074_v46, %v16158_v8  ;;  %v4126_v21 = vmul.f32 %v4078_v35, %v16159_v56  ;;  %v3244_v28 = vsel %vm12163_vm2, %v3243_v18, %v3239_v51  ;;  %v2506_v34 = vadd.f32 0.112945676, %v2505_v22  ;;  %v16175_v18 = vld [vmem:[#allocation7_spill] sm:$0xff] }
 0x378   : > { %v3245_v54 = vmul.f32 %v3244_v28, %v16160_v41  ;;  %v3395_v47 = vadd.f32 %v9047_v60, %v3394_v38  ;;  %v2480_v57 = vand.u32 2147483647, %v12187_v4  ;;  %v12205_v36 = vadd.f32 1.0, %v2629_v15  ;;  %v16170_v15 = vld [vmem:[#allocation73_spill] sm:$0xff] }
 0x379   : > { %v4158_v50 = vpack.c.bf16 %v4126_v21, %v4122_v7  ;;  %v2482_v17 = vand.u32 2147483648, %v12187_v4  ;;  %v2507_v6 = vmul.f32 %v2506_v34, %v16140_v59  ;;  %v2665_v27 = vmul.f32 %v2664_v49, %v16148_v58 }
 0x37a   : > { %v8243_v16 = vclamps-f32 %v3245_v54, 1.0  ;;  %v3399_v61 = vsel %vm3398_vm8, %v9047_v60, %v3395_v47  ;;  %9050 = vrcp.f32 %v12205_v36  ;;  %v2862_v23 = vadd.f32 0.001143296, %v2861_v3 }
 0x37b   : > { %v9049_v31 = vpop.eup %9048  ;;  %v12215_v19 = vadd.f32 1.1283791, %v16161_v44  ;;  %v2063_v53 = vmul.f32 0.5, %v16162_v48  ;;  %5500 = vmatpush.bf16.msrb.mxu2 %v4158_v50  ;;  %v3404_v24 = vsel %vm12190_vm9, %v3403_v26, %v3399_v61  ;;  %v2508_v9 = vadd.f32 0.4994258, %v2507_v6 }
 0x37c   : > { %v3405_v14 = vmul.f32 %v3404_v24, %v12036_v13  ;;  %v2472_v12 = vmul.f32 %v9049_v31, %v12187_v4  ;;  %vm2476_vm6 = vweird.f32 %v12187_v4  ;;  %vm12223_vm10 = vcmp.eq.f32.partialorder %v2480_v57, 8.507059e+37  ;;  %v16171_v4 = vld [vmem:[#allocation53_spill] sm:$0xff]  ;;  %v16174_v24 = vld [vmem:[#allocation62_spill] sm:$0xff] }
 0x37d   : > { %v2483_v0 = vor.u32 1.1754944e-38, %v2482_v17  ;;  %v2640_v40 = vand.u32 2147483647, %v12205_v36  ;;  %v2509_v1 = vmul.f32 %v2508_v9, %v16140_v59  ;;  %v2666_v20 = vadd.f32 0.112945676, %v2665_v27 }
 0x37e   : > { %v8247_v29 = vclamps-f32 %v3405_v14, 1.0  ;;  %v4075_v62 = vadd.f32 1.0, %v8243_v16  ;;  %v2473_v55 = vsub.f32 1.0, %v2472_v12  ;;  %v2863_v42 = vmul.f32 %v2862_v23, %v16157_v5 }
 0x37f   : > { %vm2636_vm11 = vweird.f32 %v12205_v36  ;;  %v12231_v13 = vadd.f32 1.0, %v2509_v1  ;;  %v2667_v60 = vmul.f32 %v2666_v20, %v16148_v58  ;;  %v3021_v52 = vmul.f32 3.8918573e-05, %v16165_v43 }
 0x380   : > { %v9051_v33 = vpop.eup %9050  ;;  %v4079_v30 = vadd.f32 1.0, %v8247_v29  ;;  %v2474_v39 = vmul.f32 %v9049_v31, %v2473_v55  ;;  %vm2477_vm12 = vweird.f32 %v9049_v31  ;;  %v2864_v46 = vadd.f32 0.014752088, %v2863_v42 }
 0x381   : > { %v2632_v59 = vmul.f32 %v9051_v33, %v12205_v36  ;;  %vm12236_vm13 = vcmp.eq.f32.partialorder %v2640_v40, 8.507059e+37  ;;  %v2642_v10 = vand.u32 2147483648, %v12205_v36  ;;  %9052 = vrcp.f32 %v12231_v13  ;;  %vm2478_vm14 = vmor %vm2476_vm6, %vm2477_vm12 }
 0x382   : > { %v4123_v2 = vmul.f32 %v4075_v62, %v16168_v32  ;;  %v4127_v45 = vmul.f32 %v4079_v30, %v2063_v53  ;;  %v2475_v22 = vadd.f32 %v9049_v31, %v2474_v39  ;;  %v2901_v11 = vmul.f32 3.8918573e-05, %v16169_v63 }
 0x383   : > { %v2633_v37 = vsub.f32 1.0, %v2632_v59  ;;  %v2668_v26 = vadd.f32 0.4994258, %v2667_v60  ;;  %v2865_v35 = vmul.f32 %v2864_v46, %v16157_v5  ;;  %v3022_v49 = vadd.f32 0.001143296, %v3021_v52 }
 0x384   : > { %v4159_v51 = vpack.c.bf16 %v4127_v45, %v4123_v2  ;;  %v2479_v38 = vsel %vm2478_vm14, %v9049_v31, %v2475_v22  ;;  %vm2637_vm15 = vweird.f32 %v9051_v33  ;;  %v3061_v3 = vmul.f32 3.8918573e-05, %v16170_v15 }
 0x385   : > { %v2484_v8 = vsel %vm12223_vm10, %v2483_v0, %v2479_v38  ;;  %v2634_v7 = vmul.f32 %v9051_v33, %v2633_v37  ;;  %v2669_v56 = vmul.f32 %v2668_v26, %v16148_v58  ;;  %v2866_v21 = vadd.f32 0.112945676, %v2865_v35  ;;  %vm2638_vm1 = vmor %vm2636_vm11, %vm2637_vm15  ;;  %v16179_v38 = vld [vmem:[#allocation10_spill] sm:$0xff] }
 0x386   : > { %5713 = vmatpush.bf16.msrb.mxu3 %v4159_v51  ;;  %v2485_v28 = vmul.f32 %v2484_v8, %v16171_v4  ;;  %v2520_v34 = vand.u32 2147483647, %v12231_v13  ;;  %v2522_v41 = vand.u32 2147483648, %v12231_v13  ;;  %v3023_v54 = vmul.f32 %v3022_v49, %v16165_v43 }
 0x387   : > { %v9053_v47 = vpop.eup %9052  ;;  %v2635_v57 = vadd.f32 %v9051_v33, %v2634_v7  ;;  %v2643_v50 = vor.u32 1.1754944e-38, %v2642_v10  ;;  %v12255_v17 = vadd.f32 1.0, %v2669_v56  ;;  %v2867_v6 = vmul.f32 %v2866_v21, %v16157_v5  ;;  %v16176_v10 = vld [vmem:[#allocation28_spill] sm:$0xff] }
 0x388   : > { %v8224_v27 = vclamps-f32 %v2485_v28, 1.0  ;;  %v2512_v58 = vmul.f32 %v9053_v47, %v12231_v13  ;;  %v3024_v16 = vadd.f32 0.014752088, %v3023_v54  ;;  %v2902_v61 = vadd.f32 0.001143296, %v2901_v11  ;;  %v16177_v11 = vld [vmem:[#allocation36_spill] sm:$0xff] }
 0x389   : > { %v2639_v23 = vsel %vm2638_vm1, %v9051_v33, %v2635_v57  ;;  %vm2516_vm2 = vweird.f32 %v12231_v13  ;;  %9054 = vrcp.f32 %v12255_v17  ;;  %v3062_v31 = vadd.f32 0.001143296, %v3061_v3  ;;  %v16178_v13 = vld [vmem:[#allocation54_spill] sm:$0xff] }
 0x38a   : > { %v2644_v44 = vsel %vm12236_vm13, %v2643_v50, %v2639_v23  ;;  %v2513_v48 = vsub.f32 1.0, %v2512_v58  ;;  %vm12266_vm0 = vcmp.eq.f32.partialorder %v2520_v34, 8.507059e+37  ;;  %v2523_v36 = vor.u32 1.1754944e-38, %v2522_v41 }
 0x38b   : > { %v2645_v9 = vmul.f32 %v2644_v44, %v16174_v24  ;;  %v2868_v14 = vadd.f32 0.4994258, %v2867_v6  ;;  %v3025_v12 = vmul.f32 %v3024_v16, %v16165_v43  ;;  %v2141_v0 = vmul.f32 3.8918573e-05, %v16175_v18 }
 0x38c   : > { %v4056_v40 = vadd.f32 1.0, %v8224_v27  ;;  %v2514_v1 = vmul.f32 %v9053_v47, %v2513_v48  ;;  %vm2517_vm3 = vweird.f32 %v9053_v47  ;;  %v2903_v20 = vmul.f32 %v2902_v61, %v16169_v63 }
 0x38d   : > { %v8228_v29 = vclamps-f32 %v2645_v9, 1.0  ;;  %v2869_v62 = vmul.f32 %v2868_v14, %v16157_v5  ;;  %v3026_v55 = vadd.f32 0.112945676, %v3025_v12  ;;  %v3063_v42 = vmul.f32 %v3062_v31, %v16170_v15  ;;  %vm2518_vm5 = vmor %vm2516_vm2, %vm2517_vm3  ;;  %v16182_v14 = vld [vmem:[#allocation63_spill] sm:$0xff] }
 0x38e   : > { %v2515_v60 = vadd.f32 %v9053_v47, %v2514_v1  ;;  %vm2676_vm4 = vweird.f32 %v12255_v17  ;;  %v2680_v52 = vand.u32 2147483647, %v12255_v17  ;;  %v2682_v33 = vand.u32 2147483648, %v12255_v17 }
 0x38f   : > { %v2904_v30 = vadd.f32 0.014752088, %v2903_v20  ;;  %v9055_v39 = vpop.eup %9054  ;;  %v4060_v46 = vadd.f32 1.0, %v8228_v29  ;;  %v2870_v59 = vadd.f32 1.0, %v2869_v62  ;;  %v3027_v25 = vmul.f32 %v3026_v55, %v16165_v43 }
 0x390   : > { %v3064_v5 = vadd.f32 0.014752088, %v3063_v42  ;;  %v4104_v32 = vmul.f32 %v4056_v40, %v16176_v10  ;;  %v2519_v2 = vsel %vm2518_vm5, %v9053_v47, %v2515_v60  ;;  %v2672_v45 = vmul.f32 %v9055_v39, %v12255_v17  ;;  %v16183_v60 = vld [vmem:[#allocation8_spill] sm:$0xff] }
 0x391   : > { %v2905_v22 = vmul.f32 %v2904_v30, %v16169_v63  ;;  %v4108_v37 = vmul.f32 %v4060_v46, %v16177_v11  ;;  %v2524_v26 = vsel %vm12266_vm0, %v2523_v36, %v2519_v2  ;;  %9056 = vrcp.f32 %v2870_v59  ;;  %v16189_v11 = vld [vmem:[#allocation37_spill] sm:$0xff] }
 0x392   : > { %v2142_v35 = vadd.f32 0.001143296, %v2141_v0  ;;  %v2525_v49 = vmul.f32 %v2524_v26, %v16178_v13  ;;  %v2673_v51 = vsub.f32 1.0, %v2672_v45  ;;  %vm2677_vm9 = vweird.f32 %v9055_v39 }
 0x393   : > { %v2301_v3 = vmul.f32 3.8918573e-05, %v16179_v38  ;;  %v4148_v8 = vpack.c.bf16 %v4108_v37, %v4104_v32  ;;  %v3028_v7 = vadd.f32 0.4994258, %v3027_v25  ;;  %v2906_v56 = vadd.f32 0.112945676, %v2905_v22  ;;  %vm2678_vm8 = vmor %vm2676_vm4, %vm2677_vm9 }
 0x394   : > { %v3065_v21 = vmul.f32 %v3064_v5, %v16170_v15  ;;  %v8225_v4 = vclamps-f32 %v2525_v49, 1.0  ;;  %v2674_v28 = vmul.f32 %v9055_v39, %v2673_v51  ;;  %v2880_v34 = vand.u32 2147483647, %v2870_v59 }
 0x395   : > { %v2882_v41 = vand.u32 2147483648, %v2870_v59  ;;  %5076 = vmatpush.bf16.msrb.mxu0 %v4148_v8  ;;  %v3029_v54 = vmul.f32 %v3028_v7, %v16165_v43  ;;  %v2907_v47 = vmul.f32 %v2906_v56, %v16169_v63  ;;  %v2143_v50 = vmul.f32 %v2142_v35, %v16175_v18  ;;  %v16190_v8 = vld [vmem:[#allocation81_spill] sm:$0xff] }
 0x396   : > { %v3066_v57 = vadd.f32 0.112945676, %v3065_v21  ;;  %v2675_v6 = vadd.f32 %v9055_v39, %v2674_v28  ;;  %vm2681_vm7 = vcmp.eq.f32.partialorder %v2680_v52, 8.507059e+37  ;;  %v2683_v27 = vor.u32 1.1754944e-38, %v2682_v33  ;;  %v16184_v33 = vld [vmem:[#allocation29_spill] sm:$0xff] }
 0x397   : > { %v2302_v58 = vadd.f32 0.001143296, %v2301_v3  ;;  %v9057_v16 = vpop.eup %9056  ;;  %v3030_v61 = vadd.f32 1.0, %v3029_v54  ;;  %v2908_v23 = vadd.f32 0.4994258, %v2907_v47  ;;  %vm2876_vm6 = vweird.f32 %v2870_v59 }
 0x398   : > { %v3067_v31 = vmul.f32 %v3066_v57, %v16170_v15  ;;  %v2144_v44 = vadd.f32 0.014752088, %v2143_v50  ;;  %v2679_v43 = vsel %vm2678_vm8, %v9055_v39, %v2675_v6  ;;  %v2872_v48 = vmul.f32 %v9057_v16, %v2870_v59  ;;  %v16191_v57 = vld [vmem:[#allocation11_spill] sm:$0xff] }
 0x399   : > { %vm12298_vm10 = vcmp.eq.f32.partialorder %v2880_v34, 8.507059e+37  ;;  %v2684_v36 = vsel %vm2681_vm7, %v2683_v27, %v2679_v43  ;;  %v4057_v24 = vadd.f32 1.0, %v8225_v4  ;;  %v2883_v9 = vor.u32 1.1754944e-38, %v2882_v41 }
 0x39a   : > { %9058 = vrcp.f32 %v3030_v61  ;;  %v2685_v12 = vmul.f32 %v2684_v36, %v16182_v14  ;;  %v2873_v17 = vsub.f32 1.0, %v2872_v48  ;;  %vm2877_vm11 = vweird.f32 %v9057_v16 }
 0x39b   : > { %v2909_v0 = vmul.f32 %v2908_v23, %v16169_v63  ;;  %v3040_v40 = vand.u32 2147483647, %v3030_v61  ;;  %v3068_v1 = vadd.f32 0.4994258, %v3067_v31  ;;  %v2145_v20 = vmul.f32 %v2144_v44, %v16175_v18  ;;  %vm12311_vm12 = vmor %vm2876_vm6, %vm2877_vm11 }
 0x39c   : > { %v2303_v29 = vmul.f32 %v2302_v58, %v16179_v38  ;;  %v8229_v62 = vclamps-f32 %v2685_v12, 1.0  ;;  %v2874_v55 = vmul.f32 %v9057_v16, %v2873_v17  ;;  %v2181_v52 = vmul.f32 3.8918573e-05, %v16183_v60 }
 0x39d   : > { %v12306_v42 = vadd.f32 1.0, %v2909_v0  ;;  %v4105_v30 = vmul.f32 %v4057_v24, %v16184_v33  ;;  %v3042_v63 = vand.u32 2147483648, %v3030_v61  ;;  %v3069_v46 = vmul.f32 %v3068_v1, %v16170_v15 }
 0x39e   : > { %v2146_v25 = vadd.f32 0.112945676, %v2145_v20  ;;  %v4061_v5 = vadd.f32 1.0, %v8229_v62  ;;  %v2875_v10 = vadd.f32 %v9057_v16, %v2874_v55  ;;  %vm3036_vm13 = vweird.f32 %v3030_v61 }
 0x39f   : > { %9060 = vrcp.f32 %v12306_v42  ;;  %vm12317_vm14 = vcmp.eq.f32.partialorder %v3040_v40, 8.507059e+37  ;;  %v3070_v45 = vadd.f32 1.0, %v3069_v46  ;;  %v2304_v22 = vadd.f32 0.014752088, %v2303_v29  ;;  %v16194_v40 = vld [vmem:[#allocation94_spill] sm:$0xff] }
 0x3a0   : > { %v9059_v32 = vpop.eup %9058  ;;  %v2147_v59 = vmul.f32 %v2146_v25, %v16175_v18  ;;  %v4109_v37 = vmul.f32 %v4061_v5, %v16189_v11  ;;  %v2879_v15 = vsel %vm12311_vm12, %v9057_v16, %v2875_v10  ;;  %v2182_v35 = vadd.f32 0.001143296, %v2181_v52  ;;  %v16197_v52 = vld [vmem:[#allocation71_spill] sm:$0xff] }
 0x3a1   : > { %v3032_v26 = vmul.f32 %v9059_v32, %v3030_v61  ;;  %v2884_v13 = vsel %vm12298_vm10, %v2883_v9, %v2879_v15  ;;  %v3043_v49 = vor.u32 1.1754944e-38, %v3042_v63  ;;  %v2922_v51 = vand.u32 2147483648, %v12306_v42  ;;  %v16203_v15 = vld [vmem:[#allocation86_spill] sm:$0xff] }
 0x3a2   : > { %9062 = vrcp.f32 %v3070_v45  ;;  %v4149_v3 = vpack.c.bf16 %v4109_v37, %v4105_v30  ;;  %v2885_v7 = vmul.f32 %v2884_v13, %v16190_v8  ;;  %vm3037_vm15 = vweird.f32 %v9059_v32 }
 0x3a3   : > { %v3033_v56 = vsub.f32 1.0, %v3032_v26  ;;  %vm2916_vm1 = vweird.f32 %v12306_v42  ;;  %v2920_v21 = vand.u32 2147483647, %v12306_v42  ;;  %v2148_v4 = vadd.f32 0.4994258, %v2147_v59  ;;  %vm12335_vm2 = vmor %vm3036_vm13, %vm3037_vm15  ;;  %v16202_v59 = vld [vmem:[#allocation66_spill] sm:$0xff] }
 0x3a4   : > { %v2305_v28 = vmul.f32 %v2304_v22, %v16179_v38  ;;  %5289 = vmatpush.bf16.msrb.mxu1 %v4149_v3  ;;  %v8234_v41 = vclamps-f32 %v2885_v7, 1.0  ;;  %v2183_v47 = vmul.f32 %v2182_v35, %v16183_v60  ;;  %v2341_v50 = vmul.f32 3.8918573e-05, %v16191_v57  ;;  %v16205_v7 = vld [vmem:[#allocation21_spill] sm:$0xff] }
 0x3a5   : > { %v9061_v34 = vpop.eup %9060  ;;  %v3034_v54 = vmul.f32 %v9059_v32, %v3033_v56  ;;  %v2923_v58 = vor.u32 1.1754944e-38, %v2922_v51  ;;  %vm3076_vm0 = vweird.f32 %v3070_v45  ;;  %v3080_v16 = vand.u32 2147483647, %v3070_v45 }
 0x3a6   : > { %v2912_v27 = vmul.f32 %v9061_v34, %v12306_v42  ;;  %v3082_v31 = vand.u32 2147483648, %v3070_v45  ;;  %v2149_v44 = vmul.f32 %v2148_v4, %v16175_v18  ;;  %v2306_v43 = vadd.f32 0.112945676, %v2305_v28 }
 0x3a7   : > { %v3035_v23 = vadd.f32 %v9059_v32, %v3034_v54  ;;  %vm2917_vm3 = vweird.f32 %v9061_v34  ;;  %v2184_v36 = vadd.f32 0.014752088, %v2183_v47  ;;  %v2342_v24 = vadd.f32 0.001143296, %v2341_v50 }
 0x3a8   : > { %v9063_v48 = vpop.eup %9062  ;;  %v2913_v53 = vsub.f32 1.0, %v2912_v27  ;;  %v4066_v9 = vadd.f32 1.0, %v8234_v41  ;;  %v12345_v0 = vadd.f32 1.0, %v2149_v44  ;;  %v2307_v18 = vmul.f32 %v2306_v43, %v16179_v38  ;;  %vm12351_vm5 = vmor %vm2916_vm1, %vm2917_vm3 }
 0x3a9   : > { %v3039_v61 = vsel %vm12335_vm2, %v9059_v32, %v3035_v23  ;;  %v3072_v14 = vmul.f32 %v9063_v48, %v3070_v45  ;;  %vm3077_vm4 = vweird.f32 %v9063_v48  ;;  %v2185_v62 = vmul.f32 %v2184_v36, %v16183_v60 }
 0x3aa   : > { %v3044_v12 = vsel %vm12317_vm14, %v3043_v49, %v3039_v61  ;;  %v2914_v17 = vmul.f32 %v9061_v34, %v2913_v53  ;;  %v2343_v55 = vmul.f32 %v2342_v24, %v16191_v57  ;;  %v3060_v33 = vmul.f32 %v12215_v19, %v16197_v52  ;;  %vm12368_vm8 = vmor %vm3076_vm0, %vm3077_vm4  ;;  %v16204_v49 = vld [vmem:[#allocation75_spill] sm:$0xff] }
 0x3ab   : > { %v3045_v1 = vmul.f32 %v3044_v12, %v16194_v40  ;;  %v3073_v29 = vsub.f32 1.0, %v3072_v14  ;;  %vm2921_vm9 = vcmp.eq.f32.partialorder %v2920_v21, 8.507059e+37  ;;  %9064 = vrcp.f32 %v12345_v0 }
 0x3ac   : > { %v2915_v30 = vadd.f32 %v9061_v34, %v2914_v17  ;;  %vm12360_vm7 = vcmp.eq.f32.partialorder %v3080_v16, 8.507059e+37  ;;  %v2308_v46 = vadd.f32 0.4994258, %v2307_v18  ;;  %v3083_v19 = vor.u32 1.1754944e-38, %v3082_v31  ;;  %v16207_v16 = vld [vmem:[#allocation27_spill] sm:$0xff]  ;;  %v16211_v17 = vld [vmem:[#allocation69_spill] sm:$0xff] }
 0x3ad   : > { %v8238_v39 = vclamps-f32 %v3045_v1, 1.0  ;;  %v3074_v63 = vmul.f32 %v9063_v48, %v3073_v29  ;;  %v2186_v10 = vadd.f32 0.112945676, %v2185_v62  ;;  %v2344_v32 = vadd.f32 0.014752088, %v2343_v55  ;;  %v16208_v31 = vld [vmem:[#allocation67_spill] sm:$0xff] }
 0x3ae   : > { %v2919_v25 = vsel %vm12351_vm5, %v9061_v34, %v2915_v30  ;;  %v4114_v22 = vmul.f32 %v4066_v9, %v16202_v59  ;;  %v2160_v35 = vand.u32 2147483647, %v12345_v0  ;;  %v2309_v13 = vmul.f32 %v2308_v46, %v16179_v38  ;;  %v16206_v38 = vld [vmem:[#allocation77_spill] sm:$0xff]  ;;  %v16212_v30 = vld [vmem:[#allocation39_spill] sm:$0xff] }
 0x3af   : > { %v4070_v2 = vadd.f32 1.0, %v8238_v39  ;;  %v2924_v11 = vsel %vm2921_vm9, %v2923_v58, %v2919_v25  ;;  %v3075_v37 = vadd.f32 %v9063_v48, %v3074_v63  ;;  %v2187_v45 = vmul.f32 %v2186_v10, %v16183_v60 }
 0x3b0   : > { %v2925_v26 = vmul.f32 %v2924_v11, %v16203_v15  ;;  %v2345_v8 = vmul.f32 %v2344_v32, %v16191_v57  ;;  %v2541_v56 = vmul.f32 3.8918573e-05, %v16205_v7  ;;  %v12384_v34 = vadd.f32 1.0, %v2309_v13  ;;  %v16213_v32 = vld [vmem:[#allocation30_spill] sm:$0xff] }
 0x3b1   : > { %v4118_v51 = vmul.f32 %v4070_v2, %v16204_v49  ;;  %v3079_v3 = vsel %vm12368_vm8, %v9063_v48, %v3075_v37  ;;  %v9065_v21 = vpop.eup %9064  ;;  %v2188_v41 = vadd.f32 0.4994258, %v2187_v45  ;;  %v12387_v54 = vadd.f32 0.18741608, %v16206_v38 }
 0x3b2   : > { %v8235_v4 = vclamps-f32 %v2925_v26, 1.0  ;;  %v3084_v28 = vsel %vm12360_vm7, %v3083_v19, %v3079_v3  ;;  %v2152_v6 = vmul.f32 %v9065_v21, %v12345_v0  ;;  %v2162_v58 = vand.u32 2147483648, %v12345_v0 }
 0x3b3   : > { %v4154_v47 = vpack.c.bf16 %v4118_v51, %v4114_v22  ;;  %v3085_v50 = vmul.f32 %v3084_v28, %v3060_v33  ;;  %9066 = vrcp.f32 %v12384_v34  ;;  %v2701_v23 = vmul.f32 3.8918573e-05, %v16207_v16 }
 0x3b4   : > { %v4067_v27 = vadd.f32 1.0, %v8235_v4  ;;  %v2055_v44 = vmul.f32 0.5, %v16208_v31  ;;  %v2153_v48 = vsub.f32 1.0, %v2152_v6  ;;  %v2189_v53 = vmul.f32 %v2188_v41, %v16183_v60  ;;  %v16218_v4 = vld [vmem:[#allocation51_spill] sm:$0xff] }
 0x3b5   : > { %5501 = vmatpush.bf16.msrb.mxu2 %v4154_v47  ;;  %v8239_v43 = vclamps-f32 %v3085_v50, 1.0  ;;  %vm2156_vm6 = vweird.f32 %v12345_v0  ;;  %vm12396_vm10 = vcmp.eq.f32.partialorder %v2160_v35, 8.507059e+37  ;;  %v2346_v24 = vadd.f32 0.112945676, %v2345_v8 }
 0x3b6   : > { %v2542_v61 = vadd.f32 0.001143296, %v2541_v56  ;;  %v2154_v14 = vmul.f32 %v9065_v21, %v2153_v48  ;;  %vm2157_vm11 = vweird.f32 %v9065_v21  ;;  %v12400_v12 = vadd.f32 1.0, %v2189_v53  ;;  %v16219_v48 = vld [vmem:[#allocation41_spill] sm:$0xff] }
 0x3b7   : > { %v4071_v9 = vadd.f32 1.0, %v8239_v43  ;;  %v4115_v18 = vmul.f32 %v4067_v27, %v16211_v17  ;;  %v2163_v40 = vor.u32 1.1754944e-38, %v2162_v58  ;;  %v2347_v1 = vmul.f32 %v2346_v24, %v16191_v57  ;;  %vm2158_vm12 = vmor %vm2156_vm6, %vm2157_vm11 }
 0x3b8   : > { %v2702_v20 = vadd.f32 0.001143296, %v2701_v23  ;;  %v2155_v29 = vadd.f32 %v9065_v21, %v2154_v14  ;;  %9068 = vrcp.f32 %v12400_v12  ;;  %v2543_v62 = vmul.f32 %v2542_v61, %v16205_v7 }
 0x3b9   : > { %v4119_v60 = vmul.f32 %v4071_v9, %v2055_v44  ;;  %v9067_v55 = vpop.eup %9066  ;;  %vm2316_vm13 = vweird.f32 %v12384_v34  ;;  %v2348_v52 = vadd.f32 0.4994258, %v2347_v1  ;;  %v2581_v39 = vmul.f32 3.8918573e-05, %v16212_v30 }
 0x3ba   : > { %v2703_v33 = vmul.f32 %v2702_v20, %v16207_v16  ;;  %v2159_v42 = vsel %vm2158_vm12, %v9065_v21, %v2155_v29  ;;  %v2312_v46 = vmul.f32 %v9067_v55, %v12384_v34  ;;  %v2320_v25 = vand.u32 2147483647, %v12384_v34 }
 0x3bb   : > { %v4155_v63 = vpack.c.bf16 %v4119_v60, %v4115_v18  ;;  %v2164_v5 = vsel %vm12396_vm10, %v2163_v40, %v2159_v42  ;;  %v2322_v19 = vand.u32 2147483648, %v12384_v34  ;;  %v2200_v0 = vand.u32 2147483647, %v12400_v12  ;;  %v16220_v60 = vld [vmem:[#allocation12_spill] sm:$0xff] }
 0x3bc   : > { %v2349_v10 = vmul.f32 %v2348_v52, %v16191_v57  ;;  %v2165_v2 = vmul.f32 %v2164_v5, %v16213_v32  ;;  %v2313_v59 = vsub.f32 1.0, %v2312_v46  ;;  %v2544_v22 = vadd.f32 0.014752088, %v2543_v62  ;;  %v16221_v46 = vld [vmem:[#allocation19_spill] sm:$0xff]  ;;  %v16222_v5 = vld [vmem:[#allocation32_spill] sm:$0xff]  ;;  %v16223_v32 = vld [vmem:[#allocation25_spill] sm:$0xff] }
 0x3bd   : > { %5714 = vmatpush.bf16.msrb.mxu3 %v4155_v63  ;;  %v2704_v11 = vadd.f32 0.014752088, %v2703_v33  ;;  %vm2317_vm14 = vweird.f32 %v9067_v55  ;;  %v2202_v37 = vand.u32 2147483648, %v12400_v12  ;;  %v2582_v26 = vadd.f32 0.001143296, %v2581_v39 }
 0x3be   : > { %v12420_v15 = vadd.f32 1.0, %v2349_v10  ;;  %v9069_v35 = vpop.eup %9068  ;;  %v8216_v13 = vclamps-f32 %v2165_v2, 1.0  ;;  %v2314_v45 = vmul.f32 %v9067_v55, %v2313_v59  ;;  %v2545_v49 = vmul.f32 %v2544_v22, %v16205_v7  ;;  %vm2318_vm0 = vmor %vm2316_vm13, %vm2317_vm14 }
 0x3bf   : > { %v2705_v51 = vmul.f32 %v2704_v11, %v16207_v16  ;;  %vm12424_vm15 = vcmp.eq.f32.partialorder %v2320_v25, 8.507059e+37  ;;  %v2323_v3 = vor.u32 1.1754944e-38, %v2322_v19  ;;  %v2192_v8 = vmul.f32 %v9069_v35, %v12400_v12 }
 0x3c0   : > { %9070 = vrcp.f32 %v12420_v15  ;;  %v2315_v56 = vadd.f32 %v9067_v55, %v2314_v45  ;;  %vm2196_vm1 = vweird.f32 %v12400_v12  ;;  %vm12431_vm2 = vcmp.eq.f32.partialorder %v2200_v0, 8.507059e+37  ;;  %v16225_v45 = vld [vmem:[#allocation74_spill] sm:$0xff] }
 0x3c1   : > { %v2741_v28 = vmul.f32 3.8918573e-05, %v16218_v4  ;;  %v2193_v41 = vsub.f32 1.0, %v2192_v8  ;;  %v2546_v38 = vadd.f32 0.112945676, %v2545_v49  ;;  %v2583_v50 = vmul.f32 %v2582_v26, %v16212_v30 }
 0x3c2   : > { %v2706_v47 = vadd.f32 0.112945676, %v2705_v51  ;;  %v2319_v6 = vsel %vm2318_vm0, %v9067_v55, %v2315_v56  ;;  %v4048_v27 = vadd.f32 1.0, %v8216_v13  ;;  %vm2197_vm3 = vweird.f32 %v9069_v35  ;;  %v16224_v13 = vld [vmem:[#allocation34_spill] sm:$0xff]  ;;  %v16226_v56 = vld [vmem:[#allocation24_spill] sm:$0xff] }
 0x3c3   : > { %v2203_v58 = vor.u32 1.1754944e-38, %v2202_v37  ;;  %v2324_v23 = vsel %vm12424_vm15, %v2323_v3, %v2319_v6  ;;  %v2194_v31 = vmul.f32 %v9069_v35, %v2193_v41  ;;  %v2547_v44 = vmul.f32 %v2546_v38, %v16205_v7  ;;  %vm2198_vm5 = vmor %vm2196_vm1, %vm2197_vm3 }
 0x3c4   : > { %v2707_v43 = vmul.f32 %v2706_v47, %v16207_v16  ;;  %v2325_v34 = vmul.f32 %v2324_v23, %v16219_v48  ;;  %vm2356_vm4 = vweird.f32 %v12420_v15  ;;  %v2360_v53 = vand.u32 2147483647, %v12420_v15 }
 0x3c5   : > { %v2584_v36 = vadd.f32 0.014752088, %v2583_v50  ;;  %v2742_v24 = vadd.f32 0.001143296, %v2741_v28  ;;  %v2195_v9 = vadd.f32 %v9069_v35, %v2194_v31  ;;  %v2362_v14 = vand.u32 2147483648, %v12420_v15  ;;  %v16227_v50 = vld [vmem:[#allocation44_spill] sm:$0xff] }
 0x3c6   : > { %v9071_v61 = vpop.eup %9070  ;;  %v2548_v17 = vadd.f32 0.4994258, %v2547_v44  ;;  %v2708_v18 = vadd.f32 0.4994258, %v2707_v43  ;;  %v8220_v40 = vclamps-f32 %v2325_v34, 1.0  ;;  %v4096_v25 = vmul.f32 %v4048_v27, %v16221_v46 }
 0x3c7   : > { %v2352_v1 = vmul.f32 %v9071_v61, %v12420_v15  ;;  %v2585_v20 = vmul.f32 %v2584_v36, %v16212_v30  ;;  %v2221_v29 = vmul.f32 3.8918573e-05, %v16220_v60  ;;  %v2199_v62 = vsel %vm2198_vm5, %v9069_v35, %v2195_v9 }
 0x3c8   : > { %v2549_v55 = vmul.f32 %v2548_v17, %v16205_v7  ;;  %v2709_v52 = vmul.f32 %v2708_v18, %v16207_v16  ;;  %v2743_v33 = vmul.f32 %v2742_v24, %v16218_v4  ;;  %v4052_v39 = vadd.f32 1.0, %v8220_v40  ;;  %v16230_v24 = vld [vmem:[#allocation20_spill] sm:$0xff] }
 0x3c9   : > { %v2204_v63 = vsel %vm12431_vm2, %v2203_v58, %v2199_v62  ;;  %v2353_v42 = vsub.f32 1.0, %v2352_v1  ;;  %v2586_v12 = vadd.f32 0.112945676, %v2585_v20  ;;  %vm2357_vm9 = vweird.f32 %v9071_v61  ;;  %v16231_v20 = vld [vmem:[#allocation33_spill] sm:$0xff]  ;;  %v16232_v62 = vld [vmem:[#allocation26_spill] sm:$0xff] }
 0x3ca   : > { %v2205_v19 = vmul.f32 %v2204_v63, %v16222_v5  ;;  %v2550_v0 = vadd.f32 1.0, %v2549_v55  ;;  %v12461_v10 = vadd.f32 1.0, %v2709_v52  ;;  %v4100_v2 = vmul.f32 %v4052_v39, %v16223_v32  ;;  %vm2358_vm7 = vmor %vm2356_vm4, %vm2357_vm9  ;;  %v12507_v5 = vld [vmem:[%s15736_s4] sm:$0xff] }
 0x3cb   : > { %v2354_v7 = vmul.f32 %v9071_v61, %v2353_v42  ;;  %v2587_v16 = vmul.f32 %v2586_v12, %v16212_v30  ;;  %v2744_v22 = vadd.f32 0.014752088, %v2743_v33  ;;  %v2222_v11 = vadd.f32 0.001143296, %v2221_v29 }
 0x3cc   : > { %v8217_v59 = vclamps-f32 %v2205_v19, 1.0  ;;  %9072 = vrcp.f32 %v2550_v0  ;;  %v4144_v37 = vpack.c.bf16 %v4100_v2, %v4096_v25  ;;  %v2560_v35 = vand.u32 2147483647, %v2550_v0 }
 0x3cd   : > { %v2355_v26 = vadd.f32 %v9071_v61, %v2354_v7  ;;  %9074 = vrcp.f32 %v12461_v10  ;;  %v12468_v49 = vmul.f32 %v16225_v45, %v16224_v13  ;;  %v12472_v51 = vmul.f32 %v12387_v54, %v16218_v4  ;;  %v16237_v45 = vld [vmem:[#allocation61_spill] sm:$0xff] }
 0x3ce   : > { %vm2361_vm8 = vcmp.eq.f32.partialorder %v2360_v53, 8.507059e+37  ;;  %v2363_v57 = vor.u32 1.1754944e-38, %v2362_v14  ;;  %5077 = vmatpush.bf16.msrb.mxu0 %v4144_v37  ;;  %vm2556_vm6 = vweird.f32 %v2550_v0  ;;  %v2588_v8 = vadd.f32 0.4994258, %v2587_v16 }
 0x3cf   : > { %v2359_v3 = vsel %vm2358_vm7, %v9071_v61, %v2355_v26  ;;  %v2381_v21 = vmul.f32 3.8918573e-05, %v16226_v56  ;;  %v4049_v41 = vadd.f32 1.0, %v8217_v59  ;;  %v2562_v38 = vand.u32 2147483648, %v2550_v0 }
 0x3d0   : > { %v2364_v28 = vsel %vm2361_vm8, %v2363_v57, %v2359_v3  ;;  %v2745_v47 = vmul.f32 %v2744_v22, %v16218_v4  ;;  %vm12479_vm10 = vcmp.eq.f32.partialorder %v2560_v35, 8.507059e+37  ;;  %v2589_v15 = vmul.f32 %v2588_v8, %v16212_v30 }
 0x3d1   : > { %v2365_v6 = vmul.f32 %v2364_v28, %v16227_v50  ;;  %v2223_v27 = vmul.f32 %v2222_v11, %v16220_v60  ;;  %vm2716_vm11 = vweird.f32 %v12461_v10  ;;  %v2720_v23 = vand.u32 2147483647, %v12461_v10 }
 0x3d2   : > { %v9073_v58 = vpop.eup %9072  ;;  %v2722_v31 = vand.u32 2147483648, %v12461_v10  ;;  %v2746_v44 = vadd.f32 0.112945676, %v2745_v47  ;;  %v12488_v53 = vadd.f32 1.0, %v2589_v15  ;;  %v2382_v36 = vadd.f32 0.001143296, %v2381_v21 }
 0x3d3   : > { %v9075_v43 = vpop.eup %9074  ;;  %v8221_v48 = vclamps-f32 %v2365_v6, 1.0  ;;  %v2552_v34 = vmul.f32 %v9073_v58, %v2550_v0  ;;  %v4097_v61 = vmul.f32 %v4049_v41, %v16230_v24  ;;  %v2224_v14 = vadd.f32 0.014752088, %v2223_v27  ;;  %v16238_v21 = vld [vmem:[#allocation68_spill] sm:$0xff] }
 0x3d4   : > { %v2712_v30 = vmul.f32 %v9075_v43, %v12461_v10  ;;  %v2747_v9 = vmul.f32 %v2746_v44, %v16218_v4  ;;  %vm2557_vm12 = vweird.f32 %v9073_v58  ;;  %9076 = vrcp.f32 %v12488_v53 }
 0x3d5   : > { %v4053_v17 = vadd.f32 1.0, %v8221_v48  ;;  %v2553_v18 = vsub.f32 1.0, %v2552_v34  ;;  %vm2717_vm13 = vweird.f32 %v9075_v43  ;;  %v2261_v29 = vmul.f32 3.8918573e-05, %v16231_v20  ;;  %vm12499_vm14 = vmor %vm2556_vm6, %vm2557_vm12 }
 0x3d6   : > { %v2713_v40 = vsub.f32 1.0, %v2712_v30  ;;  %v2748_v1 = vadd.f32 0.4994258, %v2747_v9  ;;  %v2225_v33 = vmul.f32 %v2224_v14, %v16220_v60  ;;  %v2383_v39 = vmul.f32 %v2382_v36, %v16226_v56  ;;  %vm12512_vm15 = vmor %vm2716_vm11, %vm2717_vm13 }
 0x3d7   : > { %v4101_v55 = vmul.f32 %v4053_v17, %v16232_v62  ;;  %v2554_v52 = vmul.f32 %v9073_v58, %v2553_v18  ;;  %v2563_v42 = vor.u32 1.1754944e-38, %v2562_v38  ;;  %v2723_v46 = vor.u32 1.1754944e-38, %v2722_v31  ;;  %v16239_v38 = vld [vmem:[#allocation50_spill] sm:$0xff] }
 0x3d8   : > { %v2714_v12 = vmul.f32 %v9075_v43, %v2713_v40  ;;  %v2749_v25 = vmul.f32 %v2748_v1, %v16218_v4  ;;  %vm4946_vm1 = vcmask 785408   ;;  %v2226_v2 = vadd.f32 0.112945676, %v2225_v33  ;;  %v16243_v40 = vld [vmem:[#allocation47_spill] sm:$0xff] }
 0x3d9   : > { %v4145_v19 = vpack.c.bf16 %v4101_v55, %v4097_v61  ;;  %v2555_v32 = vadd.f32 %v9073_v58, %v2554_v52  ;;  %vm2721_vm2 = vcmp.eq.f32.partialorder %v2720_v23, 8.507059e+37  ;;  %vm2596_vm0 = vweird.f32 %v12488_v53  ;;  %8428 = vmatmul.msk.bf16.vlgmr.msrb.gmra.mxu0 %vm4946_vm1, %v12507_v5 }
 0x3da   : > { %v2715_v7 = vadd.f32 %v9075_v43, %v2714_v12  ;;  %v12517_v4 = vadd.f32 1.0, %v2749_v25  ;;  %v9077_v16 = vpop.eup %9076  ;;  %v2227_v59 = vmul.f32 %v2226_v2, %v16220_v60  ;;  %v2384_v22 = vadd.f32 0.014752088, %v2383_v39  ;;  %v16246_v2 = vld [vmem:[#allocation31_spill] sm:$0xff] }
 0x3db   : > { %5290 = vmatpush.bf16.msrb.mxu1 %v4145_v19  ;;  %v2559_v10 = vsel %vm12499_vm14, %v9073_v58, %v2555_v32  ;;  %v2262_v11 = vadd.f32 0.001143296, %v2261_v29  ;;  %v2592_v35 = vmul.f32 %v9077_v16, %v12488_v53  ;;  %v2602_v13 = vand.u32 2147483648, %v12488_v53  ;;  %v16245_v32 = vld [vmem:[#allocation56_spill] sm:$0xff] }
 0x3dc   : > { %v2564_v37 = vsel %vm12479_vm10, %v2563_v42, %v2559_v10  ;;  %v2719_v26 = vsel %vm12512_vm15, %v9075_v43, %v2715_v7  ;;  %v2600_v8 = vand.u32 2147483647, %v12488_v53  ;;  %9078 = vrcp.f32 %v12517_v4  ;;  %v16244_v42 = vld [vmem:[#allocation59_spill] sm:$0xff] }
 0x3dd   : > { %v2565_v57 = vmul.f32 %v2564_v37, %v16237_v45  ;;  %v2724_v3 = vsel %vm2721_vm2, %v2723_v46, %v2719_v26  ;;  %v2593_v41 = vsub.f32 1.0, %v2592_v35  ;;  %vm2597_vm3 = vweird.f32 %v9077_v16  ;;  %v16249_v26 = vld [vmem:[#allocation58_spill] sm:$0xff] }
 0x3de   : > { %v2725_v28 = vmul.f32 %v2724_v3, %v16238_v21  ;;  %8469 = vmatmul.msk.bf16.vlgmr.msrb.gmra.mxu1 %vm4946_vm1, %v12507_v5  ;;  %v2421_v47 = vmul.f32 3.8918573e-05, %v16239_v38  ;;  %v2228_v6 = vadd.f32 0.4994258, %v2227_v59  ;;  %v2385_v54 = vmul.f32 %v2384_v22, %v16226_v56  ;;  %vm12542_vm4 = vmor %vm2596_vm0, %vm2597_vm3 }
 0x3df   : > { %v8226_v50 = vclamps-f32 %v2565_v57, 1.0  ;;  %v2263_v15 = vmul.f32 %v2262_v11, %v16231_v20  ;;  %v2739_v27 = vadd.f32 1.1283791, %v12472_v51  ;;  %v2594_v23 = vmul.f32 %v9077_v16, %v2593_v41  ;;  %v16242_v51 = vld [vmem:[#allocation43_spill] sm:$0xff] }
 0x3e0   : > { %v8230_v58 = vclamps-f32 %v2725_v28, 1.0  ;;  %v2603_v31 = vor.u32 1.1754944e-38, %v2602_v13  ;;  %v2229_v48 = vmul.f32 %v2228_v6, %v16220_v60  ;;  %v2386_v34 = vadd.f32 0.112945676, %v2385_v54  ;;  %v16250_v13 = vld [vmem:[#allocation45_spill] sm:$0xff] }
 0x3e1   : > { %v4058_v44 = vadd.f32 1.0, %v8226_v50  ;;  %v2264_v36 = vadd.f32 0.014752088, %v2263_v15  ;;  %v2595_v61 = vadd.f32 %v9077_v16, %v2594_v23  ;;  %vm2601_vm5 = vcmp.eq.f32.partialorder %v2600_v8, 8.507059e+37 }
 0x3e2   : > { %v4062_v24 = vadd.f32 1.0, %v8230_v58  ;;  %v2422_v30 = vadd.f32 0.001143296, %v2421_v47  ;;  %v9079_v9 = vpop.eup %9078  ;;  %v2230_v17 = vadd.f32 1.0, %v2229_v48  ;;  %v2387_v18 = vmul.f32 %v2386_v34, %v16226_v56  ;;  %v16251_v34 = vld [vmem:[#allocation40_spill] sm:$0xff] }
 0x3e3   : > { %v4106_v14 = vmul.f32 %v4058_v44, %v16242_v51  ;;  %v2265_v53 = vmul.f32 %v2264_v36, %v16231_v20  ;;  %v2599_v29 = vsel %vm12542_vm4, %v9077_v16, %v2595_v61  ;;  %v2752_v60 = vmul.f32 %v9079_v9, %v12517_v4  ;;  %v16253_v51 = vld [vmem:[#allocation35_spill] sm:$0xff] }
 0x3e4   : > { %v4110_v1 = vmul.f32 %v4062_v24, %v16243_v40  ;;  %v2762_v62 = vand.u32 2147483648, %v12517_v4  ;;  %v2604_v55 = vsel %vm2601_vm5, %v2603_v31, %v2599_v29  ;;  %vm2756_vm9 = vweird.f32 %v12517_v4 }
 0x3e5   : > { %v2760_v52 = vand.u32 2147483647, %v12517_v4  ;;  %9080 = vrcp.f32 %v2230_v17  ;;  %v2605_v39 = vmul.f32 %v2604_v55, %v12468_v49  ;;  %v2753_v63 = vsub.f32 1.0, %v2752_v60 }
 0x3e6   : > { %v4150_v33 = vpack.c.bf16 %v4110_v1, %v4106_v14  ;;  %vm2757_vm7 = vweird.f32 %v9079_v9  ;;  %v2413_v12 = vadd.f32 0.0036580483, %v16244_v42  ;;  %v2388_v46 = vadd.f32 0.4994258, %v2387_v18 }
 0x3e7   : > { %v2266_v25 = vadd.f32 0.112945676, %v2265_v53  ;;  %v2423_v19 = vmul.f32 %v2422_v30, %v16239_v38  ;;  %v2377_v0 = vadd.f32 0.18741608, %v16245_v32  ;;  %v2043_v7 = vmul.f32 0.5, %v16246_v2  ;;  %vm12564_vm8 = vmor %vm2756_vm9, %vm2757_vm7 }
 0x3e8   : > { %5502 = vmatpush.bf16.msrb.mxu2 %v4150_v33  ;;  %v2754_v16 = vmul.f32 %v9079_v9, %v2753_v63  ;;  %v2763_v10 = vor.u32 1.1754944e-38, %v2762_v62  ;;  %v8227_v59 = vclamps-f32 %v2605_v39, 1.0  ;;  %v2389_v22 = vmul.f32 %v2388_v46, %v16226_v56 }
 0x3e9   : > { %v2267_v11 = vmul.f32 %v2266_v25, %v16231_v20  ;;  %v2424_v37 = vadd.f32 0.014752088, %v2423_v19  ;;  %v2256_v35 = vmul.f32 %v16249_v26, %v16231_v20  ;;  %v2740_v45 = vmul.f32 %v2739_v27, %v16250_v13 }
 0x3ea   : > { %v2755_v57 = vadd.f32 %v9079_v9, %v2754_v16  ;;  %vm2761_vm6 = vcmp.eq.f32.partialorder %v2760_v52, 8.507059e+37  ;;  %v2414_v8 = vmul.f32 %v2413_v12, %v16239_v38  ;;  %v12574_v4 = vadd.f32 1.0, %v2389_v22 }
 0x3eb   : > { %v9081_v3 = vpop.eup %9080  ;;  %v2268_v21 = vadd.f32 0.4994258, %v2267_v11  ;;  %v2425_v28 = vmul.f32 %v2424_v37, %v16239_v38  ;;  %vm2236_vm10 = vweird.f32 %v2230_v17  ;;  %v2240_v50 = vand.u32 2147483647, %v2230_v17  ;;  %v8855_v37 = vld [vmem:[%s15736_s4 + $0x40] sm:$0xff] }
 0x3ec   : > { %v2759_v41 = vsel %vm12564_vm8, %v9079_v9, %v2755_v57  ;;  %v2232_v47 = vmul.f32 %v9081_v3, %v2230_v17  ;;  %v4059_v54 = vadd.f32 1.0, %v8227_v59  ;;  %v2242_v15 = vand.u32 2147483648, %v2230_v17  ;;  %v16252_v9 = vld [vmem:[#allocation9_spill] sm:$0xff] }
 0x3ed   : > { %v2764_v6 = vsel %vm2761_vm6, %v2763_v10, %v2759_v41  ;;  %9082 = vrcp.f32 %v12574_v4  ;;  %vm2237_vm11 = vweird.f32 %v9081_v3  ;;  %v2269_v23 = vmul.f32 %v2268_v21, %v16231_v20  ;;  %v16258_v10 = vld [vmem:[#allocation16_spill] sm:$0xff] }
 0x3ee   : > { %v2765_v27 = vmul.f32 %v2764_v6, %v2740_v45  ;;  %v2233_v58 = vsub.f32 1.0, %v2232_v47  ;;  %v2257_v31 = vadd.f32 0.18741608, %v2256_v35  ;;  %v2378_v44 = vmul.f32 %v2377_v0, %v16226_v56  ;;  %vm12586_vm12 = vmor %vm2236_vm10, %vm2237_vm11 }
 0x3ef   : > { %v2415_v43 = vadd.f32 0.05243302, %v2414_v8  ;;  %v2426_v48 = vadd.f32 0.112945676, %v2425_v28  ;;  %v2047_v36 = vmul.f32 0.5, %v16251_v34  ;;  %v2270_v30 = vadd.f32 1.0, %v2269_v23 }
 0x3f0   : > { %v8231_v24 = vclamps-f32 %v2765_v27, 1.0  ;;  %v2234_v61 = vmul.f32 %v9081_v3, %v2233_v58  ;;  %v2220_v14 = vmul.f32 %v16253_v51, %v16252_v9  ;;  %vm12590_vm13 = vcmp.eq.f32.partialorder %v2240_v50, 8.507059e+37  ;;  %v16261_v28 = vld [vmem:[#allocation6_spill] sm:$0xff]  ;;  %v16264_v23 = vld [vmem:[#allocation23_spill] sm:$0xff] }
 0x3f1   : > { %v2243_v56 = vor.u32 1.1754944e-38, %v2242_v15  ;;  %v2427_v40 = vmul.f32 %v2426_v48, %v16239_v38  ;;  %v4107_v29 = vmul.f32 %v4059_v54, %v2043_v7  ;;  %9084 = vrcp.f32 %v2270_v30  ;;  %v12609_v7 = vld [vmem:[%s15736_s4 + $0x8] sm:$0xff] }
 0x3f2   : > { %v4063_v1 = vadd.f32 1.0, %v8231_v24  ;;  %v2235_v60 = vadd.f32 %v9081_v3, %v2234_v61  ;;  %v2258_v55 = vmul.f32 %v2257_v31, %v16231_v20  ;;  %v2379_v52 = vadd.f32 1.1283791, %v2378_v44  ;;  %8429 = vmatmul.msk.bf16.gmra.mxu0 %vm4946_vm1, %v12609_v7  ;;  %8470 = vmatmul.msk.bf16.gmra.mxu1 %vm4946_vm1, %v12609_v7  ;;  %v16265_v44 = vld [vmem:[#allocation15_spill] sm:$0xff] }
 0x3f3   : > { %v9083_v62 = vpop.eup %9082  ;;  %v2416_v17 = vmul.f32 %v2415_v43, %v16239_v38  ;;  %v2428_v33 = vadd.f32 0.4994258, %v2427_v40  ;;  %vm2396_vm14 = vweird.f32 %v12574_v4  ;;  %v2400_v46 = vand.u32 2147483647, %v12574_v4 }
 0x3f4   : > { %v4111_v39 = vmul.f32 %v4063_v1, %v2047_v36  ;;  %v2239_v63 = vsel %vm12586_vm12, %v9081_v3, %v2235_v60  ;;  %v2392_v42 = vmul.f32 %v9083_v62, %v12574_v4  ;;  %v2402_v25 = vand.u32 2147483648, %v12574_v4  ;;  %v16266_v1 = vld [vmem:[#allocation42_spill] sm:$0xff] }
 0x3f5   : > { %v2244_v12 = vsel %vm12590_vm13, %v2243_v56, %v2239_v63  ;;  %v2429_v20 = vmul.f32 %v2428_v33, %v16239_v38  ;;  %vm2397_vm15 = vweird.f32 %v9083_v62  ;;  %v2380_v59 = vmul.f32 %v2379_v52, %v16258_v10  ;;  %v16267_v63 = vld [vmem:[#allocation18_spill] sm:$0xff]  ;;  %v8850_v10 = vld [vmem:[%s15736_s4 + $0x18] sm:$0xff] }
 0x3f6   : > { %v4151_v19 = vpack.c.bf16 %v4111_v39, %v4107_v29  ;;  %v2245_v32 = vmul.f32 %v2244_v12, %v2220_v14  ;;  %v2393_v0 = vsub.f32 1.0, %v2392_v42  ;;  %v2417_v49 = vadd.f32 0.18741608, %v2416_v17  ;;  %vm12614_vm2 = vmor %vm2396_vm14, %vm2397_vm15  ;;  %v8849_v17 = vld [vmem:[%s15736_s4 + $0x10] sm:$0xff] }
 0x3f7   : > { %v2430_v2 = vadd.f32 1.0, %v2429_v20  ;;  %v9085_v16 = vpop.eup %9084  ;;  %v2403_v26 = vor.u32 1.1754944e-38, %v2402_v25  ;;  %v2259_v13 = vadd.f32 1.1283791, %v2258_v55  ;;  %vm2401_vm0 = vcmp.eq.f32.partialorder %v2400_v46, 8.507059e+37  ;;  %v16268_v25 = vld [vmem:[#allocation38_spill] sm:$0xff] }
 0x3f8   : > { %5715 = vmatpush.bf16.msrb.mxu3 %v4151_v19  ;;  %v2394_v22 = vmul.f32 %v9083_v62, %v2393_v0  ;;  %v8218_v11 = vclamps-f32 %v2245_v32, 1.0  ;;  %v2272_v35 = vmul.f32 %v9085_v16, %v2270_v30  ;;  %v2282_v57 = vand.u32 2147483648, %v2270_v30 }
 0x3f9   : > { %9086 = vrcp.f32 %v2430_v2  ;;  %vm2276_vm3 = vweird.f32 %v2270_v30  ;;  %vm2277_vm4 = vweird.f32 %v9085_v16  ;;  %v2280_v8 = vand.u32 2147483647, %v2270_v30 }
 0x3fa   : > { %v2395_v45 = vadd.f32 %v9083_v62, %v2394_v22  ;;  %v2273_v3 = vsub.f32 1.0, %v2272_v35  ;;  %v2418_v4 = vmul.f32 %v2417_v49, %v16239_v38  ;;  %v2034_v41 = vmul.f32 0.5, %v16261_v28  ;;  %vm12626_vm5 = vmor %vm2276_vm3, %vm2277_vm4  ;;  %v8854_v49 = vld [vmem:[%s15736_s4 + $0x38] sm:$0xff]  ;;  %v8857_v28 = vld [vmem:[%s15736_s4 + $0x50] sm:$0xff] }
 0x3fb   : > { %v4050_v50 = vadd.f32 1.0, %v8218_v11  ;;  %v2283_v27 = vor.u32 1.1754944e-38, %v2282_v57  ;;  %v2260_v31 = vmul.f32 %v2259_v13, %v16264_v23  ;;  %v2038_v43 = vmul.f32 0.5, %v16265_v44  ;;  %v8856_v57 = vld [vmem:[%s15736_s4 + $0x48] sm:$0xff] }
 0x3fc   : > { %v2399_v21 = vsel %vm12614_vm2, %v9083_v62, %v2395_v45  ;;  %v2274_v6 = vmul.f32 %v9085_v16, %v2273_v3  ;;  %vm2281_vm9 = vcmp.eq.f32.partialorder %v2280_v8, 8.507059e+37  ;;  %v2419_v48 = vadd.f32 1.1283791, %v2418_v4 }
 0x3fd   : > { %v2404_v47 = vsel %vm2401_vm0, %v2403_v26, %v2399_v21  ;;  %vm2436_vm7 = vweird.f32 %v2430_v2  ;;  %v4098_v24 = vmul.f32 %v4050_v50, %v2034_v41  ;;  %v2440_v30 = vand.u32 2147483647, %v2430_v2 }
 0x3fe   : > { %v2405_v54 = vmul.f32 %v2404_v47, %v2380_v59  ;;  %v2275_v38 = vadd.f32 %v9085_v16, %v2274_v6  ;;  %v2442_v9 = vand.u32 2147483648, %v2430_v2  ;;  %v2420_v29 = vmul.f32 %v2419_v48, %v16266_v1  ;;  %v8851_v59 = vld [vmem:[%s15736_s4 + $0x20] sm:$0xff] }
 0x3ff   : > { %v9087_v58 = vpop.eup %9086  ;;  %vm2441_vm10 = vcmp.eq.f32.partialorder %v2440_v30, 8.507059e+37  ;;  %v2035_v42 = vmul.f32 0.5, %v16267_v63  ;;  %v2039_v20 = vmul.f32 0.5, %v16268_v25  ;;  %vm5970_vm11 = vcmask 1040384  }
 0x400   : > { %v8222_v34 = vclamps-f32 %v2405_v54, 1.0  ;;  %v2432_v36 = vmul.f32 %v9087_v58, %v2430_v2  ;;  %v2279_v61 = vsel %vm12626_vm5, %v9085_v16, %v2275_v38  ;;  %vm2437_vm8 = vweird.f32 %v9087_v58 }
 0x401   : > { %v2284_v14 = vsel %vm2281_vm9, %v2283_v27, %v2279_v61  ;;  %vm2438_vm6 = vmor %vm2436_vm7, %vm2437_vm8  ;;  %v2443_v60 = vor.u32 1.1754944e-38, %v2442_v9  ;;  %vm5971_vm12 = vcmask 1041408   ;;  %vm5957_vm13 = vcmask 23552  }
 0x402   : > { %v4054_v51 = vadd.f32 1.0, %v8222_v34  ;;  %v2433_v18 = vsub.f32 1.0, %v2432_v36  ;;  %v2285_v53 = vmul.f32 %v2284_v14, %v2260_v31  ;;  %8430 = vmatmul.msk.bf16.gmra.mxu0 %vm4946_vm1, %v8849_v17  ;;  %8471 = vmatmul.msk.bf16.gmra.mxu1 %vm4946_vm1, %v8849_v17  ;;  %vm8041_vm14 = vcmask 1043456  }
 0x404   : > { %v4102_v56 = vmul.f32 %v4054_v51, %v2038_v43  ;;  %v2434_v40 = vmul.f32 %v9087_v58, %v2433_v18  ;;  %v8219_v55 = vclamps-f32 %v2285_v53, 1.0 }
 0x406   : > { %v4146_v62 = vpack.c.bf16 %v4102_v56, %v4098_v24  ;;  %v2435_v52 = vadd.f32 %v9087_v58, %v2434_v40  ;;  %v4051_v46 = vadd.f32 1.0, %v8219_v55  ;;  %v8859_v24 = vld [vmem:[%s15736_s4 + $0x60] sm:$0xff]  ;;  %v8860_v40 = vld [vmem:[%s15736_s4 + $0x68] sm:$0xff] }
 0x408   : > { %5503 = vmatpush.bf16.msrb.mxu2 %v4146_v62  ;;  %v2439_v33 = vsel %vm2438_vm6, %v9087_v58, %v2435_v52  ;;  %v4099_v0 = vmul.f32 %v4051_v46, %v2035_v42  ;;  %v8858_v58 = vld [vmem:[%s15736_s4 + $0x58] sm:$0xff] }
 0x409   : > { %v2444_v39 = vsel %vm2441_vm10, %v2443_v60, %v2439_v33 }
 0x40a   : > { %v2445_v12 = vmul.f32 %v2444_v39, %v2420_v29  ;;  %v8861_v39 = vld [vmem:[%s15736_s4 + $0x70] sm:$0xff] }
 0x40b   : > { %8510 = vmatmul.msk.bf16.vlgmr.msrb.gmra.mxu2 %vm4946_vm1, %v12507_v5 }
 0x40c   : > { %v8223_v19 = vclamps-f32 %v2445_v12, 1.0  ;;  %v5954_v12 = vld.sshfl [vmem:[#allocation1 + $0x8] sm:$0xff pattern:$0x73625140] }
 0x40e   : > { %v4055_v32 = vadd.f32 1.0, %v8223_v19 }
 0x410   : > { %v4103_v2 = vmul.f32 %v4055_v32, %v2039_v20  ;;  %v9161_v20 = vmov 65535  }
 0x411   : > { %v5972_v19 = vsel %vm5970_vm11, 4294967295, %v9161_v20 }
 0x412   : > { %v4147_v16 = vpack.c.bf16 %v4103_v2, %v4099_v0  ;;  %8431 = vmatmul.msk.bf16.gmra.mxu0 %vm4946_vm1, %v8850_v10  ;;  %8472 = vmatmul.msk.bf16.gmra.mxu1 %vm4946_vm1, %v8850_v10  ;;  %v12821_v32 = vsel %vm5971_vm12, %v5972_v19, 0 }
 0x413   : > { %v5976_v2 = vand.u32 %v12821_v32, %v5954_v12 }
 0x414   : > { %5716 = vmatpush.bf16.msrb.mxu3 %v4147_v16  ;;  %v5953_v16 = vld.sshfl [vmem:[#allocation1] sm:$0xff pattern:$0x73625140] }
 0x415   : > { %6018 = vmatpush.bf16.msra.mxu1 %v5976_v2  ;;  %v8863_v2 = vld [vmem:[%s15736_s4 + $0x80] sm:$0xff] }
 0x417   : > { %8551 = vmatmul.msk.bf16.vlgmr.msrb.gmra.mxu3 %vm4946_vm1, %v12507_v5  ;;  %v8852_v5 = vld [vmem:[%s15736_s4 + $0x28] sm:$0xff] }
 0x41b   : > { %8511 = vmatmul.msk.bf16.gmra.mxu2 %vm4946_vm1, %v12609_v7 }
 0x422   : > { %8432 = vmatmul.msk.bf16.gmra.mxu0 %vm4946_vm1, %v8851_v59  ;;  %8473 = vmatmul.msk.bf16.gmra.mxu1 %vm4946_vm1, %v8851_v59 }
 0x427   : > { %8552 = vmatmul.msk.bf16.gmra.mxu3 %vm4946_vm1, %v12609_v7  ;;  %v8853_v7 = vld [vmem:[%s15736_s4 + $0x30] sm:$0xff] }
 0x42b   : > { %8512 = vmatmul.msk.bf16.gmra.mxu2 %vm4946_vm1, %v8849_v17 }
 0x432   : > { %8433 = vmatmul.msk.bf16.gmra.mxu0 %vm4946_vm1, %v8852_v5  ;;  %8474 = vmatmul.msk.bf16.gmra.mxu1 %vm4946_vm1, %v8852_v5 }
 0x437   : > { %8553 = vmatmul.msk.bf16.gmra.mxu3 %vm4946_vm1, %v8849_v17 }
 0x43b   : > { %8513 = vmatmul.msk.bf16.gmra.mxu2 %vm4946_vm1, %v8850_v10 }
 0x442   : > { %8434 = vmatmul.msk.bf16.gmra.mxu0 %vm4946_vm1, %v8853_v7  ;;  %8475 = vmatmul.msk.bf16.gmra.mxu1 %vm4946_vm1, %v8853_v7 }
 0x447   : > { %8554 = vmatmul.msk.bf16.gmra.mxu3 %vm4946_vm1, %v8850_v10  ;;  %v5974_v10 = vand.u32 %v12821_v32, %v5953_v16  ;;  %v12863_v16 = vpop.permute.xlu2 %4354 }
 0x449   : > { %5989 = vmatpush.bf16.msra.mxu0 %v5974_v10 }
 0x44b   : > { %8514 = vmatmul.msk.bf16.gmra.mxu2 %vm4946_vm1, %v8851_v59 }
 0x452   : > { %8435 = vmatmul.msk.bf16.gmra.mxu0 %vm4946_vm1, %v8854_v49  ;;  %8476 = vmatmul.msk.bf16.gmra.mxu1 %vm4946_vm1, %v8854_v49 }
 0x456   : > { %v12683_v22 = vpop.f32.mrf.mxu0 }
 0x457   : > { %8555 = vmatmul.msk.bf16.gmra.mxu3 %vm4946_vm1, %v8851_v59 }
 0x45b   : > { %8515 = vmatmul.msk.bf16.gmra.mxu2 %vm4946_vm1, %v8852_v5  ;;  %v12685_v11 = vpop.f32.mrf.mxu1 }
 0x45e   : > { %v12693_v26 = vpop.f32.mrf.mxu0 }
 0x462   : > { %8436 = vmatmul.msk.bf16.gmra.mxu0 %vm4946_vm1, %v8855_v37  ;;  %8477 = vmatmul.msk.bf16.gmra.mxu1 %vm4946_vm1, %v8855_v37 }
 0x463   : > { %v12695_v35 = vpop.f32.mrf.mxu1 }
 0x467   : > { %8556 = vmatmul.msk.bf16.gmra.mxu3 %vm4946_vm1, %v8852_v5 }
 0x46b   : > { %8516 = vmatmul.msk.bf16.gmra.mxu2 %vm4946_vm1, %v8853_v7 }
 0x46f   : > { %v12699_v13 = vpop.f32.mrf.mxu0  ;;  %v12701_v45 = vpop.f32.mrf.mxu1 }
 0x472   : > { %8437 = vmatmul.msk.bf16.gmra.mxu0 %vm4946_vm1, %v8856_v57  ;;  %8478 = vmatmul.msk.bf16.gmra.mxu1 %vm4946_vm1, %v8856_v57 }
 0x477   : > { %8557 = vmatmul.msk.bf16.gmra.mxu3 %vm4946_vm1, %v8853_v7  ;;  %v12708_v3 = vpop.f32.mrf.mxu0  ;;  %v12710_v8 = vpop.f32.mrf.mxu1 }
 0x47b   : > { %8517 = vmatmul.msk.bf16.gmra.mxu2 %vm4946_vm1, %v8854_v49 }
 0x47f   : > { %v12714_v4 = vpop.f32.mrf.mxu0  ;;  %v12716_v21 = vpop.f32.mrf.mxu1 }
 0x482   : > { %8438 = vmatmul.msk.bf16.gmra.mxu0 %vm4946_vm1, %v8857_v28  ;;  %8479 = vmatmul.msk.bf16.gmra.mxu1 %vm4946_vm1, %v8857_v28 }
 0x487   : > { %8558 = vmatmul.msk.bf16.gmra.mxu3 %vm4946_vm1, %v8854_v49  ;;  %v12725_v47 = vpop.f32.mrf.mxu0  ;;  %v12727_v50 = vpop.f32.mrf.mxu1  ;;  %v8862_v49 = vld [vmem:[%s15736_s4 + $0x78] sm:$0xff] }
 0x48b   : > { %8518 = vmatmul.msk.bf16.gmra.mxu2 %vm4946_vm1, %v8855_v37 }
 0x48e   : > { %v12723_v41 = vpop.f32.mrf.mxu2 }
 0x48f   : > { %v12735_v15 = vpop.f32.mrf.mxu0  ;;  %v12737_v27 = vpop.f32.mrf.mxu1 }
 0x492   : > { %8439 = vmatmul.msk.bf16.gmra.mxu0 %vm4946_vm1, %v8858_v58  ;;  %8480 = vmatmul.msk.bf16.gmra.mxu1 %vm4946_vm1, %v8858_v58 }
 0x496   : > { %v12729_v6 = vpop.f32.mrf.mxu2 }
 0x497   : > { %8559 = vmatmul.msk.bf16.gmra.mxu3 %vm4946_vm1, %v8855_v37  ;;  %v12748_v44 = vpop.f32.mrf.mxu0  ;;  %v12750_v43 = vpop.f32.mrf.mxu1 }
 0x49a   : > { %v12732_v54 = vpop.f32.mrf.mxu3 }
 0x49b   : > { %8519 = vmatmul.msk.bf16.gmra.mxu2 %vm4946_vm1, %v8856_v57 }
 0x49e   : > { %v12744_v23 = vpop.f32.mrf.mxu2 }
 0x49f   : > { %v12758_v34 = vpop.f32.mrf.mxu0  ;;  %v12760_v36 = vpop.f32.mrf.mxu1 }
 0x4a0   : > { %16269 = vst [vmem:[#allocation113_spill] sm:$0xff] %v12758_v34 }
 0x4a1   : > { %16270 = vst [vmem:[#allocation83_spill] sm:$0xff] %v12760_v36 }
 0x4a2   : > { %v12746_v31 = vpop.f32.mrf.mxu3  ;;  %8440 = vmatmul.msk.bf16.gmra.mxu0 %vm4946_vm1, %v8859_v24  ;;  %8481 = vmatmul.msk.bf16.gmra.mxu1 %vm4946_vm1, %v8859_v24 }
 0x4a6   : > { %v12752_v38 = vpop.f32.mrf.mxu2 }
 0x4a7   : > { %8560 = vmatmul.msk.bf16.gmra.mxu3 %vm4946_vm1, %v8856_v57  ;;  %v12771_v9 = vpop.f32.mrf.mxu0  ;;  %v12773_v51 = vpop.f32.mrf.mxu1 }
 0x4a8   : > { %16271 = vst [vmem:[#allocation101_spill] sm:$0xff] %v12771_v9 }
 0x4a9   : > { %16272 = vst [vmem:[#allocation118_spill] sm:$0xff] %v12773_v51 }
 0x4aa   : > { %v12755_v48 = vpop.f32.mrf.mxu3 }
 0x4ab   : > { %8520 = vmatmul.msk.bf16.gmra.mxu2 %vm4946_vm1, %v8857_v28 }
 0x4ae   : > { %v12767_v61 = vpop.f32.mrf.mxu2 }
 0x4af   : > { %v12781_v53 = vpop.f32.mrf.mxu0  ;;  %v12783_v56 = vpop.f32.mrf.mxu1 }
 0x4b0   : > { %16273 = vst [vmem:[#allocation121_spill] sm:$0xff] %v12781_v53 }
 0x4b1   : > { %16274 = vst [vmem:[#allocation119_spill] sm:$0xff] %v12783_v56 }
 0x4b2   : > { %v12769_v30 = vpop.f32.mrf.mxu3  ;;  %8441 = vmatmul.msk.bf16.gmra.mxu0 %vm4946_vm1, %v8860_v40  ;;  %8482 = vmatmul.msk.bf16.gmra.mxu1 %vm4946_vm1, %v8860_v40 }
 0x4b6   : > { %v12775_v14 = vpop.f32.mrf.mxu2 }
 0x4b7   : > { %8561 = vmatmul.msk.bf16.gmra.mxu3 %vm4946_vm1, %v8857_v28  ;;  %v12794_v60 = vpop.f32.mrf.mxu0  ;;  %v12796_v62 = vpop.f32.mrf.mxu1 }
 0x4b8   : > { %16277 = vst [vmem:[#allocation120_spill] sm:$0xff] %v12794_v60 }
 0x4b9   : > { %16278 = vst [vmem:[#allocation99_spill] sm:$0xff] %v12796_v62 }
 0x4ba   : > { %v12778_v18 = vpop.f32.mrf.mxu3 }
 0x4bb   : > { %8521 = vmatmul.msk.bf16.gmra.mxu2 %vm4946_vm1, %v8858_v58 }
 0x4be   : > { %v12790_v1 = vpop.f32.mrf.mxu2 }
 0x4bf   : > { %16275 = vst [vmem:[#allocation106_spill] sm:$0xff] %v12790_v1  ;;  %v12804_v17 = vpop.f32.mrf.mxu0  ;;  %v12806_v33 = vpop.f32.mrf.mxu1 }
 0x4c0   : > { %16281 = vst [vmem:[#allocation82_spill] sm:$0xff] %v12804_v17 }
 0x4c1   : > { %16282 = vst [vmem:[#allocation91_spill] sm:$0xff] %v12806_v33 }
 0x4c2   : > { %v12792_v29 = vpop.f32.mrf.mxu3  ;;  %8442 = vmatmul.msk.bf16.gmra.mxu0 %vm4946_vm1, %v8861_v39  ;;  %8483 = vmatmul.msk.bf16.gmra.mxu1 %vm4946_vm1, %v8861_v39 }
 0x4c3   : > { %16276 = vst [vmem:[#allocation102_spill] sm:$0xff] %v12792_v29 }
 0x4c6   : > { %v12798_v55 = vpop.f32.mrf.mxu2 }
 0x4c7   : > { %16279 = vst [vmem:[#allocation111_spill] sm:$0xff] %v12798_v55  ;;  %8562 = vmatmul.msk.bf16.gmra.mxu3 %vm4946_vm1, %v8858_v58  ;;  %v12817_v46 = vpop.f32.mrf.mxu0  ;;  %v12819_v25 = vpop.f32.mrf.mxu1 }
 0x4c8   : > { %16285 = vst [vmem:[#allocation57_spill] sm:$0xff] %v12817_v46 }
 0x4c9   : > { %16286 = vst [vmem:[#allocation49_spill] sm:$0xff] %v12819_v25  ;;  %v12876_v25 = vpop.permute.xlu2 %4349 }
 0x4ca   : > { %v12801_v52 = vpop.f32.mrf.mxu3 }
 0x4cb   : > { %16280 = vst [vmem:[#allocation107_spill] sm:$0xff] %v12801_v52  ;;  %8522 = vmatmul.msk.bf16.gmra.mxu2 %vm4946_vm1, %v8859_v24 }
 0x4ce   : > { %v12813_v63 = vpop.f32.mrf.mxu2 }
 0x4cf   : > { %16283 = vst [vmem:[#allocation48_spill] sm:$0xff] %v12813_v63  ;;  %v12831_v5 = vpop.f32.mrf.mxu0  ;;  %v12833_v7 = vpop.f32.mrf.mxu1 }
 0x4d0   : > { %16289 = vst [vmem:[#allocation95_spill] sm:$0xff] %v12831_v5  ;;  %v5955_v5 = vld.sshfl [vmem:[#allocation1 + $0x10] sm:$0xff pattern:$0x73625140] }
 0x4d1   : > { %16290 = vst [vmem:[#allocation116_spill] sm:$0xff] %v12833_v7 }
 0x4d2   : > { %v12815_v42 = vpop.f32.mrf.mxu3  ;;  %8443 = vmatmul.msk.bf16.gmra.mxu0 %vm4946_vm1, %v8862_v49  ;;  %8484 = vmatmul.msk.bf16.gmra.mxu1 %vm4946_vm1, %v8862_v49 }
 0x4d3   : > { %16284 = vst [vmem:[#allocation100_spill] sm:$0xff] %v12815_v42 }
 0x4d6   : > { %v12823_v0 = vpop.f32.mrf.mxu2 }
 0x4d7   : > { %16287 = vst [vmem:[#allocation109_spill] sm:$0xff] %v12823_v0  ;;  %8563 = vmatmul.msk.bf16.gmra.mxu3 %vm4946_vm1, %v8859_v24  ;;  %v12844_v28 = vpop.f32.mrf.mxu0  ;;  %v12846_v58 = vpop.f32.mrf.mxu1 }
 0x4d8   : > { %16293 = vst [vmem:[#allocation117_spill] sm:$0xff] %v12844_v28 }
 0x4d9   : > { %16294 = vst [vmem:[#allocation108_spill] sm:$0xff] %v12846_v58 }
 0x4da   : > { %v12828_v59 = vpop.f32.mrf.mxu3 }
 0x4db   : > { %16288 = vst [vmem:[#allocation84_spill] sm:$0xff] %v12828_v59  ;;  %8523 = vmatmul.msk.bf16.gmra.mxu2 %vm4946_vm1, %v8860_v40 }
 0x4de   : > { %v12840_v37 = vpop.f32.mrf.mxu2 }
 0x4df   : > { %16291 = vst [vmem:[#allocation60_spill] sm:$0xff] %v12840_v37  ;;  %v12854_v20 = vpop.f32.mrf.mxu0  ;;  %v12856_v19 = vpop.f32.mrf.mxu1 }
 0x4e0   : > { %16297 = vst [vmem:[#allocation92_spill] sm:$0xff] %v12854_v20 }
 0x4e1   : > { %16298 = vst [vmem:[#allocation114_spill] sm:$0xff] %v12856_v19 }
 0x4e2   : > { %v12842_v57 = vpop.f32.mrf.mxu3  ;;  %8444 = vmatmul.msk.bf16.gmra.mxu0 %vm4946_vm1, %v8863_v2  ;;  %8485 = vmatmul.msk.bf16.gmra.mxu1 %vm4946_vm1, %v8863_v2 }
 0x4e3   : > { %16292 = vst [vmem:[#allocation122_spill] sm:$0xff] %v12842_v57 }
 0x4e6   : > { %v12848_v24 = vpop.f32.mrf.mxu2 }
 0x4e7   : > { %16295 = vst [vmem:[#allocation115_spill] sm:$0xff] %v12848_v24  ;;  %8564 = vmatmul.msk.bf16.gmra.mxu3 %vm4946_vm1, %v8860_v40  ;;  %v12869_v58 = vpop.f32.mrf.mxu0  ;;  %v12871_v28 = vpop.f32.mrf.mxu1 }
 0x4e8   : > { %16301 = vst [vmem:[#allocation110_spill] sm:$0xff] %v12869_v58  ;;  %v8864_v58 = vld [vmem:[%s15736_s4 + $0x88] sm:$0xff] }
 0x4e9   : > { %16302 = vst [vmem:[#allocation78_spill] sm:$0xff] %v12871_v28 }
 0x4ea   : > { %v12851_v12 = vpop.f32.mrf.mxu3 }
 0x4eb   : > { %16296 = vst [vmem:[#allocation76_spill] sm:$0xff] %v12851_v12  ;;  %8524 = vmatmul.msk.bf16.gmra.mxu2 %vm4946_vm1, %v8861_v39 }
 0x4ee   : > { %v12865_v10 = vpop.f32.mrf.mxu2 }
 0x4ef   : > { %16299 = vst [vmem:[#allocation105_spill] sm:$0xff] %v12865_v10  ;;  %v12881_v57 = vpop.f32.mrf.mxu0  ;;  %v12883_v0 = vpop.f32.mrf.mxu1 }
 0x4f0   : > { %16305 = vst [vmem:[#allocation13_spill] sm:$0xff] %v12881_v57 }
 0x4f1   : > { %16306 = vst [vmem:[#allocation87_spill] sm:$0xff] %v12883_v0  ;;  %v12903_v0 = vpop.permute.xlu1 %4369 }
 0x4f2   : > { %v12867_v40 = vpop.f32.mrf.mxu3  ;;  %8445 = vmatmul.msk.bf16.gmra.mxu0 %vm4946_vm1, %v8864_v58  ;;  %8486 = vmatmul.msk.bf16.gmra.mxu1 %vm4946_vm1, %v8864_v58  ;;  %16313 = vst [vmem:[#allocation64_spill] sm:$0xff] %v12903_v0 }
 0x4f3   : > { %16300 = vst [vmem:[#allocation88_spill] sm:$0xff] %v12867_v40 }
 0x4f6   : > { %v12873_v24 = vpop.f32.mrf.mxu2 }
 0x4f7   : > { %16303 = vst [vmem:[#allocation79_spill] sm:$0xff] %v12873_v24  ;;  %8565 = vmatmul.msk.bf16.gmra.mxu3 %vm4946_vm1, %v8861_v39  ;;  %v12892_v39 = vpop.permute.xlu2 %4444  ;;  %v12896_v40 = vpop.f32.mrf.mxu0 }
 0x4f8   : > { %16308 = vst [vmem:[#allocation70_spill] sm:$0xff] %v12892_v39  ;;  %v12898_v62 = vpop.f32.mrf.mxu1 }
 0x4f9   : > { %16310 = vst [vmem:[#allocation17_spill] sm:$0xff] %v12896_v40 }
 0x4fa   : > { %v12878_v46 = vpop.f32.mrf.mxu3  ;;  %16311 = vst [vmem:[#allocation14_spill] sm:$0xff] %v12898_v62 }
 0x4fb   : > { %16304 = vst [vmem:[#allocation96_spill] sm:$0xff] %v12878_v46  ;;  %8525 = vmatmul.msk.bf16.gmra.mxu2 %vm4946_vm1, %v8862_v49 }
 0x4fe   : > { %v12890_v28 = vpop.f32.mrf.mxu2 }
 0x4ff   : > { %16307 = vst [vmem:[#allocation46_spill] sm:$0xff] %v12890_v28  ;;  %v12908_v46 = vpop.f32.mrf.mxu0  ;;  %v12915_v39 = vpop.permute.xlu2 %4439 }
 0x500   : > { %16315 = vst [vmem:[#allocation22_spill] sm:$0xff] %v12908_v46  ;;  %v12910_v28 = vpop.f32.mrf.mxu1 }
 0x501   : > { %16316 = vst [vmem:[#allocation103_spill] sm:$0xff] %v12910_v28 }
 0x502   : > { %v12894_v24 = vpop.f32.mrf.mxu3  ;;  %16317 = vst [vmem:[#allocation112_spill] sm:$0xff] %v12915_v39 }
 0x503   : > { %16309 = vst [vmem:[#allocation80_spill] sm:$0xff] %v12894_v24  ;;  %v8865_v24 = vld [vmem:[%s15736_s4 + $0x90] sm:$0xff] }
 0x504   : > { %8446 = vmatmul.msk.bf16.gmra.mxu0 %vm4946_vm1, %v8865_v24  ;;  %8487 = vmatmul.msk.bf16.gmra.mxu1 %vm4946_vm1, %v8865_v24 }
 0x506   : > { %v12900_v57 = vpop.f32.mrf.mxu2 }
 0x507   : > { %16312 = vst [vmem:[#allocation93_spill] sm:$0xff] %v12900_v57  ;;  %8566 = vmatmul.msk.bf16.gmra.mxu3 %vm4946_vm1, %v8862_v49  ;;  %v12921_v57 = vpop.permute.xlu1 %4344  ;;  %v12925_v40 = vpop.f32.mrf.mxu0 }
 0x508   : > { %16320 = vst [vmem:[#allocation97_spill] sm:$0xff] %v12925_v40  ;;  %v12927_v46 = vpop.f32.mrf.mxu1  ;;  %v12929_v28 = vpop.permute.xlu2 %4414 }
 0x509   : > { %16321 = vst [vmem:[#allocation104_spill] sm:$0xff] %v12927_v46  ;;  %v12952_v46 = vpop.permute.xlu0 %4364 }
 0x50a   : > { %v12905_v60 = vpop.f32.mrf.mxu3  ;;  %16322 = vst [vmem:[#allocation98_spill] sm:$0xff] %v12929_v28 }
 0x50b   : > { %16314 = vst [vmem:[#allocation72_spill] sm:$0xff] %v12905_v60  ;;  %8526 = vmatmul.msk.bf16.gmra.mxu2 %vm4946_vm1, %v8863_v2 }
 0x50c   : > { %16329 = vst [vmem:[#allocation62_spill] sm:$0xff] %v12952_v46 }
 0x50e   : > { %v12919_v49 = vpop.f32.mrf.mxu2 }
 0x50f   : > { %16318 = vst [vmem:[#allocation52_spill] sm:$0xff] %v12919_v49  ;;  %v12937_v51 = vpop.f32.mrf.mxu0  ;;  %v12944_v40 = vpop.permute.xlu1 %4339 }
 0x510   : > { %16325 = vst [vmem:[#allocation89_spill] sm:$0xff] %v12937_v51  ;;  %v12939_v49 = vpop.f32.mrf.mxu1 }
 0x511   : > { %16326 = vst [vmem:[#allocation55_spill] sm:$0xff] %v12939_v49 }
 0x512   : > { %v12923_v62 = vpop.f32.mrf.mxu3 }
 0x513   : > { %16319 = vst [vmem:[#allocation85_spill] sm:$0xff] %v12923_v62  ;;  %v8866_v62 = vld [vmem:[%s15736_s4 + $0x98] sm:$0xff] }
 0x514   : > { %8447 = vmatmul.msk.bf16.gmra.mxu0 %vm4946_vm1, %v8866_v62  ;;  %8488 = vmatmul.msk.bf16.gmra.mxu1 %vm4946_vm1, %v8866_v62 }
 0x516   : > { %v12931_v60 = vpop.f32.mrf.mxu2 }
 0x517   : > { %16323 = vst [vmem:[#allocation90_spill] sm:$0xff] %v12931_v60  ;;  %8567 = vmatmul.msk.bf16.gmra.mxu3 %vm4946_vm1, %v8863_v2  ;;  %v12950_v2 = vpop.permute.xlu2 %4409  ;;  %v12956_v51 = vpop.f32.mrf.mxu0 }
 0x518   : > { %16328 = vst [vmem:[#allocation53_spill] sm:$0xff] %v12950_v2  ;;  %v12958_v49 = vpop.f32.mrf.mxu1  ;;  %v12960_v9 = vpop.permute.xlu1 %4434 }
 0x519   : > { %16331 = vst [vmem:[#allocation28_spill] sm:$0xff] %v12956_v51 }
 0x51a   : > { %v12934_v39 = vpop.f32.mrf.mxu3  ;;  %16332 = vst [vmem:[#allocation36_spill] sm:$0xff] %v12958_v49  ;;  %v12977_v49 = vpop.permute.xlu0 %4359 }
 0x51b   : > { %16324 = vst [vmem:[#allocation65_spill] sm:$0xff] %v12934_v39  ;;  %8527 = vmatmul.msk.bf16.gmra.mxu2 %vm4946_vm1, %v8864_v58 }
 0x51c   : > { %16333 = vst [vmem:[#allocation54_spill] sm:$0xff] %v12960_v9 }
 0x51e   : > { %v12948_v60 = vpop.f32.mrf.mxu2 }
 0x51f   : > { %16327 = vst [vmem:[#allocation73_spill] sm:$0xff] %v12948_v60  ;;  %v12965_v19 = vpop.permute.xlu2 %4384  ;;  %v12970_v60 = vpop.f32.mrf.mxu0 }
 0x520   : > { %16335 = vst [vmem:[#allocation63_spill] sm:$0xff] %v12965_v19  ;;  %v12972_v2 = vpop.f32.mrf.mxu1 }
 0x521   : > { %16337 = vst [vmem:[#allocation29_spill] sm:$0xff] %v12970_v60 }
 0x522   : > { %v12954_v39 = vpop.f32.mrf.mxu3  ;;  %16338 = vst [vmem:[#allocation37_spill] sm:$0xff] %v12972_v2  ;;  %v12993_v9 = vpop.permute.xlu0 %4334 }
 0x523   : > { %16330 = vst [vmem:[#allocation7_spill] sm:$0xff] %v12954_v39  ;;  %v8867_v39 = vld [vmem:[%s15736_s4 + $0xa0] sm:$0xff] }
 0x524   : > { %8448 = vmatmul.msk.bf16.gmra.mxu0 %vm4946_vm1, %v8867_v39  ;;  %8489 = vmatmul.msk.bf16.gmra.mxu1 %vm4946_vm1, %v8867_v39 }
 0x526   : > { %v12962_v10 = vpop.f32.mrf.mxu2 }
 0x527   : > { %16334 = vst [vmem:[#allocation10_spill] sm:$0xff] %v12962_v10  ;;  %8568 = vmatmul.msk.bf16.gmra.mxu3 %vm4946_vm1, %v8864_v58  ;;  %v12983_v10 = vpop.permute.xlu1 %4429  ;;  %v12987_v51 = vpop.f32.mrf.mxu0 }
 0x528   : > { %16340 = vst [vmem:[#allocation11_spill] sm:$0xff] %v12983_v10  ;;  %v12989_v60 = vpop.f32.mrf.mxu1  ;;  %v12991_v2 = vpop.permute.xlu2 %4379 }
 0x529   : > { %16342 = vst [vmem:[#allocation71_spill] sm:$0xff] %v12987_v51  ;;  %v5956_v51 = vld.sshfl [vmem:[#allocation1 + $0x18] sm:$0xff pattern:$0x73625140] }
 0x52a   : > { %v12967_v20 = vpop.f32.mrf.mxu3  ;;  %16343 = vst [vmem:[#allocation66_spill] sm:$0xff] %v12989_v60  ;;  %v8868_v60 = vld [vmem:[%s15736_s4 + $0xa8] sm:$0xff]  ;;  %v5980_v10 = vand.u32 %v12821_v32, %v5956_v51 }
 0x52b   : > { %16336 = vst [vmem:[#allocation8_spill] sm:$0xff] %v12967_v20  ;;  %8528 = vmatmul.msk.bf16.gmra.mxu2 %vm4946_vm1, %v8865_v24 }
 0x52c   : > { %16344 = vst [vmem:[#allocation86_spill] sm:$0xff] %v12991_v2  ;;  %6076 = vmatpush.bf16.msra.mxu3 %v5980_v10 }
 0x52e   : > { %v12981_v58 = vpop.f32.mrf.mxu2 }
 0x52f   : > { %16339 = vst [vmem:[#allocation81_spill] sm:$0xff] %v12981_v58  ;;  %v12998_v12 = vpop.permute.xlu1 %4404  ;;  %v13003_v58 = vpop.f32.mrf.mxu0 }
 0x530   : > { %16346 = vst [vmem:[#allocation21_spill] sm:$0xff] %v12998_v12 }
 0x531   : > { %16348 = vst [vmem:[#allocation27_spill] sm:$0xff] %v13003_v58 }
 0x532   : > { %v12985_v20 = vpop.f32.mrf.mxu3 }
 0x533   : > { %16341 = vst [vmem:[#allocation94_spill] sm:$0xff] %v12985_v20  ;;  %v13005_v20 = vpop.f32.mrf.mxu1 }
 0x534   : > { %16349 = vst [vmem:[#allocation67_spill] sm:$0xff] %v13005_v20  ;;  %8449 = vmatmul.msk.bf16.gmra.mxu0 %vm4946_vm1, %v8868_v60  ;;  %8490 = vmatmul.msk.bf16.gmra.mxu1 %vm4946_vm1, %v8868_v60 }
 0x536   : > { %v12995_v28 = vpop.f32.mrf.mxu2 }
 0x537   : > { %16345 = vst [vmem:[#allocation75_spill] sm:$0xff] %v12995_v28  ;;  %8569 = vmatmul.msk.bf16.gmra.mxu3 %vm4946_vm1, %v8865_v24  ;;  %v13013_v24 = vpop.permute.xlu2 %4604  ;;  %v13017_v28 = vpop.permute.xlu0 %4449 }
 0x538   : > { %16350 = vst [vmem:[#allocation69_spill] sm:$0xff] %v13013_v24  ;;  %v13021_v20 = vpop.f32.mrf.mxu0  ;;  %v13025_v7 = vpop.permute.xlu1 %4399  ;;  %v5978_v24 = vand.u32 %v12821_v32, %v5955_v5 }
 0x539   : > { %16352 = vst [vmem:[#allocation30_spill] sm:$0xff] %v13017_v28 }
 0x53a   : > { %v13000_v37 = vpop.f32.mrf.mxu3  ;;  %16354 = vst [vmem:[#allocation41_spill] sm:$0xff] %v13021_v20  ;;  %6047 = vmatpush.bf16.msra.mxu2 %v5978_v24 }
 0x53b   : > { %16347 = vst [vmem:[#allocation77_spill] sm:$0xff] %v13000_v37  ;;  %8529 = vmatmul.msk.bf16.gmra.mxu2 %vm4946_vm1, %v8866_v62  ;;  %v13023_v2 = vpop.f32.mrf.mxu1 }
 0x53c   : > { %16355 = vst [vmem:[#allocation12_spill] sm:$0xff] %v13023_v2 }
 0x53d   : > { %16356 = vst [vmem:[#allocation19_spill] sm:$0xff] %v13025_v7 }
 0x53e   : > { %v13015_v37 = vpop.f32.mrf.mxu2 }
 0x53f   : > { %16351 = vst [vmem:[#allocation39_spill] sm:$0xff] %v13015_v37  ;;  %v13030_v12 = vpop.permute.xlu2 %4519  ;;  %v13033_v10 = vpop.permute.xlu0 %4424 }
 0x540   : > { %16358 = vst [vmem:[#allocation25_spill] sm:$0xff] %v13030_v12  ;;  %v13038_v20 = vpop.f32.mrf.mxu0  ;;  %v13047_v32 = vpop.permute.xlu1 %4374 }
 0x541   : > { %16359 = vst [vmem:[#allocation34_spill] sm:$0xff] %v13033_v10 }
 0x542   : > { %v13019_v58 = vpop.f32.mrf.mxu3  ;;  %16361 = vst [vmem:[#allocation24_spill] sm:$0xff] %v13038_v20 }
 0x543   : > { %16353 = vst [vmem:[#allocation51_spill] sm:$0xff] %v13019_v58  ;;  %v13040_v2 = vpop.f32.mrf.mxu1 }
 0x544   : > { %16362 = vst [vmem:[#allocation44_spill] sm:$0xff] %v13040_v2 }
 0x545   : > { %16363 = vst [vmem:[#allocation20_spill] sm:$0xff] %v13047_v32 }
 0x546   : > { %v13027_v51 = vpop.f32.mrf.mxu2 }
 0x547   : > { %16357 = vst [vmem:[#allocation32_spill] sm:$0xff] %v13027_v51  ;;  %8570 = vmatmul.msk.bf16.gmra.mxu3 %vm4946_vm1, %v8866_v62  ;;  %v8869_v62 = vld [vmem:[%s15736_s4 + $0xb0] sm:$0xff]  ;;  %v13051_v12 = vpop.permute.xlu2 %4504  ;;  %v13059_v2 = vpop.permute.xlu0 %4419 }
 0x548   : > { %8450 = vmatmul.msk.bf16.gmra.mxu0 %vm4946_vm1, %v8869_v62  ;;  %8491 = vmatmul.msk.bf16.gmra.mxu1 %vm4946_vm1, %v8869_v62  ;;  %16365 = vst [vmem:[#allocation26_spill] sm:$0xff] %v13051_v12  ;;  %v13064_v58 = vpop.permute.xlu1 %4529 }
 0x549   : > { %16369 = vst [vmem:[#allocation43_spill] sm:$0xff] %v13059_v2 }
 0x54a   : > { %v13035_v37 = vpop.f32.mrf.mxu3  ;;  %16371 = vst [vmem:[#allocation59_spill] sm:$0xff] %v13064_v58 }
 0x54b   : > { %16360 = vst [vmem:[#allocation74_spill] sm:$0xff] %v13035_v37  ;;  %8530 = vmatmul.msk.bf16.gmra.mxu2 %vm4946_vm1, %v8867_v39  ;;  %v13055_v37 = vpop.f32.mrf.mxu0  ;;  %v13057_v20 = vpop.f32.mrf.mxu1 }
 0x54c   : > { %16367 = vst [vmem:[#allocation68_spill] sm:$0xff] %v13055_v37 }
 0x54d   : > { %16368 = vst [vmem:[#allocation50_spill] sm:$0xff] %v13057_v20  ;;  %v8870_v20 = vld [vmem:[%s15736_s4 + $0xb8] sm:$0xff] }
 0x54e   : > { %v13049_v5 = vpop.f32.mrf.mxu2 }
 0x54f   : > { %16364 = vst [vmem:[#allocation33_spill] sm:$0xff] %v13049_v5  ;;  %v13076_v37 = vpop.permute.xlu2 %4589 }
 0x550   : > { %16375 = vst [vmem:[#allocation45_spill] sm:$0xff] %v13076_v37 }
 0x552   : > { %v13053_v24 = vpop.f32.mrf.mxu3 }
 0x553   : > { %16366 = vst [vmem:[#allocation61_spill] sm:$0xff] %v13053_v24  ;;  %v13069_v5 = vpop.f32.mrf.mxu0  ;;  %v13071_v12 = vpop.f32.mrf.mxu1 }
 0x554   : > { %16373 = vst [vmem:[#allocation31_spill] sm:$0xff] %v13069_v5 }
 0x555   : > { %16374 = vst [vmem:[#allocation58_spill] sm:$0xff] %v13071_v12 }
 0x556   : > { %v13061_v51 = vpop.f32.mrf.mxu2 }
 0x557   : > { %16370 = vst [vmem:[#allocation47_spill] sm:$0xff] %v13061_v51  ;;  %8571 = vmatmul.msk.bf16.gmra.mxu3 %vm4946_vm1, %v8867_v39  ;;  %v13080_v39 = vpop.permute.xlu0 %4394  ;;  %v13092_v24 = vpop.permute.xlu2 %4574 }
 0x558   : > { %8451 = vmatmul.msk.bf16.gmra.mxu0 %vm4946_vm1, %v8870_v20  ;;  %8492 = vmatmul.msk.bf16.gmra.mxu1 %vm4946_vm1, %v8870_v20  ;;  %16376 = vst [vmem:[#allocation40_spill] sm:$0xff] %v13080_v39 }
 0x559   : > { %16382 = vst [vmem:[#allocation15_spill] sm:$0xff] %v13092_v24 }
 0x55a   : > { %v13066_v28 = vpop.f32.mrf.mxu3 }
 0x55b   : > { %16372 = vst [vmem:[#allocation56_spill] sm:$0xff] %v13066_v28  ;;  %8531 = vmatmul.msk.bf16.gmra.mxu2 %vm4946_vm1, %v8868_v60  ;;  %v13084_v28 = vpop.permute.xlu1 %4514  ;;  %v13088_v5 = vpop.f32.mrf.mxu0 }
 0x55c   : > { %16378 = vst [vmem:[#allocation35_spill] sm:$0xff] %v13084_v28  ;;  %v13090_v12 = vpop.f32.mrf.mxu1 }
 0x55d   : > { %16380 = vst [vmem:[#allocation6_spill] sm:$0xff] %v13088_v5 }
 0x55e   : > { %v13082_v58 = vpop.f32.mrf.mxu2  ;;  %16381 = vst [vmem:[#allocation23_spill] sm:$0xff] %v13090_v12 }
 0x55f   : > { %16377 = vst [vmem:[#allocation9_spill] sm:$0xff] %v13082_v58  ;;  %v13097_v37 = vpop.permute.xlu0 %4389  ;;  %v13115_v24 = vpop.permute.xlu2 %4489 }
 0x560   : > { %16384 = vst [vmem:[#allocation18_spill] sm:$0xff] %v13097_v37 }
 0x561   : > { %16390 = vst [vmem:[#allocation127_spill] sm:$0xff] %v13115_v24 }
 0x562   : > { %v13086_v51 = vpop.f32.mrf.mxu3 }
 0x563   : > { %16379 = vst [vmem:[#allocation16_spill] sm:$0xff] %v13086_v51  ;;  %v13102_v58 = vpop.f32.mrf.mxu0  ;;  %v8871_v51 = vld [vmem:[%s15736_s4 + $0xc0] sm:$0xff]  ;;  %v13109_v12 = vpop.permute.xlu1 %4599 }
 0x564   : > { %16386 = vst [vmem:[#allocation123_spill] sm:$0xff] %v13102_v58  ;;  %v13104_v28 = vpop.f32.mrf.mxu1 }
 0x565   : > { %16387 = vst [vmem:[#allocation124_spill] sm:$0xff] %v13104_v28 }
 0x566   : > { %v13094_v2 = vpop.f32.mrf.mxu2  ;;  %16388 = vst [vmem:[#allocation125_spill] sm:$0xff] %v13109_v12 }
 0x567   : > { %16383 = vst [vmem:[#allocation42_spill] sm:$0xff] %v13094_v2  ;;  %8572 = vmatmul.msk.bf16.gmra.mxu3 %vm4946_vm1, %v8868_v60  ;;  %v13130_v12 = vpop.permute.xlu2 %4474 }
 0x568   : > { %8452 = vmatmul.msk.bf16.gmra.mxu0 %vm4946_vm1, %v8871_v51  ;;  %8493 = vmatmul.msk.bf16.gmra.mxu1 %vm4946_vm1, %v8871_v51  ;;  %16397 = vst [vmem:[#allocation134_spill] sm:$0xff] %v13130_v12 }
 0x56a   : > { %v13099_v10 = vpop.f32.mrf.mxu3 }
 0x56b   : > { %16385 = vst [vmem:[#allocation38_spill] sm:$0xff] %v13099_v10  ;;  %8532 = vmatmul.msk.bf16.gmra.mxu2 %vm4946_vm1, %v8869_v62  ;;  %v13117_v10 = vpop.permute.xlu0 %4524  ;;  %v13121_v58 = vpop.f32.mrf.mxu0 }
 0x56c   : > { %16391 = vst [vmem:[#allocation128_spill] sm:$0xff] %v13117_v10  ;;  %v13123_v28 = vpop.f32.mrf.mxu1  ;;  %v13125_v5 = vpop.permute.xlu1 %4584 }
 0x56d   : > { %16393 = vst [vmem:[#allocation130_spill] sm:$0xff] %v13121_v58 }
 0x56e   : > { %v13113_v60 = vpop.f32.mrf.mxu2  ;;  %16394 = vst [vmem:[#allocation131_spill] sm:$0xff] %v13123_v28 }
 0x56f   : > { %16389 = vst [vmem:[#allocation126_spill] sm:$0xff] %v13113_v60 }
 0x570   : > { %16395 = vst [vmem:[#allocation132_spill] sm:$0xff] %v13125_v5  ;;  %v8872_v5 = vld [vmem:[%s15736_s4 + $0xc8] sm:$0xff] }
 0x572   : > { %v13119_v2 = vpop.f32.mrf.mxu3 }
 0x573   : > { %16392 = vst [vmem:[#allocation129_spill] sm:$0xff] %v13119_v2  ;;  %v13136_v10 = vpop.f32.mrf.mxu0  ;;  %v13143_v28 = vpop.permute.xlu0 %4609 }
 0x574   : > { %16399 = vst [vmem:[#allocation136_spill] sm:$0xff] %v13136_v10  ;;  %v13138_v2 = vpop.f32.mrf.mxu1 }
 0x575   : > { %16400 = vst [vmem:[#allocation137_spill] sm:$0xff] %v13138_v2 }
 0x576   : > { %v13127_v7 = vpop.f32.mrf.mxu2  ;;  %16401 = vst [vmem:[#allocation138_spill] sm:$0xff] %v13143_v28 }
 0x577   : > { %16396 = vst [vmem:[#allocation133_spill] sm:$0xff] %v13127_v7  ;;  %8573 = vmatmul.msk.bf16.gmra.mxu3 %vm4946_vm1, %v8869_v62 }
 0x578   : > { %8453 = vmatmul.msk.bf16.gmra.mxu0 %vm4946_vm1, %v8872_v5  ;;  %8494 = vmatmul.msk.bf16.gmra.mxu1 %vm4946_vm1, %v8872_v5 }
 0x57a   : > { %v5788_v37 = vpop.f32.mrf.mxu3 }
 0x57b   : > { %v13133_v60 = vadd.f32 %v5788_v37, %v13130_v12  ;;  %8533 = vmatmul.msk.bf16.gmra.mxu2 %vm4946_vm1, %v8870_v20  ;;  %v13149_v37 = vpop.permute.xlu1 %4499  ;;  %v13157_v2 = vpop.permute.xlu0 %4594 }
 0x57c   : > { %16403 = vst [vmem:[#allocation140_spill] sm:$0xff] %v13149_v37  ;;  %v13155_v10 = vpop.f32.mrf.mxu1 }
 0x57d   : > { %16398 = vst [vmem:[#allocation135_spill] sm:$0xff] %v13133_v60  ;;  %v13153_v60 = vpop.f32.mrf.mxu0 }
 0x57e   : > { %v13147_v62 = vpop.f32.mrf.mxu2  ;;  %16405 = vst [vmem:[#allocation142_spill] sm:$0xff] %v13153_v60 }
 0x57f   : > { %16402 = vst [vmem:[#allocation139_spill] sm:$0xff] %v13147_v62 }
 0x580   : > { %16406 = vst [vmem:[#allocation143_spill] sm:$0xff] %v13155_v10 }
 0x581   : > { %16407 = vst [vmem:[#allocation144_spill] sm:$0xff] %v13157_v2  ;;  %v8873_v2 = vld [vmem:[%s15736_s4 + $0xd0] sm:$0xff] }
 0x582   : > { %v13151_v58 = vpop.f32.mrf.mxu3 }
 0x583   : > { %16404 = vst [vmem:[#allocation141_spill] sm:$0xff] %v13151_v58  ;;  %v13162_v28 = vpop.permute.xlu1 %4484  ;;  %v13179_v10 = vpop.permute.xlu0 %4509 }
 0x584   : > { %16409 = vst [vmem:[#allocation146_spill] sm:$0xff] %v13162_v28  ;;  %v13170_v58 = vpop.f32.mrf.mxu1 }
 0x585   : > { %v13168_v37 = vpop.f32.mrf.mxu0  ;;  %16412 = vst [vmem:[#allocation149_spill] sm:$0xff] %v13170_v58 }
 0x586   : > { %v13159_v7 = vpop.f32.mrf.mxu2  ;;  %16411 = vst [vmem:[#allocation148_spill] sm:$0xff] %v13168_v37 }
 0x587   : > { %16408 = vst [vmem:[#allocation145_spill] sm:$0xff] %v13159_v7  ;;  %8574 = vmatmul.msk.bf16.gmra.mxu3 %vm4946_vm1, %v8870_v20 }
 0x588   : > { %8454 = vmatmul.msk.bf16.gmra.mxu0 %vm4946_vm1, %v8873_v2  ;;  %8495 = vmatmul.msk.bf16.gmra.mxu1 %vm4946_vm1, %v8873_v2  ;;  %16414 = vst [vmem:[#allocation151_spill] sm:$0xff] %v13179_v10 }
 0x58a   : > { %v5793_v12 = vpop.f32.mrf.mxu3 }
 0x58b   : > { %v13165_v59 = vadd.f32 %v5793_v12, %v13162_v28  ;;  %8534 = vmatmul.msk.bf16.gmra.mxu2 %vm4946_vm1, %v8871_v51  ;;  %v13191_v7 = vpop.permute.xlu0 %4494 }
 0x58c   : > { %v13186_v37 = vpop.f32.mrf.mxu1  ;;  %16419 = vst [vmem:[#allocation156_spill] sm:$0xff] %v13191_v7 }
 0x58d   : > { %16410 = vst [vmem:[#allocation147_spill] sm:$0xff] %v13165_v59  ;;  %v13184_v59 = vpop.f32.mrf.mxu0 }
 0x58e   : > { %v13177_v20 = vpop.f32.mrf.mxu2  ;;  %16416 = vst [vmem:[#allocation153_spill] sm:$0xff] %v13184_v59 }
 0x58f   : > { %16413 = vst [vmem:[#allocation150_spill] sm:$0xff] %v13177_v20 }
 0x590   : > { %16417 = vst [vmem:[#allocation154_spill] sm:$0xff] %v13186_v37  ;;  %v8874_v37 = vld [vmem:[%s15736_s4 + $0xd8] sm:$0xff] }
 0x592   : > { %v5795_v12 = vpop.f32.mrf.mxu3 }
 0x593   : > { %v13182_v60 = vadd.f32 %v5795_v12, %v13115_v24 }
 0x594   : > { %v13199_v12 = vpop.f32.mrf.mxu1 }
 0x595   : > { %16415 = vst [vmem:[#allocation152_spill] sm:$0xff] %v13182_v60  ;;  %v13197_v10 = vpop.f32.mrf.mxu0 }
 0x596   : > { %v13188_v58 = vpop.f32.mrf.mxu2  ;;  %16421 = vst [vmem:[#allocation158_spill] sm:$0xff] %v13197_v10 }
 0x597   : > { %16418 = vst [vmem:[#allocation155_spill] sm:$0xff] %v13188_v58  ;;  %8575 = vmatmul.msk.bf16.gmra.mxu3 %vm4946_vm1, %v8871_v51 }
 0x598   : > { %16422 = vst [vmem:[#allocation159_spill] sm:$0xff] %v13199_v12  ;;  %8455 = vmatmul.msk.bf16.gmra.mxu0 %vm4946_vm1, %v8874_v37  ;;  %8496 = vmatmul.msk.bf16.gmra.mxu1 %vm4946_vm1, %v8874_v37 }
 0x59a   : > { %v5798_v62 = vpop.f32.mrf.mxu3 }
 0x59b   : > { %v13194_v28 = vadd.f32 %v5798_v62, %v13191_v7  ;;  %8535 = vmatmul.msk.bf16.gmra.mxu2 %vm4946_vm1, %v8872_v5 }
 0x59d   : > { %16420 = vst [vmem:[#allocation157_spill] sm:$0xff] %v13194_v28  ;;  %v13210_v62 = vpop.f32.mrf.mxu0  ;;  %v13212_v28 = vpop.f32.mrf.mxu1 }
 0x59e   : > { %v13206_v51 = vpop.f32.mrf.mxu2  ;;  %16425 = vst [vmem:[#allocation162_spill] sm:$0xff] %v13210_v62 }
 0x59f   : > { %16423 = vst [vmem:[#allocation160_spill] sm:$0xff] %v13206_v51 }
 0x5a0   : > { %16426 = vst [vmem:[#allocation163_spill] sm:$0xff] %v13212_v28 }
 0x5a2   : > { %v13208_v58 = vpop.f32.mrf.mxu3 }
 0x5a3   : > { %16424 = vst [vmem:[#allocation161_spill] sm:$0xff] %v13208_v58  ;;  %v8875_v58 = vld [vmem:[%s15736_s4 + $0xe0] sm:$0xff] }
 0x5a5   : > { %v13220_v10 = vpop.f32.mrf.mxu0  ;;  %v13222_v60 = vpop.f32.mrf.mxu1 }
 0x5a6   : > { %v13214_v59 = vpop.f32.mrf.mxu2  ;;  %16429 = vst [vmem:[#allocation166_spill] sm:$0xff] %v13220_v10 }
 0x5a7   : > { %16427 = vst [vmem:[#allocation164_spill] sm:$0xff] %v13214_v59  ;;  %8576 = vmatmul.msk.bf16.gmra.mxu3 %vm4946_vm1, %v8872_v5 }
 0x5a8   : > { %16430 = vst [vmem:[#allocation167_spill] sm:$0xff] %v13222_v60  ;;  %8456 = vmatmul.msk.bf16.gmra.mxu0 %vm4946_vm1, %v8875_v58  ;;  %8497 = vmatmul.msk.bf16.gmra.mxu1 %vm4946_vm1, %v8875_v58 }
 0x5aa   : > { %v13217_v12 = vpop.f32.mrf.mxu3 }
 0x5ab   : > { %16428 = vst [vmem:[#allocation165_spill] sm:$0xff] %v13217_v12  ;;  %8536 = vmatmul.msk.bf16.gmra.mxu2 %vm4946_vm1, %v8873_v2 }
 0x5ad   : > { %v13233_v5 = vpop.f32.mrf.mxu0  ;;  %v13235_v12 = vpop.f32.mrf.mxu1 }
 0x5ae   : > { %v13229_v51 = vpop.f32.mrf.mxu2  ;;  %16433 = vst [vmem:[#allocation170_spill] sm:$0xff] %v13233_v5 }
 0x5af   : > { %16431 = vst [vmem:[#allocation168_spill] sm:$0xff] %v13229_v51  ;;  %v8876_v51 = vld [vmem:[%s15736_s4 + $0xe8] sm:$0xff] }
 0x5b0   : > { %16434 = vst [vmem:[#allocation171_spill] sm:$0xff] %v13235_v12 }
 0x5b2   : > { %v13231_v59 = vpop.f32.mrf.mxu3 }
 0x5b3   : > { %16432 = vst [vmem:[#allocation169_spill] sm:$0xff] %v13231_v59 }
 0x5b5   : > { %v13243_v10 = vpop.f32.mrf.mxu0  ;;  %v13245_v62 = vpop.f32.mrf.mxu1 }
 0x5b6   : > { %v13237_v28 = vpop.f32.mrf.mxu2  ;;  %16437 = vst [vmem:[#allocation174_spill] sm:$0xff] %v13243_v10 }
 0x5b7   : > { %16435 = vst [vmem:[#allocation172_spill] sm:$0xff] %v13237_v28  ;;  %8577 = vmatmul.msk.bf16.gmra.mxu3 %vm4946_vm1, %v8873_v2 }
 0x5b8   : > { %16438 = vst [vmem:[#allocation175_spill] sm:$0xff] %v13245_v62  ;;  %8457 = vmatmul.msk.bf16.gmra.mxu0 %vm4946_vm1, %v8876_v51  ;;  %8498 = vmatmul.msk.bf16.gmra.mxu1 %vm4946_vm1, %v8876_v51 }
 0x5ba   : > { %v13240_v60 = vpop.f32.mrf.mxu3 }
 0x5bb   : > { %16436 = vst [vmem:[#allocation173_spill] sm:$0xff] %v13240_v60  ;;  %8537 = vmatmul.msk.bf16.gmra.mxu2 %vm4946_vm1, %v8874_v37 }
 0x5bd   : > { %v13256_v2 = vpop.f32.mrf.mxu0  ;;  %v13258_v60 = vpop.f32.mrf.mxu1 }
 0x5be   : > { %v13252_v12 = vpop.f32.mrf.mxu2  ;;  %16441 = vst [vmem:[#allocation178_spill] sm:$0xff] %v13256_v2 }
 0x5bf   : > { %16439 = vst [vmem:[#allocation176_spill] sm:$0xff] %v13252_v12  ;;  %v8877_v12 = vld [vmem:[%s15736_s4 + $0xf0] sm:$0xff] }
 0x5c0   : > { %16442 = vst [vmem:[#allocation179_spill] sm:$0xff] %v13258_v60 }
 0x5c2   : > { %v13254_v5 = vpop.f32.mrf.mxu3 }
 0x5c3   : > { %16440 = vst [vmem:[#allocation177_spill] sm:$0xff] %v13254_v5 }
 0x5c5   : > { %v13266_v62 = vpop.f32.mrf.mxu0  ;;  %v13268_v10 = vpop.f32.mrf.mxu1 }
 0x5c6   : > { %v13260_v28 = vpop.f32.mrf.mxu2  ;;  %16445 = vst [vmem:[#allocation182_spill] sm:$0xff] %v13266_v62 }
 0x5c7   : > { %16443 = vst [vmem:[#allocation180_spill] sm:$0xff] %v13260_v28  ;;  %8578 = vmatmul.msk.bf16.gmra.mxu3 %vm4946_vm1, %v8874_v37 }
 0x5c8   : > { %16446 = vst [vmem:[#allocation183_spill] sm:$0xff] %v13268_v10  ;;  %8458 = vmatmul.msk.bf16.gmra.mxu0 %vm4946_vm1, %v8877_v12  ;;  %8499 = vmatmul.msk.bf16.gmra.mxu1 %vm4946_vm1, %v8877_v12 }
 0x5ca   : > { %v13263_v59 = vpop.f32.mrf.mxu3 }
 0x5cb   : > { %16444 = vst [vmem:[#allocation181_spill] sm:$0xff] %v13263_v59  ;;  %8538 = vmatmul.msk.bf16.gmra.mxu2 %vm4946_vm1, %v8875_v58 }
 0x5cd   : > { %v13279_v37 = vpop.f32.mrf.mxu0  ;;  %v13281_v59 = vpop.f32.mrf.mxu1 }
 0x5ce   : > { %v13275_v60 = vpop.f32.mrf.mxu2  ;;  %16449 = vst [vmem:[#allocation186_spill] sm:$0xff] %v13279_v37 }
 0x5cf   : > { %16447 = vst [vmem:[#allocation184_spill] sm:$0xff] %v13275_v60 }
 0x5d0   : > { %16450 = vst [vmem:[#allocation187_spill] sm:$0xff] %v13281_v59 }
 0x5d2   : > { %v13277_v2 = vpop.f32.mrf.mxu3 }
 0x5d3   : > { %16448 = vst [vmem:[#allocation185_spill] sm:$0xff] %v13277_v2  ;;  %v8878_v2 = vld [vmem:[%s15736_s4 + $0xf8] sm:$0xff] }
 0x5d5   : > { %v13289_v62 = vpop.f32.mrf.mxu0  ;;  %v13291_v5 = vpop.f32.mrf.mxu1 }
 0x5d6   : > { %v13283_v28 = vpop.f32.mrf.mxu2  ;;  %16453 = vst [vmem:[#allocation190_spill] sm:$0xff] %v13289_v62 }
 0x5d7   : > { %16451 = vst [vmem:[#allocation188_spill] sm:$0xff] %v13283_v28  ;;  %8579 = vmatmul.msk.bf16.gmra.mxu3 %vm4946_vm1, %v8875_v58 }
 0x5d8   : > { %16454 = vst [vmem:[#allocation191_spill] sm:$0xff] %v13291_v5  ;;  %8459 = vmatmul.msk.bf16.gmra.mxu0 %vm4946_vm1, %v8878_v2  ;;  %8500 = vmatmul.msk.bf16.gmra.mxu1 %vm4946_vm1, %v8878_v2 }
 0x5da   : > { %v13286_v10 = vpop.f32.mrf.mxu3 }
 0x5db   : > { %16452 = vst [vmem:[#allocation189_spill] sm:$0xff] %v13286_v10  ;;  %8539 = vmatmul.msk.bf16.gmra.mxu2 %vm4946_vm1, %v8876_v51 }
 0x5dd   : > { %v13302_v58 = vpop.f32.mrf.mxu0  ;;  %v13304_v10 = vpop.f32.mrf.mxu1 }
 0x5de   : > { %v13298_v59 = vpop.f32.mrf.mxu2  ;;  %16457 = vst [vmem:[#allocation194_spill] sm:$0xff] %v13302_v58 }
 0x5df   : > { %16455 = vst [vmem:[#allocation192_spill] sm:$0xff] %v13298_v59 }
 0x5e0   : > { %16458 = vst [vmem:[#allocation195_spill] sm:$0xff] %v13304_v10 }
 0x5e2   : > { %v13300_v37 = vpop.f32.mrf.mxu3 }
 0x5e3   : > { %16456 = vst [vmem:[#allocation193_spill] sm:$0xff] %v13300_v37  ;;  %v8879_v37 = vld [vmem:[%s15736_s4 + $0x100] sm:$0xff] }
 0x5e5   : > { %v13312_v62 = vpop.f32.mrf.mxu0  ;;  %v13314_v60 = vpop.f32.mrf.mxu1 }
 0x5e6   : > { %v13306_v28 = vpop.f32.mrf.mxu2  ;;  %16461 = vst [vmem:[#allocation198_spill] sm:$0xff] %v13312_v62 }
 0x5e7   : > { %16459 = vst [vmem:[#allocation196_spill] sm:$0xff] %v13306_v28  ;;  %8580 = vmatmul.msk.bf16.gmra.mxu3 %vm4946_vm1, %v8876_v51 }
 0x5e8   : > { %16462 = vst [vmem:[#allocation199_spill] sm:$0xff] %v13314_v60  ;;  %8460 = vmatmul.msk.bf16.gmra.mxu0 %vm4946_vm1, %v8879_v37  ;;  %8501 = vmatmul.msk.bf16.gmra.mxu1 %vm4946_vm1, %v8879_v37 }
 0x5ea   : > { %v13309_v5 = vpop.f32.mrf.mxu3 }
 0x5eb   : > { %16460 = vst [vmem:[#allocation197_spill] sm:$0xff] %v13309_v5  ;;  %8540 = vmatmul.msk.bf16.gmra.mxu2 %vm4946_vm1, %v8877_v12 }
 0x5ed   : > { %v13325_v51 = vpop.f32.mrf.mxu0  ;;  %v13327_v5 = vpop.f32.mrf.mxu1 }
 0x5ee   : > { %v13321_v10 = vpop.f32.mrf.mxu2  ;;  %16465 = vst [vmem:[#allocation202_spill] sm:$0xff] %v13325_v51 }
 0x5ef   : > { %16463 = vst [vmem:[#allocation200_spill] sm:$0xff] %v13321_v10 }
 0x5f0   : > { %16466 = vst [vmem:[#allocation203_spill] sm:$0xff] %v13327_v5 }
 0x5f2   : > { %v13323_v58 = vpop.f32.mrf.mxu3 }
 0x5f3   : > { %16464 = vst [vmem:[#allocation201_spill] sm:$0xff] %v13323_v58  ;;  %v8880_v58 = vld [vmem:[%s15736_s4 + $0x108] sm:$0xff] }
 0x5f5   : > { %v13335_v62 = vpop.f32.mrf.mxu0  ;;  %v13337_v59 = vpop.f32.mrf.mxu1 }
 0x5f6   : > { %v13329_v28 = vpop.f32.mrf.mxu2  ;;  %16469 = vst [vmem:[#allocation206_spill] sm:$0xff] %v13335_v62 }
 0x5f7   : > { %16467 = vst [vmem:[#allocation204_spill] sm:$0xff] %v13329_v28  ;;  %8581 = vmatmul.msk.bf16.gmra.mxu3 %vm4946_vm1, %v8877_v12 }
 0x5f8   : > { %16470 = vst [vmem:[#allocation207_spill] sm:$0xff] %v13337_v59  ;;  %8461 = vmatmul.msk.bf16.gmra.mxu0 %vm4946_vm1, %v8880_v58  ;;  %8502 = vmatmul.msk.bf16.gmra.mxu1 %vm4946_vm1, %v8880_v58 }
 0x5fa   : > { %v13332_v60 = vpop.f32.mrf.mxu3 }
 0x5fb   : > { %16468 = vst [vmem:[#allocation205_spill] sm:$0xff] %v13332_v60  ;;  %8541 = vmatmul.msk.bf16.gmra.mxu2 %vm4946_vm1, %v8878_v2 }
 0x5fd   : > { %v13348_v12 = vpop.f32.mrf.mxu0  ;;  %v13350_v60 = vpop.f32.mrf.mxu1 }
 0x5fe   : > { %v13344_v5 = vpop.f32.mrf.mxu2  ;;  %16473 = vst [vmem:[#allocation210_spill] sm:$0xff] %v13348_v12 }
 0x5ff   : > { %16471 = vst [vmem:[#allocation208_spill] sm:$0xff] %v13344_v5 }
 0x600   : > { %16474 = vst [vmem:[#allocation211_spill] sm:$0xff] %v13350_v60 }
 0x602   : > { %v13346_v51 = vpop.f32.mrf.mxu3 }
 0x603   : > { %16472 = vst [vmem:[#allocation209_spill] sm:$0xff] %v13346_v51  ;;  %v8881_v51 = vld [vmem:[%s15736_s4 + $0x110] sm:$0xff] }
 0x605   : > { %v13358_v62 = vpop.f32.mrf.mxu0  ;;  %v13360_v10 = vpop.f32.mrf.mxu1 }
 0x606   : > { %v13352_v28 = vpop.f32.mrf.mxu2  ;;  %16477 = vst [vmem:[#allocation214_spill] sm:$0xff] %v13358_v62 }
 0x607   : > { %16475 = vst [vmem:[#allocation212_spill] sm:$0xff] %v13352_v28  ;;  %8582 = vmatmul.msk.bf16.gmra.mxu3 %vm4946_vm1, %v8878_v2 }
 0x608   : > { %16478 = vst [vmem:[#allocation215_spill] sm:$0xff] %v13360_v10  ;;  %8462 = vmatmul.msk.bf16.gmra.mxu0 %vm4946_vm1, %v8881_v51  ;;  %8503 = vmatmul.msk.bf16.gmra.mxu1 %vm4946_vm1, %v8881_v51 }
 0x60a   : > { %v13355_v59 = vpop.f32.mrf.mxu3 }
 0x60b   : > { %16476 = vst [vmem:[#allocation213_spill] sm:$0xff] %v13355_v59  ;;  %8542 = vmatmul.msk.bf16.gmra.mxu2 %vm4946_vm1, %v8879_v37 }
 0x60d   : > { %v13371_v2 = vpop.f32.mrf.mxu0  ;;  %v13373_v59 = vpop.f32.mrf.mxu1 }
 0x60e   : > { %v13367_v60 = vpop.f32.mrf.mxu2  ;;  %16481 = vst [vmem:[#allocation218_spill] sm:$0xff] %v13371_v2 }
 0x60f   : > { %16479 = vst [vmem:[#allocation216_spill] sm:$0xff] %v13367_v60 }
 0x610   : > { %16482 = vst [vmem:[#allocation219_spill] sm:$0xff] %v13373_v59 }
 0x612   : > { %v13369_v12 = vpop.f32.mrf.mxu3 }
 0x613   : > { %16480 = vst [vmem:[#allocation217_spill] sm:$0xff] %v13369_v12  ;;  %v8882_v12 = vld [vmem:[%s15736_s4 + $0x118] sm:$0xff] }
 0x615   : > { %v13381_v62 = vpop.f32.mrf.mxu0  ;;  %v13383_v5 = vpop.f32.mrf.mxu1 }
 0x616   : > { %v13375_v28 = vpop.f32.mrf.mxu2  ;;  %16485 = vst [vmem:[#allocation222_spill] sm:$0xff] %v13381_v62 }
 0x617   : > { %16483 = vst [vmem:[#allocation220_spill] sm:$0xff] %v13375_v28  ;;  %8583 = vmatmul.msk.bf16.gmra.mxu3 %vm4946_vm1, %v8879_v37 }
 0x618   : > { %16486 = vst [vmem:[#allocation223_spill] sm:$0xff] %v13383_v5  ;;  %8463 = vmatmul.msk.bf16.gmra.mxu0 %vm4946_vm1, %v8882_v12  ;;  %8504 = vmatmul.msk.bf16.gmra.mxu1 %vm4946_vm1, %v8882_v12 }
 0x61a   : > { %v13378_v10 = vpop.f32.mrf.mxu3 }
 0x61b   : > { %16484 = vst [vmem:[#allocation221_spill] sm:$0xff] %v13378_v10  ;;  %8543 = vmatmul.msk.bf16.gmra.mxu2 %vm4946_vm1, %v8880_v58 }
 0x61d   : > { %v13394_v37 = vpop.f32.mrf.mxu0  ;;  %v13396_v2 = vpop.f32.mrf.mxu1 }
 0x61e   : > { %v13390_v59 = vpop.f32.mrf.mxu2  ;;  %16489 = vst [vmem:[#allocation226_spill] sm:$0xff] %v13394_v37 }
 0x61f   : > { %16487 = vst [vmem:[#allocation224_spill] sm:$0xff] %v13390_v59 }
 0x620   : > { %16490 = vst [vmem:[#allocation227_spill] sm:$0xff] %v13396_v2 }
 0x622   : > { %v13392_v28 = vpop.f32.mrf.mxu3 }
 0x623   : > { %16488 = vst [vmem:[#allocation225_spill] sm:$0xff] %v13392_v28  ;;  %v8883_v28 = vld [vmem:[%s15736_s4 + $0x120] sm:$0xff] }
 0x625   : > { %v13404_v62 = vpop.f32.mrf.mxu0  ;;  %v13406_v60 = vpop.f32.mrf.mxu1 }
 0x626   : > { %v13398_v10 = vpop.f32.mrf.mxu2  ;;  %16493 = vst [vmem:[#allocation230_spill] sm:$0xff] %v13404_v62 }
 0x627   : > { %16491 = vst [vmem:[#allocation228_spill] sm:$0xff] %v13398_v10  ;;  %8584 = vmatmul.msk.bf16.gmra.mxu3 %vm4946_vm1, %v8880_v58 }
 0x628   : > { %16494 = vst [vmem:[#allocation231_spill] sm:$0xff] %v13406_v60  ;;  %8464 = vmatmul.msk.bf16.gmra.mxu0 %vm4946_vm1, %v8883_v28  ;;  %8505 = vmatmul.msk.bf16.gmra.mxu1 %vm4946_vm1, %v8883_v28 }
 0x62a   : > { %v13401_v5 = vpop.f32.mrf.mxu3 }
 0x62b   : > { %16492 = vst [vmem:[#allocation229_spill] sm:$0xff] %v13401_v5  ;;  %8544 = vmatmul.msk.bf16.gmra.mxu2 %vm4946_vm1, %v8881_v51 }
 0x62d   : > { %v13417_v58 = vpop.f32.mrf.mxu0  ;;  %v13419_v5 = vpop.f32.mrf.mxu1 }
 0x62e   : > { %v13413_v59 = vpop.f32.mrf.mxu2  ;;  %16497 = vst [vmem:[#allocation234_spill] sm:$0xff] %v13417_v58 }
 0x62f   : > { %16495 = vst [vmem:[#allocation232_spill] sm:$0xff] %v13413_v59  ;;  %v8884_v59 = vld [vmem:[%s15736_s4 + $0x128] sm:$0xff] }
 0x630   : > { %16498 = vst [vmem:[#allocation235_spill] sm:$0xff] %v13419_v5 }
 0x632   : > { %v13415_v10 = vpop.f32.mrf.mxu3 }
 0x633   : > { %16496 = vst [vmem:[#allocation233_spill] sm:$0xff] %v13415_v10 }
 0x635   : > { %v13427_v62 = vpop.f32.mrf.mxu0  ;;  %v13429_v37 = vpop.f32.mrf.mxu1 }
 0x636   : > { %v13421_v2 = vpop.f32.mrf.mxu2  ;;  %16501 = vst [vmem:[#allocation238_spill] sm:$0xff] %v13427_v62 }
 0x637   : > { %16499 = vst [vmem:[#allocation236_spill] sm:$0xff] %v13421_v2  ;;  %8585 = vmatmul.msk.bf16.gmra.mxu3 %vm4946_vm1, %v8881_v51 }
 0x638   : > { %16502 = vst [vmem:[#allocation239_spill] sm:$0xff] %v13429_v37  ;;  %8465 = vmatmul.msk.bf16.gmra.mxu0 %vm4946_vm1, %v8884_v59  ;;  %8506 = vmatmul.msk.bf16.gmra.mxu1 %vm4946_vm1, %v8884_v59 }
 0x63a   : > { %v13424_v60 = vpop.f32.mrf.mxu3 }
 0x63b   : > { %16500 = vst [vmem:[#allocation237_spill] sm:$0xff] %v13424_v60  ;;  %8545 = vmatmul.msk.bf16.gmra.mxu2 %vm4946_vm1, %v8882_v12 }
 0x63d   : > { %v13440_v51 = vpop.f32.mrf.mxu0  ;;  %v13442_v60 = vpop.f32.mrf.mxu1 }
 0x63e   : > { %v13436_v5 = vpop.f32.mrf.mxu2  ;;  %16505 = vst [vmem:[#allocation242_spill] sm:$0xff] %v13440_v51 }
 0x63f   : > { %16503 = vst [vmem:[#allocation240_spill] sm:$0xff] %v13436_v5  ;;  %v8885_v5 = vld [vmem:[%s15736_s4 + $0x130] sm:$0xff] }
 0x640   : > { %16506 = vst [vmem:[#allocation243_spill] sm:$0xff] %v13442_v60 }
 0x642   : > { %v13438_v58 = vpop.f32.mrf.mxu3 }
 0x643   : > { %16504 = vst [vmem:[#allocation241_spill] sm:$0xff] %v13438_v58  ;;  %v13457_v58 = vpop.permute.xlu0 %4579 }
 0x644   : > { %16511 = vst [vmem:[#allocation248_spill] sm:$0xff] %v13457_v58 }
 0x645   : > { %v13450_v62 = vpop.f32.mrf.mxu0  ;;  %v13452_v10 = vpop.f32.mrf.mxu1 }
 0x646   : > { %v13444_v2 = vpop.f32.mrf.mxu2  ;;  %16509 = vst [vmem:[#allocation246_spill] sm:$0xff] %v13450_v62 }
 0x647   : > { %16507 = vst [vmem:[#allocation244_spill] sm:$0xff] %v13444_v2  ;;  %8586 = vmatmul.msk.bf16.gmra.mxu3 %vm4946_vm1, %v8882_v12 }
 0x648   : > { %16510 = vst [vmem:[#allocation247_spill] sm:$0xff] %v13452_v10  ;;  %8466 = vmatmul.msk.bf16.gmra.mxu0 %vm4946_vm1, %v8885_v5  ;;  %8507 = vmatmul.msk.bf16.gmra.mxu1 %vm4946_vm1, %v8885_v5 }
 0x64a   : > { %v13447_v37 = vpop.f32.mrf.mxu3 }
 0x64b   : > { %16508 = vst [vmem:[#allocation245_spill] sm:$0xff] %v13447_v37  ;;  %8546 = vmatmul.msk.bf16.gmra.mxu2 %vm4946_vm1, %v8883_v28  ;;  %v13469_v62 = vpop.permute.xlu0 %4564 }
 0x64c   : > { %16516 = vst [vmem:[#allocation253_spill] sm:$0xff] %v13469_v62 }
 0x64d   : > { %v13465_v51 = vpop.f32.mrf.mxu0  ;;  %v13467_v37 = vpop.f32.mrf.mxu1 }
 0x64e   : > { %v13461_v60 = vpop.f32.mrf.mxu2  ;;  %16514 = vst [vmem:[#allocation251_spill] sm:$0xff] %v13465_v51 }
 0x64f   : > { %16512 = vst [vmem:[#allocation249_spill] sm:$0xff] %v13461_v60  ;;  %v8886_v60 = vld [vmem:[%s15736_s4 + $0x138] sm:$0xff] }
 0x650   : > { %16515 = vst [vmem:[#allocation252_spill] sm:$0xff] %v13467_v37 }
 0x652   : > { %v13463_v12 = vpop.f32.mrf.mxu3 }
 0x653   : > { %16513 = vst [vmem:[#allocation250_spill] sm:$0xff] %v13463_v12 }
 0x655   : > { %v13477_v58 = vpop.f32.mrf.mxu0  ;;  %v13479_v20 = vpop.f32.mrf.mxu1 }
 0x656   : > { %v13471_v10 = vpop.f32.mrf.mxu2  ;;  %16519 = vst [vmem:[#allocation256_spill] sm:$0xff] %v13477_v58 }
 0x657   : > { %16517 = vst [vmem:[#allocation254_spill] sm:$0xff] %v13471_v10  ;;  %8587 = vmatmul.msk.bf16.gmra.mxu3 %vm4946_vm1, %v8883_v28  ;;  %v13488_v10 = vpop.permute.xlu0 %4479 }
 0x658   : > { %16520 = vst [vmem:[#allocation257_spill] sm:$0xff] %v13479_v20  ;;  %8467 = vmatmul.msk.bf16.gmra.mxu0 %vm4946_vm1, %v8886_v60  ;;  %8508 = vmatmul.msk.bf16.gmra.mxu1 %vm4946_vm1, %v8886_v60 }
 0x659   : > { %16522 = vst [vmem:[#allocation259_spill] sm:$0xff] %v13488_v10 }
 0x65a   : > { %v13474_v2 = vpop.f32.mrf.mxu3 }
 0x65b   : > { %16518 = vst [vmem:[#allocation255_spill] sm:$0xff] %v13474_v2  ;;  %8547 = vmatmul.msk.bf16.gmra.mxu2 %vm4946_vm1, %v8884_v59 }
 0x65d   : > { %v13492_v2 = vpop.f32.mrf.mxu0  ;;  %v13494_v51 = vpop.f32.mrf.mxu1 }
 0x65e   : > { %v13486_v37 = vpop.f32.mrf.mxu2  ;;  %16524 = vst [vmem:[#allocation261_spill] sm:$0xff] %v13492_v2 }
 0x65f   : > { %16521 = vst [vmem:[#allocation258_spill] sm:$0xff] %v13486_v37  ;;  %v13499_v20 = vpop.permute.xlu0 %4464 }
 0x660   : > { %16525 = vst [vmem:[#allocation262_spill] sm:$0xff] %v13494_v51 }
 0x661   : > { %16527 = vst [vmem:[#allocation264_spill] sm:$0xff] %v13499_v20 }
 0x662   : > { %v13490_v28 = vpop.f32.mrf.mxu3 }
 0x663   : > { %16523 = vst [vmem:[#allocation260_spill] sm:$0xff] %v13490_v28  ;;  %v8887_v28 = vld [vmem:[%s15736_s4 + $0x140] sm:$0xff] }
 0x665   : > { %v13504_v62 = vpop.f32.mrf.mxu0  ;;  %v13506_v37 = vpop.f32.mrf.mxu1 }
 0x666   : > { %v13496_v58 = vpop.f32.mrf.mxu2  ;;  %16529 = vst [vmem:[#allocation266_spill] sm:$0xff] %v13504_v62 }
 0x667   : > { %16526 = vst [vmem:[#allocation263_spill] sm:$0xff] %v13496_v58  ;;  %8588 = vmatmul.msk.bf16.gmra.mxu3 %vm4946_vm1, %v8884_v59  ;;  %v13521_v2 = vpop.permute.xlu0 %4549 }
 0x668   : > { %16530 = vst [vmem:[#allocation267_spill] sm:$0xff] %v13506_v37  ;;  %8468 = vmatmul.msk.bf16.gmra.mxu0 %vm4946_vm1, %v8887_v28  ;;  %8509 = vmatmul.msk.bf16.gmra.mxu1 %vm4946_vm1, %v8887_v28 }
 0x669   : > { %16535 = vst [vmem:[#allocation272_spill] sm:$0xff] %v13521_v2 }
 0x66a   : > { %v13501_v12 = vpop.f32.mrf.mxu3 }
 0x66b   : > { %16528 = vst [vmem:[#allocation265_spill] sm:$0xff] %v13501_v12  ;;  %8548 = vmatmul.msk.bf16.gmra.mxu2 %vm4946_vm1, %v8885_v5 }
 0x66d   : > { %v13517_v51 = vpop.f32.mrf.mxu0  ;;  %v13519_v12 = vpop.f32.mrf.mxu1 }
 0x66e   : > { %v13513_v58 = vpop.f32.mrf.mxu2  ;;  %16533 = vst [vmem:[#allocation270_spill] sm:$0xff] %v13517_v51  ;;  %v8888_v51 = vld [vmem:[%s15738_s6] sm:$0xff] }
 0x66f   : > { %16531 = vst [vmem:[#allocation268_spill] sm:$0xff] %v13513_v58 }
 0x670   : > { %16534 = vst [vmem:[#allocation271_spill] sm:$0xff] %v13519_v12  ;;  %v13538_v12 = vpop.permute.xlu0 %4534 }
 0x671   : > { %16540 = vst [vmem:[#allocation277_spill] sm:$0xff] %v13538_v12 }
 0x672   : > { %v13515_v59 = vpop.f32.mrf.mxu3 }
 0x673   : > { %16532 = vst [vmem:[#allocation269_spill] sm:$0xff] %v13515_v59 }
 0x675   : > { %v13529_v7 = vpop.f32.mrf.mxu0  ;;  %v13531_v24 = vpop.f32.mrf.mxu1 }
 0x676   : > { %v13523_v62 = vpop.f32.mrf.mxu2  ;;  %16538 = vst [vmem:[#allocation275_spill] sm:$0xff] %v13529_v7 }
 0x677   : > { %16536 = vst [vmem:[#allocation273_spill] sm:$0xff] %v13523_v62  ;;  %8589 = vmatmul.msk.bf16.gmra.mxu3 %vm4946_vm1, %v8885_v5 }
 0x678   : > { %16539 = vst [vmem:[#allocation276_spill] sm:$0xff] %v13531_v24  ;;  %8608 = vmatmul.msk.bf16.vlgmr.msra.gmra.mxu0 %vm5957_vm13, %v8888_v51  ;;  %8612 = vmatmul.msk.bf16.vlgmr.msra.gmra.mxu1 %vm5957_vm13, %v8888_v51  ;;  %v13551_v59 = vpop.permute.xlu0 %4689 }
 0x679   : > { %16546 = vst [vmem:[#allocation283_spill] sm:$0xff] %v13551_v59 }
 0x67a   : > { %v13526_v37 = vpop.f32.mrf.mxu3 }
 0x67b   : > { %16537 = vst [vmem:[#allocation274_spill] sm:$0xff] %v13526_v37  ;;  %8549 = vmatmul.msk.bf16.gmra.mxu2 %vm4946_vm1, %v8886_v60 }
 0x67d   : > { %v13544_v62 = vpop.f32.mrf.mxu0  ;;  %v13546_v7 = vpop.f32.mrf.mxu1 }
 0x67e   : > { %v13540_v5 = vpop.f32.mrf.mxu2  ;;  %16543 = vst [vmem:[#allocation280_spill] sm:$0xff] %v13544_v62  ;;  %v8889_v62 = vld [vmem:[%s15738_s6 + $0x8] sm:$0xff] }
 0x67f   : > { %16541 = vst [vmem:[#allocation278_spill] sm:$0xff] %v13540_v5 }
 0x680   : > { %16544 = vst [vmem:[#allocation281_spill] sm:$0xff] %v13546_v7 }
 0x682   : > { %v13542_v37 = vpop.f32.mrf.mxu3 }
 0x683   : > { %16542 = vst [vmem:[#allocation279_spill] sm:$0xff] %v13542_v37 }
 0x685   : > { %v13556_v2 = vpop.f32.mrf.mxu0  ;;  %v13558_v12 = vpop.f32.mrf.mxu1 }
 0x686   : > { %v13548_v24 = vpop.f32.mrf.mxu2  ;;  %16548 = vst [vmem:[#allocation285_spill] sm:$0xff] %v13556_v2 }
 0x687   : > { %16545 = vst [vmem:[#allocation282_spill] sm:$0xff] %v13548_v24  ;;  %8590 = vmatmul.msk.bf16.gmra.mxu3 %vm4946_vm1, %v8886_v60  ;;  %v13567_v60 = vpop.permute.xlu0 %4664 }
 0x688   : > { %16549 = vst [vmem:[#allocation286_spill] sm:$0xff] %v13558_v12  ;;  %8609 = vmatmul.msk.bf16.gmra.mxu0 %vm5957_vm13, %v8889_v62  ;;  %8613 = vmatmul.msk.bf16.gmra.mxu1 %vm5957_vm13, %v8889_v62 }
 0x689   : > { %16551 = vst [vmem:[#allocation288_spill] sm:$0xff] %v13567_v60  ;;  %v8890_v60 = vld [vmem:[%s15738_s6 + $0x10] sm:$0xff] }
 0x68a   : > { %v13553_v58 = vpop.f32.mrf.mxu3 }
 0x68b   : > { %16547 = vst [vmem:[#allocation284_spill] sm:$0xff] %v13553_v58  ;;  %8550 = vmatmul.msk.bf16.gmra.mxu2 %vm4946_vm1, %v8887_v28 }
 0x68d   : > { %v13571_v58 = vpop.f32.mrf.mxu0  ;;  %v13573_v24 = vpop.f32.mrf.mxu1 }
 0x68e   : > { %v13565_v7 = vpop.f32.mrf.mxu2  ;;  %16553 = vst [vmem:[#allocation290_spill] sm:$0xff] %v13571_v58 }
 0x68f   : > { %16550 = vst [vmem:[#allocation287_spill] sm:$0xff] %v13565_v7 }
 0x690   : > { %16554 = vst [vmem:[#allocation291_spill] sm:$0xff] %v13573_v24 }
 0x692   : > { %v13569_v59 = vpop.f32.mrf.mxu3 }
 0x693   : > { %16552 = vst [vmem:[#allocation289_spill] sm:$0xff] %v13569_v59  ;;  %v13588_v59 = vpop.permute.xlu0 %4659 }
 0x694   : > { %16559 = vst [vmem:[#allocation296_spill] sm:$0xff] %v13588_v59 }
 0x695   : > { %v13581_v37 = vpop.f32.mrf.mxu0  ;;  %v13583_v5 = vpop.f32.mrf.mxu1 }
 0x696   : > { %v13575_v2 = vpop.f32.mrf.mxu2  ;;  %16557 = vst [vmem:[#allocation294_spill] sm:$0xff] %v13581_v37 }
 0x697   : > { %16555 = vst [vmem:[#allocation292_spill] sm:$0xff] %v13575_v2  ;;  %8591 = vmatmul.msk.bf16.gmra.mxu3 %vm4946_vm1, %v8887_v28  ;;  %v13594_v28 = vpop.permute.xlu2 %4559  ;;  %vm6202_vm1 = vcmask 523264  }
 0x698   : > { %16558 = vst [vmem:[#allocation295_spill] sm:$0xff] %v13583_v5  ;;  %8610 = vmatmul.msk.bf16.gmra.mxu0 %vm5957_vm13, %v8890_v60  ;;  %8614 = vmatmul.msk.bf16.gmra.mxu1 %vm5957_vm13, %v8890_v60 }
 0x699   : > { %16561 = vst [vmem:[#allocation298_spill] sm:$0xff] %v13594_v28 }
 0x69a   : > { %v13578_v12 = vpop.f32.mrf.mxu3 }
 0x69b   : > { %16556 = vst [vmem:[#allocation293_spill] sm:$0xff] %v13578_v12  ;;  %8616 = vmatmul.msk.bf16.vlgmr.msra.gmra.mxu2 %vm5957_vm13, %v8888_v51  ;;  %v13602_v5 = vpop.permute.xlu0 %4634 }
 0x69c   : > { %16565 = vst [vmem:[#allocation302_spill] sm:$0xff] %v13602_v5 }
 0x69d   : > { %v13598_v58 = vpop.f32.mrf.mxu0  ;;  %v13600_v37 = vpop.f32.mrf.mxu1 }
 0x69e   : > { %v13592_v2 = vpop.f32.mrf.mxu2  ;;  %16563 = vst [vmem:[#allocation300_spill] sm:$0xff] %v13598_v58 }
 0x69f   : > { %16560 = vst [vmem:[#allocation297_spill] sm:$0xff] %v13592_v2  ;;  %v13607_v59 = vpop.permute.xlu2 %4544 }
 0x6a0   : > { %16564 = vst [vmem:[#allocation301_spill] sm:$0xff] %v13600_v37 }
 0x6a1   : > { %16567 = vst [vmem:[#allocation304_spill] sm:$0xff] %v13607_v59 }
 0x6a2   : > { %v13596_v24 = vpop.f32.mrf.mxu3 }
 0x6a3   : > { %16562 = vst [vmem:[#allocation299_spill] sm:$0xff] %v13596_v24  ;;  %v8891_v24 = vld [vmem:[%s15738_s6 + $0x18] sm:$0xff] }
 0x6a5   : > { %v13612_v2 = vpop.f32.mrf.mxu0  ;;  %v13614_v28 = vpop.f32.mrf.mxu1 }
 0x6a6   : > { %v13604_v12 = vpop.f32.mrf.mxu2  ;;  %16569 = vst [vmem:[#allocation306_spill] sm:$0xff] %v13612_v2 }
 0x6a7   : > { %16566 = vst [vmem:[#allocation303_spill] sm:$0xff] %v13604_v12  ;;  %8620 = vmatmul.msk.bf16.vlgmr.msra.gmra.mxu3 %vm5957_vm13, %v8888_v51  ;;  %v13623_v51 = vpop.permute.xlu0 %4629  ;;  %v13631_v2 = vpop.permute.xlu2 %4459 }
 0x6a8   : > { %16570 = vst [vmem:[#allocation307_spill] sm:$0xff] %v13614_v28  ;;  %8611 = vmatmul.msk.bf16.gmra.mxu0 %vm5957_vm13, %v8891_v24  ;;  %8615 = vmatmul.msk.bf16.gmra.mxu1 %vm5957_vm13, %v8891_v24 }
 0x6a9   : > { %16572 = vst [vmem:[#allocation309_spill] sm:$0xff] %v13623_v51 }
 0x6aa   : > { %v13609_v7 = vpop.f32.mrf.mxu3  ;;  %16576 = vst [vmem:[#allocation313_spill] sm:$0xff] %v13631_v2  ;;  %v5506_v2 = vadd.f32 %v12723_v41, %v12993_v9  ;;  %v5095_v41 = vadd.f32 %v12735_v15, %v12952_v46  ;;  %v5090_v15 = vadd.f32 %v12714_v4, %v12863_v16 }
 0x6ab   : > { %16568 = vst [vmem:[#allocation305_spill] sm:$0xff] %v13609_v7  ;;  %8617 = vmatmul.msk.bf16.gmra.mxu2 %vm5957_vm13, %v8889_v62 }
 0x6ad   : > { %v13627_v7 = vpop.f32.mrf.mxu0  ;;  %v13629_v58 = vpop.f32.mrf.mxu1 }
 0x6ae   : > { %v13621_v12 = vpop.f32.mrf.mxu2  ;;  %16574 = vst [vmem:[#allocation311_spill] sm:$0xff] %v13627_v7 }
 0x6af   : > { %16571 = vst [vmem:[#allocation308_spill] sm:$0xff] %v13621_v12  ;;  %v13636_v5 = vpop.permute.xlu0 %4724 }
 0x6b0   : > { %16575 = vst [vmem:[#allocation312_spill] sm:$0xff] %v13629_v58 }
 0x6b1   : > { %16578 = vst [vmem:[#allocation315_spill] sm:$0xff] %v13636_v5 }
 0x6b2   : > { %v13625_v37 = vpop.f32.mrf.mxu3 }
 0x6b3   : > { %16573 = vst [vmem:[#allocation310_spill] sm:$0xff] %v13625_v37  ;;  %v13645_v37 = vpop.permute.xlu2 %4684 }
 0x6b4   : > { %16582 = vst [vmem:[#allocation319_spill] sm:$0xff] %v13645_v37 }
 0x6b5   : > { %v13641_v12 = vpop.f32.mrf.mxu0  ;;  %v13643_v51 = vpop.f32.mrf.mxu1 }
 0x6b6   : > { %v13633_v28 = vpop.f32.mrf.mxu2  ;;  %16580 = vst [vmem:[#allocation317_spill] sm:$0xff] %v13641_v12 }
 0x6b7   : > { %16577 = vst [vmem:[#allocation314_spill] sm:$0xff] %v13633_v28  ;;  %8621 = vmatmul.msk.bf16.gmra.mxu3 %vm5957_vm13, %v8889_v62  ;;  %v13655_v62 = vpop.permute.xlu0 %4719 }
 0x6b8   : > { %16581 = vst [vmem:[#allocation318_spill] sm:$0xff] %v13643_v51 }
 0x6b9   : > { %16587 = vst [vmem:[#allocation324_spill] sm:$0xff] %v13655_v62 }
 0x6ba   : > { %v13638_v59 = vpop.f32.mrf.mxu3 }
 0x6bb   : > { %16579 = vst [vmem:[#allocation316_spill] sm:$0xff] %v13638_v59  ;;  %8618 = vmatmul.msk.bf16.gmra.mxu2 %vm5957_vm13, %v8890_v60  ;;  %v13660_v59 = vpop.permute.xlu2 %4679 }
 0x6bc   : > { %16589 = vst [vmem:[#allocation326_spill] sm:$0xff] %v13660_v59 }
 0x6bd   : > { %v13651_v10 = vpop.f32.mrf.mxu0  ;;  %v13653_v28 = vpop.f32.mrf.mxu1 }
 0x6be   : > { %v13647_v7 = vpop.f32.mrf.mxu2  ;;  %16585 = vst [vmem:[#allocation322_spill] sm:$0xff] %v13651_v10 }
 0x6bf   : > { %16583 = vst [vmem:[#allocation320_spill] sm:$0xff] %v13647_v7 }
 0x6c0   : > { %16586 = vst [vmem:[#allocation323_spill] sm:$0xff] %v13653_v28 }
 0x6c2   : > { %v13649_v58 = vpop.f32.mrf.mxu3 }
 0x6c3   : > { %16584 = vst [vmem:[#allocation321_spill] sm:$0xff] %v13649_v58  ;;  %v13669_v58 = vpop.permute.xlu0 %4694  ;;  %v13674_v62 = vpop.permute.xlu2 %4654 }
 0x6c4   : > { %16593 = vst [vmem:[#allocation330_spill] sm:$0xff] %v13669_v58 }
 0x6c5   : > { %v13665_v51 = vpop.f32.mrf.mxu0  ;;  %v13667_v7 = vpop.f32.mrf.mxu1  ;;  %16595 = vst [vmem:[#allocation332_spill] sm:$0xff] %v13674_v62 }
 0x6c6   : > { %v13657_v5 = vpop.f32.mrf.mxu2  ;;  %16591 = vst [vmem:[#allocation328_spill] sm:$0xff] %v13665_v51 }
 0x6c7   : > { %16588 = vst [vmem:[#allocation325_spill] sm:$0xff] %v13657_v5  ;;  %8622 = vmatmul.msk.bf16.gmra.mxu3 %vm5957_vm13, %v8890_v60 }
 0x6c8   : > { %16592 = vst [vmem:[#allocation329_spill] sm:$0xff] %v13667_v7 }
 0x6ca   : > { %v13662_v12 = vpop.f32.mrf.mxu3 }
 0x6cb   : > { %16590 = vst [vmem:[#allocation327_spill] sm:$0xff] %v13662_v12  ;;  %8619 = vmatmul.msk.bf16.gmra.mxu2 %vm5957_vm13, %v8891_v24 }
 0x6cd   : > { %v13678_v60 = vpop.f32.mrf.mxu0  ;;  %v13680_v59 = vpop.f32.mrf.mxu1 }
 0x6ce   : > { %v5685_v10 = vpop.f32.mrf.mxu2  ;;  %16597 = vst [vmem:[#allocation334_spill] sm:$0xff] %v13678_v60 }
 0x6cf   : > { %v13672_v28 = vadd.f32 %v5685_v10, %v13669_v58  ;;  %16598 = vst [vmem:[#allocation335_spill] sm:$0xff] %v13680_v59 }
 0x6d1   : > { %16594 = vst [vmem:[#allocation331_spill] sm:$0xff] %v13672_v28  ;;  %v13692_v28 = vpop.permute.xlu2 %4649 }
 0x6d2   : > { %v13676_v5 = vpop.f32.mrf.mxu3  ;;  %16603 = vst [vmem:[#allocation340_spill] sm:$0xff] %v13692_v28 }
 0x6d3   : > { %16596 = vst [vmem:[#allocation333_spill] sm:$0xff] %v13676_v5 }
 0x6d5   : > { %v13688_v37 = vpop.f32.mrf.mxu0  ;;  %v13690_v10 = vpop.f32.mrf.mxu1 }
 0x6d6   : > { %v13682_v12 = vpop.f32.mrf.mxu2  ;;  %16601 = vst [vmem:[#allocation338_spill] sm:$0xff] %v13688_v37 }
 0x6d7   : > { %16599 = vst [vmem:[#allocation336_spill] sm:$0xff] %v13682_v12  ;;  %8623 = vmatmul.msk.bf16.gmra.mxu3 %vm5957_vm13, %v8891_v24 }
 0x6d8   : > { %16602 = vst [vmem:[#allocation339_spill] sm:$0xff] %v13690_v10 }
 0x6d9   : > { %v13702_v12 = vpop.permute.xlu2 %4624 }
 0x6da   : > { %v5898_v51 = vpop.f32.mrf.mxu3  ;;  %16608 = vst [vmem:[#allocation345_spill] sm:$0xff] %v13702_v12 }
 0x6db   : > { %v13686_v7 = vadd.f32 %v5898_v51, %v13669_v58 }
 0x6dd   : > { %16600 = vst [vmem:[#allocation337_spill] sm:$0xff] %v13686_v7  ;;  %v13698_v60 = vpop.f32.mrf.mxu0  ;;  %v13700_v59 = vpop.f32.mrf.mxu1 }
 0x6de   : > { %v13694_v62 = vpop.f32.mrf.mxu2  ;;  %16606 = vst [vmem:[#allocation343_spill] sm:$0xff] %v13698_v60 }
 0x6df   : > { %16604 = vst [vmem:[#allocation341_spill] sm:$0xff] %v13694_v62 }
 0x6e0   : > { %16607 = vst [vmem:[#allocation344_spill] sm:$0xff] %v13700_v59 }
 0x6e1   : > { %v13714_v58 = vpop.permute.xlu2 %4619 }
 0x6e2   : > { %v13696_v5 = vpop.f32.mrf.mxu3  ;;  %16614 = vst [vmem:[#allocation351_spill] sm:$0xff] %v13714_v58 }
 0x6e3   : > { %16605 = vst [vmem:[#allocation342_spill] sm:$0xff] %v13696_v5 }
 0x6e5   : > { %v13708_v7 = vpop.f32.mrf.mxu0  ;;  %v13710_v37 = vpop.f32.mrf.mxu1 }
 0x6e6   : > { %v13704_v24 = vpop.f32.mrf.mxu2  ;;  %16611 = vst [vmem:[#allocation348_spill] sm:$0xff] %v13708_v7  ;;  %v5293_v7 = vadd.f32 %v12685_v11, %v12993_v9 }
 0x6e7   : > { %16609 = vst [vmem:[#allocation346_spill] sm:$0xff] %v13704_v24  ;;  %v5080_v24 = vadd.f32 %v12683_v22, %v12993_v9 }
 0x6e8   : > { %16612 = vst [vmem:[#allocation349_spill] sm:$0xff] %v13710_v37 }
 0x6e9   : > { %v13720_v59 = vpop.permute.xlu2 %4714 }
 0x6ea   : > { %v13706_v51 = vpop.f32.mrf.mxu3  ;;  %16617 = vst [vmem:[#allocation354_spill] sm:$0xff] %v13720_v59 }
 0x6eb   : > { %16610 = vst [vmem:[#allocation347_spill] sm:$0xff] %v13706_v51 }
 0x6ed   : > { %v5281_v5 = vpop.f32.mrf.mxu0  ;;  %v5494_v60 = vpop.f32.mrf.mxu1 }
 0x6ee   : > { %v13712_v10 = vpop.f32.mrf.mxu2 }
 0x6ef   : > { %16613 = vst [vmem:[#allocation350_spill] sm:$0xff] %v13712_v10 }
 0x6f1   : > { %v13740_v22 = vpop.permute.xlu2 %4709 }
 0x6f2   : > { %v13716_v62 = vpop.f32.mrf.mxu3  ;;  %16621 = vst [vmem:[#allocation358_spill] sm:$0xff] %v13740_v22 }
 0x6f3   : > { %16615 = vst [vmem:[#allocation352_spill] sm:$0xff] %v13716_v62 }
 0x6f5   : > { %v5991_v37 = vpop.f32.mrf.mxu0  ;;  %v6020_v10 = vpop.f32.mrf.mxu1 }
 0x6f6   : > { %v13718_v28 = vpop.f32.mrf.mxu2  ;;  %v13728_v12 = vadd.f32 %v5991_v37, %v5080_v24  ;;  %v13730_v58 = vadd.f32 %v6020_v10, %v5293_v7 }
 0x6f7   : > { %16616 = vst [vmem:[#allocation353_spill] sm:$0xff] %v13718_v28 }
 0x6f9   : > { %v13750_v7 = vpop.permute.xlu2 %4734 }
 0x6fa   : > { %v13726_v51 = vpop.f32.mrf.mxu3  ;;  %16624 = vst [vmem:[#allocation361_spill] sm:$0xff] %v13750_v7 }
 0x6fb   : > { %16618 = vst [vmem:[#allocation355_spill] sm:$0xff] %v13726_v51 }
 0x6fd   : > { %v13736_v62 = vpop.f32.mrf.mxu0  ;;  %v13738_v28 = vpop.f32.mrf.mxu1 }
 0x6fe   : > { %v13732_v5 = vpop.f32.mrf.mxu2 }
 0x6ff   : > { %16619 = vst [vmem:[#allocation356_spill] sm:$0xff] %v13732_v5 }
 0x702   : > { %v13734_v60 = vpop.f32.mrf.mxu3 }
 0x703   : > { %16620 = vst [vmem:[#allocation357_spill] sm:$0xff] %v13734_v60 }
 0x705   : > { %v13746_v51 = vpop.f32.mrf.mxu0  ;;  %v13748_v37 = vpop.f32.mrf.mxu1 }
 0x706   : > { %v13742_v59 = vpop.f32.mrf.mxu2 }
 0x707   : > { %16622 = vst [vmem:[#allocation359_spill] sm:$0xff] %v13742_v59 }
 0x70a   : > { %v13744_v11 = vpop.f32.mrf.mxu3 }
 0x70b   : > { %16623 = vst [vmem:[#allocation360_spill] sm:$0xff] %v13744_v11 }
 0x70d   : > { %v13757_v5 = vpop.f32.mrf.mxu0  ;;  %v13759_v20 = vpop.f32.mrf.mxu1 }
 0x70e   : > { %v5705_v10 = vpop.f32.mrf.mxu2 }
 0x70f   : > { %v13753_v24 = vadd.f32 %v5705_v10, %v13750_v7 }
 0x711   : > { %16625 = vst [vmem:[#allocation362_spill] sm:$0xff] %v13753_v24 }
 0x712   : > { %v13755_v60 = vpop.f32.mrf.mxu3 }
 0x713   : > { %16626 = vst [vmem:[#allocation363_spill] sm:$0xff] %v13755_v60 }
 0x715   : > { %v6001_v63 = vpop.f32.mrf.mxu0  ;;  %v6030_v33 = vpop.f32.mrf.mxu1 }
 0x716   : > { %v5707_v22 = vpop.f32.mrf.mxu2  ;;  %v6002_v1 = vadd.f32 %v6001_v63, %v5090_v15  ;;  %v5087_v63 = vadd.f32 %v12708_v3, %v12876_v25 }
 0x717   : > { %v5719_v22 = vadd.f32 %v12732_v54, %v12993_v9  ;;  %v5305_v54 = vadd.f32 %v12727_v50, %v12977_v49  ;;  %v5097_v9 = vadd.f32 %v12748_v44, %v12903_v0 }
 0x71a   : > { %v5918_v59 = vpop.f32.mrf.mxu3 }
 0x71b   : > { %v13762_v11 = vadd.f32 %v5918_v59, %v13750_v7 }
 0x71d   : > { %16627 = vst [vmem:[#allocation364_spill] sm:$0xff] %v13762_v11  ;;  %v6003_v24 = vpop.f32.mrf.mxu0  ;;  %v6032_v60 = vpop.f32.mrf.mxu1 }
 0x71e   : > { %v6049_v17 = vpop.f32.mrf.mxu2  ;;  %v6033_v32 = vadd.f32 %v6032_v60, %v5305_v54  ;;  %v5082_v60 = vadd.f32 %v12693_v26, %v12944_v40  ;;  %v5298_v26 = vadd.f32 %v12701_v45, %v12921_v57  ;;  %v5511_v45 = vadd.f32 %v12744_v23, %v12921_v57 }
 0x71f   : > { %v13766_v39 = vadd.f32 %v6049_v17, %v5506_v2  ;;  %v5308_v17 = vadd.f32 %v12737_v27, %v12952_v46  ;;  %v5303_v27 = vadd.f32 %v12716_v21, %v12863_v16  ;;  %v6098_v23 = vmax.f32 %v13728_v12, 0.0 }
 0x721   : > { %v6031_v44 = vadd.f32 %v6030_v33, %v5303_v27 }
 0x722   : > { %v5920_v10 = vpop.f32.mrf.mxu3 }
 0x723   : > { %v5092_v10 = vadd.f32 %v12725_v47, %v12977_v49  ;;  %v6115_v21 = vmax.f32 %v6031_v44, 0.0 }
 0x725   : > { %v6006_v59 = vpop.f32.mrf.mxu0  ;;  %v6035_v11 = vpop.f32.mrf.mxu1  ;;  %v6004_v34 = vadd.f32 %v6003_v24, %v5092_v10 }
 0x726   : > { %v13768_v56 = vpop.f32.mrf.mxu2  ;;  %v6036_v36 = vadd.f32 %v6035_v11, %v5308_v17 }
 0x727   : > { %v6118_v11 = vmax.f32 %v6004_v34, 0.0  ;;  %v5295_v34 = vadd.f32 %v12695_v35, %v12944_v40  ;;  %v5508_v35 = vadd.f32 %v12729_v6, %v12944_v40 }
 0x728   : > { %v6123_v29 = vmax.f32 %v6036_v36, 0.0  ;;  %v5300_v36 = vadd.f32 %v12710_v8, %v12876_v25 }
 0x729   : > { %v6023_v8 = vadd.f32 %v13738_v28, %v5295_v34  ;;  %v6052_v12 = vadd.f32 %v13768_v56, %v5508_v35 }
 0x72a   : > { %v6078_v53 = vpop.f32.mrf.mxu3  ;;  %v6028_v3 = vadd.f32 %v13759_v20, %v5300_v36  ;;  %v5516_v20 = vadd.f32 %v12767_v61, %v12863_v16  ;;  %v5721_v61 = vadd.f32 %v12746_v31, %v12944_v40 }
 0x72b   : > { %v13772_v19 = vadd.f32 %v6078_v53, %v5719_v22  ;;  %v5310_v53 = vadd.f32 %v12750_v43, %v12903_v0  ;;  %v6007_v22 = vadd.f32 %v6006_v59, %v5095_v41  ;;  %v6119_v41 = vmax.f32 %v6033_v32, 0.0 }
 0x72c   : > { %v5513_v32 = vadd.f32 %v12752_v38, %v12876_v25  ;;  %v6103_v24 = vmax.f32 %v6023_v8, 0.0 }
 0x72d   : > { %16628 = vst [vmem:[#allocation365_spill] sm:$0xff] %v13772_v19  ;;  %v6008_v47 = vpop.f32.mrf.mxu0  ;;  %v6037_v42 = vpop.f32.mrf.mxu1  ;;  %v6122_v46 = vmax.f32 %v6007_v22, 0.0  ;;  %v6114_v19 = vmax.f32 %v6002_v1, 0.0  ;;  %v5085_v1 = vadd.f32 %v12699_v13, %v12921_v57  ;;  %v6026_v13 = vadd.f32 %v13748_v37, %v5298_v26 }
 0x72e   : > { %v13774_v7 = vpop.f32.mrf.mxu2  ;;  %v6009_v50 = vadd.f32 %v6008_v47, %v5097_v9  ;;  %v6038_v55 = vadd.f32 %v6037_v42, %v5310_v53  ;;  %v5994_v42 = vadd.f32 %v13736_v62, %v5082_v60  ;;  %v5726_v62 = vadd.f32 %v12769_v30, %v12876_v25 }
 0x72f   : > { %v6138_v33 = vpack.c.bf16 %v6118_v11, %v6114_v19  ;;  %v5724_v19 = vadd.f32 %v12755_v48, %v12921_v57  ;;  %v5518_v37 = vadd.f32 %v12775_v14, %v12977_v49  ;;  %v6107_v57 = vmax.f32 %v6026_v13, 0.0 }
 0x730   : > { %v6126_v43 = vmax.f32 %v6009_v50, 0.0  ;;  %v6127_v59 = vmax.f32 %v6038_v55, 0.0  ;;  %v6139_v55 = vpack.c.bf16 %v6119_v41, %v6115_v21  ;;  %v6099_v9 = vmax.f32 %v13730_v58, 0.0  ;;  %v8892_v41 = vld [vmem:[%s15739_s7] sm:$0xff] }
 0x731   : > { %v6055_v30 = vadd.f32 %v13774_v7, %v5511_v45  ;;  %v6104_v11 = vmax.f32 %v6052_v12, 0.0  ;;  %v5729_v21 = vadd.f32 %v12778_v18, %v12863_v16  ;;  %v6100_v60 = vmax.f32 %v13766_v39, 0.0  ;;  %v16633_v18 = vld [vmem:[#allocation64_spill] sm:$0xff]  ;;  %v16634_v16 = vld [vmem:[#allocation111_spill] sm:$0xff] }
 0x732   : > { %v13780_v2 = vpop.f32.mrf.mxu3  ;;  %v6142_v4 = vpack.c.bf16 %v6126_v43, %v6122_v46  ;;  %v6143_v0 = vpack.c.bf16 %v6127_v59, %v6123_v29  ;;  %v5999_v46 = vadd.f32 %v13757_v5, %v5087_v63  ;;  %v6111_v5 = vmax.f32 %v6028_v3, 0.0  ;;  %v16639_v12 = vld [vmem:[#allocation83_spill] sm:$0xff] }
 0x733   : > { %v6081_v47 = vadd.f32 %v13780_v2, %v5721_v61  ;;  %v6108_v40 = vmax.f32 %v6055_v30, 0.0  ;;  %v5523_v39 = vadd.f32 %v16634_v16, %v16633_v18  ;;  %v8894_v61 = vld [vmem:[%s15739_s7 + $0x10] sm:$0xff]  ;;  %v8896_v30 = vld [vmem:[%s15739_s7 + $0x20] sm:$0xff] }
 0x734   : > { %6231 = vmatpush.bf16.msrb.mxu0 %v6142_v4  ;;  %6280 = vmatpush.bf16.msrb.mxu1 %v6143_v0  ;;  %v5997_v0 = vadd.f32 %v13746_v51, %v5085_v1  ;;  %v6102_v51 = vmax.f32 %v5994_v42, 0.0  ;;  %v6110_v6 = vmax.f32 %v5999_v46, 0.0  ;;  %v6135_v14 = vpack.c.bf16 %v6111_v5, %v6107_v57  ;;  %v16629_v63 = vld [vmem:[#allocation365_spill] sm:$0xff]  ;;  %v16631_v42 = vld [vmem:[#allocation62_spill] sm:$0xff] }
 0x735   : > { %v6101_v36 = vmax.f32 %v16629_v63, 0.0  ;;  %v6132_v1 = vpack.c.bf16 %v6104_v11, %v6100_v60  ;;  %v16632_v46 = vld [vmem:[#allocation106_spill] sm:$0xff]  ;;  %v16642_v11 = vld [vmem:[#allocation119_spill] sm:$0xff]  ;;  %v16643_v63 = vld [vmem:[#allocation40_spill] sm:$0xff] }
 0x736   : > { %v6056_v52 = vpop.f32.mrf.mxu2  ;;  %v6106_v48 = vmax.f32 %v5997_v0, 0.0  ;;  %v6130_v27 = vpack.c.bf16 %v6102_v51, %v6098_v23  ;;  %v5521_v3 = vadd.f32 %v16632_v46, %v16631_v42  ;;  %v8893_v51 = vld [vmem:[%s15739_s7 + $0x8] sm:$0xff] }
 0x737   : > { %v6057_v10 = vadd.f32 %v6056_v52, %v5513_v32  ;;  %v6131_v52 = vpack.c.bf16 %v6103_v24, %v6099_v9  ;;  %v8895_v9 = vld [vmem:[%s15739_s7 + $0x18] sm:$0xff] }
 0x738   : > { %6232 = vmatpush.bf16.msrb.mxu0 %v6138_v33  ;;  %6281 = vmatpush.bf16.msrb.mxu1 %v6139_v55  ;;  %v6134_v15 = vpack.c.bf16 %v6110_v6, %v6106_v48  ;;  %v16630_v33 = vld [vmem:[#allocation102_spill] sm:$0xff]  ;;  %v16635_v6 = vld [vmem:[#allocation107_spill] sm:$0xff] }
 0x739   : > { %v6112_v50 = vmax.f32 %v6057_v10, 0.0  ;;  %v5731_v55 = vadd.f32 %v16630_v33, %v12977_v49  ;;  %v5734_v5 = vadd.f32 %v16635_v6, %v16631_v42 }
 0x73a   : > { %v6083_v17 = vpop.f32.mrf.mxu3 }
 0x73b   : > { %v6084_v25 = vadd.f32 %v6083_v17, %v5724_v19  ;;  %v6105_v17 = vmax.f32 %v6081_v47, 0.0  ;;  %v6136_v56 = vpack.c.bf16 %v6112_v50, %v6108_v40  ;;  %v16640_v40 = vld [vmem:[#allocation63_spill] sm:$0xff] }
 0x73c   : > { %6233 = vmatpush.bf16.msrb.mxu0 %v6134_v15  ;;  %6282 = vmatpush.bf16.msrb.mxu1 %v6135_v14  ;;  %v16637_v15 = vld [vmem:[#allocation20_spill] sm:$0xff]  ;;  %v16638_v14 = vld [vmem:[#allocation113_spill] sm:$0xff] }
 0x73d   : > { %v6109_v58 = vmax.f32 %v6084_v25, 0.0  ;;  %v8897_v25 = vld [vmem:[%s15739_s7 + $0x28] sm:$0xff]  ;;  %v5313_v47 = vadd.f32 %v16639_v12, %v16637_v15 }
 0x73e   : > { %v6059_v29 = vpop.f32.mrf.mxu2 }
 0x73f   : > { %v6060_v54 = vadd.f32 %v6059_v29, %v5516_v20  ;;  %v6133_v29 = vpack.c.bf16 %v6105_v17, %v6101_v36  ;;  %v16644_v36 = vld [vmem:[#allocation82_spill] sm:$0xff] }
 0x740   : > { %6234 = vmatpush.bf16.msrb.mxu0 %v6130_v27  ;;  %6283 = vmatpush.bf16.msrb.mxu1 %v6131_v52  ;;  %v5100_v27 = vadd.f32 %v16638_v14, %v16637_v15  ;;  %v5110_v33 = vadd.f32 %v16644_v36, %v16643_v63  ;;  %v16655_v14 = vld [vmem:[#allocation114_spill] sm:$0xff] }
 0x741   : > { %v6116_v43 = vmax.f32 %v6060_v54, 0.0 }
 0x742   : > { %v6085_v28 = vpop.f32.mrf.mxu3 }
 0x743   : > { %v6086_v38 = vadd.f32 %v6085_v28, %v5726_v62  ;;  %8656 = vmatmul.msk.bf16.vlgmr.msrb.gmra.mxu0 %vm6202_vm1, %v8892_v41  ;;  %8664 = vmatmul.msk.bf16.vlgmr.msrb.gmra.mxu1 %vm6202_vm1, %v8892_v41 }
 0x745   : > { %v6113_v44 = vmax.f32 %v6086_v38, 0.0 }
 0x746   : > { %v6061_v53 = vpop.f32.mrf.mxu2 }
 0x747   : > { %v6062_v22 = vadd.f32 %v6061_v53, %v5518_v37  ;;  %v6137_v2 = vpack.c.bf16 %v6113_v44, %v6109_v58  ;;  %v16636_v37 = vld [vmem:[#allocation100_spill] sm:$0xff]  ;;  %v8898_v53 = vld [vmem:[%s15739_s7 + $0x30] sm:$0xff]  ;;  %v16641_v58 = vld [vmem:[#allocation121_spill] sm:$0xff] }
 0x748   : > { %v5736_v23 = vadd.f32 %v16636_v37, %v16633_v18 }
 0x749   : > { %v6120_v59 = vmax.f32 %v6062_v22, 0.0  ;;  %v8899_v22 = vld [vmem:[%s15739_s7 + $0x38] sm:$0xff] }
 0x74a   : > { %v6088_v31 = vpop.f32.mrf.mxu3 }
 0x74b   : > { %v6140_v7 = vpack.c.bf16 %v6120_v59, %v6116_v43  ;;  %v6089_v34 = vadd.f32 %v6088_v31, %v5729_v21 }
 0x74d   : > { %v6117_v0 = vmax.f32 %v6089_v34, 0.0 }
 0x74e   : > { %v6064_v4 = vpop.f32.mrf.mxu2 }
 0x74f   : > { %v6065_v13 = vadd.f32 %v6064_v4, %v5521_v3 }
 0x751   : > { %v6124_v20 = vmax.f32 %v6065_v13, 0.0 }
 0x752   : > { %v6090_v26 = vpop.f32.mrf.mxu3 }
 0x753   : > { %v6091_v8 = vadd.f32 %v6090_v26, %v5731_v55  ;;  %8657 = vmatmul.msk.bf16.gmra.mxu0 %vm6202_vm1, %v8893_v51  ;;  %8665 = vmatmul.msk.bf16.gmra.mxu1 %vm6202_vm1, %v8893_v51  ;;  %v16645_v55 = vld [vmem:[#allocation91_spill] sm:$0xff]  ;;  %v16646_v26 = vld [vmem:[#allocation48_spill] sm:$0xff] }
 0x754   : > { %v5323_v34 = vadd.f32 %v16645_v55, %v16643_v63  ;;  %v5526_v42 = vadd.f32 %v16646_v26, %v16637_v15  ;;  %v16657_v55 = vld [vmem:[#allocation86_spill] sm:$0xff] }
 0x755   : > { %v6121_v35 = vmax.f32 %v6091_v8, 0.0 }
 0x756   : > { %v6066_v45 = vpop.f32.mrf.mxu2 }
 0x757   : > { %v6067_v19 = vadd.f32 %v6066_v45, %v5523_v39  ;;  %v6141_v32 = vpack.c.bf16 %v6121_v35, %v6117_v0  ;;  %v16647_v35 = vld [vmem:[#allocation84_spill] sm:$0xff] }
 0x758   : > { %v5739_v13 = vadd.f32 %v16647_v35, %v16637_v15 }
 0x759   : > { %v6128_v28 = vmax.f32 %v6067_v19, 0.0  ;;  %v16648_v19 = vld [vmem:[#allocation21_spill] sm:$0xff] }
 0x75a   : > { %v6093_v49 = vpop.f32.mrf.mxu3 }
 0x75b   : > { %v6144_v62 = vpack.c.bf16 %v6128_v28, %v6124_v20  ;;  %v6094_v24 = vadd.f32 %v6093_v49, %v5734_v5  ;;  %v16650_v28 = vld [vmem:[#allocation116_spill] sm:$0xff] }
 0x75c   : > { %v5328_v49 = vadd.f32 %v16650_v28, %v16648_v19  ;;  %v16651_v5 = vld [vmem:[#allocation60_spill] sm:$0xff] }
 0x75d   : > { %6329 = vmatpush.bf16.msrb.mxu2 %v6144_v62  ;;  %v6125_v10 = vmax.f32 %v6094_v24, 0.0  ;;  %v5531_v37 = vadd.f32 %v16651_v5, %v16640_v40 }
 0x761   : > { %6330 = vmatpush.bf16.msrb.mxu2 %v6140_v7  ;;  %v5105_v7 = vadd.f32 %v16641_v58, %v16640_v40 }
 0x762   : > { %v6095_v48 = vpop.f32.mrf.mxu3 }
 0x763   : > { %v6096_v57 = vadd.f32 %v6095_v48, %v5736_v23  ;;  %8658 = vmatmul.msk.bf16.gmra.mxu0 %vm6202_vm1, %v8894_v61  ;;  %8666 = vmatmul.msk.bf16.gmra.mxu1 %vm6202_vm1, %v8894_v61 }
 0x765   : > { %v6129_v38 = vmax.f32 %v6096_v57, 0.0  ;;  %6331 = vmatpush.bf16.msrb.mxu2 %v6136_v56 }
 0x767   : > { %v6145_v54 = vpack.c.bf16 %v6129_v38, %v6125_v10 }
 0x769   : > { %6378 = vmatpush.bf16.msrb.mxu3 %v6145_v54  ;;  %6332 = vmatpush.bf16.msrb.mxu2 %v6132_v1 }
 0x76c   : > { %8672 = vmatmul.msk.bf16.vlgmr.msrb.gmra.mxu2 %vm6202_vm1, %v8892_v41 }
 0x76d   : > { %6379 = vmatpush.bf16.msrb.mxu3 %v6141_v32  ;;  %v16649_v32 = vld [vmem:[#allocation95_spill] sm:$0xff] }
 0x76e   : > { %v5115_v20 = vadd.f32 %v16649_v32, %v16648_v19 }
 0x771   : > { %6380 = vmatpush.bf16.msrb.mxu3 %v6137_v2 }
 0x773   : > { %8659 = vmatmul.msk.bf16.gmra.mxu0 %vm6202_vm1, %v8895_v9  ;;  %8667 = vmatmul.msk.bf16.gmra.mxu1 %vm6202_vm1, %v8895_v9 }
 0x775   : > { %6381 = vmatpush.bf16.msrb.mxu3 %v6133_v29 }
 0x778   : > { %8680 = vmatmul.msk.bf16.vlgmr.msrb.gmra.mxu3 %vm6202_vm1, %v8892_v41  ;;  %v5318_v41 = vadd.f32 %v16642_v11, %v16640_v40 }
 0x77c   : > { %8673 = vmatmul.msk.bf16.gmra.mxu2 %vm6202_vm1, %v8893_v51 }
 0x783   : > { %8660 = vmatmul.msk.bf16.gmra.mxu0 %vm6202_vm1, %v8896_v30  ;;  %8668 = vmatmul.msk.bf16.gmra.mxu1 %vm6202_vm1, %v8896_v30 }
 0x788   : > { %8681 = vmatmul.msk.bf16.gmra.mxu3 %vm6202_vm1, %v8893_v51 }
 0x78c   : > { %8674 = vmatmul.msk.bf16.gmra.mxu2 %vm6202_vm1, %v8894_v61 }
 0x793   : > { %8661 = vmatmul.msk.bf16.gmra.mxu0 %vm6202_vm1, %v8897_v25  ;;  %8669 = vmatmul.msk.bf16.gmra.mxu1 %vm6202_vm1, %v8897_v25 }
 0x798   : > { %8682 = vmatmul.msk.bf16.gmra.mxu3 %vm6202_vm1, %v8894_v61 }
 0x79c   : > { %8675 = vmatmul.msk.bf16.gmra.mxu2 %vm6202_vm1, %v8895_v9 }
 0x7a3   : > { %8662 = vmatmul.msk.bf16.gmra.mxu0 %vm6202_vm1, %v8898_v53  ;;  %8670 = vmatmul.msk.bf16.gmra.mxu1 %vm6202_vm1, %v8898_v53 }
 0x7a8   : > { %8683 = vmatmul.msk.bf16.gmra.mxu3 %vm6202_vm1, %v8895_v9  ;;  %v16652_v9 = vld [vmem:[#allocation76_spill] sm:$0xff] }
 0x7ac   : > { %8676 = vmatmul.msk.bf16.gmra.mxu2 %vm6202_vm1, %v8896_v30 }
 0x7b3   : > { %8663 = vmatmul.msk.bf16.gmra.mxu0 %vm6202_vm1, %v8899_v22  ;;  %8671 = vmatmul.msk.bf16.gmra.mxu1 %vm6202_vm1, %v8899_v22 }
 0x7b8   : > { %8684 = vmatmul.msk.bf16.gmra.mxu3 %vm6202_vm1, %v8896_v30  ;;  %v5744_v30 = vadd.f32 %v16652_v9, %v16640_v40 }
 0x7bc   : > { %8677 = vmatmul.msk.bf16.gmra.mxu2 %vm6202_vm1, %v8897_v25 }
 0x7c0   : > { %v6236_v52 = vpop.f32.mrf.mxu0  ;;  %v6285_v50 = vpop.f32.mrf.mxu1 }
 0x7c1   : > { %v13904_v44 = vadd.f32 %v6236_v52, %v5100_v27  ;;  %v13906_v43 = vadd.f32 %v6285_v50, %v5313_v47  ;;  %v16656_v50 = vld [vmem:[#allocation105_spill] sm:$0xff] }
 0x7c2   : > { %v5536_v58 = vadd.f32 %v16656_v50, %v16643_v63 }
 0x7c3   : > { %v6423_v9 = vmax.f32 %v13904_v44, 0.0 }
 0x7c8   : > { %8685 = vmatmul.msk.bf16.gmra.mxu3 %vm6202_vm1, %v8897_v25  ;;  %v6238_v59 = vpop.f32.mrf.mxu0  ;;  %v6287_v31 = vpop.f32.mrf.mxu1 }
 0x7cc   : > { %8678 = vmatmul.msk.bf16.gmra.mxu2 %vm6202_vm1, %v8898_v53 }
 0x7d0   : > { %v6241_v17 = vpop.f32.mrf.mxu0  ;;  %v6290_v56 = vpop.f32.mrf.mxu1 }
 0x7d1   : > { %v13914_v2 = vadd.f32 %v6241_v17, %v5105_v7  ;;  %v13916_v4 = vadd.f32 %v6290_v56, %v5318_v41 }
 0x7d8   : > { %8686 = vmatmul.msk.bf16.gmra.mxu3 %vm6202_vm1, %v8898_v53  ;;  %v13918_v21 = vpop.f32.mrf.mxu0  ;;  %v13920_v60 = vpop.f32.mrf.mxu1  ;;  %v16653_v53 = vld [vmem:[#allocation98_spill] sm:$0xff] }
 0x7d9   : > { %v5333_v27 = vadd.f32 %v16655_v14, %v16653_v53  ;;  %v16666_v14 = vld [vmem:[#allocation18_spill] sm:$0xff] }
 0x7dc   : > { %8679 = vmatmul.msk.bf16.gmra.mxu2 %vm6202_vm1, %v8899_v22 }
 0x7e0   : > { %v6246_v1 = vpop.f32.mrf.mxu0  ;;  %v6295_v29 = vpop.f32.mrf.mxu1 }
 0x7e1   : > { %v13929_v46 = vadd.f32 %v6246_v1, %v5110_v33  ;;  %v13931_v3 = vadd.f32 %v6295_v29, %v5323_v34  ;;  %v16658_v34 = vld [vmem:[#allocation101_spill] sm:$0xff]  ;;  %v16659_v29 = vld [vmem:[#allocation118_spill] sm:$0xff] }
 0x7e2   : > { %v5102_v1 = vadd.f32 %v16658_v34, %v16657_v55  ;;  %v5315_v26 = vadd.f32 %v16659_v29, %v16657_v55  ;;  %v16671_v34 = vld [vmem:[#allocation122_spill] sm:$0xff] }
 0x7e4   : > { %v6239_v35 = vadd.f32 %v6238_v59, %v5102_v1  ;;  %v6424_v59 = vmax.f32 %v13906_v43, 0.0  ;;  %v16669_v43 = vld [vmem:[#allocation72_spill] sm:$0xff]  ;;  %v5741_v1 = vadd.f32 %v16671_v34, %v16657_v55 }
 0x7e5   : > { %v5754_v50 = vadd.f32 %v16669_v43, %v16648_v19 }
 0x7e8   : > { %8687 = vmatmul.msk.bf16.gmra.mxu3 %vm6202_vm1, %v8899_v22  ;;  %v13935_v16 = vpop.f32.mrf.mxu0  ;;  %v13937_v39 = vpop.f32.mrf.mxu1  ;;  %v16654_v22 = vld [vmem:[#allocation92_spill] sm:$0xff] }
 0x7e9   : > { %v5120_v15 = vadd.f32 %v16654_v22, %v16653_v53 }
 0x7ef   : > { %v6334_v8 = vpop.f32.mrf.mxu2 }
 0x7f0   : > { %v13933_v18 = vadd.f32 %v6334_v8, %v5526_v42  ;;  %v6251_v51 = vpop.f32.mrf.mxu0  ;;  %v6300_v6 = vpop.f32.mrf.mxu1  ;;  %v16660_v42 = vld [vmem:[#allocation96_spill] sm:$0xff] }
 0x7f1   : > { %v13951_v23 = vadd.f32 %v6251_v51, %v5115_v20  ;;  %v13953_v24 = vadd.f32 %v6300_v6, %v5328_v49  ;;  %v5749_v8 = vadd.f32 %v16660_v42, %v16643_v63  ;;  %v16661_v49 = vld [vmem:[#allocation46_spill] sm:$0xff]  ;;  %v6427_v6 = vmax.f32 %v6239_v35, 0.0 }
 0x7f2   : > { %v5541_v51 = vadd.f32 %v16661_v49, %v16648_v19  ;;  %v16673_v19 = vld [vmem:[#allocation52_spill] sm:$0xff] }
 0x7f3   : > { %v14007_v63 = vpack.c.bf16 %v6427_v6, %v6423_v9 }
 0x7f5   : > { %16663 = vst [vmem:[#allocation102_spill] sm:$0xff] %v14007_v63  ;;  %v16700_v63 = vld [vmem:[#allocation70_spill] sm:$0xff] }
 0x7f7   : > { %v13939_v0 = vpop.f32.mrf.mxu2 }
 0x7f8   : > { %v13957_v38 = vpop.f32.mrf.mxu0  ;;  %v13959_v54 = vpop.f32.mrf.mxu1 }
 0x7fb   : > { %v6383_v45 = vpop.f32.mrf.mxu3 }
 0x7fc   : > { %v13947_v62 = vadd.f32 %v6383_v45, %v5739_v13  ;;  %v6288_v13 = vadd.f32 %v6287_v31, %v5315_v26 }
 0x7fe   : > { %v6428_v5 = vmax.f32 %v6288_v13, 0.0 }
 0x7ff   : > { %v6339_v48 = vpop.f32.mrf.mxu2 }
 0x800   : > { %v13955_v57 = vadd.f32 %v6339_v48, %v5531_v37  ;;  %v6256_v47 = vpop.f32.mrf.mxu0  ;;  %v6305_v52 = vpop.f32.mrf.mxu1 }
 0x801   : > { %v13973_v7 = vadd.f32 %v6256_v47, %v5120_v15  ;;  %v13975_v11 = vadd.f32 %v6305_v52, %v5333_v27  ;;  %v16667_v27 = vld [vmem:[#allocation120_spill] sm:$0xff]  ;;  %v16668_v52 = vld [vmem:[#allocation99_spill] sm:$0xff] }
 0x802   : > { %v5107_v47 = vadd.f32 %v16667_v27, %v16666_v14  ;;  %v5320_v44 = vadd.f32 %v16668_v52, %v16666_v14 }
 0x803   : > { %v6385_v10 = vpop.f32.mrf.mxu3 }
 0x804   : > { %v6244_v29 = vadd.f32 %v13918_v21, %v5107_v47  ;;  %v6293_v26 = vadd.f32 %v13920_v60, %v5320_v44  ;;  %v6386_v13 = vadd.f32 %v6385_v10, %v5741_v1  ;;  %v6431_v21 = vmax.f32 %v13914_v2, 0.0  ;;  %v16683_v1 = vld [vmem:[#allocation65_spill] sm:$0xff] }
 0x805   : > { %v6432_v60 = vmax.f32 %v13916_v4, 0.0  ;;  %v6426_v10 = vmax.f32 %v13947_v62, 0.0  ;;  %v16680_v4 = vld [vmem:[#allocation19_spill] sm:$0xff] }
 0x806   : > { %v6435_v6 = vmax.f32 %v6244_v29, 0.0  ;;  %v5759_v29 = vadd.f32 %v16683_v1, %v16653_v53 }
 0x807   : > { %v13961_v61 = vpop.f32.mrf.mxu2 }
 0x808   : > { %v13981_v56 = vpop.f32.mrf.mxu0  ;;  %v13983_v36 = vpop.f32.mrf.mxu1  ;;  %v14046_v47 = vpack.c.bf16 %v6435_v6, %v6431_v21 }
 0x80a   : > { %16676 = vst [vmem:[#allocation100_spill] sm:$0xff] %v14046_v47 }
 0x80b   : > { %v6388_v25 = vpop.f32.mrf.mxu3 }
 0x80c   : > { %v13969_v12 = vadd.f32 %v6388_v25, %v5744_v30  ;;  %v14009_v30 = vpack.c.bf16 %v6428_v5, %v6424_v59  ;;  %v6436_v5 = vmax.f32 %v6293_v26, 0.0  ;;  %v6430_v59 = vmax.f32 %v6386_v13, 0.0  ;;  %v16684_v26 = vld [vmem:[#allocation115_spill] sm:$0xff] }
 0x80e   : > { %16664 = vst [vmem:[#allocation62_spill] sm:$0xff] %v14009_v30  ;;  %v14048_v52 = vpack.c.bf16 %v6436_v5, %v6432_v60 }
 0x80f   : > { %v6344_v41 = vpop.f32.mrf.mxu2 }
 0x810   : > { %v13977_v40 = vadd.f32 %v6344_v41, %v5536_v58  ;;  %v13995_v20 = vpop.f32.mrf.mxu0  ;;  %v13997_v28 = vpop.f32.mrf.mxu1  ;;  %v16670_v58 = vld [vmem:[#allocation109_spill] sm:$0xff]  ;;  %16677 = vst [vmem:[#allocation20_spill] sm:$0xff] %v14048_v52 }
 0x811   : > { %v5528_v41 = vadd.f32 %v16670_v58, %v16657_v55  ;;  %v14052_v58 = vpack.c.bf16 %v6430_v59, %v6426_v10  ;;  %v16688_v59 = vld [vmem:[#allocation117_spill] sm:$0xff]  ;;  %v16689_v10 = vld [vmem:[#allocation34_spill] sm:$0xff] }
 0x813   : > { %v13979_v17 = vpop.f32.mrf.mxu3  ;;  %v6337_v35 = vadd.f32 %v13939_v0, %v5528_v41  ;;  %v6425_v0 = vmax.f32 %v13933_v18, 0.0  ;;  %16679 = vst [vmem:[#allocation83_spill] sm:$0xff] %v14052_v58  ;;  %v16681_v41 = vld [vmem:[#allocation57_spill] sm:$0xff] }
 0x814   : > { %v5112_v34 = vadd.f32 %v16681_v41, %v16680_v4  ;;  %v16682_v18 = vld [vmem:[#allocation49_spill] sm:$0xff] }
 0x815   : > { %v6429_v9 = vmax.f32 %v6337_v35, 0.0  ;;  %v5325_v62 = vadd.f32 %v16682_v18, %v16680_v4  ;;  %v16685_v35 = vld [vmem:[#allocation88_spill] sm:$0xff]  ;;  %v16690_v41 = vld [vmem:[#allocation13_spill] sm:$0xff] }
 0x816   : > { %v5746_v13 = vadd.f32 %v16685_v35, %v16666_v14  ;;  %v5125_v18 = vadd.f32 %v16690_v41, %v16689_v10  ;;  %v16696_v35 = vld [vmem:[#allocation22_spill] sm:$0xff]  ;;  %v16697_v41 = vld [vmem:[#allocation112_spill] sm:$0xff]  ;;  %v16698_v58 = vld [vmem:[#allocation97_spill] sm:$0xff] }
 0x817   : > { %v13985_v33 = vpop.f32.mrf.mxu2 }
 0x818   : > { %v14011_v25 = vpop.f32.mrf.mxu0  ;;  %v14013_v22 = vpop.f32.mrf.mxu1  ;;  %v6391_v21 = vadd.f32 %v13979_v17, %v5746_v13  ;;  %v16694_v17 = vld [vmem:[#allocation14_spill] sm:$0xff] }
 0x81b   : > { %v6393_v45 = vpop.f32.mrf.mxu3 }
 0x81c   : > { %v13993_v32 = vadd.f32 %v6393_v45, %v5749_v8 }
 0x81f   : > { %v6349_v37 = vpop.f32.mrf.mxu2 }
 0x820   : > { %v14001_v48 = vadd.f32 %v6349_v37, %v5541_v51  ;;  %v14032_v45 = vpop.f32.mrf.mxu0  ;;  %v14034_v49 = vpop.f32.mrf.mxu1  ;;  %v5546_v51 = vadd.f32 %v16673_v19, %v16653_v53  ;;  %v6249_v19 = vadd.f32 %v13935_v16, %v5112_v34  ;;  %v16687_v53 = vld [vmem:[#allocation53_spill] sm:$0xff] }
 0x822   : > { %16662 = vst [vmem:[#allocation365_spill] sm:$0xff] %v14001_v48 }
 0x823   : > { %v14005_v31 = vpop.f32.mrf.mxu3 }
 0x827   : > { %v14015_v15 = vpop.f32.mrf.mxu2 }
 0x828   : > { %16665 = vst [vmem:[#allocation106_spill] sm:$0xff] %v14015_v15  ;;  %v6268_v44 = vpop.f32.mrf.mxu0  ;;  %v6317_v43 = vpop.f32.mrf.mxu1 }
 0x82b   : > { %v6398_v42 = vpop.f32.mrf.mxu3 }
 0x82c   : > { %v14029_v8 = vadd.f32 %v6398_v42, %v5754_v50  ;;  %v14050_v50 = vpack.c.bf16 %v6429_v9, %v6425_v0  ;;  %v5533_v42 = vadd.f32 %v16684_v26, %v16666_v14  ;;  %v5117_v0 = vadd.f32 %v16688_v59, %v16687_v53 }
 0x82d   : > { %v6443_v14 = vmax.f32 %v6249_v19, 0.0  ;;  %v6440_v59 = vmax.f32 %v13931_v3, 0.0 }
 0x82e   : > { %16672 = vst [vmem:[#allocation64_spill] sm:$0xff] %v14029_v8 }
 0x82f   : > { %v6354_v55 = vpop.f32.mrf.mxu2  ;;  %16678 = vst [vmem:[#allocation113_spill] sm:$0xff] %v14050_v50  ;;  %v5132_v50 = vadd.f32 %v16698_v58, %v16697_v41  ;;  %v16704_v58 = vld [vmem:[#allocation30_spill] sm:$0xff] }
 0x830   : > { %v14038_v37 = vadd.f32 %v6354_v55, %v5546_v51  ;;  %v6298_v51 = vadd.f32 %v13937_v39, %v5325_v62  ;;  %v6342_v55 = vadd.f32 %v13961_v61, %v5533_v42  ;;  %v6271_v60 = vpop.f32.mrf.mxu0  ;;  %v6320_v9 = vpop.f32.mrf.mxu1  ;;  %v16691_v39 = vld [vmem:[#allocation87_spill] sm:$0xff]  ;;  %v16695_v42 = vld [vmem:[#allocation54_spill] sm:$0xff] }
 0x831   : > { %v5338_v34 = vadd.f32 %v16691_v39, %v16689_v10  ;;  %v16692_v62 = vld [vmem:[#allocation11_spill] sm:$0xff]  ;;  %v5130_v13 = vadd.f32 %v16696_v35, %v16695_v42  ;;  %v16699_v39 = vld [vmem:[#allocation104_spill] sm:$0xff]  ;;  %v6433_v35 = vmax.f32 %v13955_v57, 0.0 }
 0x832   : > { %16674 = vst [vmem:[#allocation111_spill] sm:$0xff] %v14038_v37  ;;  %v6444_v1 = vmax.f32 %v6298_v51, 0.0  ;;  %v5340_v26 = vadd.f32 %v16694_v17, %v16692_v62  ;;  %v6437_v19 = vmax.f32 %v6342_v55, 0.0  ;;  %v6438_v51 = vmax.f32 %v6391_v21, 0.0  ;;  %v16702_v17 = vld [vmem:[#allocation55_spill] sm:$0xff]  ;;  %v16705_v21 = vld [vmem:[#allocation28_spill] sm:$0xff] }
 0x833   : > { %v14044_v27 = vpop.f32.mrf.mxu3  ;;  %v5345_v30 = vadd.f32 %v16699_v39, %v16697_v41  ;;  %v5348_v47 = vadd.f32 %v16702_v17, %v16700_v63  ;;  %v5137_v48 = vadd.f32 %v16705_v21, %v16704_v58  ;;  %v16706_v39 = vld [vmem:[#allocation36_spill] sm:$0xff]  ;;  %v16707_v17 = vld [vmem:[#allocation103_spill] sm:$0xff] }
 0x834   : > { %16675 = vst [vmem:[#allocation107_spill] sm:$0xff] %v14044_v27  ;;  %v14102_v55 = vpack.c.bf16 %v6444_v1, %v6440_v59  ;;  %v14111_v15 = vpack.c.bf16 %v6437_v19, %v6433_v35  ;;  %v6269_v1 = vadd.f32 %v6268_v44, %v5132_v50 }
 0x835   : > { %v6321_v37 = vadd.f32 %v6320_v9, %v5348_v47  ;;  %v6267_v47 = vadd.f32 %v14032_v45, %v5130_v13 }
 0x836   : > { %16703 = vst [vmem:[#allocation121_spill] sm:$0xff] %v14102_v55  ;;  %v6262_v55 = vadd.f32 %v13995_v20, %v5125_v18  ;;  %v6475_v44 = vmax.f32 %v6269_v1, 0.0 }
 0x837   : > { %v14054_v2 = vpop.f32.mrf.mxu2  ;;  %v6471_v13 = vmax.f32 %v6267_v47, 0.0 }
 0x838   : > { %v6322_v27 = vpop.f32.mrf.mxu1 }
 0x83b   : > { %v6403_v6 = vpop.f32.mrf.mxu3 }
 0x83c   : > { %v14068_v5 = vadd.f32 %v6403_v6, %v5759_v29  ;;  %v16693_v29 = vld [vmem:[#allocation17_spill] sm:$0xff]  ;;  %v6439_v6 = vmax.f32 %v13929_v46, 0.0  ;;  %v6434_v46 = vmax.f32 %v13969_v12, 0.0  ;;  %v6273_v12 = vpop.f32.mrf.mxu0 }
 0x83d   : > { %v5127_v61 = vadd.f32 %v16693_v29, %v16692_v62  ;;  %v16701_v29 = vld [vmem:[#allocation89_spill] sm:$0xff]  ;;  %v6274_v59 = vadd.f32 %v6273_v12, %v5137_v48 }
 0x83e   : > { %16686 = vst [vmem:[#allocation63_spill] sm:$0xff] %v14068_v5  ;;  %v5135_v52 = vadd.f32 %v16701_v29, %v16700_v63  ;;  %v14100_v3 = vpack.c.bf16 %v6443_v14, %v6439_v6  ;;  %v5350_v5 = vadd.f32 %v16706_v39, %v16704_v58  ;;  %v5343_v63 = vadd.f32 %v16707_v17, %v16695_v42 }
 0x83f   : > { %v14076_v16 = vpop.f32.mrf.mxu2  ;;  %v6264_v57 = vadd.f32 %v14011_v25, %v5127_v61  ;;  %v14113_v14 = vpack.c.bf16 %v6438_v51, %v6434_v46  ;;  %v6318_v6 = vadd.f32 %v6317_v43, %v5345_v30  ;;  %v6480_v61 = vmax.f32 %v6321_v37, 0.0  ;;  %v16708_v51 = vld [vmem:[#allocation79_spill] sm:$0xff]  ;;  %v16709_v30 = vld [vmem:[#allocation108_spill] sm:$0xff] }
 0x840   : > { %v6272_v29 = vadd.f32 %v6271_v60, %v5135_v52  ;;  %v6323_v21 = vadd.f32 %v6322_v27, %v5350_v5  ;;  %v6313_v52 = vadd.f32 %v14013_v22, %v5340_v26  ;;  %v6316_v60 = vadd.f32 %v14034_v49, %v5343_v63  ;;  %v16710_v63 = vld [vmem:[#allocation80_spill] sm:$0xff] }
 0x841   : > { %v6483_v39 = vmax.f32 %v6274_v59, 0.0  ;;  %v5538_v35 = vadd.f32 %v16708_v51, %v16680_v4  ;;  %v5330_v48 = vadd.f32 %v16709_v30, %v16687_v53  ;;  %v6311_v27 = vadd.f32 %v13997_v28, %v5338_v34  ;;  %v16711_v28 = vld [vmem:[#allocation43_spill] sm:$0xff]  ;;  %v16712_v34 = vld [vmem:[#allocation110_spill] sm:$0xff] }
 0x842   : > { %v6479_v25 = vmax.f32 %v6272_v29, 0.0  ;;  %v6484_v19 = vmax.f32 %v6323_v21, 0.0  ;;  %v6467_v20 = vmax.f32 %v6264_v57, 0.0  ;;  %v6476_v22 = vmax.f32 %v6318_v6, 0.0 }
 0x843   : > { %v14098_v8 = vpop.f32.mrf.mxu3  ;;  %v5751_v49 = vadd.f32 %v16710_v63, %v16680_v4  ;;  %v6254_v37 = vadd.f32 %v13957_v38, %v5117_v0  ;;  %v6303_v50 = vadd.f32 %v13959_v54, %v5330_v48  ;;  %v6468_v5 = vmax.f32 %v6313_v52, 0.0  ;;  %v16713_v4 = vld [vmem:[#allocation78_spill] sm:$0xff] }
 0x844   : > { %v6515_v43 = vpack.c.bf16 %v6483_v39, %v6479_v25  ;;  %v6516_v45 = vpack.c.bf16 %v6484_v19, %v6480_v61  ;;  %v6463_v26 = vmax.f32 %v6262_v55, 0.0  ;;  %v6472_v46 = vmax.f32 %v6316_v60, 0.0  ;;  %v16714_v61 = vld [vmem:[#allocation73_spill] sm:$0xff]  ;;  %v16715_v19 = vld [vmem:[#allocation8_spill] sm:$0xff] }
 0x845   : > { %v5122_v29 = vadd.f32 %v16712_v34, %v16711_v28  ;;  %v6347_v17 = vadd.f32 %v13985_v33, %v5538_v35  ;;  %v6396_v57 = vadd.f32 %v14005_v31, %v5751_v49  ;;  %v6464_v12 = vmax.f32 %v6311_v27, 0.0  ;;  %v16716_v35 = vld [vmem:[#allocation10_spill] sm:$0xff] }
 0x846   : > { %6647 = vmatpush.bf16.msra.mxu0 %v6515_v43  ;;  %6736 = vmatpush.bf16.msra.mxu1 %v6516_v45  ;;  %v5335_v38 = vadd.f32 %v16713_v4, %v16711_v28  ;;  %v6511_v0 = vpack.c.bf16 %v6475_v44, %v6471_v13  ;;  %v6512_v54 = vpack.c.bf16 %v6476_v22, %v6472_v46  ;;  %v6451_v6 = vmax.f32 %v6254_v37, 0.0  ;;  %v16718_v44 = vld [vmem:[#allocation81_spill] sm:$0xff]  ;;  %v16721_v46 = vld [vmem:[#allocation7_spill] sm:$0xff] }
 0x847   : > { %v6361_v9 = vpop.f32.mrf.mxu2  ;;  %v6507_v1 = vpack.c.bf16 %v6467_v20, %v6463_v26  ;;  %v6452_v55 = vmax.f32 %v6303_v50, 0.0  ;;  %v6508_v21 = vpack.c.bf16 %v6468_v5, %v6464_v12  ;;  %v6259_v52 = vadd.f32 %v13981_v56, %v5122_v29  ;;  %v16720_v26 = vld [vmem:[#allocation90_spill] sm:$0xff] }
 0x848   : > { %v6308_v47 = vadd.f32 %v13983_v36, %v5335_v38  ;;  %v6447_v33 = vmax.f32 %v13951_v23, 0.0  ;;  %v6448_v31 = vmax.f32 %v13953_v24, 0.0  ;;  %v6445_v60 = vmax.f32 %v6347_v17, 0.0  ;;  %v16717_v24 = vld [vmem:[#allocation94_spill] sm:$0xff] }
 0x849   : > { %v6446_v25 = vmax.f32 %v6396_v57, 0.0  ;;  %v5551_v39 = vadd.f32 %v16714_v61, %v16689_v10  ;;  %v5764_v51 = vadd.f32 %v16715_v19, %v16689_v10  ;;  %v5553_v30 = vadd.f32 %v16716_v35, %v16692_v62  ;;  %v16719_v10 = vld [vmem:[#allocation75_spill] sm:$0xff]  ;;  %v16726_v19 = vld [vmem:[#allocation77_spill] sm:$0xff] }
 0x84a   : > { %6648 = vmatpush.bf16.msra.mxu0 %v6511_v0  ;;  %6737 = vmatpush.bf16.msra.mxu1 %v6512_v54  ;;  %v6441_v56 = vmax.f32 %v13977_v40, 0.0  ;;  %v6442_v36 = vmax.f32 %v13993_v32, 0.0  ;;  %v6499_v27 = vpack.c.bf16 %v6451_v6, %v6447_v33  ;;  %v6500_v23 = vpack.c.bf16 %v6452_v55, %v6448_v31  ;;  %v16722_v6 = vld [vmem:[#allocation93_spill] sm:$0xff]  ;;  %v16725_v33 = vld [vmem:[#allocation107_spill] sm:$0xff] }
 0x84b   : > { %v6408_v18 = vpop.f32.mrf.mxu3  ;;  %v5766_v20 = vadd.f32 %v16717_v24, %v16692_v62  ;;  %v5556_v22 = vadd.f32 %v16718_v44, %v16695_v42  ;;  %v6459_v43 = vmax.f32 %v6259_v52, 0.0  ;;  %v6460_v45 = vmax.f32 %v6308_v47, 0.0  ;;  %v16724_v47 = vld [vmem:[#allocation106_spill] sm:$0xff]  ;;  %v16727_v35 = vld [vmem:[#allocation111_spill] sm:$0xff] }
 0x84c   : > { %v5558_v63 = vadd.f32 %v16719_v10, %v16697_v41  ;;  %v6455_v40 = vmax.f32 %v13973_v7, 0.0  ;;  %v14153_v49 = vpack.c.bf16 %v6445_v60, %v6441_v56  ;;  %v14155_v32 = vpack.c.bf16 %v6446_v25, %v6442_v36  ;;  %v16729_v36 = vld [vmem:[#allocation51_spill] sm:$0xff]  ;;  %v16732_v10 = vld [vmem:[#allocation64_spill] sm:$0xff] }
 0x84d   : > { %v6456_v37 = vmax.f32 %v13975_v11, 0.0  ;;  %v6362_v50 = vadd.f32 %v6361_v9, %v5553_v30  ;;  %v5548_v13 = vadd.f32 %v16720_v26, %v16711_v28  ;;  %v5761_v34 = vadd.f32 %v16721_v46, %v16711_v28  ;;  %v16728_v30 = vld [vmem:[#allocation63_spill] sm:$0xff]  ;;  %v16735_v26 = vld [vmem:[#allocation32_spill] sm:$0xff] }
 0x84e   : > { %6649 = vmatpush.bf16.msra.mxu0 %v6507_v1  ;;  %6738 = vmatpush.bf16.msra.mxu1 %v6508_v21  ;;  %v6360_v29 = vadd.f32 %v14076_v16, %v5551_v39  ;;  %v6409_v57 = vadd.f32 %v6408_v18, %v5764_v51  ;;  %v6503_v12 = vpack.c.bf16 %v6459_v43, %v6455_v40  ;;  %v16723_v16 = vld [vmem:[#allocation85_spill] sm:$0xff]  ;;  %v6458_v56 = vmax.f32 %v16728_v30, 0.0  ;;  %v16733_v40 = vld [vmem:[#allocation70_spill] sm:$0xff] }
 0x84f   : > { %v6364_v59 = vpop.f32.mrf.mxu2  ;;  %v6504_v4 = vpack.c.bf16 %v6460_v45, %v6456_v37  ;;  %v6357_v38 = vadd.f32 %v14054_v2, %v5548_v13  ;;  %v6406_v11 = vadd.f32 %v14098_v8, %v5761_v34  ;;  %v6469_v9 = vmax.f32 %v6362_v50, 0.0  ;;  %v16731_v43 = vld [vmem:[#allocation365_spill] sm:$0xff]  ;;  %v16734_v37 = vld [vmem:[#allocation39_spill] sm:$0xff] }
 0x850   : > { %v6365_v5 = vadd.f32 %v6364_v59, %v5556_v22  ;;  %v5543_v28 = vadd.f32 %v16722_v6, %v16687_v53  ;;  %v5756_v55 = vadd.f32 %v16723_v16, %v16687_v53  ;;  %v6465_v59 = vmax.f32 %v6360_v29, 0.0  ;;  %v16736_v29 = vld [vmem:[#allocation100_spill] sm:$0xff]  ;;  %v16740_v6 = vld [vmem:[#allocation74_spill] sm:$0xff]  ;;  %v16741_v16 = vld [vmem:[#allocation61_spill] sm:$0xff] }
 0x851   : > { %v6466_v21 = vmax.f32 %v6409_v57, 0.0  ;;  %v6461_v31 = vmax.f32 %v6357_v38, 0.0  ;;  %v6462_v60 = vmax.f32 %v6406_v11, 0.0  ;;  %v5769_v51 = vadd.f32 %v16726_v19, %v16695_v42 }
 0x852   : > { %v6473_v54 = vmax.f32 %v6365_v5, 0.0  ;;  %6650 = vmatpush.bf16.msra.mxu0 %v6503_v12  ;;  %6739 = vmatpush.bf16.msra.mxu1 %v6504_v4  ;;  %v6352_v2 = vadd.f32 %v16724_v47, %v5543_v28  ;;  %v6401_v8 = vadd.f32 %v16725_v33, %v5756_v55  ;;  %v6509_v25 = vpack.c.bf16 %v6469_v9, %v6465_v59  ;;  %v8900_v4 = vld [vmem:[%s15740_s8] sm:$0xff]  ;;  %v16738_v9 = vld [vmem:[#allocation102_spill] sm:$0xff] }
 0x853   : > { %v6410_v48 = vpop.f32.mrf.mxu3  ;;  %v6457_v53 = vmax.f32 %v16727_v35, 0.0  ;;  %v6506_v22 = vpack.c.bf16 %v6462_v60, %v6458_v56  ;;  %v6449_v45 = vmax.f32 %v16731_v43, 0.0  ;;  %v6450_v42 = vmax.f32 %v16732_v10, 0.0  ;;  %v14220_v60 = vpop.permute.xlu1 %4569  ;;  %v8908_v56 = vld [vmem:[%s15740_s8 + $0x40] sm:$0xff] }
 0x854   : > { %v6411_v62 = vadd.f32 %v6410_v48, %v5766_v20  ;;  %v5771_v48 = vadd.f32 %v16729_v36, %v16697_v41  ;;  %v6453_v24 = vmax.f32 %v6352_v2, 0.0  ;;  %v6454_v20 = vmax.f32 %v6401_v8, 0.0  ;;  %v8901_v8 = vld [vmem:[%s15740_s8 + $0x8] sm:$0xff]  ;;  %16744 = vst [vmem:[#allocation119_spill] sm:$0xff] %v14220_v60 }
 0x855   : > { %v5561_v50 = vadd.f32 %v16734_v37, %v16733_v40  ;;  %v5563_v13 = vadd.f32 %v16735_v26, %v16704_v58  ;;  %v5774_v28 = vadd.f32 %v16740_v6, %v16733_v40  ;;  %v5776_v55 = vadd.f32 %v16741_v16, %v16704_v58  ;;  %v8902_v58 = vld [vmem:[%s15740_s8 + $0x10] sm:$0xff]  ;;  %v16751_v40 = vld [vmem:[#allocation264_spill] sm:$0xff] }
 0x856   : > { %v6470_v0 = vmax.f32 %v6411_v62, 0.0  ;;  %6651 = vmatpush.bf16.msra.mxu0 %v6499_v27  ;;  %6740 = vmatpush.bf16.msra.mxu1 %v6500_v23  ;;  %v16730_v27 = vld [vmem:[#allocation121_spill] sm:$0xff]  ;;  %v6505_v23 = vpack.c.bf16 %v6461_v31, %v6457_v53  ;;  %v6501_v5 = vpack.c.bf16 %v6453_v24, %v6449_v45  ;;  %v6502_v41 = vpack.c.bf16 %v6454_v20, %v6450_v42  ;;  %v16743_v31 = vld [vmem:[#allocation83_spill] sm:$0xff] }
 0x857   : > { %v6366_v17 = vpop.f32.mrf.mxu2  ;;  %v16747_v53 = vld [vmem:[#allocation37_spill] sm:$0xff]  ;;  %v16752_v37 = vld [vmem:[#allocation27_spill] sm:$0xff] }
 0x858   : > { %v6367_v7 = vadd.f32 %v6366_v17, %v5558_v63  ;;  %v6510_v61 = vpack.c.bf16 %v6470_v0, %v6466_v21  ;;  %v16737_v17 = vld [vmem:[#allocation20_spill] sm:$0xff]  ;;  %v16739_v0 = vld [vmem:[#allocation62_spill] sm:$0xff] }
 0x85a   : > { %v6477_v1 = vmax.f32 %v6367_v7, 0.0  ;;  %6652 = vmatpush.bf16.msra.mxu0 %v14100_v3  ;;  %6741 = vmatpush.bf16.msra.mxu1 %v16730_v27  ;;  %v16749_v27 = vld [vmem:[#allocation71_spill] sm:$0xff] }
 0x85b   : > { %v6413_v18 = vpop.f32.mrf.mxu3 }
 0x85c   : > { %v6513_v52 = vpack.c.bf16 %v6477_v1, %v6473_v54  ;;  %v6414_v44 = vadd.f32 %v6413_v18, %v5769_v51  ;;  %v16746_v51 = vld [vmem:[#allocation29_spill] sm:$0xff] }
 0x85e   : > { %v6474_v46 = vmax.f32 %v6414_v44, 0.0  ;;  %6653 = vmatpush.bf16.msra.mxu0 %v16736_v29  ;;  %6742 = vmatpush.bf16.msra.mxu1 %v16737_v17  ;;  %v16748_v44 = vld [vmem:[#allocation313_spill] sm:$0xff]  ;;  %v16755_v17 = vld [vmem:[#allocation12_spill] sm:$0xff] }
 0x85f   : > { %v6369_v39 = vpop.f32.mrf.mxu2 }
 0x860   : > { %v6370_v34 = vadd.f32 %v6369_v39, %v5561_v50  ;;  %v5145_v50 = vadd.f32 %v16752_v37, %v16751_v40 }
 0x862   : > { %v6481_v38 = vmax.f32 %v6370_v34, 0.0  ;;  %6654 = vmatpush.bf16.msra.mxu0 %v16738_v9  ;;  %6743 = vmatpush.bf16.msra.mxu1 %v16739_v0  ;;  %v16754_v34 = vld [vmem:[#allocation41_spill] sm:$0xff]  ;;  %v16757_v9 = vld [vmem:[#allocation24_spill] sm:$0xff] }
 0x863   : > { %v6415_v63 = vpop.f32.mrf.mxu3 }
 0x864   : > { %v6416_v62 = vadd.f32 %v6415_v63, %v5771_v48 }
 0x865   : > { %6655 = vmatmul.bf16.vlgmr.msra.gmra.mxu0 %v8900_v4  ;;  %6744 = vmatmul.bf16.vlgmr.msra.gmra.mxu1 %v8900_v4 }
 0x866   : > { %v6478_v3 = vmax.f32 %v6416_v62, 0.0  ;;  %v16753_v62 = vld [vmem:[#allocation67_spill] sm:$0xff] }
 0x867   : > { %v6371_v57 = vpop.f32.mrf.mxu2 }
 0x868   : > { %v6372_v7 = vadd.f32 %v6371_v57, %v5563_v13  ;;  %v6514_v12 = vpack.c.bf16 %v6478_v3, %v6474_v46 }
 0x86a   : > { %v6485_v11 = vmax.f32 %v6372_v7, 0.0 }
 0x86b   : > { %v6418_v54 = vpop.f32.mrf.mxu3 }
 0x86c   : > { %v6517_v1 = vpack.c.bf16 %v6485_v11, %v6481_v38  ;;  %v6419_v18 = vadd.f32 %v6418_v54, %v5774_v28  ;;  %v16756_v11 = vld [vmem:[#allocation134_spill] sm:$0xff]  ;;  %v14278_v54 = vld [vmem:[%s15740_s8 + $0x50] sm:$0xff] }
 0x86d   : > { %v5150_v0 = vadd.f32 %v16757_v9, %v16756_v11 }
 0x86e   : > { %6825 = vmatpush.bf16.msra.mxu2 %v6517_v1  ;;  %v6482_v47 = vmax.f32 %v6419_v18, 0.0  ;;  %v16758_v1 = vld [vmem:[#allocation44_spill] sm:$0xff] }
 0x86f   : > { %v5363_v6 = vadd.f32 %v16758_v1, %v16756_v11 }
 0x872   : > { %6826 = vmatpush.bf16.msra.mxu2 %v6513_v52  ;;  %v16742_v52 = vld [vmem:[#allocation113_spill] sm:$0xff] }
 0x873   : > { %v6420_v59 = vpop.f32.mrf.mxu3 }
 0x874   : > { %v6421_v21 = vadd.f32 %v6420_v59, %v5776_v55  ;;  %v16759_v59 = vld [vmem:[#allocation33_spill] sm:$0xff] }
 0x875   : > { %6660 = vmatmul.bf16.gmra.mxu0 %v8901_v8  ;;  %6749 = vmatmul.bf16.gmra.mxu1 %v8901_v8 }
 0x876   : > { %v6486_v2 = vmax.f32 %v6421_v21, 0.0  ;;  %6827 = vmatpush.bf16.msra.mxu2 %v6509_v25  ;;  %v14222_v25 = vpop.permute.xlu1 %4554 }
 0x877   : > { %16745 = vst [vmem:[#allocation40_spill] sm:$0xff] %v14222_v25 }
 0x878   : > { %v6518_v33 = vpack.c.bf16 %v6486_v2, %v6482_v47  ;;  %v16760_v2 = vld [vmem:[#allocation259_spill] sm:$0xff] }
 0x87a   : > { %6914 = vmatpush.bf16.msra.mxu3 %v6518_v33  ;;  %6828 = vmatpush.bf16.msra.mxu2 %v6505_v23  ;;  %v5142_v23 = vadd.f32 %v16749_v27, %v16748_v44  ;;  %v16761_v33 = vld [vmem:[#allocation68_spill] sm:$0xff] }
 0x87b   : > { %v14309_v27 = vld [vmem:[%s15740_s8 + $0x58] sm:$0xff] }
 0x87e   : > { %6915 = vmatpush.bf16.msra.mxu3 %v6514_v12  ;;  %6829 = vmatpush.bf16.msra.mxu2 %v6501_v5  ;;  %v14227_v39 = vpop.permute.xlu1 %4469  ;;  %v5358_v5 = vadd.f32 %v16753_v62, %v16751_v40 }
 0x87f   : > { %v5147_v29 = vadd.f32 %v16754_v34, %v14227_v39  ;;  %v5360_v57 = vadd.f32 %v16755_v17, %v14227_v39 }
 0x882   : > { %6916 = vmatpush.bf16.msra.mxu3 %v6510_v61  ;;  %6830 = vmatpush.bf16.msra.mxu2 %v14153_v49  ;;  %v8904_v49 = vld [vmem:[%s15740_s8 + $0x20] sm:$0xff]  ;;  %v8907_v61 = vld [vmem:[%s15740_s8 + $0x38] sm:$0xff] }
 0x885   : > { %6665 = vmatmul.bf16.gmra.mxu0 %v8902_v58  ;;  %6754 = vmatmul.bf16.gmra.mxu1 %v8902_v58 }
 0x886   : > { %6917 = vmatpush.bf16.msra.mxu3 %v6506_v22  ;;  %6831 = vmatpush.bf16.msra.mxu2 %v14111_v15  ;;  %v8903_v15 = vld [vmem:[%s15740_s8 + $0x18] sm:$0xff]  ;;  %v14229_v19 = vpop.permute.xlu1 %4454  ;;  %v16750_v22 = vld [vmem:[#allocation66_spill] sm:$0xff] }
 0x887   : > { %v5140_v35 = vadd.f32 %v16746_v51, %v14229_v19  ;;  %v5353_v30 = vadd.f32 %v16747_v53, %v14229_v19  ;;  %v5355_v43 = vadd.f32 %v16750_v22, %v16748_v44  ;;  %v5566_v21 = vadd.f32 %v16759_v59, %v14229_v19  ;;  %v16764_v53 = vld [vmem:[#allocation146_spill] sm:$0xff] }
 0x88a   : > { %6918 = vmatpush.bf16.msra.mxu3 %v6502_v41  ;;  %6832 = vmatpush.bf16.msra.mxu2 %v16742_v52  ;;  %v14257_v41 = vld [vmem:[%s15740_s8 + $0x48] sm:$0xff] }
 0x88b   : > { %v16762_v52 = vld [vmem:[#allocation50_spill] sm:$0xff] }
 0x88d   : > { %6833 = vmatmul.bf16.vlgmr.msra.gmra.mxu2 %v8900_v4 }
 0x88e   : > { %6919 = vmatpush.bf16.msra.mxu3 %v14155_v32  ;;  %v8906_v32 = vld [vmem:[%s15740_s8 + $0x30] sm:$0xff] }
 0x892   : > { %6920 = vmatpush.bf16.msra.mxu3 %v14113_v14  ;;  %v8905_v14 = vld [vmem:[%s15740_s8 + $0x28] sm:$0xff] }
 0x895   : > { %6670 = vmatmul.bf16.gmra.mxu0 %v8903_v15  ;;  %6759 = vmatmul.bf16.gmra.mxu1 %v8903_v15 }
 0x896   : > { %6921 = vmatpush.bf16.msra.mxu3 %v16743_v31  ;;  %v5365_v31 = vadd.f32 %v16762_v52, %v16760_v2  ;;  %v16774_v52 = vld [vmem:[#allocation156_spill] sm:$0xff] }
 0x899   : > { %6922 = vmatmul.bf16.vlgmr.msra.gmra.mxu3 %v8900_v4 }
 0x89d   : > { %6838 = vmatmul.bf16.gmra.mxu2 %v8901_v8 }
 0x8a5   : > { %6675 = vmatmul.bf16.gmra.mxu0 %v8904_v49  ;;  %6764 = vmatmul.bf16.gmra.mxu1 %v8904_v49 }
 0x8a9   : > { %6927 = vmatmul.bf16.gmra.mxu3 %v8901_v8  ;;  %v5152_v8 = vadd.f32 %v16761_v33, %v16760_v2 }
 0x8ad   : > { %6843 = vmatmul.bf16.gmra.mxu2 %v8902_v58 }
 0x8b5   : > { %6680 = vmatmul.bf16.gmra.mxu0 %v8905_v14  ;;  %6769 = vmatmul.bf16.gmra.mxu1 %v8905_v14 }
 0x8b9   : > { %6932 = vmatmul.bf16.gmra.mxu3 %v8902_v58 }
 0x8bd   : > { %6848 = vmatmul.bf16.gmra.mxu2 %v8903_v15 }
 0x8c5   : > { %6685 = vmatmul.bf16.gmra.mxu0 %v8906_v32  ;;  %6774 = vmatmul.bf16.gmra.mxu1 %v8906_v32 }
 0x8c9   : > { %6937 = vmatmul.bf16.gmra.mxu3 %v8903_v15 }
 0x8cd   : > { %6853 = vmatmul.bf16.gmra.mxu2 %v8904_v49 }
 0x8d5   : > { %6690 = vmatmul.bf16.gmra.mxu0 %v8907_v61  ;;  %6779 = vmatmul.bf16.gmra.mxu1 %v8907_v61 }
 0x8d9   : > { %6942 = vmatmul.bf16.gmra.mxu3 %v8904_v49 }
 0x8dd   : > { %6858 = vmatmul.bf16.gmra.mxu2 %v8905_v14 }
 0x8e2   : > { %v6656_v36 = vpop.f32.mrf.mxu0  ;;  %v6745_v48 = vpop.f32.mrf.mxu1 }
 0x8e3   : > { %v14238_v24 = vadd.f32 %v6656_v36, %v5140_v35  ;;  %v14240_v20 = vadd.f32 %v6745_v48, %v5353_v30  ;;  %v16765_v30 = vld [vmem:[#allocation31_spill] sm:$0xff] }
 0x8e4   : > { %v5155_v36 = vadd.f32 %v16765_v30, %v16764_v53  ;;  %v16777_v30 = vld [vmem:[#allocation38_spill] sm:$0xff] }
 0x8e5   : > { %6695 = vmatmul.bf16.gmra.mxu0 %v8908_v56  ;;  %6784 = vmatmul.bf16.gmra.mxu1 %v8908_v56 }
 0x8e9   : > { %6947 = vmatmul.bf16.gmra.mxu3 %v8905_v14 }
 0x8ea   : > { %v6658_v45 = vpop.f32.mrf.mxu0  ;;  %v6747_v10 = vpop.f32.mrf.mxu1 }
 0x8eb   : > { %v14246_v42 = vadd.f32 %v6658_v45, %v5142_v23  ;;  %v14248_v63 = vadd.f32 %v6747_v10, %v5355_v43  ;;  %v16766_v23 = vld [vmem:[#allocation58_spill] sm:$0xff]  ;;  %v16767_v45 = vld [vmem:[#allocation56_spill] sm:$0xff] }
 0x8ec   : > { %v5368_v22 = vadd.f32 %v16766_v23, %v16764_v53  ;;  %v5779_v10 = vadd.f32 %v16767_v45, %v14229_v19  ;;  %v16770_v19 = vld [vmem:[#allocation6_spill] sm:$0xff] }
 0x8ed   : > { %6863 = vmatmul.bf16.gmra.mxu2 %v8906_v32 }
 0x8f2   : > { %v6661_v26 = vpop.f32.mrf.mxu0  ;;  %v6750_v13 = vpop.f32.mrf.mxu1 }
 0x8f3   : > { %v14259_v46 = vadd.f32 %v6661_v26, %v5145_v50  ;;  %v14261_v3 = vadd.f32 %v6750_v13, %v5358_v5  ;;  %v16768_v26 = vld [vmem:[#allocation9_spill] sm:$0xff] }
 0x8f4   : > { %v5571_v13 = vadd.f32 %v16768_v26, %v16751_v40 }
 0x8f5   : > { %6700 = vmatmul.bf16.gmra.mxu0 %v14257_v41  ;;  %6789 = vmatmul.bf16.gmra.mxu1 %v14257_v41 }
 0x8f9   : > { %6952 = vmatmul.bf16.gmra.mxu3 %v8906_v32 }
 0x8fa   : > { %v6663_v7 = vpop.f32.mrf.mxu0  ;;  %v6752_v12 = vpop.f32.mrf.mxu1 }
 0x8fb   : > { %v14269_v4 = vadd.f32 %v6663_v7, %v5147_v29  ;;  %v14271_v38 = vadd.f32 %v6752_v12, %v5360_v57  ;;  %v16769_v29 = vld [vmem:[#allocation127_spill] sm:$0xff] }
 0x8fc   : > { %v5157_v17 = vadd.f32 %v16770_v19, %v16769_v29  ;;  %v16771_v7 = vld [vmem:[#allocation23_spill] sm:$0xff] }
 0x8fd   : > { %6868 = vmatmul.bf16.gmra.mxu2 %v8907_v61  ;;  %v5370_v12 = vadd.f32 %v16771_v7, %v16769_v29 }
 0x902   : > { %v6666_v28 = vpop.f32.mrf.mxu0  ;;  %v6755_v55 = vpop.f32.mrf.mxu1 }
 0x903   : > { %v14282_v16 = vadd.f32 %v6666_v28, %v5150_v0  ;;  %v14284_v18 = vadd.f32 %v6755_v55, %v5363_v6  ;;  %v16772_v0 = vld [vmem:[#allocation16_spill] sm:$0xff] }
 0x904   : > { %v5781_v1 = vadd.f32 %v16772_v0, %v16748_v44 }
 0x905   : > { %6705 = vmatmul.bf16.gmra.mxu0 %v14278_v54  ;;  %6794 = vmatmul.bf16.gmra.mxu1 %v14278_v54 }
 0x909   : > { %6957 = vmatmul.bf16.gmra.mxu3 %v8907_v61  ;;  %v16763_v61 = vld [vmem:[#allocation47_spill] sm:$0xff] }
 0x90a   : > { %v6668_v15 = vpop.f32.mrf.mxu0  ;;  %v6757_v14 = vpop.f32.mrf.mxu1  ;;  %v5568_v51 = vadd.f32 %v16763_v61, %v16748_v44  ;;  %v14350_v44 = vld [vmem:[%s15740_s8 + $0x60] sm:$0xff]  ;;  %v16776_v61 = vld [vmem:[#allocation124_spill] sm:$0xff] }
 0x90b   : > { %v14296_v49 = vadd.f32 %v6668_v15, %v5152_v8  ;;  %v14298_v32 = vadd.f32 %v6757_v14, %v5365_v31  ;;  %v16775_v31 = vld [vmem:[#allocation123_spill] sm:$0xff] }
 0x90c   : > { %v5160_v15 = vadd.f32 %v16775_v31, %v16774_v52  ;;  %v16781_v31 = vld [vmem:[#allocation135_spill] sm:$0xff] }
 0x90d   : > { %6873 = vmatmul.bf16.gmra.mxu2 %v8908_v56 }
 0x910   : > { %v6834_v47 = vpop.f32.mrf.mxu2 }
 0x911   : > { %v14292_v58 = vadd.f32 %v6834_v47, %v5566_v21  ;;  %v16773_v47 = vld [vmem:[#allocation42_spill] sm:$0xff] }
 0x912   : > { %v6671_v43 = vpop.f32.mrf.mxu0  ;;  %v6760_v50 = vpop.f32.mrf.mxu1  ;;  %v5573_v33 = vadd.f32 %v16773_v47, %v14227_v39 }
 0x913   : > { %v14315_v37 = vadd.f32 %v6671_v43, %v5155_v36  ;;  %v14317_v5 = vadd.f32 %v6760_v50, %v5368_v22  ;;  %v5784_v36 = vadd.f32 %v16777_v30, %v16751_v40  ;;  %v16786_v30 = vld [vmem:[#allocation141_spill] sm:$0xff] }
 0x915   : > { %6710 = vmatmul.bf16.gmra.mxu0 %v14309_v27  ;;  %6799 = vmatmul.bf16.gmra.mxu1 %v14309_v27 }
 0x918   : > { %v6836_v35 = vpop.f32.mrf.mxu2 }
 0x919   : > { %6962 = vmatmul.bf16.gmra.mxu3 %v8908_v56  ;;  %v14304_v48 = vadd.f32 %v6836_v35, %v5568_v51  ;;  %v5373_v51 = vadd.f32 %v16776_v61, %v16774_v52  ;;  %v16784_v61 = vld [vmem:[#allocation139_spill] sm:$0xff] }
 0x91a   : > { %v6673_v9 = vpop.f32.mrf.mxu0  ;;  %v6762_v28 = vpop.f32.mrf.mxu1 }
 0x91b   : > { %v14334_v6 = vadd.f32 %v6673_v9, %v5157_v17  ;;  %v14336_v59 = vadd.f32 %v6762_v28, %v5370_v12  ;;  %v16780_v12 = vld [vmem:[#allocation133_spill] sm:$0xff]  ;;  %v7008_v28 = vmax.f32 %v14248_v63, 0.0 }
 0x91c   : > { %v6923_v62 = vpop.f32.mrf.mxu3  ;;  %v5578_v9 = vadd.f32 %v16780_v12, %v16760_v2 }
 0x91d   : > { %v14319_v56 = vadd.f32 %v6923_v62, %v5779_v10  ;;  %6878 = vmatmul.bf16.gmra.mxu2 %v14257_v41  ;;  %v16778_v10 = vld [vmem:[#allocation126_spill] sm:$0xff] }
 0x91e   : > { %v5576_v50 = vadd.f32 %v16778_v10, %v16756_v11 }
 0x920   : > { %v6839_v34 = vpop.f32.mrf.mxu2 }
 0x921   : > { %v14328_v57 = vadd.f32 %v6839_v34, %v5571_v13  ;;  %v16779_v13 = vld [vmem:[#allocation129_spill] sm:$0xff] }
 0x922   : > { %v6676_v35 = vpop.f32.mrf.mxu0  ;;  %v6765_v22 = vpop.f32.mrf.mxu1  ;;  %v5786_v34 = vadd.f32 %v16779_v13, %v14227_v39  ;;  %v7007_v39 = vmax.f32 %v14246_v42, 0.0 }
 0x923   : > { %v14356_v23 = vadd.f32 %v6676_v35, %v5160_v15  ;;  %v14358_v45 = vadd.f32 %v6765_v22, %v5373_v51  ;;  %v5581_v51 = vadd.f32 %v16784_v61, %v16764_v53 }
 0x924   : > { %v6925_v55 = vpop.f32.mrf.mxu3 }
 0x925   : > { %v14338_v21 = vadd.f32 %v6925_v55, %v5781_v1  ;;  %6715 = vmatmul.bf16.gmra.mxu0 %v14350_v44  ;;  %6804 = vmatmul.bf16.gmra.mxu1 %v14350_v44  ;;  %v14385_v1 = vld [vmem:[%s15740_s8 + $0x68] sm:$0xff] }
 0x928   : > { %v6841_v8 = vpop.f32.mrf.mxu2 }
 0x929   : > { %6967 = vmatmul.bf16.gmra.mxu3 %v14257_v41  ;;  %v14345_v14 = vadd.f32 %v6841_v8, %v5573_v33  ;;  %v7003_v33 = vmax.f32 %v14238_v24, 0.0  ;;  %v7004_v8 = vmax.f32 %v14240_v20, 0.0 }
 0x92a   : > { %v14369_v40 = vpop.f32.mrf.mxu0  ;;  %v14373_v19 = vpop.f32.mrf.mxu1 }
 0x92b   : > { %v14401_v42 = vpack.c.bf16 %v7007_v39, %v7003_v33  ;;  %v14403_v63 = vpack.c.bf16 %v7008_v28, %v7004_v8  ;;  %v16789_v39 = vld [vmem:[#allocation147_spill] sm:$0xff]  ;;  %v16793_v33 = vld [vmem:[#allocation150_spill] sm:$0xff] }
 0x92c   : > { %v6928_v43 = vpop.f32.mrf.mxu3  ;;  %v5586_v8 = vadd.f32 %v16793_v33, %v16774_v52  ;;  %v7024_v33 = vmax.f32 %v14298_v32, 0.0 }
 0x92d   : > { %v14360_v41 = vadd.f32 %v6928_v43, %v5784_v36  ;;  %6883 = vmatmul.bf16.gmra.mxu2 %v14278_v54  ;;  %16782 = vst [vmem:[#allocation82_spill] sm:$0xff] %v14401_v42  ;;  %v5791_v36 = vadd.f32 %v16786_v30, %v16760_v2  ;;  %v7015_v2 = vmax.f32 %v14269_v4, 0.0  ;;  %v7006_v30 = vmax.f32 %v14319_v56, 0.0  ;;  %v16802_v56 = vld [vmem:[#allocation131_spill] sm:$0xff]  ;;  %v16815_v42 = vld [vmem:[#allocation128_spill] sm:$0xff] }
 0x92e   : > { %16783 = vst [vmem:[#allocation91_spill] sm:$0xff] %v14403_v63 }
 0x930   : > { %v6844_v62 = vpop.f32.mrf.mxu2 }
 0x931   : > { %v14367_v26 = vadd.f32 %v6844_v62, %v5576_v50  ;;  %v16787_v50 = vld [vmem:[#allocation145_spill] sm:$0xff] }
 0x932   : > { %v14389_v55 = vpop.f32.mrf.mxu0  ;;  %v14391_v47 = vpop.f32.mrf.mxu1  ;;  %v5583_v62 = vadd.f32 %v16787_v50, %v16769_v29  ;;  %v7011_v29 = vmax.f32 %v14259_v46, 0.0 }
 0x934   : > { %v6930_v17 = vpop.f32.mrf.mxu3  ;;  %v14441_v4 = vpack.c.bf16 %v7015_v2, %v7011_v29  ;;  %v16800_v2 = vld [vmem:[#allocation140_spill] sm:$0xff]  ;;  %v16803_v29 = vld [vmem:[#allocation26_spill] sm:$0xff] }
 0x935   : > { %v14375_v7 = vadd.f32 %v6930_v17, %v5786_v34  ;;  %6720 = vmatmul.bf16.gmra.mxu0 %v14385_v1  ;;  %6809 = vmatmul.bf16.gmra.mxu1 %v14385_v1  ;;  %v14425_v34 = vld [vmem:[%s15740_s8 + $0x70] sm:$0xff]  ;;  %v7016_v17 = vmax.f32 %v14271_v38, 0.0 }
 0x936   : > { %16791 = vst [vmem:[#allocation95_spill] sm:$0xff] %v14441_v4 }
 0x938   : > { %v6846_v0 = vpop.f32.mrf.mxu2 }
 0x939   : > { %6972 = vmatmul.bf16.gmra.mxu3 %v14278_v54  ;;  %v14380_v11 = vadd.f32 %v6846_v0, %v5578_v9  ;;  %v7012_v0 = vmax.f32 %v14261_v3, 0.0  ;;  %v7009_v3 = vmax.f32 %v14304_v48, 0.0  ;;  %v16801_v48 = vld [vmem:[#allocation130_spill] sm:$0xff] }
 0x93a   : > { %v14409_v20 = vpop.f32.mrf.mxu0  ;;  %v14413_v22 = vpop.f32.mrf.mxu1 }
 0x93b   : > { %v14443_v38 = vpack.c.bf16 %v7016_v17, %v7012_v0  ;;  %v5162_v17 = vadd.f32 %v16801_v48, %v16800_v2  ;;  %v16804_v0 = vld [vmem:[#allocation136_spill] sm:$0xff] }
 0x93c   : > { %v6933_v54 = vpop.f32.mrf.mxu3  ;;  %v16810_v48 = vld [vmem:[#allocation148_spill] sm:$0xff] }
 0x93d   : > { %v14396_v15 = vadd.f32 %v6933_v54, %v16781_v31  ;;  %6888 = vmatmul.bf16.gmra.mxu2 %v14309_v27  ;;  %16792 = vst [vmem:[#allocation116_spill] sm:$0xff] %v14443_v38  ;;  %v7010_v31 = vmax.f32 %v14338_v21, 0.0  ;;  %v5375_v21 = vadd.f32 %v16802_v56, %v16800_v2 }
 0x93f   : > { %v14458_v52 = vpack.c.bf16 %v7010_v31, %v7006_v30  ;;  %v16807_v31 = vld [vmem:[#allocation142_spill] sm:$0xff]  ;;  %v16808_v30 = vld [vmem:[#allocation143_spill] sm:$0xff] }
 0x940   : > { %v6849_v24 = vpop.f32.mrf.mxu2 }
 0x941   : > { %v14407_v35 = vadd.f32 %v6849_v24, %v5581_v51  ;;  %v7005_v24 = vmax.f32 %v14292_v58, 0.0  ;;  %16798 = vst [vmem:[#allocation92_spill] sm:$0xff] %v14458_v52  ;;  %v14468_v58 = vld [vmem:[%s15740_s8 + $0x78] sm:$0xff] }
 0x942   : > { %v14429_v12 = vpop.f32.mrf.mxu0  ;;  %v14431_v9 = vpop.f32.mrf.mxu1 }
 0x943   : > { %16785 = vst [vmem:[#allocation48_spill] sm:$0xff] %v14407_v35  ;;  %v16821_v35 = vld [vmem:[#allocation162_spill] sm:$0xff] }
 0x944   : > { %v6935_v43 = vpop.f32.mrf.mxu3 }
 0x945   : > { %v14415_v10 = vadd.f32 %v6935_v43, %v5791_v36  ;;  %6725 = vmatmul.bf16.gmra.mxu0 %v14425_v34  ;;  %6814 = vmatmul.bf16.gmra.mxu1 %v14425_v34  ;;  %v16795_v43 = vld [vmem:[#allocation152_spill] sm:$0xff] }
 0x948   : > { %v6851_v13 = vpop.f32.mrf.mxu2 }
 0x949   : > { %6977 = vmatmul.bf16.gmra.mxu3 %v14309_v27  ;;  %v14420_v53 = vadd.f32 %v6851_v13, %v5583_v62  ;;  %v14456_v62 = vpack.c.bf16 %v7009_v3, %v7005_v24 }
 0x94a   : > { %v6688_v61 = vpop.f32.mrf.mxu0  ;;  %v6777_v51 = vpop.f32.mrf.mxu1 }
 0x94b   : > { %16788 = vst [vmem:[#allocation84_spill] sm:$0xff] %v14420_v53  ;;  %v7017_v53 = vmax.f32 %v14345_v14, 0.0  ;;  %v6768_v14 = vadd.f32 %v14373_v19, %v5375_v21 }
 0x94c   : > { %v6938_v27 = vpop.f32.mrf.mxu3  ;;  %16797 = vst [vmem:[#allocation98_spill] sm:$0xff] %v14456_v62  ;;  %v16813_v62 = vld [vmem:[#allocation153_spill] sm:$0xff] }
 0x94d   : > { %v14436_v28 = vadd.f32 %v6938_v27, %v16789_v39  ;;  %6893 = vmatmul.bf16.gmra.mxu2 %v14350_v44  ;;  %v5165_v27 = vadd.f32 %v16804_v0, %v16803_v29  ;;  %v7023_v39 = vmax.f32 %v14296_v49, 0.0  ;;  %v16811_v0 = vld [vmem:[#allocation149_spill] sm:$0xff] }
 0x94e   : > { %v16812_v49 = vld [vmem:[#allocation25_spill] sm:$0xff] }
 0x94f   : > { %16790 = vst [vmem:[#allocation21_spill] sm:$0xff] %v14436_v28  ;;  %v5172_v32 = vadd.f32 %v16813_v62, %v16812_v49  ;;  %v16817_v28 = vld [vmem:[#allocation157_spill] sm:$0xff]  ;;  %v16819_v62 = vld [vmem:[#allocation159_spill] sm:$0xff] }
 0x950   : > { %v6854_v46 = vpop.f32.mrf.mxu2 }
 0x951   : > { %v14447_v54 = vadd.f32 %v6854_v46, %v5586_v8  ;;  %v16805_v46 = vld [vmem:[#allocation137_spill] sm:$0xff] }
 0x952   : > { %v6691_v8 = vpop.f32.mrf.mxu0  ;;  %v5378_v3 = vadd.f32 %v16805_v46, %v16803_v29  ;;  %v6780_v60 = vpop.f32.mrf.mxu1  ;;  %v7020_v46 = vmax.f32 %v14284_v18, 0.0 }
 0x953   : > { %16794 = vst [vmem:[#allocation60_spill] sm:$0xff] %v14447_v54  ;;  %v7019_v54 = vmax.f32 %v14282_v16, 0.0  ;;  %v16820_v16 = vld [vmem:[#allocation59_spill] sm:$0xff] }
 0x954   : > { %v6940_v36 = vpop.f32.mrf.mxu3  ;;  %v5177_v18 = vadd.f32 %v16821_v35, %v16820_v16 }
 0x955   : > { %v14454_v50 = vadd.f32 %v6940_v36, %v16795_v43  ;;  %v16809_v43 = vld [vmem:[#allocation35_spill] sm:$0xff]  ;;  %6730 = vmatmul.bf16.gmra.mxu0 %v14468_v58  ;;  %6819 = vmatmul.bf16.gmra.mxu1 %v14468_v58  ;;  %v14504_v38 = vpack.c.bf16 %v7023_v39, %v7019_v54  ;;  %v7014_v54 = vmax.f32 %v14360_v41, 0.0 }
 0x956   : > { %v5170_v56 = vadd.f32 %v16810_v48, %v16809_v43  ;;  %v5383_v52 = vadd.f32 %v16811_v0, %v16809_v43  ;;  %v5388_v0 = vadd.f32 %v16819_v62, %v16815_v42  ;;  %v6682_v62 = vadd.f32 %v14389_v55, %v5165_v27 }
 0x957   : > { %16796 = vst [vmem:[#allocation76_spill] sm:$0xff] %v14454_v50 }
 0x958   : > { %v14460_v13 = vpop.f32.mrf.mxu2  ;;  %v6687_v39 = vadd.f32 %v14429_v12, %v5170_v56  ;;  %v6781_v55 = vadd.f32 %v6780_v60, %v5388_v0  ;;  %v7043_v41 = vmax.f32 %v6682_v62, 0.0  ;;  %v16824_v0 = vld [vmem:[#allocation166_spill] sm:$0xff]  ;;  %v7031_v62 = vmax.f32 %v14334_v6, 0.0 }
 0x959   : > { %16799 = vst [vmem:[#allocation114_spill] sm:$0xff] %v14460_v13  ;;  %6982 = vmatmul.bf16.gmra.mxu3 %v14350_v44  ;;  %v16806_v44 = vld [vmem:[#allocation151_spill] sm:$0xff]  ;;  %v7036_v6 = vmax.f32 %v14358_v45, 0.0  ;;  %v7021_v45 = vmax.f32 %v14367_v26, 0.0 }
 0x95a   : > { %v5167_v24 = vadd.f32 %v16807_v31, %v16806_v44  ;;  %v5380_v36 = vadd.f32 %v16808_v30, %v16806_v44  ;;  %v16814_v31 = vld [vmem:[#allocation154_spill] sm:$0xff] }
 0x95b   : > { %v5385_v63 = vadd.f32 %v16814_v31, %v16812_v49  ;;  %v16816_v30 = vld [vmem:[#allocation158_spill] sm:$0xff]  ;;  %v14506_v31 = vpack.c.bf16 %v7024_v33, %v7020_v46  ;;  %v6776_v33 = vadd.f32 %v14431_v9, %v5383_v52  ;;  %v7051_v52 = vmax.f32 %v6687_v39, 0.0 }
 0x95c   : > { %v6943_v25 = vpop.f32.mrf.mxu3  ;;  %v5175_v13 = vadd.f32 %v16816_v30, %v16815_v42  ;;  %v16822_v30 = vld [vmem:[#allocation163_spill] sm:$0xff]  ;;  %v6684_v4 = vadd.f32 %v14409_v20, %v5167_v24  ;;  %v6773_v35 = vadd.f32 %v14413_v22, %v5380_v36  ;;  %v6771_v20 = vadd.f32 %v14391_v47, %v5378_v3  ;;  %v6782_v24 = vpop.f32.mrf.mxu1 }
 0x95d   : > { %v14495_v48 = vadd.f32 %v6943_v25, %v16817_v28  ;;  %6898 = vmatmul.bf16.gmra.mxu2 %v14385_v1  ;;  %v5390_v25 = vadd.f32 %v16822_v30, %v16820_v16  ;;  %v7013_v28 = vmax.f32 %v14328_v57, 0.0  ;;  %v6778_v50 = vadd.f32 %v6777_v51, %v5385_v63 }
 0x95e   : > { %v6692_v46 = vadd.f32 %v6691_v8, %v5175_v13  ;;  %v7018_v57 = vmax.f32 %v14375_v7, 0.0  ;;  %v6679_v63 = vadd.f32 %v14369_v40, %v5162_v17  ;;  %v7047_v36 = vmax.f32 %v6684_v4, 0.0 }
 0x95f   : > { %16818 = vst [vmem:[#allocation105_spill] sm:$0xff] %v14495_v48  ;;  %v6689_v48 = vadd.f32 %v6688_v61, %v5172_v32  ;;  %v6693_v61 = vpop.f32.mrf.mxu0  ;;  %v7056_v51 = vmax.f32 %v6778_v50, 0.0  ;;  %v7048_v12 = vmax.f32 %v6773_v35, 0.0  ;;  %v6783_v9 = vadd.f32 %v6782_v24, %v5390_v25 }
 0x960   : > { %v14515_v42 = vpop.f32.mrf.mxu2  ;;  %v6694_v27 = vadd.f32 %v6693_v61, %v5177_v18  ;;  %v7052_v7 = vmax.f32 %v6776_v33, 0.0  ;;  %v7059_v13 = vmax.f32 %v6692_v46, 0.0  ;;  %v7060_v17 = vmax.f32 %v6781_v55, 0.0 }
 0x961   : > { %v7055_v22 = vmax.f32 %v6689_v48, 0.0  ;;  %v7064_v19 = vmax.f32 %v6783_v9, 0.0  ;;  %v14526_v60 = vpack.c.bf16 %v7017_v53, %v7013_v28  ;;  %v14528_v21 = vpack.c.bf16 %v7018_v57, %v7014_v54  ;;  %v16823_v48 = vld [vmem:[#allocation277_spill] sm:$0xff]  ;;  %v16825_v53 = vld [vmem:[#allocation167_spill] sm:$0xff] }
 0x962   : > { %v7063_v40 = vmax.f32 %v6694_v27, 0.0  ;;  %v7044_v47 = vmax.f32 %v6771_v20, 0.0  ;;  %v7156_v3 = vpack.c.bf16 %v7056_v51, %v7052_v7  ;;  %v5180_v18 = vadd.f32 %v16824_v0, %v16823_v48  ;;  %v16827_v7 = vld [vmem:[#allocation174_spill] sm:$0xff] }
 0x963   : > { %v7155_v8 = vpack.c.bf16 %v7055_v22, %v7051_v52  ;;  %v7160_v4 = vpack.c.bf16 %v7064_v19, %v7060_v17  ;;  %v7151_v30 = vpack.c.bf16 %v7047_v36, %v7043_v41  ;;  %v5393_v28 = vadd.f32 %v16825_v53, %v16823_v48 }
 0x964   : > { %v14524_v56 = vpop.f32.mrf.mxu3  ;;  %v7159_v50 = vpack.c.bf16 %v7063_v40, %v7059_v13  ;;  %v7152_v25 = vpack.c.bf16 %v7048_v12, %v7044_v47  ;;  %v7032_v35 = vmax.f32 %v14336_v59, 0.0  ;;  %v7039_v39 = vmax.f32 %v6679_v63, 0.0  ;;  %v6785_v57 = vpop.f32.mrf.mxu1  ;;  %v16828_v13 = vld [vmem:[#allocation175_spill] sm:$0xff] }
 0x965   : > { %7389 = vmatpush.bf16.msrb.mxu2 %v7160_v4  ;;  %v7040_v33 = vmax.f32 %v6768_v14, 0.0  ;;  %v7027_v55 = vmax.f32 %v14315_v37, 0.0  ;;  %v14543_v20 = vadd.f32 %v6785_v57, %v5393_v28  ;;  %v7035_v22 = vmax.f32 %v14356_v23, 0.0  ;;  %v16834_v28 = vld [vmem:[#allocation168_spill] sm:$0xff] }
 0x966   : > { %7291 = vmatpush.bf16.msrb.mxu0 %v7159_v50  ;;  %v7025_v37 = vmax.f32 %v14380_v11, 0.0  ;;  %v7022_v41 = vmax.f32 %v14396_v15, 0.0  ;;  %v16826_v11 = vld [vmem:[#allocation304_spill] sm:$0xff] }
 0x967   : > { %v6696_v54 = vpop.f32.mrf.mxu0  ;;  %v7143_v59 = vpack.c.bf16 %v7031_v62, %v7027_v55  ;;  %v7147_v14 = vpack.c.bf16 %v7039_v39, %v7035_v22  ;;  %v7148_v51 = vpack.c.bf16 %v7040_v33, %v7036_v6  ;;  %v5398_v40 = vadd.f32 %v16828_v13, %v16826_v11  ;;  %v16829_v50 = vld [vmem:[#allocation164_spill] sm:$0xff]  ;;  %v16835_v39 = vld [vmem:[#allocation155_spill] sm:$0xff]  ;;  %v16837_v55 = vld [vmem:[#allocation173_spill] sm:$0xff] }
 0x968   : > { %v14530_v32 = vpop.f32.mrf.mxu2  ;;  %v14539_v46 = vadd.f32 %v6696_v54, %v5180_v18  ;;  %v14556_v12 = vpack.c.bf16 %v7025_v37, %v7021_v45  ;;  %v16832_v18 = vld [vmem:[#allocation160_spill] sm:$0xff]  ;;  %v5596_v62 = vadd.f32 %v16834_v28, %v16809_v43  ;;  %v5588_v33 = vadd.f32 %v16835_v39, %v16800_v2  ;;  %v16841_v37 = vld [vmem:[#allocation95_spill] sm:$0xff]  ;;  %v16850_v28 = vld [vmem:[#allocation82_spill] sm:$0xff] }
 0x969   : > { %6987 = vmatmul.bf16.gmra.mxu3 %v14385_v1  ;;  %v7028_v1 = vmax.f32 %v14317_v5, 0.0  ;;  %7390 = vmatpush.bf16.msrb.mxu2 %v7156_v3  ;;  %v7026_v5 = vmax.f32 %v14415_v10, 0.0  ;;  %v5185_v10 = vadd.f32 %v16827_v7, %v16826_v11  ;;  %v16830_v3 = vld [vmem:[#allocation169_spill] sm:$0xff]  ;;  %v16843_v45 = vld [vmem:[#allocation84_spill] sm:$0xff] }
 0x96a   : > { %7292 = vmatpush.bf16.msrb.mxu0 %v7155_v8  ;;  %v5593_v8 = vadd.f32 %v16829_v50, %v16806_v44  ;;  %v5806_v4 = vadd.f32 %v16830_v3, %v16806_v44  ;;  %v16846_v7 = vld [vmem:[#allocation48_spill] sm:$0xff]  ;;  %v16847_v50 = vld [vmem:[#allocation21_spill] sm:$0xff]  ;;  %v16848_v3 = vld [vmem:[#allocation114_spill] sm:$0xff] }
 0x96b   : > { %v7144_v63 = vpack.c.bf16 %v7032_v35, %v7028_v1  ;;  %v14558_v9 = vpack.c.bf16 %v7026_v5, %v7022_v41  ;;  %v5809_v1 = vadd.f32 %v16837_v55, %v16809_v43  ;;  %v8917_v43 = vld [vmem:[%s15741_s9 + $0x4] sm:$0xf0]  ;;  %v16844_v41 = vld [vmem:[#allocation76_spill] sm:$0xff] }
 0x96c   : > { %v6948_v61 = vpop.f32.mrf.mxu3  ;;  %v14552_v23 = vpop.f32.mrf.mxu1  ;;  %v6862_v44 = vadd.f32 %v14530_v32, %v5593_v8  ;;  %v7030_v8 = vmax.f32 %v16847_v50, 0.0  ;;  %v16858_v50 = vld [vmem:[#allocation181_spill] sm:$0xff] }
 0x96d   : > { %6903 = vmatmul.bf16.gmra.mxu2 %v14425_v34 }
 0x96e   : > { %7293 = vmatpush.bf16.msrb.mxu0 %v7151_v30  ;;  %7391 = vmatpush.bf16.msrb.mxu2 %v7152_v25  ;;  %v5591_v30 = vadd.f32 %v16832_v18, %v16803_v29  ;;  %v16833_v25 = vld [vmem:[#allocation165_spill] sm:$0xff]  ;;  %v7049_v13 = vmax.f32 %v6862_v44, 0.0 }
 0x96f   : > { %v14550_v24 = vpop.f32.mrf.mxu0  ;;  %v5804_v53 = vadd.f32 %v16833_v25, %v16803_v29 }
 0x970   : > { %v6864_v27 = vpop.f32.mrf.mxu2  ;;  %v6860_v29 = vadd.f32 %v14515_v42, %v5591_v30  ;;  %v16842_v42 = vld [vmem:[#allocation180_spill] sm:$0xff] }
 0x971   : > { %v5603_v5 = vadd.f32 %v16842_v42, %v16820_v16 }
 0x972   : > { %7294 = vmatpush.bf16.msrb.mxu0 %v7147_v14  ;;  %7392 = vmatpush.bf16.msrb.mxu2 %v7148_v51  ;;  %v6949_v14 = vadd.f32 %v6948_v61, %v5804_v53  ;;  %v6865_v51 = vadd.f32 %v6864_v27, %v5596_v62  ;;  %v16845_v61 = vld [vmem:[#allocation116_spill] sm:$0xff] }
 0x974   : > { %v6950_v36 = vpop.f32.mrf.mxu3  ;;  %v6790_v17 = vpop.f32.mrf.mxu1  ;;  %v7046_v30 = vmax.f32 %v6949_v14, 0.0  ;;  %v7053_v25 = vmax.f32 %v6865_v51, 0.0 }
 0x975   : > { %v14567_v47 = vadd.f32 %v6790_v17, %v5398_v40  ;;  %v6951_v35 = vadd.f32 %v6950_v36, %v5806_v4  ;;  %v7034_v36 = vmax.f32 %v16844_v41, 0.0  ;;  %v6857_v4 = vadd.f32 %v16848_v3, %v5588_v33 }
 0x976   : > { %7295 = vmatpush.bf16.msrb.mxu0 %v7143_v59  ;;  %7393 = vmatpush.bf16.msrb.mxu2 %v7144_v63  ;;  %v16839_v59 = vld [vmem:[#allocation128_spill] sm:$0xff] }
 0x977   : > { %v6701_v26 = vpop.f32.mrf.mxu0  ;;  %v16840_v63 = vld [vmem:[#allocation176_spill] sm:$0xff]  ;;  %v7050_v40 = vmax.f32 %v6951_v35, 0.0  ;;  %v16851_v35 = vld [vmem:[#allocation91_spill] sm:$0xff]  ;;  %v14622_v39 = vpack.c.bf16 %v7034_v36, %v7030_v8  ;;  %v7041_v14 = vmax.f32 %v6857_v4, 0.0  ;;  %v5814_v8 = vadd.f32 %v16858_v50, %v16839_v59 }
 0x978   : > { %v6866_v52 = vpop.f32.mrf.mxu2  ;;  %v14565_v15 = vadd.f32 %v6701_v26, %v5185_v10  ;;  %v5601_v32 = vadd.f32 %v16840_v63, %v16839_v59  ;;  %v7029_v10 = vmax.f32 %v16846_v7, 0.0  ;;  %v16854_v63 = vld [vmem:[#allocation183_spill] sm:$0xff]  ;;  %v16855_v36 = vld [vmem:[#allocation60_spill] sm:$0xff] }
 0x979   : > { %6992 = vmatmul.bf16.gmra.mxu3 %v14425_v34  ;;  %v16831_v34 = vld [vmem:[#allocation172_spill] sm:$0xff]  ;;  %v8762_v4 = vld [vmem:[%s15741_s9 + $0x10] sm:$0xf] }
 0x97a   : > { %v5598_v0 = vadd.f32 %v16831_v34, %v16812_v49  ;;  %7296 = vmatpush.bf16.msrb.mxu0 %v14504_v38  ;;  %7394 = vmatpush.bf16.msrb.mxu2 %v14506_v31  ;;  %v16836_v38 = vld [vmem:[#allocation161_spill] sm:$0xff]  ;;  %v7045_v34 = vmax.f32 %v6860_v29, 0.0  ;;  %v16857_v7 = vld [vmem:[#allocation184_spill] sm:$0xff] }
 0x97b   : > { %v5801_v57 = vadd.f32 %v16836_v38, %v16800_v2  ;;  %v16838_v31 = vld [vmem:[#allocation177_spill] sm:$0xff]  ;;  %v16868_v50 = vld [vmem:[#allocation272_spill] sm:$0xff] }
 0x97c   : > { %v6953_v19 = vpop.f32.mrf.mxu3  ;;  %v6867_v54 = vadd.f32 %v6866_v52, %v5598_v0  ;;  %v5811_v6 = vadd.f32 %v16838_v31, %v16812_v49  ;;  %v8754_v2 = vld [vmem:[%s15741_s9] sm:$0xf]  ;;  %v7033_v49 = vmax.f32 %v16843_v45, 0.0  ;;  %v14611_v17 = vpop.f32.mrf.mxu1  ;;  %v7153_v55 = vpack.c.bf16 %v7049_v13, %v7045_v34  ;;  %v8919_v34 = vld [vmem:[%s15741_s9 + $0x14] sm:$0xf0] }
 0x97d   : > { %6908 = vmatmul.bf16.gmra.mxu2 %v14468_v58  ;;  %v6954_v52 = vadd.f32 %v6953_v19, %v5809_v1  ;;  %v14615_v18 = vor.u32 %v8917_v43, %v8754_v2  ;;  %v6946_v19 = vadd.f32 %v14524_v56, %v5801_v57  ;;  %v14624_v1 = vpack.c.bf16 %v7050_v40, %v7046_v30  ;;  %v16852_v56 = vld [vmem:[#allocation40_spill] sm:$0xff]  ;;  %v16853_v57 = vld [vmem:[#allocation182_spill] sm:$0xff] }
 0x97e   : > { %7297 = vmatpush.bf16.msrb.mxu0 %v16841_v37  ;;  %7395 = vmatpush.bf16.msrb.mxu2 %v16845_v61  ;;  %v7057_v26 = vmax.f32 %v6867_v54, 0.0  ;;  %v14620_v54 = vpack.c.bf16 %v7033_v49, %v7029_v10  ;;  %v5190_v31 = vadd.f32 %v16853_v57, %v16852_v56  ;;  %v16856_v61 = vld [vmem:[#allocation105_spill] sm:$0xff]  ;;  %v5606_v10 = vadd.f32 %v16857_v7, %v16823_v48 }
 0x97f   : > { %v14608_v27 = vpop.f32.mrf.mxu0  ;;  %16849 = vst [vmem:[#allocation86_spill] sm:$0xff] %v14615_v18  ;;  %v7054_v62 = vmax.f32 %v6954_v52, 0.0  ;;  %v7042_v37 = vmax.f32 %v6946_v19, 0.0  ;;  %v7037_v52 = vmax.f32 %v16855_v36, 0.0  ;;  %v16859_v19 = vld [vmem:[#allocation185_spill] sm:$0xff] }
 0x980   : > { %v6869_v22 = vpop.f32.mrf.mxu2  ;;  %v7157_v38 = vpack.c.bf16 %v7057_v26, %v7053_v25  ;;  %v5816_v30 = vadd.f32 %v16859_v19, %v16820_v16  ;;  %v16862_v16 = vld [vmem:[#allocation253_spill] sm:$0xff]  ;;  %v16870_v19 = vld [vmem:[#allocation15_spill] sm:$0xff] }
 0x981   : > { %v6870_v44 = vadd.f32 %v6869_v22, %v5601_v32  ;;  %v5403_v32 = vadd.f32 %v16854_v63, %v16852_v56  ;;  %v7149_v13 = vpack.c.bf16 %v7041_v14, %v7037_v52  ;;  %v16864_v14 = vld [vmem:[#allocation191_spill] sm:$0xff]  ;;  %v8770_v7 = vld [vmem:[%s15741_s9 + $0x20] sm:$0xf] }
 0x982   : > { %7298 = vmatpush.bf16.msrb.mxu0 %v16850_v28  ;;  %7396 = vmatpush.bf16.msrb.mxu2 %v16851_v35  ;;  %v14657_v28 = vor.u32 %v8919_v34, %v8762_v4  ;;  %v16861_v35 = vld [vmem:[#allocation188_spill] sm:$0xff] }
 0x983   : > { %v7061_v2 = vmax.f32 %v6870_v44, 0.0  ;;  %v14659_v44 = vpop.permute.xlu1 %4539 }
 0x984   : > { %v6955_v0 = vpop.f32.mrf.mxu3  ;;  %v6795_v45 = vpop.f32.mrf.mxu1  ;;  %16860 = vst [vmem:[#allocation101_spill] sm:$0xff] %v14657_v28 }
 0x985   : > { %v6956_v53 = vadd.f32 %v6955_v0, %v5811_v6  ;;  %7299 = vmatmul.bf16.vlgmr.msrb.gmra.mxu0 %v14615_v18  ;;  %v14634_v41 = vadd.f32 %v6795_v45, %v5403_v32 }
 0x987   : > { %v7058_v33 = vmax.f32 %v6956_v53, 0.0  ;;  %v6706_v51 = vpop.f32.mrf.mxu0 }
 0x988   : > { %v6871_v29 = vpop.f32.mrf.mxu2  ;;  %v14632_v42 = vadd.f32 %v6706_v51, %v5190_v31  ;;  %v5408_v51 = vadd.f32 %v16864_v14, %v16862_v16 }
 0x989   : > { %6997 = vmatmul.bf16.gmra.mxu3 %v14468_v58  ;;  %v6872_v22 = vadd.f32 %v6871_v29, %v5603_v5  ;;  %v7158_v6 = vpack.c.bf16 %v7058_v33, %v7054_v62  ;;  %v7038_v58 = vmax.f32 %v16856_v61, 0.0  ;;  %v5608_v33 = vadd.f32 %v16861_v35, %v14659_v44  ;;  %v16866_v61 = vld [vmem:[#allocation192_spill] sm:$0xff]  ;;  %v16873_v35 = vld [vmem:[#allocation197_spill] sm:$0xff] }
 0x98b   : > { %v7065_v43 = vmax.f32 %v6872_v22, 0.0  ;;  %v7150_v40 = vpack.c.bf16 %v7042_v37, %v7038_v58  ;;  %v16863_v22 = vld [vmem:[#allocation190_spill] sm:$0xff]  ;;  %v5611_v58 = vadd.f32 %v16866_v61, %v16826_v11 }
 0x98c   : > { %v6958_v49 = vpop.f32.mrf.mxu3  ;;  %v14655_v53 = vpop.f32.mrf.mxu1 }
 0x98d   : > { %v7161_v5 = vpack.c.bf16 %v7065_v43, %v7061_v2  ;;  %7397 = vmatmul.bf16.vlgmr.msrb.gmra.mxu2 %v14615_v18  ;;  %v6959_v25 = vadd.f32 %v6958_v49, %v5814_v8  ;;  %v16865_v2 = vld [vmem:[#allocation189_spill] sm:$0xff]  ;;  %v16869_v8 = vld [vmem:[#allocation196_spill] sm:$0xff] }
 0x98e   : > { %v5819_v43 = vadd.f32 %v16865_v2, %v16823_v48  ;;  %v5613_v4 = vadd.f32 %v16869_v8, %v16868_v50  ;;  %v16880_v8 = vld [vmem:[#allocation204_spill] sm:$0xff] }
 0x98f   : > { %7487 = vmatpush.bf16.msra.mxu0 %v7161_v5  ;;  %v14651_v0 = vpop.f32.mrf.mxu0  ;;  %v7062_v29 = vmax.f32 %v6959_v25, 0.0 }
 0x990   : > { %v6874_v26 = vpop.f32.mrf.mxu2 }
 0x991   : > { %v14643_v3 = vadd.f32 %v6874_v26, %v5606_v10  ;;  %v8921_v10 = vld [vmem:[%s15741_s9 + $0x24] sm:$0xf0] }
 0x992   : > { %v14698_v26 = vor.u32 %v8921_v10, %v8770_v7  ;;  %v16879_v10 = vld [vmem:[#allocation298_spill] sm:$0xff] }
 0x993   : > { %7488 = vmatpush.bf16.msra.mxu0 %v7157_v38  ;;  %v5195_v38 = vadd.f32 %v16863_v22, %v16862_v16 }
 0x994   : > { %v6960_v59 = vpop.f32.mrf.mxu3  ;;  %16867 = vst [vmem:[#allocation118_spill] sm:$0xff] %v14698_v26 }
 0x995   : > { %v6961_v62 = vadd.f32 %v6960_v59, %v5816_v30  ;;  %7304 = vmatmul.bf16.gmra.mxu0 %v14657_v28  ;;  %v16871_v30 = vld [vmem:[#allocation198_spill] sm:$0xff] }
 0x997   : > { %v7066_v57 = vmax.f32 %v6961_v62, 0.0  ;;  %7489 = vmatpush.bf16.msra.mxu0 %v7153_v55  ;;  %v6711_v37 = vpop.f32.mrf.mxu0  ;;  %v6800_v55 = vpop.f32.mrf.mxu1 }
 0x998   : > { %v6876_v31 = vpop.f32.mrf.mxu2  ;;  %v14672_v45 = vadd.f32 %v6711_v37, %v5195_v38  ;;  %v14674_v36 = vadd.f32 %v6800_v55, %v5408_v51  ;;  %v16875_v38 = vld [vmem:[#allocation200_spill] sm:$0xff]  ;;  %v16877_v55 = vld [vmem:[#allocation171_spill] sm:$0xff] }
 0x999   : > { %v7162_v63 = vpack.c.bf16 %v7066_v57, %v7062_v29  ;;  %v14666_v32 = vadd.f32 %v6876_v31, %v5608_v33  ;;  %v5824_v33 = vadd.f32 %v16873_v35, %v16826_v11  ;;  %v8923_v51 = vld [vmem:[%s15741_s9 + $0x34] sm:$0xf0] }
 0x99b   : > { %7585 = vmatpush.bf16.msra.mxu2 %v7162_v63  ;;  %7490 = vmatpush.bf16.msra.mxu0 %v7149_v13  ;;  %v5616_v63 = vadd.f32 %v16875_v38, %v16852_v56 }
 0x99c   : > { %v6963_v49 = vpop.f32.mrf.mxu3 }
 0x99d   : > { %v14676_v52 = vadd.f32 %v6963_v49, %v5819_v43  ;;  %7402 = vmatmul.bf16.gmra.mxu2 %v14657_v28  ;;  %v16876_v43 = vld [vmem:[#allocation170_spill] sm:$0xff]  ;;  %v5395_v49 = vadd.f32 %v16877_v55, %v14659_v44 }
 0x99f   : > { %7586 = vmatpush.bf16.msra.mxu2 %v7158_v6  ;;  %7491 = vmatpush.bf16.msra.mxu0 %v14620_v54  ;;  %v14690_v13 = vpop.f32.mrf.mxu0  ;;  %v14694_v6 = vpop.f32.mrf.mxu1  ;;  %v6788_v7 = vadd.f32 %v14552_v23, %v5395_v49  ;;  %v7067_v23 = vmax.f32 %v14539_v46, 0.0  ;;  %v8786_v46 = vld [vmem:[%s15741_s9 + $0x40] sm:$0xf]  ;;  %v16888_v49 = vld [vmem:[#allocation179_spill] sm:$0xff] }
 0x9a0   : > { %v6879_v5 = vpop.f32.mrf.mxu2 }
 0x9a1   : > { %v14682_v48 = vadd.f32 %v6879_v5, %v5611_v58 }
 0x9a3   : > { %7587 = vmatpush.bf16.msra.mxu2 %v14624_v1  ;;  %7492 = vmatpush.bf16.msra.mxu0 %v14556_v12  ;;  %v5200_v1 = vadd.f32 %v16871_v30, %v16870_v19  ;;  %v16872_v12 = vld [vmem:[#allocation199_spill] sm:$0xff] }
 0x9a4   : > { %v14696_v54 = vpop.f32.mrf.mxu3  ;;  %v5413_v59 = vadd.f32 %v16872_v12, %v16870_v19  ;;  %v7072_v12 = vmax.f32 %v6788_v7, 0.0 }
 0x9a5   : > { %7309 = vmatmul.bf16.gmra.mxu0 %v14698_v26 }
 0x9a7   : > { %7588 = vmatpush.bf16.msra.mxu2 %v7150_v40  ;;  %7493 = vmatpush.bf16.msra.mxu0 %v14526_v60  ;;  %v6716_v62 = vpop.f32.mrf.mxu0  ;;  %v16874_v40 = vld [vmem:[#allocation98_spill] sm:$0xff]  ;;  %v6805_v29 = vpop.f32.mrf.mxu1 }
 0x9a8   : > { %v6881_v34 = vpop.f32.mrf.mxu2  ;;  %v14714_v60 = vadd.f32 %v6716_v62, %v5200_v1  ;;  %v14716_v31 = vadd.f32 %v6805_v29, %v5413_v59  ;;  %v16882_v62 = vld [vmem:[#allocation205_spill] sm:$0xff] }
 0x9a9   : > { %v14706_v25 = vadd.f32 %v6881_v34, %v5613_v4  ;;  %v5618_v4 = vadd.f32 %v16880_v8, %v16879_v10  ;;  %v5829_v35 = vadd.f32 %v16882_v62, %v16852_v56 }
 0x9ab   : > { %7589 = vmatpush.bf16.msra.mxu2 %v14622_v39  ;;  %7494 = vmatpush.bf16.msra.mxu0 %v16874_v40  ;;  %v8778_v39 = vld [vmem:[%s15741_s9 + $0x30] sm:$0xf] }
 0x9ac   : > { %v6968_v57 = vpop.f32.mrf.mxu3  ;;  %v14743_v58 = vor.u32 %v8923_v51, %v8778_v39 }
 0x9ad   : > { %v14718_v22 = vadd.f32 %v6968_v57, %v5824_v33  ;;  %7407 = vmatmul.bf16.gmra.mxu2 %v14698_v26  ;;  %v7068_v33 = vmax.f32 %v14543_v20, 0.0  ;;  %v8925_v20 = vld [vmem:[%s15741_s9 + $0x44] sm:$0xf0] }
 0x9ae   : > { %16878 = vst [vmem:[#allocation96_spill] sm:$0xff] %v14743_v58  ;;  %v14788_v8 = vor.u32 %v8925_v20, %v8786_v46  ;;  %v7075_v46 = vmax.f32 %v14565_v15, 0.0  ;;  %v7076_v20 = vmax.f32 %v14567_v47, 0.0  ;;  %v8794_v15 = vld [vmem:[%s15741_s9 + $0x50] sm:$0xf] }
 0x9af   : > { %7590 = vmatpush.bf16.msra.mxu2 %v14558_v9  ;;  %v14732_v37 = vpop.f32.mrf.mxu0  ;;  %v14735_v2 = vpop.f32.mrf.mxu1  ;;  %v5182_v9 = vadd.f32 %v16876_v43, %v14659_v44  ;;  %v14766_v38 = vpack.c.bf16 %v7072_v12, %v7068_v33  ;;  %v8927_v47 = vld [vmem:[%s15741_s9 + $0x54] sm:$0xf0] }
 0x9b0   : > { %v6884_v11 = vpop.f32.mrf.mxu2  ;;  %16889 = vst [vmem:[#allocation99_spill] sm:$0xff] %v14788_v8 }
 0x9b1   : > { %v14724_v14 = vadd.f32 %v6884_v11, %v5616_v63  ;;  %v6699_v5 = vadd.f32 %v14550_v24, %v5182_v9  ;;  %16884 = vst [vmem:[#allocation18_spill] sm:$0xff] %v14766_v38  ;;  %v16885_v63 = vld [vmem:[#allocation208_spill] sm:$0xff]  ;;  %v16887_v9 = vld [vmem:[#allocation178_spill] sm:$0xff] }
 0x9b2   : > { %v5621_v11 = vadd.f32 %v16885_v63, %v16862_v16  ;;  %v5187_v55 = vadd.f32 %v16887_v9, %v16868_v50  ;;  %v16893_v63 = vld [vmem:[#allocation213_spill] sm:$0xff] }
 0x9b3   : > { %7591 = vmatpush.bf16.msra.mxu2 %v14528_v21  ;;  %v16881_v21 = vld [vmem:[#allocation92_spill] sm:$0xff]  ;;  %v7071_v1 = vmax.f32 %v6699_v5, 0.0  ;;  %v5400_v5 = vadd.f32 %v16888_v49, %v16868_v50 }
 0x9b4   : > { %v14741_v61 = vpop.f32.mrf.mxu3 }
 0x9b5   : > { %7314 = vmatmul.bf16.gmra.mxu0 %v14743_v58  ;;  %v14764_v57 = vpack.c.bf16 %v7071_v1, %v7067_v23  ;;  %v16891_v1 = vld [vmem:[#allocation212_spill] sm:$0xff] }
 0x9b7   : > { %7592 = vmatpush.bf16.msra.mxu2 %v16881_v21  ;;  %v14753_v59 = vpop.f32.mrf.mxu0  ;;  %v14757_v24 = vpop.f32.mrf.mxu1  ;;  %16883 = vst [vmem:[#allocation46_spill] sm:$0xff] %v14764_v57  ;;  %v6793_v21 = vadd.f32 %v14611_v17, %v5400_v5  ;;  %v16921_v57 = vld [vmem:[#allocation221_spill] sm:$0xff] }
 0x9b8   : > { %v6886_v34 = vpop.f32.mrf.mxu2 }
 0x9b9   : > { %v14751_v30 = vadd.f32 %v6886_v34, %v5618_v4  ;;  %v6704_v4 = vadd.f32 %v14608_v27, %v5187_v55  ;;  %v16890_v34 = vld [vmem:[#allocation119_spill] sm:$0xff]  ;;  %v7080_v33 = vmax.f32 %v6793_v21, 0.0  ;;  %v16894_v27 = vld [vmem:[#allocation193_spill] sm:$0xff] }
 0x9ba   : > { %v5623_v12 = vadd.f32 %v16891_v1, %v16890_v34  ;;  %v5821_v17 = vadd.f32 %v16894_v27, %v14659_v44 }
 0x9bb   : > { %v7079_v23 = vmax.f32 %v6704_v4, 0.0  ;;  %v14813_v4 = vpack.c.bf16 %v7080_v33, %v7076_v20 }
 0x9bc   : > { %v6973_v40 = vpop.f32.mrf.mxu3  ;;  %v6966_v49 = vadd.f32 %v14696_v54, %v5821_v17  ;;  %v7073_v54 = vmax.f32 %v14666_v32, 0.0  ;;  %v7069_v17 = vmax.f32 %v14643_v3, 0.0 }
 0x9bd   : > { %v14761_v29 = vadd.f32 %v6973_v40, %v5829_v35  ;;  %7412 = vmatmul.bf16.gmra.mxu2 %v14743_v58  ;;  %v14811_v5 = vpack.c.bf16 %v7079_v23, %v7075_v46  ;;  %16897 = vst [vmem:[#allocation52_spill] sm:$0xff] %v14813_v4  ;;  %v16900_v23 = vld [vmem:[#allocation186_spill] sm:$0xff]  ;;  %v7070_v46 = vmax.f32 %v14676_v52, 0.0  ;;  %v16907_v52 = vld [vmem:[#allocation195_spill] sm:$0xff]  ;;  %v16908_v58 = vld [vmem:[#allocation248_spill] sm:$0xff] }
 0x9be   : > { %v5192_v33 = vadd.f32 %v16900_v23, %v16879_v10  ;;  %v16924_v4 = vld [vmem:[#allocation218_spill] sm:$0xff] }
 0x9bf   : > { %v14778_v51 = vpop.f32.mrf.mxu0  ;;  %v14780_v43 = vpop.f32.mrf.mxu1  ;;  %16896 = vst [vmem:[#allocation122_spill] sm:$0xff] %v14811_v5 }
 0x9c0   : > { %v6889_v39 = vpop.f32.mrf.mxu2 }
 0x9c1   : > { %v14770_v56 = vadd.f32 %v6889_v39, %v5621_v11  ;;  %v5834_v11 = vadd.f32 %v16893_v63, %v16862_v16  ;;  %v16898_v16 = vld [vmem:[#allocation216_spill] sm:$0xff] }
 0x9c2   : > { %v5626_v21 = vadd.f32 %v16898_v16, %v16870_v19  ;;  %v6709_v16 = vadd.f32 %v14651_v0, %v5192_v33  ;;  %v16911_v0 = vld [vmem:[#allocation203_spill] sm:$0xff] }
 0x9c3   : > { %16886 = vst [vmem:[#allocation120_spill] sm:$0xff] %v14770_v56  ;;  %v16914_v33 = vld [vmem:[#allocation207_spill] sm:$0xff]  ;;  %v16923_v56 = vld [vmem:[#allocation125_spill] sm:$0xff] }
 0x9c4   : > { %v14786_v7 = vpop.f32.mrf.mxu3  ;;  %v7087_v28 = vmax.f32 %v6709_v16, 0.0 }
 0x9c5   : > { %7319 = vmatmul.bf16.gmra.mxu0 %v14788_v8 }
 0x9c7   : > { %v14797_v40 = vpop.f32.mrf.mxu0  ;;  %v14801_v39 = vpop.f32.mrf.mxu1 }
 0x9c8   : > { %v6891_v62 = vpop.f32.mrf.mxu2 }
 0x9c9   : > { %v14795_v35 = vadd.f32 %v6891_v62, %v5623_v12  ;;  %v7074_v12 = vmax.f32 %v6966_v49, 0.0  ;;  %v14838_v49 = vpack.c.bf16 %v7073_v54, %v7069_v17  ;;  %v16912_v54 = vld [vmem:[#allocation132_spill] sm:$0xff]  ;;  %v16915_v17 = vld [vmem:[#allocation45_spill] sm:$0xff] }
 0x9cb   : > { %16892 = vst [vmem:[#allocation72_spill] sm:$0xff] %v14795_v35  ;;  %v16925_v35 = vld [vmem:[#allocation219_spill] sm:$0xff] }
 0x9cc   : > { %v6978_v9 = vpop.f32.mrf.mxu3  ;;  %16903 = vst [vmem:[#allocation49_spill] sm:$0xff] %v14838_v49 }
 0x9cd   : > { %v14807_v55 = vadd.f32 %v6978_v9, %v5834_v11  ;;  %7417 = vmatmul.bf16.gmra.mxu2 %v14788_v8  ;;  %v16901_v11 = vld [vmem:[#allocation187_spill] sm:$0xff]  ;;  %v14834_v9 = vor.u32 %v8927_v47, %v8794_v15  ;;  %v5410_v8 = vadd.f32 %v16907_v52, %v16890_v34  ;;  %v16909_v15 = vld [vmem:[#allocation202_spill] sm:$0xff] }
 0x9ce   : > { %v5405_v27 = vadd.f32 %v16901_v11, %v16879_v10  ;;  %v16906_v11 = vld [vmem:[#allocation194_spill] sm:$0xff]  ;;  %v5202_v47 = vadd.f32 %v16909_v15, %v16908_v58  ;;  %v16918_v15 = vld [vmem:[#allocation144_spill] sm:$0xff] }
 0x9cf   : > { %16895 = vst [vmem:[#allocation109_spill] sm:$0xff] %v14807_v55  ;;  %v6728_v62 = vpop.f32.mrf.mxu0  ;;  %v6817_v63 = vpop.f32.mrf.mxu1  ;;  %v5197_v3 = vadd.f32 %v16906_v11, %v16890_v34  ;;  %v16917_v11 = vld [vmem:[#allocation211_spill] sm:$0xff]  ;;  %v16929_v34 = vld [vmem:[#allocation138_spill] sm:$0xff] }
 0x9d0   : > { %v6894_v1 = vpop.f32.mrf.mxu2  ;;  %v6798_v32 = vadd.f32 %v14655_v53, %v5405_v27  ;;  %v14855_v53 = vadd.f32 %v16911_v0, %v16908_v58  ;;  %v5418_v27 = vadd.f32 %v16914_v33, %v16912_v54  ;;  %v5420_v52 = vadd.f32 %v16917_v11, %v16915_v17  ;;  %v14867_v0 = vpop.permute.xlu1 %4674  ;;  %v16922_v55 = vld [vmem:[#allocation215_spill] sm:$0xff] }
 0x9d1   : > { %v14817_v44 = vadd.f32 %v6894_v1, %v5626_v21  ;;  %v14840_v21 = vpack.c.bf16 %v7074_v12, %v7070_v46  ;;  %v16905_v1 = vld [vmem:[#allocation201_spill] sm:$0xff]  ;;  %v16913_v12 = vld [vmem:[#allocation206_spill] sm:$0xff]  ;;  %16920 = vst [vmem:[#allocation88_spill] sm:$0xff] %v14867_v0  ;;  %v5423_v33 = vadd.f32 %v16922_v55, %v16918_v15  ;;  %v5425_v11 = vadd.f32 %v16925_v35, %v16923_v56 }
 0x9d2   : > { %v5826_v23 = vadd.f32 %v16905_v1, %v16868_v50  ;;  %v5205_v50 = vadd.f32 %v16913_v12, %v16912_v54  ;;  %v16916_v46 = vld [vmem:[#allocation210_spill] sm:$0xff]  ;;  %v7088_v18 = vmax.f32 %v6798_v32, 0.0  ;;  %v5839_v12 = vadd.f32 %v16921_v57, %v16870_v19  ;;  %v16928_v32 = vld [vmem:[#allocation223_spill] sm:$0xff] }
 0x9d3   : > { %16899 = vst [vmem:[#allocation19_spill] sm:$0xff] %v14817_v44  ;;  %v5207_v1 = vadd.f32 %v16916_v46, %v16915_v17  ;;  %v5212_v46 = vadd.f32 %v16924_v4, %v16923_v56  ;;  %v16926_v44 = vld [vmem:[#allocation69_spill] sm:$0xff]  ;;  %v7083_v0 = vmax.f32 %v14632_v42, 0.0  ;;  %v7084_v19 = vmax.f32 %v14634_v41, 0.0  ;;  %v16930_v55 = vld [vmem:[#allocation226_spill] sm:$0xff]  ;;  %v16931_v4 = vld [vmem:[#allocation227_spill] sm:$0xff] }
 0x9d4   : > { %v14832_v20 = vpop.f32.mrf.mxu3  ;;  %16904 = vst [vmem:[#allocation65_spill] sm:$0xff] %v14840_v21  ;;  %v16919_v21 = vld [vmem:[#allocation214_spill] sm:$0xff]  ;;  %v5430_v58 = vadd.f32 %v16931_v4, %v16929_v34  ;;  %v7077_v35 = vmax.f32 %v14682_v48, 0.0  ;;  %v7081_v48 = vmax.f32 %v14706_v25, 0.0 }
 0x9d5   : > { %16902 = vst [vmem:[#allocation57_spill] sm:$0xff] %v14832_v20  ;;  %7324 = vmatmul.bf16.gmra.mxu0 %v14834_v9  ;;  %v5210_v49 = vadd.f32 %v16919_v21, %v16918_v15  ;;  %v16927_v21 = vld [vmem:[#allocation222_spill] sm:$0xff]  ;;  %v5428_v20 = vadd.f32 %v16928_v32, %v16926_v44  ;;  %v6722_v32 = vadd.f32 %v14753_v59, %v5205_v50 }
 0x9d6   : > { %v5215_v16 = vadd.f32 %v16927_v21, %v16926_v44  ;;  %v6971_v21 = vadd.f32 %v14741_v61, %v5826_v23  ;;  %v14893_v42 = vpack.c.bf16 %v7087_v28, %v7083_v0  ;;  %v14895_v41 = vpack.c.bf16 %v7088_v18, %v7084_v19 }
 0x9d7   : > { %v6731_v38 = vpop.f32.mrf.mxu0  ;;  %v6820_v5 = vpop.f32.mrf.mxu1  ;;  %v14898_v44 = vadd.f32 %v14690_v13, %v5197_v3  ;;  %v6729_v4 = vadd.f32 %v6728_v62, %v5212_v46  ;;  %v6813_v61 = vadd.f32 %v14780_v43, %v5420_v52  ;;  %v7078_v18 = vmax.f32 %v14718_v22, 0.0 }
 0x9d8   : > { %v14850_v26 = vpop.f32.mrf.mxu2  ;;  %v6727_v28 = vadd.f32 %v14797_v40, %v5210_v49  ;;  %v6816_v13 = vadd.f32 %v14801_v39, %v5423_v33  ;;  %v6732_v23 = vadd.f32 %v6731_v38, %v5215_v16  ;;  %v7082_v25 = vmax.f32 %v6971_v21, 0.0  ;;  %v14921_v52 = vpop.permute.xlu1 %4669 }
 0x9d9   : > { %16910 = vst [vmem:[#allocation115_spill] sm:$0xff] %v14850_v26  ;;  %v5217_v26 = vadd.f32 %v16930_v55, %v16929_v34  ;;  %v6811_v55 = vadd.f32 %v14757_v24, %v5418_v27  ;;  %v6818_v34 = vadd.f32 %v6817_v63, %v5425_v11  ;;  %v8802_v24 = vld [vmem:[%s15741_s9 + $0x60] sm:$0xf]  ;;  %v7107_v43 = vmax.f32 %v6722_v32, 0.0 }
 0x9da   : > { %v7119_v63 = vmax.f32 %v6729_v4, 0.0  ;;  %v7112_v3 = vmax.f32 %v6813_v61, 0.0  ;;  %v7115_v0 = vmax.f32 %v6727_v28, 0.0  ;;  %v7116_v33 = vmax.f32 %v6816_v13, 0.0  ;;  %v16932_v61 = vld [vmem:[#allocation209_spill] sm:$0xff] }
 0x9db   : > { %v7108_v22 = vmax.f32 %v6811_v55, 0.0  ;;  %v7120_v40 = vmax.f32 %v6818_v34, 0.0  ;;  %v14923_v46 = vpack.c.bf16 %v7081_v48, %v7077_v35  ;;  %v14925_v34 = vpack.c.bf16 %v7082_v25, %v7078_v18 }
 0x9dc   : > { %v6983_v57 = vpop.f32.mrf.mxu3  ;;  %v7187_v16 = vpack.c.bf16 %v7119_v63, %v7115_v0  ;;  %v7095_v4 = vmax.f32 %v14898_v44, 0.0  ;;  %v5831_v18 = vadd.f32 %v16932_v61, %v16879_v10  ;;  %v7099_v13 = vmax.f32 %v14714_v60, 0.0  ;;  %v8931_v60 = vld [vmem:[%s15741_s9 + $0x74] sm:$0xf0] }
 0x9dd   : > { %v14888_v56 = vadd.f32 %v6983_v57, %v5839_v12  ;;  %7422 = vmatmul.bf16.gmra.mxu2 %v14834_v9  ;;  %v6803_v12 = vadd.f32 %v14694_v6, %v5410_v8  ;;  %v6724_v57 = vadd.f32 %v14778_v51, %v5207_v1  ;;  %v8929_v6 = vld [vmem:[%s15741_s9 + $0x64] sm:$0xf0]  ;;  %v6719_v51 = vadd.f32 %v14732_v37, %v5202_v47 }
 0x9de   : > { %v6821_v8 = vadd.f32 %v6820_v5, %v5428_v20  ;;  %v14919_v1 = vor.u32 %v8929_v6, %v8802_v24  ;;  %v7123_v37 = vmax.f32 %v6732_v23, 0.0  ;;  %v7184_v55 = vpack.c.bf16 %v7112_v3, %v7108_v22  ;;  %v16933_v22 = vld [vmem:[#allocation228_spill] sm:$0xff] }
 0x9df   : > { %v6733_v62 = vpop.f32.mrf.mxu0  ;;  %v6822_v39 = vpop.f32.mrf.mxu1  ;;  %v7111_v38 = vmax.f32 %v6724_v57, 0.0  ;;  %v7096_v57 = vmax.f32 %v6803_v12, 0.0  ;;  %v7103_v35 = vmax.f32 %v6719_v51, 0.0  ;;  %v7100_v23 = vmax.f32 %v14716_v31, 0.0 }
 0x9e0   : > { %v14905_v59 = vpop.f32.mrf.mxu2  ;;  %v6734_v49 = vadd.f32 %v6733_v62, %v5217_v26  ;;  %v6823_v27 = vadd.f32 %v6822_v39, %v5430_v58  ;;  %v7124_v5 = vmax.f32 %v6821_v8, 0.0  ;;  %v6808_v26 = vadd.f32 %v14735_v2, %v14855_v53  ;;  %v14939_v6 = vpop.permute.xlu1 %4644  ;;  %v16935_v39 = vld [vmem:[#allocation232_spill] sm:$0xff] }
 0x9e1   : > { %v7188_v58 = vpack.c.bf16 %v7120_v40, %v7116_v33  ;;  %v7183_v32 = vpack.c.bf16 %v7111_v38, %v7107_v43  ;;  %v7091_v2 = vmax.f32 %v14672_v45, 0.0  ;;  %v7092_v53 = vmax.f32 %v14674_v36, 0.0  ;;  %v8810_v36 = vld [vmem:[%s15741_s9 + $0x70] sm:$0xf]  ;;  %v16934_v40 = vld [vmem:[#allocation233_spill] sm:$0xff] }
 0x9e2   : > { %v7127_v47 = vmax.f32 %v6734_v49, 0.0  ;;  %v7128_v20 = vmax.f32 %v6823_v27, 0.0  ;;  %v7104_v48 = vmax.f32 %v6808_v26, 0.0  ;;  %v6976_v44 = vadd.f32 %v14786_v7, %v5831_v18  ;;  %v16938_v33 = vld [vmem:[#allocation125_spill] sm:$0xff]  ;;  %v16940_v26 = vld [vmem:[#allocation248_spill] sm:$0xff] }
 0x9e3   : > { %v7175_v12 = vpack.c.bf16 %v7095_v4, %v7091_v2  ;;  %v7176_v24 = vpack.c.bf16 %v7096_v57, %v7092_v53  ;;  %v7179_v10 = vpack.c.bf16 %v7103_v35, %v7099_v13  ;;  %v7089_v31 = vmax.f32 %v14751_v30, 0.0  ;;  %v16936_v30 = vld [vmem:[#allocation224_spill] sm:$0xff]  ;;  %v16943_v35 = vld [vmem:[#allocation115_spill] sm:$0xff] }
 0x9e4   : > { %v14917_v50 = vpop.f32.mrf.mxu3  ;;  %v7191_v11 = vpack.c.bf16 %v7127_v47, %v7123_v37  ;;  %v7192_v21 = vpack.c.bf16 %v7128_v20, %v7124_v5  ;;  %v7180_v25 = vpack.c.bf16 %v7104_v48, %v7100_v23  ;;  %v7090_v7 = vmax.f32 %v6976_v44, 0.0  ;;  %v16939_v37 = vld [vmem:[#allocation236_spill] sm:$0xff]  ;;  %v16944_v13 = vld [vmem:[#allocation119_spill] sm:$0xff]  ;;  %v16945_v23 = vld [vmem:[#allocation217_spill] sm:$0xff] }
 0x9e5   : > { %7329 = vmatmul.bf16.gmra.mxu0 %v14919_v1  ;;  %v7085_v51 = vmax.f32 %v14724_v14, 0.0  ;;  %v7086_v43 = vmax.f32 %v14761_v29, 0.0  ;;  %v14950_v62 = vor.u32 %v8931_v60, %v8810_v36  ;;  %v5633_v63 = vadd.f32 %v16933_v22, %v16915_v17  ;;  %v16937_v14 = vld [vmem:[#allocation229_spill] sm:$0xff] }
 0x9e6   : > { %7340 = vmatpush.bf16.msrb.mxu1 %v7191_v11  ;;  %7438 = vmatpush.bf16.msrb.mxu3 %v7192_v21  ;;  %v5846_v49 = vadd.f32 %v16934_v40, %v16915_v17  ;;  %v5636_v38 = vadd.f32 %v16935_v39, %v16918_v15  ;;  %v5631_v3 = vadd.f32 %v16936_v30, %v16912_v54  ;;  %v16941_v11 = vld [vmem:[#allocation220_spill] sm:$0xff]  ;;  %v7102_v22 = vmax.f32 %v14888_v56, 0.0  ;;  %v16952_v30 = vld [vmem:[#allocation241_spill] sm:$0xff] }
 0x9e7   : > { %v5844_v27 = vadd.f32 %v16937_v14, %v16912_v54  ;;  %v14962_v29 = vpack.c.bf16 %v7089_v31, %v7085_v51  ;;  %v14964_v0 = vpack.c.bf16 %v7090_v7, %v7086_v43  ;;  %v5638_v47 = vadd.f32 %v16939_v37, %v16938_v33  ;;  %v16947_v7 = vld [vmem:[#allocation237_spill] sm:$0xff]  ;;  %v16948_v43 = vld [vmem:[#allocation19_spill] sm:$0xff]  ;;  %v16950_v40 = vld [vmem:[#allocation72_spill] sm:$0xff] }
 0x9e8   : > { %v6901_v19 = vpop.f32.mrf.mxu2  ;;  %v14973_v54 = vpop.permute.xlu1 %4639  ;;  %v5836_v44 = vadd.f32 %v16945_v23, %v16944_v13  ;;  %v5849_v51 = vadd.f32 %v16947_v7, %v16918_v15  ;;  %v5851_v56 = vadd.f32 %v16952_v30, %v16938_v33  ;;  %v16953_v37 = vld [vmem:[#allocation230_spill] sm:$0xff] }
 0x9e9   : > { %v6902_v5 = vadd.f32 %v6901_v19, %v5633_v63  ;;  %v8756_v63 = vld [vmem:[%s15741_s9 + $0x8] sm:$0xf0] }
 0x9ea   : > { %7341 = vmatpush.bf16.msrb.mxu1 %v7187_v16  ;;  %7439 = vmatpush.bf16.msrb.mxu3 %v7188_v58  ;;  %v5628_v16 = vadd.f32 %v16941_v11, %v16940_v26  ;;  %v16942_v58 = vld [vmem:[#allocation225_spill] sm:$0xff]  ;;  %v16958_v33 = vld [vmem:[#allocation46_spill] sm:$0xff] }
 0x9eb   : > { %v5841_v21 = vadd.f32 %v16942_v58, %v16940_v26  ;;  %v7113_v61 = vmax.f32 %v6902_v5, 0.0  ;;  %v16954_v5 = vld [vmem:[#allocation120_spill] sm:$0xff]  ;;  %v16956_v58 = vld [vmem:[#allocation69_spill] sm:$0xff]  ;;  %v16967_v30 = vld [vmem:[#allocation250_spill] sm:$0xff] }
 0x9ec   : > { %v6988_v28 = vpop.f32.mrf.mxu3  ;;  %v6897_v19 = vadd.f32 %v16943_v35, %v5628_v16  ;;  %v16959_v35 = vld [vmem:[#allocation18_spill] sm:$0xff] }
 0x9ed   : > { %7427 = vmatmul.bf16.gmra.mxu2 %v14919_v1  ;;  %v6989_v4 = vadd.f32 %v6988_v28, %v5844_v27  ;;  %v6986_v48 = vadd.f32 %v14917_v50, %v5841_v21  ;;  %v16946_v28 = vld [vmem:[#allocation57_spill] sm:$0xff]  ;;  %v16957_v21 = vld [vmem:[#allocation240_spill] sm:$0xff] }
 0x9ee   : > { %7342 = vmatpush.bf16.msrb.mxu1 %v7183_v32  ;;  %7440 = vmatpush.bf16.msrb.mxu3 %v7184_v55  ;;  %v6900_v55 = vadd.f32 %v14905_v59, %v5631_v3  ;;  %v7105_v50 = vmax.f32 %v6897_v19, 0.0 }
 0x9f0   : > { %v6904_v45 = vpop.f32.mrf.mxu2  ;;  %v15001_v15 = vpop.permute.xlu1 %4614 }
 0x9f1   : > { %v6905_v20 = vadd.f32 %v6904_v45, %v5636_v38  ;;  %v7110_v45 = vmax.f32 %v6989_v4, 0.0  ;;  %v16951_v38 = vld [vmem:[#allocation52_spill] sm:$0xff] }
 0x9f2   : > { %7343 = vmatpush.bf16.msrb.mxu1 %v7179_v10  ;;  %7441 = vmatpush.bf16.msrb.mxu3 %v7180_v25  ;;  %v7109_v25 = vmax.f32 %v6900_v55, 0.0 }
 0x9f3   : > { %v7117_v2 = vmax.f32 %v6905_v20, 0.0  ;;  %v16955_v20 = vld [vmem:[#allocation109_spill] sm:$0xff] }
 0x9f4   : > { %v6990_v8 = vpop.f32.mrf.mxu3  ;;  %v14984_v36 = vpack.c.bf16 %v7113_v61, %v7109_v25  ;;  %v7094_v26 = vmax.f32 %v16955_v20, 0.0  ;;  %v16960_v61 = vld [vmem:[#allocation138_spill] sm:$0xff] }
 0x9f5   : > { %v6991_v17 = vadd.f32 %v6990_v8, %v5846_v49  ;;  %7334 = vmatmul.bf16.gmra.mxu0 %v14950_v62  ;;  %v7101_v8 = vmax.f32 %v16948_v43, 0.0  ;;  %v7097_v49 = vmax.f32 %v16950_v40, 0.0 }
 0x9f6   : > { %7344 = vmatpush.bf16.msrb.mxu1 %v7175_v12  ;;  %7442 = vmatpush.bf16.msrb.mxu3 %v7176_v24  ;;  %v6981_v12 = vadd.f32 %v16946_v28, %v5836_v44  ;;  %v7106_v24 = vmax.f32 %v6986_v48, 0.0 }
 0x9f7   : > { %v7114_v18 = vmax.f32 %v6991_v17, 0.0  ;;  %v7181_v14 = vpack.c.bf16 %v7105_v50, %v7101_v8  ;;  %v7093_v17 = vmax.f32 %v16954_v5, 0.0  ;;  %v16963_v50 = vld [vmem:[#allocation351_spill] sm:$0xff] }
 0x9f8   : > { %v6906_v32 = vpop.f32.mrf.mxu2  ;;  %v7098_v39 = vmax.f32 %v6981_v12, 0.0  ;;  %v15005_v27 = vpack.c.bf16 %v7106_v24, %v7102_v22  ;;  %v16964_v24 = vld [vmem:[#allocation234_spill] sm:$0xff]  ;;  %v16965_v22 = vld [vmem:[#allocation231_spill] sm:$0xff] }
 0x9f9   : > { %v6907_v57 = vadd.f32 %v6906_v32, %v5638_v47  ;;  %v14986_v60 = vpack.c.bf16 %v7114_v18, %v7110_v45  ;;  %v5220_v47 = vadd.f32 %v16953_v37, %v15001_v15  ;;  %v5641_v32 = vadd.f32 %v16957_v21, %v16956_v58  ;;  %v16961_v18 = vld [vmem:[#allocation244_spill] sm:$0xff]  ;;  %v16968_v37 = vld [vmem:[#allocation345_spill] sm:$0xff]  ;;  %v16970_v21 = vld [vmem:[#allocation235_spill] sm:$0xff] }
 0x9fa   : > { %7345 = vmatpush.bf16.msrb.mxu1 %v14893_v42  ;;  %7443 = vmatpush.bf16.msrb.mxu3 %v14895_v41  ;;  %v16949_v42 = vld [vmem:[#allocation122_spill] sm:$0xff]  ;;  %v8916_v41 = vld [vmem:[%s15741_s9 + $0x4] sm:$0xf]  ;;  %v7177_v19 = vpack.c.bf16 %v7097_v49, %v7093_v17  ;;  %v15019_v48 = vpack.c.bf16 %v7098_v39, %v7094_v26  ;;  %v5222_v7 = vadd.f32 %v16964_v24, %v16963_v50  ;;  %v8918_v39 = vld [vmem:[%s15741_s9 + $0x14] sm:$0xf] }
 0x9fb   : > { %v7121_v53 = vmax.f32 %v6907_v57, 0.0  ;;  %v15011_v16 = vor.u32 %v8916_v41, %v8756_v63  ;;  %v16966_v63 = vld [vmem:[#allocation245_spill] sm:$0xff]  ;;  %v16976_v24 = vld [vmem:[#allocation246_spill] sm:$0xff] }
 0x9fc   : > { %v6993_v10 = vpop.f32.mrf.mxu3  ;;  %v5854_v40 = vadd.f32 %v16966_v63, %v16956_v58 }
 0x9fd   : > { %7432 = vmatmul.bf16.gmra.mxu2 %v14950_v62  ;;  %v7189_v59 = vpack.c.bf16 %v7121_v53, %v7117_v2  ;;  %v6994_v3 = vadd.f32 %v6993_v10, %v5849_v51  ;;  %v5643_v2 = vadd.f32 %v16961_v18, %v16960_v61  ;;  %v16962_v10 = vld [vmem:[#allocation86_spill] sm:$0xff]  ;;  %v16972_v18 = vld [vmem:[#allocation309_spill] sm:$0xff] }
 0x9fe   : > { %7346 = vmatpush.bf16.msrb.mxu1 %v16949_v42  ;;  %7444 = vmatpush.bf16.msrb.mxu3 %v16951_v38  ;;  %v5433_v42 = vadd.f32 %v16965_v22, %v15001_v15  ;;  %v8764_v38 = vld [vmem:[%s15741_s9 + $0x18] sm:$0xf0] }
 0x9ff   : > { %v7118_v53 = vmax.f32 %v6994_v3, 0.0  ;;  %v15047_v20 = vor.u32 %v8918_v39, %v8764_v38 }
 0xa00   : > { %v6909_v31 = vpop.f32.mrf.mxu2 }
 0xa01   : > { %v6910_v23 = vadd.f32 %v6909_v31, %v5641_v32  ;;  %v5435_v32 = vadd.f32 %v16970_v21, %v16963_v50  ;;  %v16984_v21 = vld [vmem:[#allocation65_spill] sm:$0xff] }
 0xa02   : > { %v7300_v4 = vpop.f32.mrf.mxu0  ;;  %7347 = vmatpush.bf16.msrb.mxu1 %v16958_v33  ;;  %7445 = vmatpush.bf16.msrb.mxu3 %v16959_v35 }
 0xa03   : > { %v15016_v57 = vadd.f32 %v7300_v4, %v5220_v47  ;;  %v7125_v28 = vmax.f32 %v6910_v23, 0.0  ;;  %v16969_v47 = vld [vmem:[#allocation238_spill] sm:$0xff] }
 0xa04   : > { %v6995_v11 = vpop.f32.mrf.mxu3  ;;  %v5225_v5 = vadd.f32 %v16969_v47, %v16968_v37 }
 0xa05   : > { %v6996_v55 = vadd.f32 %v6995_v11, %v5851_v56  ;;  %7348 = vmatmul.bf16.vlgmr.msrb.gmra.mxu1 %v15011_v16  ;;  %7495 = vmatmul.bf16.vlgmr.msra.gmra.mxu0 %v16962_v10  ;;  %v5856_v56 = vadd.f32 %v16967_v30, %v16960_v61 }
 0xa06   : > { %7446 = vmatmul.bf16.vlgmr.msrb.gmra.mxu3 %v15011_v16 }
 0xa07   : > { %v7122_v13 = vmax.f32 %v6996_v55, 0.0 }
 0xa08   : > { %v6911_v44 = vpop.f32.mrf.mxu2 }
 0xa09   : > { %v6912_v25 = vadd.f32 %v6911_v44, %v5643_v2  ;;  %v7190_v45 = vpack.c.bf16 %v7122_v13, %v7118_v53  ;;  %v16973_v2 = vld [vmem:[#allocation242_spill] sm:$0xff] }
 0xa0a   : > { %v7302_v8 = vpop.f32.mrf.mxu0  ;;  %v5227_v53 = vadd.f32 %v16973_v2, %v16972_v18 }
 0xa0b   : > { %v7129_v12 = vmax.f32 %v6912_v25, 0.0  ;;  %v15029_v31 = vadd.f32 %v7302_v8, %v5222_v7 }
 0xa0c   : > { %v6998_v51 = vpop.f32.mrf.mxu3 }
 0xa0d   : > { %v7193_v43 = vpack.c.bf16 %v7129_v12, %v7125_v28  ;;  %7593 = vmatmul.bf16.vlgmr.msra.gmra.mxu2 %v16962_v10  ;;  %v6999_v3 = vadd.f32 %v6998_v51, %v5854_v40  ;;  %v8772_v28 = vld [vmem:[%s15741_s9 + $0x28] sm:$0xf0]  ;;  %v16981_v40 = vld [vmem:[#allocation247_spill] sm:$0xff] }
 0xa0e   : > { %v16975_v12 = vld [vmem:[#allocation302_spill] sm:$0xff] }
 0xa0f   : > { %7536 = vmatpush.bf16.msra.mxu1 %v7193_v43  ;;  %v7126_v55 = vmax.f32 %v6999_v3, 0.0  ;;  %v5230_v7 = vadd.f32 %v16976_v24, %v16975_v12  ;;  %v16977_v43 = vld [vmem:[#allocation243_spill] sm:$0xff]  ;;  %v5443_v39 = vadd.f32 %v16981_v40, %v16975_v12  ;;  %v16982_v3 = vld [vmem:[#allocation256_spill] sm:$0xff]  ;;  %v16990_v24 = vld [vmem:[#allocation266_spill] sm:$0xff] }
 0xa10   : > { %v7398_v41 = vpop.f32.mrf.mxu2  ;;  %v5440_v8 = vadd.f32 %v16977_v43, %v16972_v18  ;;  %v5235_v47 = vadd.f32 %v16982_v3, %v14939_v6  ;;  %v16993_v40 = vld [vmem:[#allocation267_spill] sm:$0xff]  ;;  %v8796_v3 = vld [vmem:[%s15741_s9 + $0x58] sm:$0xf0] }
 0xa11   : > { %v15035_v49 = vadd.f32 %v7398_v41, %v5433_v42  ;;  %v16979_v42 = vld [vmem:[#allocation49_spill] sm:$0xff]  ;;  %v16980_v41 = vld [vmem:[#allocation251_spill] sm:$0xff] }
 0xa12   : > { %v7305_v11 = vpop.f32.mrf.mxu0  ;;  %v5232_v63 = vadd.f32 %v16980_v41, %v14973_v54  ;;  %v16992_v41 = vld [vmem:[#allocation99_spill] sm:$0xff] }
 0xa13   : > { %7537 = vmatpush.bf16.msra.mxu1 %v7189_v59  ;;  %v15049_v58 = vadd.f32 %v7305_v11, %v5225_v5  ;;  %v16971_v59 = vld [vmem:[#allocation101_spill] sm:$0xff] }
 0xa14   : > { %v7000_v17 = vpop.f32.mrf.mxu3 }
 0xa15   : > { %v7001_v26 = vadd.f32 %v7000_v17, %v5856_v56  ;;  %7353 = vmatmul.bf16.gmra.mxu1 %v15047_v20  ;;  %7500 = vmatmul.bf16.gmra.mxu0 %v16971_v59  ;;  %v8780_v56 = vld [vmem:[%s15741_s9 + $0x38] sm:$0xf0] }
 0xa16   : > { %7451 = vmatmul.bf16.gmra.mxu3 %v15047_v20 }
 0xa17   : > { %v7130_v4 = vmax.f32 %v7001_v26, 0.0  ;;  %7538 = vmatpush.bf16.msra.mxu1 %v14984_v36  ;;  %v16974_v36 = vld [vmem:[#allocation239_spill] sm:$0xff]  ;;  %v16983_v26 = vld [vmem:[#allocation252_spill] sm:$0xff] }
 0xa18   : > { %v7400_v33 = vpop.f32.mrf.mxu2  ;;  %v5438_v44 = vadd.f32 %v16974_v36, %v16968_v37  ;;  %v5445_v11 = vadd.f32 %v16983_v26, %v14973_v54 }
 0xa19   : > { %v7194_v35 = vpack.c.bf16 %v7130_v4, %v7126_v55  ;;  %v15056_v61 = vadd.f32 %v7400_v33, %v5435_v32  ;;  %v16985_v55 = vld [vmem:[#allocation96_spill] sm:$0xff]  ;;  %v16987_v33 = vld [vmem:[#allocation261_spill] sm:$0xff] }
 0xa1a   : > { %v7307_v13 = vpop.f32.mrf.mxu0 }
 0xa1b   : > { %7634 = vmatpush.bf16.msra.mxu3 %v7194_v35  ;;  %7539 = vmatpush.bf16.msra.mxu1 %v7181_v14  ;;  %v15062_v23 = vadd.f32 %v7307_v13, %v5227_v53  ;;  %v8920_v14 = vld [vmem:[%s15741_s9 + $0x24] sm:$0xf] }
 0xa1c   : > { %v16988_v53 = vld [vmem:[#allocation257_spill] sm:$0xff] }
 0xa1d   : > { %7598 = vmatmul.bf16.gmra.mxu2 %v16971_v59  ;;  %v5448_v13 = vadd.f32 %v16988_v53, %v14939_v6 }
 0xa1f   : > { %7635 = vmatpush.bf16.msra.mxu3 %v7190_v45  ;;  %7540 = vmatpush.bf16.msra.mxu1 %v7177_v19  ;;  %v15078_v45 = vor.u32 %v8920_v14, %v8772_v28  ;;  %v8788_v14 = vld [vmem:[%s15741_s9 + $0x48] sm:$0xf0]  ;;  %v16989_v28 = vld [vmem:[#allocation332_spill] sm:$0xff] }
 0xa20   : > { %v7403_v10 = vpop.f32.mrf.mxu2 }
 0xa21   : > { %v15066_v25 = vadd.f32 %v7403_v10, %v5438_v44  ;;  %v8924_v10 = vld [vmem:[%s15741_s9 + $0x44] sm:$0xf] }
 0xa22   : > { %v7310_v19 = vpop.f32.mrf.mxu0 }
 0xa23   : > { %7636 = vmatpush.bf16.msra.mxu3 %v14986_v60  ;;  %7541 = vmatpush.bf16.msra.mxu1 %v14962_v29  ;;  %v15080_v51 = vadd.f32 %v7310_v19, %v5230_v7  ;;  %v16978_v60 = vld [vmem:[#allocation118_spill] sm:$0xff]  ;;  %v5240_v7 = vadd.f32 %v16990_v24, %v16989_v28  ;;  %v15141_v19 = vor.u32 %v8924_v10, %v8788_v14 }
 0xa25   : > { %7358 = vmatmul.bf16.gmra.mxu1 %v15078_v45  ;;  %7505 = vmatmul.bf16.gmra.mxu0 %v16978_v60 }
 0xa26   : > { %7456 = vmatmul.bf16.gmra.mxu3 %v15078_v45 }
 0xa27   : > { %7637 = vmatpush.bf16.msra.mxu3 %v15005_v27  ;;  %7542 = vmatpush.bf16.msra.mxu1 %v14923_v46 }
 0xa28   : > { %v7405_v22 = vpop.f32.mrf.mxu2 }
 0xa29   : > { %v15088_v29 = vadd.f32 %v7405_v22, %v5440_v8  ;;  %v16991_v22 = vld [vmem:[#allocation262_spill] sm:$0xff] }
 0xa2a   : > { %v7312_v27 = vpop.f32.mrf.mxu0 }
 0xa2b   : > { %7638 = vmatpush.bf16.msra.mxu3 %v15019_v48  ;;  %7543 = vmatpush.bf16.msra.mxu1 %v16979_v42  ;;  %v15096_v46 = vadd.f32 %v7312_v27, %v5232_v63  ;;  %v8922_v48 = vld [vmem:[%s15741_s9 + $0x34] sm:$0xf] }
 0xa2c   : > { %v15112_v5 = vor.u32 %v8922_v48, %v8780_v56  ;;  %v8926_v56 = vld [vmem:[%s15741_s9 + $0x54] sm:$0xf] }
 0xa2d   : > { %7603 = vmatmul.bf16.gmra.mxu2 %v16978_v60 }
 0xa2f   : > { %7639 = vmatpush.bf16.msra.mxu3 %v14964_v0 }
 0xa30   : > { %v7408_v38 = vpop.f32.mrf.mxu2 }
 0xa31   : > { %v15101_v30 = vadd.f32 %v7408_v38, %v5443_v39  ;;  %v5453_v39 = vadd.f32 %v16993_v40, %v16989_v28 }
 0xa32   : > { %v7315_v17 = vpop.f32.mrf.mxu0 }
 0xa33   : > { %7640 = vmatpush.bf16.msra.mxu3 %v14925_v34  ;;  %v15114_v0 = vadd.f32 %v7315_v17, %v5235_v47  ;;  %v16986_v34 = vld [vmem:[#allocation340_spill] sm:$0xff]  ;;  %v15165_v47 = vor.u32 %v8926_v56, %v8796_v3 }
 0xa34   : > { %v5237_v59 = vadd.f32 %v16987_v33, %v16986_v34  ;;  %v5450_v60 = vadd.f32 %v16991_v22, %v16986_v34 }
 0xa35   : > { %7363 = vmatmul.bf16.gmra.mxu1 %v15112_v5  ;;  %7510 = vmatmul.bf16.gmra.mxu0 %v16985_v55 }
 0xa36   : > { %7461 = vmatmul.bf16.gmra.mxu3 %v15112_v5 }
 0xa37   : > { %7641 = vmatpush.bf16.msra.mxu3 %v16984_v21 }
 0xa38   : > { %v7410_v32 = vpop.f32.mrf.mxu2 }
 0xa39   : > { %v15121_v4 = vadd.f32 %v7410_v32, %v5445_v11  ;;  %v8928_v32 = vld [vmem:[%s15741_s9 + $0x64] sm:$0xf] }
 0xa3a   : > { %v7317_v35 = vpop.f32.mrf.mxu0 }
 0xa3b   : > { %v15127_v2 = vadd.f32 %v7317_v35, %v5237_v59 }
 0xa3d   : > { %7608 = vmatmul.bf16.gmra.mxu2 %v16985_v55  ;;  %v8804_v55 = vld [vmem:[%s15741_s9 + $0x68] sm:$0xf0] }
 0xa3e   : > { %v15185_v33 = vor.u32 %v8928_v32, %v8804_v55 }
 0xa40   : > { %v7413_v36 = vpop.f32.mrf.mxu2 }
 0xa41   : > { %v15131_v44 = vadd.f32 %v7413_v36, %v5448_v13  ;;  %v8930_v13 = vld [vmem:[%s15741_s9 + $0x74] sm:$0xf]  ;;  %v8812_v36 = vld [vmem:[%s15741_s9 + $0x78] sm:$0xf0] }
 0xa42   : > { %v7320_v43 = vpop.f32.mrf.mxu0  ;;  %v15205_v10 = vor.u32 %v8930_v13, %v8812_v36 }
 0xa43   : > { %v15143_v8 = vadd.f32 %v7320_v43, %v5240_v7  ;;  %v16994_v43 = vld [vmem:[#allocation249_spill] sm:$0xff] }
 0xa44   : > { %v5646_v22 = vadd.f32 %v16994_v43, %v15001_v15  ;;  %v16997_v43 = vld [vmem:[#allocation258_spill] sm:$0xff] }
 0xa45   : > { %7368 = vmatmul.bf16.gmra.mxu1 %v15141_v19  ;;  %7515 = vmatmul.bf16.gmra.mxu0 %v16992_v41 }
 0xa46   : > { %7466 = vmatmul.bf16.gmra.mxu3 %v15141_v19 }
 0xa48   : > { %v7415_v42 = vpop.f32.mrf.mxu2 }
 0xa49   : > { %v15149_v63 = vadd.f32 %v7415_v42, %v5450_v60 }
 0xa4a   : > { %v15153_v27 = vpop.f32.mrf.mxu0 }
 0xa4d   : > { %7613 = vmatmul.bf16.gmra.mxu2 %v16992_v41 }
 0xa50   : > { %v7418_v38 = vpop.f32.mrf.mxu2 }
 0xa51   : > { %v15157_v48 = vadd.f32 %v7418_v38, %v5453_v39 }
 0xa52   : > { %v15167_v17 = vpop.f32.mrf.mxu0 }
 0xa55   : > { %7373 = vmatmul.bf16.gmra.mxu1 %v15165_v47  ;;  %7520 = vmatmul.bf16.gmra.mxu0 %v14834_v9 }
 0xa56   : > { %7471 = vmatmul.bf16.gmra.mxu3 %v15165_v47 }
 0xa58   : > { %v15169_v26 = vpop.f32.mrf.mxu2 }
 0xa5a   : > { %v15175_v11 = vpop.f32.mrf.mxu0 }
 0xa5d   : > { %7618 = vmatmul.bf16.gmra.mxu2 %v14834_v9 }
 0xa60   : > { %v15177_v21 = vpop.f32.mrf.mxu2 }
 0xa62   : > { %v15187_v59 = vpop.f32.mrf.mxu0 }
 0xa65   : > { %7378 = vmatmul.bf16.gmra.mxu1 %v15185_v33  ;;  %7525 = vmatmul.bf16.gmra.mxu0 %v14919_v1 }
 0xa66   : > { %7476 = vmatmul.bf16.gmra.mxu3 %v15185_v33 }
 0xa68   : > { %v15189_v35 = vpop.f32.mrf.mxu2 }
 0xa6a   : > { %v15195_v9 = vpop.f32.mrf.mxu0 }
 0xa6d   : > { %7623 = vmatmul.bf16.gmra.mxu2 %v14919_v1 }
 0xa70   : > { %v15197_v53 = vpop.f32.mrf.mxu2 }
 0xa72   : > { %v15207_v14 = vpop.f32.mrf.mxu0 }
 0xa75   : > { %7383 = vmatmul.bf16.gmra.mxu1 %v15205_v10  ;;  %7530 = vmatmul.bf16.gmra.mxu0 %v14950_v62 }
 0xa76   : > { %7481 = vmatmul.bf16.gmra.mxu3 %v15205_v10 }
 0xa78   : > { %v15209_v24 = vpop.f32.mrf.mxu2 }
 0xa7a   : > { %v15215_v1 = vpop.f32.mrf.mxu0 }
 0xa7d   : > { %7628 = vmatmul.bf16.gmra.mxu2 %v14950_v62 }
 0xa80   : > { %v15217_v7 = vpop.f32.mrf.mxu2 }
 0xa82   : > { %v7349_v60 = vpop.f32.mrf.mxu1  ;;  %v7496_v42 = vpop.f32.mrf.mxu0 }
 0xa83   : > { %v15222_v41 = vadd.f32 %v7349_v60, %v15016_v57  ;;  %v15224_v40 = vadd.f32 %v7496_v42, %v5646_v22  ;;  %v16996_v57 = vld [vmem:[#allocation255_spill] sm:$0xff]  ;;  %v5651_v22 = vadd.f32 %v16997_v43, %v16968_v37 }
 0xa84   : > { %v5859_v55 = vadd.f32 %v16996_v57, %v15001_v15  ;;  %v16999_v15 = vld [vmem:[#allocation263_spill] sm:$0xff] }
 0xa85   : > { %7544 = vmatmul.bf16.vlgmr.msra.gmra.mxu1 %v15011_v16  ;;  %v5653_v57 = vadd.f32 %v16999_v15, %v16972_v18 }
 0xa86   : > { %7642 = vmatmul.bf16.vlgmr.msra.gmra.mxu3 %v15011_v16 }
 0xa88   : > { %v15226_v39 = vpop.f32.mrf.mxu2 }
 0xa89   : > { %v7447_v62 = vpop.f32.mrf.mxu3 }
 0xa8a   : > { %v15231_v38 = vadd.f32 %v7447_v62, %v15035_v49  ;;  %v7351_v56 = vpop.f32.mrf.mxu1  ;;  %v15233_v3 = vpop.f32.mrf.mxu0 }
 0xa8b   : > { %16995 = vst [vmem:[#allocation53_spill] sm:$0xff] %v15233_v3  ;;  %v15236_v32 = vadd.f32 %v7351_v56, %v15029_v31 }
 0xa90   : > { %v7594_v13 = vpop.f32.mrf.mxu2 }
 0xa91   : > { %v15240_v36 = vadd.f32 %v7594_v13, %v5859_v55  ;;  %v7449_v16 = vpop.f32.mrf.mxu3 }
 0xa92   : > { %v15245_v60 = vadd.f32 %v7449_v16, %v15056_v61  ;;  %v7354_v49 = vpop.f32.mrf.mxu1  ;;  %v7501_v42 = vpop.f32.mrf.mxu0  ;;  %v17000_v16 = vld [vmem:[#allocation265_spill] sm:$0xff] }
 0xa93   : > { %v15248_v62 = vadd.f32 %v7354_v49, %v15049_v58  ;;  %v15250_v31 = vadd.f32 %v7501_v42, %v5651_v22  ;;  %v5864_v49 = vadd.f32 %v17000_v16, %v16968_v37 }
 0xa95   : > { %7549 = vmatmul.bf16.gmra.mxu1 %v15047_v20 }
 0xa96   : > { %7647 = vmatmul.bf16.gmra.mxu3 %v15047_v20  ;;  %v17001_v20 = vld [vmem:[#allocation268_spill] sm:$0xff] }
 0xa97   : > { %v5656_v15 = vadd.f32 %v17001_v20, %v16975_v12 }
 0xa98   : > { %v15252_v56 = vpop.f32.mrf.mxu2 }
 0xa99   : > { %16998 = vst [vmem:[#allocation117_spill] sm:$0xff] %v15252_v56  ;;  %v7452_v55 = vpop.f32.mrf.mxu3 }
 0xa9a   : > { %v15259_v61 = vadd.f32 %v7452_v55, %v15066_v25  ;;  %v7356_v13 = vpop.f32.mrf.mxu1  ;;  %v7503_v43 = vpop.f32.mrf.mxu0 }
 0xa9b   : > { %v15262_v58 = vadd.f32 %v7356_v13, %v15062_v23  ;;  %v15264_v22 = vadd.f32 %v7503_v43, %v5653_v57  ;;  %v17003_v13 = vld [vmem:[#allocation269_spill] sm:$0xff] }
 0xa9c   : > { %v5866_v37 = vadd.f32 %v17003_v13, %v16972_v18 }
 0xaa0   : > { %v7599_v42 = vpop.f32.mrf.mxu2 }
 0xaa1   : > { %v15268_v56 = vadd.f32 %v7599_v42, %v5864_v49  ;;  %v7454_v3 = vpop.f32.mrf.mxu3 }
 0xaa2   : > { %v15273_v25 = vadd.f32 %v7454_v3, %v15088_v29  ;;  %v7359_v55 = vpop.f32.mrf.mxu1  ;;  %v7506_v50 = vpop.f32.mrf.mxu0  ;;  %v17004_v29 = vld [vmem:[#allocation273_spill] sm:$0xff] }
 0xaa3   : > { %v15276_v23 = vadd.f32 %v7359_v55, %v15080_v51  ;;  %v15278_v57 = vadd.f32 %v7506_v50, %v5656_v15  ;;  %v5658_v3 = vadd.f32 %v17004_v29, %v14973_v54  ;;  %v17005_v15 = vld [vmem:[#allocation274_spill] sm:$0xff] }
 0xaa4   : > { %v5869_v55 = vadd.f32 %v17005_v15, %v16975_v12 }
 0xaa5   : > { %17002 = vst [vmem:[#allocation34_spill] sm:$0xff] %v15278_v57  ;;  %7554 = vmatmul.bf16.gmra.mxu1 %v15078_v45 }
 0xaa6   : > { %7652 = vmatmul.bf16.gmra.mxu3 %v15078_v45  ;;  %v17006_v45 = vld [vmem:[#allocation278_spill] sm:$0xff] }
 0xaa8   : > { %v7601_v43 = vpop.f32.mrf.mxu2 }
 0xaa9   : > { %v15283_v16 = vadd.f32 %v7601_v43, %v5866_v37  ;;  %v7457_v49 = vpop.f32.mrf.mxu3  ;;  %v5661_v43 = vadd.f32 %v17006_v45, %v14939_v6 }
 0xaaa   : > { %v15289_v42 = vadd.f32 %v7457_v49, %v15101_v30  ;;  %v7361_v51 = vpop.f32.mrf.mxu1  ;;  %v7508_v50 = vpop.f32.mrf.mxu0 }
 0xaab   : > { %v15292_v20 = vadd.f32 %v7361_v51, %v15096_v46  ;;  %v15294_v18 = vadd.f32 %v7508_v50, %v5658_v3  ;;  %v17008_v51 = vld [vmem:[#allocation279_spill] sm:$0xff] }
 0xaac   : > { %v5871_v12 = vadd.f32 %v17008_v51, %v14973_v54 }
 0xab0   : > { %v7604_v13 = vpop.f32.mrf.mxu2 }
 0xab1   : > { %v15298_v37 = vadd.f32 %v7604_v13, %v5869_v55  ;;  %v7459_v29 = vpop.f32.mrf.mxu3 }
 0xab2   : > { %v15303_v30 = vadd.f32 %v7459_v29, %v15121_v4  ;;  %v7364_v49 = vpop.f32.mrf.mxu1  ;;  %v7511_v57 = vpop.f32.mrf.mxu0  ;;  %v17009_v4 = vld [vmem:[#allocation282_spill] sm:$0xff]  ;;  %v17011_v29 = vld [vmem:[#allocation284_spill] sm:$0xff] }
 0xab3   : > { %v15306_v46 = vadd.f32 %v7364_v49, %v15114_v0  ;;  %v15308_v3 = vadd.f32 %v7511_v57, %v5661_v43  ;;  %v5663_v55 = vadd.f32 %v17009_v4, %v16986_v34  ;;  %v5874_v49 = vadd.f32 %v17011_v29, %v14939_v6 }
 0xab5   : > { %17007 = vst [vmem:[#allocation13_spill] sm:$0xff] %v15308_v3  ;;  %7559 = vmatmul.bf16.gmra.mxu1 %v15112_v5 }
 0xab6   : > { %7657 = vmatmul.bf16.gmra.mxu3 %v15112_v5  ;;  %v17013_v5 = vld [vmem:[#allocation287_spill] sm:$0xff] }
 0xab8   : > { %v7606_v50 = vpop.f32.mrf.mxu2 }
 0xab9   : > { %v15313_v15 = vadd.f32 %v7606_v50, %v5871_v12  ;;  %v7462_v13 = vpop.f32.mrf.mxu3  ;;  %v5666_v50 = vadd.f32 %v17013_v5, %v16989_v28  ;;  %v17017_v5 = vld [vmem:[#allocation293_spill] sm:$0xff] }
 0xaba   : > { %v15319_v45 = vadd.f32 %v7462_v13, %v15131_v44  ;;  %v7366_v0 = vpop.f32.mrf.mxu1  ;;  %v7513_v57 = vpop.f32.mrf.mxu0 }
 0xabb   : > { %v15322_v43 = vadd.f32 %v7366_v0, %v15127_v2  ;;  %v15324_v54 = vadd.f32 %v7513_v57, %v5663_v55  ;;  %v17015_v55 = vld [vmem:[#allocation289_spill] sm:$0xff] }
 0xabc   : > { %v5876_v57 = vadd.f32 %v17015_v55, %v16986_v34  ;;  %v7687_v34 = vmax.f32 %v15236_v32, 0.0  ;;  %v7683_v55 = vmax.f32 %v15222_v41, 0.0  ;;  %v17019_v32 = vld [vmem:[#allocation296_spill] sm:$0xff] }
 0xabd   : > { %17010 = vst [vmem:[#allocation87_spill] sm:$0xff] %v15324_v54  ;;  %v17032_v54 = vld [vmem:[#allocation275_spill] sm:$0xff] }
 0xac0   : > { %v7609_v51 = vpop.f32.mrf.mxu2 }
 0xac1   : > { %v15328_v12 = vadd.f32 %v7609_v51, %v5874_v49  ;;  %v7464_v4 = vpop.f32.mrf.mxu3 }
 0xac2   : > { %v15333_v44 = vadd.f32 %v7464_v4, %v15149_v63  ;;  %v7369_v13 = vpop.f32.mrf.mxu1  ;;  %v7516_v3 = vpop.f32.mrf.mxu0  ;;  %v5879_v4 = vadd.f32 %v17017_v5, %v16989_v28  ;;  %v7684_v28 = vmax.f32 %v15231_v38, 0.0  ;;  %v17020_v5 = vld [vmem:[#allocation270_spill] sm:$0xff] }
 0xac3   : > { %17012 = vst [vmem:[#allocation11_spill] sm:$0xff] %v15328_v12  ;;  %v7370_v2 = vadd.f32 %v7369_v13, %v15143_v8  ;;  %v15336_v0 = vadd.f32 %v7516_v3, %v5666_v50 }
 0xac5   : > { %17014 = vst [vmem:[#allocation17_spill] sm:$0xff] %v15336_v0  ;;  %7564 = vmatmul.bf16.gmra.mxu1 %v15141_v19 }
 0xac6   : > { %7662 = vmatmul.bf16.gmra.mxu3 %v15141_v19  ;;  %v15355_v19 = vpack.c.bf16 %v7687_v34, %v7683_v55 }
 0xac8   : > { %v7611_v6 = vpop.f32.mrf.mxu2 }
 0xac9   : > { %v15341_v29 = vadd.f32 %v7611_v6, %v5876_v57  ;;  %v7467_v49 = vpop.f32.mrf.mxu3 }
 0xaca   : > { %v7468_v63 = vadd.f32 %v7467_v49, %v15157_v48  ;;  %v7371_v51 = vpop.f32.mrf.mxu1  ;;  %v7688_v48 = vmax.f32 %v15245_v60, 0.0  ;;  %v7691_v60 = vmax.f32 %v15248_v62, 0.0 }
 0xacb   : > { %17016 = vst [vmem:[#allocation14_spill] sm:$0xff] %v15341_v29  ;;  %v7699_v29 = vmax.f32 %v15276_v23, 0.0  ;;  %v17025_v23 = vld [vmem:[#allocation290_spill] sm:$0xff] }
 0xacc   : > { %v15363_v49 = vpack.c.bf16 %v7688_v48, %v7684_v28  ;;  %v7696_v48 = vmax.f32 %v15273_v25, 0.0  ;;  %v17021_v28 = vld [vmem:[#allocation271_spill] sm:$0xff]  ;;  %v7703_v25 = vmax.f32 %v15292_v20, 0.0 }
 0xad0   : > { %v7614_v8 = vpop.f32.mrf.mxu2 }
 0xad1   : > { %v15347_v3 = vadd.f32 %v7614_v8, %v5879_v4  ;;  %v7469_v50 = vpop.f32.mrf.mxu3  ;;  %v5242_v4 = vadd.f32 %v17020_v5, %v17019_v32  ;;  %v7695_v8 = vmax.f32 %v15262_v58, 0.0  ;;  %v5455_v5 = vadd.f32 %v17021_v28, %v17019_v32 }
 0xad2   : > { %v15350_v13 = vpop.f32.mrf.mxu1  ;;  %v7692_v58 = vmax.f32 %v15259_v61, 0.0  ;;  %v7707_v32 = vmax.f32 %v15306_v46, 0.0  ;;  %v17024_v46 = vld [vmem:[#allocation326_spill] sm:$0xff] }
 0xad3   : > { %17018 = vst [vmem:[#allocation54_spill] sm:$0xff] %v15347_v3  ;;  %v7323_v34 = vadd.f32 %v15153_v27, %v5242_v4  ;;  %v15374_v38 = vpack.c.bf16 %v7695_v8, %v7691_v60  ;;  %v7421_v62 = vadd.f32 %v15169_v26, %v5455_v5  ;;  %v7711_v8 = vmax.f32 %v15322_v43, 0.0 }
 0xad4   : > { %v15383_v4 = vpack.c.bf16 %v7696_v48, %v7692_v58  ;;  %v7712_v60 = vmax.f32 %v15333_v44, 0.0  ;;  %v7708_v26 = vmax.f32 %v15319_v45, 0.0  ;;  %v15400_v43 = vpack.c.bf16 %v7703_v25, %v7699_v29  ;;  %v17026_v45 = vld [vmem:[#allocation283_spill] sm:$0xff] }
 0xad5   : > { %7569 = vmatmul.bf16.gmra.mxu1 %v15165_v47  ;;  %v7372_v55 = vadd.f32 %v7371_v51, %v7323_v34  ;;  %v7715_v51 = vmax.f32 %v7370_v2, 0.0  ;;  %v7470_v34 = vadd.f32 %v7469_v50, %v7421_v62  ;;  %v7716_v2 = vmax.f32 %v7468_v63, 0.0  ;;  %v17023_v50 = vld [vmem:[#allocation294_spill] sm:$0xff]  ;;  %v17027_v63 = vld [vmem:[#allocation300_spill] sm:$0xff] }
 0xad6   : > { %7667 = vmatmul.bf16.gmra.mxu3 %v15165_v47  ;;  %v15393_v48 = vpack.c.bf16 %v7711_v8, %v7707_v32  ;;  %v15402_v44 = vpack.c.bf16 %v7712_v60, %v7708_v26  ;;  %v5252_v58 = vadd.f32 %v17025_v23, %v17024_v46  ;;  %v5257_v32 = vadd.f32 %v17027_v63, %v17026_v45  ;;  %v17029_v8 = vld [vmem:[#allocation285_spill] sm:$0xff] }
 0xad7   : > { %v7719_v3 = vmax.f32 %v7372_v55, 0.0  ;;  %v7720_v55 = vmax.f32 %v7470_v34, 0.0  ;;  %v17028_v34 = vld [vmem:[#allocation88_spill] sm:$0xff] }
 0xad8   : > { %v7333_v29 = vadd.f32 %v15195_v9, %v5252_v58  ;;  %v7338_v25 = vadd.f32 %v15215_v1, %v5257_v32 }
 0xad9   : > { %v15358_v57 = vpop.f32.mrf.mxu3  ;;  %v15398_v20 = vpack.c.bf16 %v7720_v55, %v7716_v2  ;;  %v5250_v55 = vadd.f32 %v17029_v8, %v17028_v34  ;;  %v17033_v8 = vld [vmem:[#allocation295_spill] sm:$0xff] }
 0xada   : > { %v15361_v6 = vpop.f32.mrf.mxu1 }
 0xadb   : > { %v7331_v63 = vadd.f32 %v15187_v59, %v5250_v55  ;;  %v17035_v59 = vld [vmem:[#allocation301_spill] sm:$0xff] }
 0xae1   : > { %v15367_v41 = vpop.f32.mrf.mxu3 }
 0xae2   : > { %v7379_v47 = vpop.f32.mrf.mxu1 }
 0xae5   : > { %7574 = vmatmul.bf16.gmra.mxu1 %v15185_v33 }
 0xae6   : > { %7672 = vmatmul.bf16.gmra.mxu3 %v15185_v33  ;;  %v15385_v33 = vpack.c.bf16 %v7719_v3, %v7715_v51  ;;  %v17022_v3 = vld [vmem:[#allocation319_spill] sm:$0xff]  ;;  %v7704_v51 = vmax.f32 %v15303_v30, 0.0  ;;  %v17031_v30 = vld [vmem:[#allocation288_spill] sm:$0xff] }
 0xae7   : > { %v5255_v5 = vadd.f32 %v17023_v50, %v17022_v3  ;;  %v17030_v50 = vld [vmem:[#allocation280_spill] sm:$0xff]  ;;  %v5245_v12 = vadd.f32 %v17032_v54, %v17031_v30  ;;  %v5468_v9 = vadd.f32 %v17033_v8, %v17022_v3 }
 0xae8   : > { %v5247_v23 = vadd.f32 %v17030_v50, %v14921_v52 }
 0xae9   : > { %v15379_v0 = vpop.f32.mrf.mxu3  ;;  %v7336_v62 = vadd.f32 %v15207_v14, %v5255_v5  ;;  %v7434_v55 = vadd.f32 %v15217_v7, %v5468_v9  ;;  %v7326_v54 = vadd.f32 %v15167_v17, %v5245_v12  ;;  %v17037_v7 = vld [vmem:[#allocation281_spill] sm:$0xff]  ;;  %v17038_v9 = vld [vmem:[#allocation276_spill] sm:$0xff] }
 0xaea   : > { %v7381_v27 = vpop.f32.mrf.mxu1  ;;  %v7328_v1 = vadd.f32 %v15175_v11, %v5247_v23  ;;  %v5460_v17 = vadd.f32 %v17037_v7, %v14921_v52 }
 0xaeb   : > { %v7382_v14 = vadd.f32 %v7381_v27, %v7333_v29  ;;  %v5470_v27 = vadd.f32 %v17035_v59, %v17026_v45  ;;  %v7375_v23 = vadd.f32 %v15350_v13, %v7326_v54 }
 0xaec   : > { %v7377_v29 = vadd.f32 %v15361_v6, %v7328_v1  ;;  %v5458_v1 = vadd.f32 %v17038_v9, %v17031_v30  ;;  %v7426_v13 = vadd.f32 %v15189_v35, %v5460_v17 }
 0xaf1   : > { %v7479_v28 = vpop.f32.mrf.mxu3 }
 0xaf2   : > { %v7384_v61 = vpop.f32.mrf.mxu1 }
 0xaf3   : > { %v7385_v60 = vadd.f32 %v7384_v61, %v7336_v62  ;;  %v7380_v61 = vadd.f32 %v7379_v47, %v7331_v63  ;;  %v17034_v62 = vld [vmem:[#allocation291_spill] sm:$0xff] }
 0xaf4   : > { %v5465_v50 = vadd.f32 %v17034_v62, %v17024_v46  ;;  %v7723_v62 = vmax.f32 %v7375_v23, 0.0 }
 0xaf5   : > { %7579 = vmatmul.bf16.gmra.mxu1 %v15205_v10  ;;  %v7731_v63 = vmax.f32 %v7380_v61, 0.0 }
 0xaf6   : > { %7677 = vmatmul.bf16.gmra.mxu3 %v15205_v10  ;;  %v7700_v10 = vmax.f32 %v15289_v42, 0.0  ;;  %v7739_v42 = vmax.f32 %v7385_v60, 0.0  ;;  %v7431_v47 = vadd.f32 %v15209_v24, %v5465_v50  ;;  %v7436_v60 = vadd.f32 %v15226_v39, %v5470_v27 }
 0xaf7   : > { %v7727_v24 = vmax.f32 %v7377_v29, 0.0 }
 0xaf8   : > { %v15423_v58 = vpack.c.bf16 %v7704_v51, %v7700_v10  ;;  %v17036_v10 = vld [vmem:[#allocation286_spill] sm:$0xff]  ;;  %v7480_v6 = vadd.f32 %v7479_v28, %v7431_v47  ;;  %v7475_v28 = vadd.f32 %v15367_v41, %v7426_v13  ;;  %v17041_v13 = vld [vmem:[#allocation11_spill] sm:$0xff] }
 0xaf9   : > { %v7482_v26 = vpop.f32.mrf.mxu3  ;;  %v5463_v11 = vadd.f32 %v17036_v10, %v17028_v34  ;;  %v7767_v27 = vpack.c.bf16 %v7727_v24, %v7723_v62 }
 0xafa   : > { %v7386_v2 = vpop.f32.mrf.mxu1  ;;  %v7736_v50 = vmax.f32 %v7480_v6, 0.0  ;;  %v7728_v35 = vmax.f32 %v7475_v28, 0.0 }
 0xafb   : > { %v7387_v5 = vadd.f32 %v7386_v2, %v7338_v25  ;;  %v7735_v25 = vmax.f32 %v7382_v14, 0.0  ;;  %v7483_v2 = vadd.f32 %v7482_v26, %v7434_v55  ;;  %v7429_v12 = vadd.f32 %v15197_v53, %v5463_v11 }
 0xafc   : > { %v7424_v53 = vadd.f32 %v15177_v21, %v5458_v1 }
 0xafd   : > { %v7743_v32 = vmax.f32 %v7387_v5, 0.0  ;;  %v7771_v26 = vpack.c.bf16 %v7735_v25, %v7731_v63  ;;  %v7478_v61 = vadd.f32 %v15379_v0, %v7429_v12 }
 0xafe   : > { %v7473_v55 = vadd.f32 %v15358_v57, %v7424_v53 }
 0xaff   : > { %v7775_v51 = vpack.c.bf16 %v7743_v32, %v7739_v42  ;;  %v7740_v42 = vmax.f32 %v7483_v2, 0.0 }
 0xb01   : > { %v7484_v5 = vpop.f32.mrf.mxu3  ;;  %7811 = vmatpush.bf16.msrb.mxu0 %v7775_v51  ;;  %v7724_v51 = vmax.f32 %v7473_v55, 0.0  ;;  %v17043_v55 = vld [vmem:[#allocation14_spill] sm:$0xff] }
 0xb02   : > { %v7485_v14 = vadd.f32 %v7484_v5, %v7436_v60  ;;  %v7545_v8 = vpop.f32.mrf.mxu1 }
 0xb03   : > { %v15444_v39 = vadd.f32 %v7545_v8, %v15224_v40  ;;  %v7732_v40 = vmax.f32 %v7478_v61, 0.0  ;;  %v7768_v21 = vpack.c.bf16 %v7728_v35, %v7724_v51  ;;  %v17040_v8 = vld [vmem:[#allocation13_spill] sm:$0xff] }
 0xb04   : > { %v7744_v32 = vmax.f32 %v7485_v14, 0.0  ;;  %v17044_v35 = vld [vmem:[#allocation17_spill] sm:$0xff] }
 0xb05   : > { %7812 = vmatpush.bf16.msrb.mxu0 %v7771_v26  ;;  %v7772_v25 = vpack.c.bf16 %v7736_v50, %v7732_v40  ;;  %v7518_v26 = vpop.f32.mrf.mxu0 }
 0xb06   : > { %v7776_v59 = vpack.c.bf16 %v7744_v32, %v7740_v42  ;;  %v17042_v32 = vld [vmem:[#allocation87_spill] sm:$0xff] }
 0xb08   : > { %7840 = vmatpush.bf16.msrb.mxu1 %v7776_v59  ;;  %v7616_v59 = vpop.f32.mrf.mxu2 }
 0xb09   : > { %v7643_v54 = vpop.f32.mrf.mxu3  ;;  %7813 = vmatpush.bf16.msrb.mxu0 %v7767_v27 }
 0xb0a   : > { %v15452_v0 = vadd.f32 %v7643_v54, %v15240_v36  ;;  %v15454_v29 = vpop.f32.mrf.mxu1 }
 0xb0c   : > { %7841 = vmatpush.bf16.msrb.mxu1 %v7772_v25 }
 0xb0d   : > { %7814 = vmatpush.bf16.msrb.mxu0 %v15385_v33  ;;  %v15511_v51 = vpop.f32.mrf.mxu0 }
 0xb10   : > { %7842 = vmatpush.bf16.msrb.mxu1 %v7768_v21 }
 0xb11   : > { %v15457_v41 = vpop.f32.mrf.mxu3  ;;  %7815 = vmatpush.bf16.msrb.mxu0 %v15393_v48 }
 0xb12   : > { %v7550_v57 = vpop.f32.mrf.mxu1 }
 0xb13   : > { %v7551_v10 = vadd.f32 %v7550_v57, %v15250_v31  ;;  %v15471_v31 = vld [vmem:[%s15742_s10] sm:$0xff] }
 0xb14   : > { %7843 = vmatpush.bf16.msrb.mxu1 %v15398_v20 }
 0xb15   : > { %7816 = vmatpush.bf16.msrb.mxu0 %v15400_v43  ;;  %v7693_v48 = vmax.f32 %v7551_v10, 0.0 }
 0xb18   : > { %7844 = vmatpush.bf16.msrb.mxu1 %v15402_v44  ;;  %v17039_v44 = vld [vmem:[#allocation34_spill] sm:$0xff] }
 0xb19   : > { %v7648_v36 = vpop.f32.mrf.mxu3  ;;  %7817 = vmatpush.bf16.msrb.mxu0 %v15374_v38 }
 0xb1a   : > { %v7649_v33 = vadd.f32 %v7648_v36, %v15268_v56  ;;  %v7552_v11 = vpop.f32.mrf.mxu1  ;;  %v17045_v36 = vld [vmem:[#allocation296_spill] sm:$0xff] }
 0xb1b   : > { %v7553_v47 = vadd.f32 %v7552_v11, %v15264_v22 }
 0xb1c   : > { %7845 = vmatpush.bf16.msrb.mxu1 %v15423_v58  ;;  %v7694_v60 = vmax.f32 %v7649_v33, 0.0  ;;  %v17046_v33 = vld [vmem:[#allocation292_spill] sm:$0xff] }
 0xb1d   : > { %v7697_v20 = vmax.f32 %v7553_v47, 0.0  ;;  %7818 = vmatpush.bf16.msrb.mxu0 %v15355_v19  ;;  %v5668_v11 = vadd.f32 %v17046_v33, %v17045_v36 }
 0xb1f   : > { %v15474_v43 = vpack.c.bf16 %v7697_v20, %v7693_v48  ;;  %v7519_v47 = vadd.f32 %v7518_v26, %v5668_v11  ;;  %v17047_v20 = vld [vmem:[#allocation351_spill] sm:$0xff]  ;;  %v17053_v26 = vld [vmem:[#allocation117_spill] sm:$0xff] }
 0xb20   : > { %7846 = vmatpush.bf16.msrb.mxu1 %v15383_v4  ;;  %7819 = vmatmul.bf16.vlgmr.msrb.gmra.mxu0 %v15471_v31 }
 0xb21   : > { %v7650_v56 = vpop.f32.mrf.mxu3 }
 0xb22   : > { %v7651_v22 = vadd.f32 %v7650_v56, %v15283_v16  ;;  %v7555_v38 = vpop.f32.mrf.mxu1  ;;  %v15489_v16 = vld [vmem:[%s15742_s10 + $0x8] sm:$0xff] }
 0xb23   : > { %v7556_v58 = vadd.f32 %v7555_v38, %v17039_v44  ;;  %v17048_v56 = vld [vmem:[#allocation254_spill] sm:$0xff] }
 0xb24   : > { %v7698_v2 = vmax.f32 %v7651_v22, 0.0  ;;  %7847 = vmatpush.bf16.msrb.mxu1 %v15363_v49  ;;  %v5648_v22 = vadd.f32 %v17048_v56, %v17047_v20  ;;  %v17049_v38 = vld [vmem:[#allocation54_spill] sm:$0xff] }
 0xb25   : > { %v7701_v7 = vmax.f32 %v7556_v58, 0.0 }
 0xb26   : > { %v15481_v23 = vpack.c.bf16 %v7698_v2, %v7694_v60  ;;  %v15521_v60 = vpop.f32.mrf.mxu2 }
 0xb27   : > { %7848 = vmatmul.bf16.vlgmr.msrb.gmra.mxu1 %v15471_v31 }
 0xb29   : > { %v7653_v19 = vpop.f32.mrf.mxu3 }
 0xb2a   : > { %v7654_v63 = vadd.f32 %v7653_v19, %v15298_v37  ;;  %v7557_v4 = vpop.f32.mrf.mxu1  ;;  %v17050_v19 = vld [vmem:[#allocation53_spill] sm:$0xff] }
 0xb2b   : > { %v7558_v5 = vadd.f32 %v7557_v4, %v15294_v18  ;;  %v15527_v4 = vld [vmem:[%s15742_s10 + $0x18] sm:$0xff] }
 0xb2c   : > { %v7702_v9 = vmax.f32 %v7654_v63, 0.0  ;;  %v7499_v63 = vadd.f32 %v17050_v19, %v5648_v22 }
 0xb2d   : > { %v7705_v17 = vmax.f32 %v7558_v5, 0.0 }
 0xb2f   : > { %v15491_v12 = vpack.c.bf16 %v7705_v17, %v7701_v7  ;;  %v17051_v17 = vld [vmem:[#allocation299_spill] sm:$0xff] }
 0xb30   : > { %7824 = vmatmul.bf16.gmra.mxu0 %v15489_v16 }
 0xb31   : > { %v7655_v49 = vpop.f32.mrf.mxu3 }
 0xb32   : > { %v7656_v6 = vadd.f32 %v7655_v49, %v15313_v15  ;;  %v7560_v14 = vpop.f32.mrf.mxu1  ;;  %v15504_v15 = vld [vmem:[%s15742_s10 + $0x10] sm:$0xff]  ;;  %v5881_v49 = vadd.f32 %v17051_v17, %v17045_v36  ;;  %v17057_v17 = vld [vmem:[#allocation308_spill] sm:$0xff] }
 0xb33   : > { %v7561_v37 = vadd.f32 %v7560_v14, %v17040_v8  ;;  %v7548_v14 = vadd.f32 %v15454_v29, %v7499_v63  ;;  %v17056_v63 = vld [vmem:[#allocation325_spill] sm:$0xff] }
 0xb34   : > { %v7706_v1 = vmax.f32 %v7656_v6, 0.0  ;;  %v7523_v6 = vpop.f32.mrf.mxu0 }
 0xb35   : > { %v7709_v53 = vmax.f32 %v7561_v37, 0.0  ;;  %v17052_v37 = vld [vmem:[#allocation260_spill] sm:$0xff] }
 0xb36   : > { %v15496_v18 = vpack.c.bf16 %v7706_v1, %v7702_v9  ;;  %v5861_v9 = vadd.f32 %v17052_v37, %v17047_v20  ;;  %v7617_v1 = vadd.f32 %v7616_v59, %v5881_v49  ;;  %v5676_v49 = vadd.f32 %v17057_v17, %v17028_v34  ;;  %v17063_v17 = vld [vmem:[#allocation316_spill] sm:$0xff] }
 0xb37   : > { %7853 = vmatmul.bf16.gmra.mxu1 %v15489_v16 }
 0xb39   : > { %v7658_v24 = vpop.f32.mrf.mxu3 }
 0xb3a   : > { %v7659_v61 = vadd.f32 %v7658_v24, %v17041_v13  ;;  %v7562_v42 = vpop.f32.mrf.mxu1  ;;  %v7597_v13 = vadd.f32 %v17053_v26, %v5861_v9  ;;  %v17058_v26 = vld [vmem:[#allocation303_spill] sm:$0xff] }
 0xb3b   : > { %v7563_v62 = vadd.f32 %v7562_v42, %v17042_v32 }
 0xb3c   : > { %v7710_v21 = vmax.f32 %v7659_v61, 0.0  ;;  %v7689_v61 = vmax.f32 %v7548_v14, 0.0  ;;  %v7526_v59 = vpop.f32.mrf.mxu0 }
 0xb3d   : > { %v7713_v28 = vmax.f32 %v7563_v62, 0.0  ;;  %v7685_v62 = vmax.f32 %v15444_v39, 0.0 }
 0xb3f   : > { %v15506_v50 = vpack.c.bf16 %v7713_v28, %v7709_v53  ;;  %v7646_v53 = vadd.f32 %v15457_v41, %v7597_v13  ;;  %v5673_v13 = vadd.f32 %v17058_v26, %v14921_v52 }
 0xb40   : > { %7829 = vmatmul.bf16.gmra.mxu0 %v15504_v15 }
 0xb41   : > { %v7660_v27 = vpop.f32.mrf.mxu3 }
 0xb42   : > { %v7661_v40 = vadd.f32 %v7660_v27, %v17043_v55  ;;  %v7565_v54 = vpop.f32.mrf.mxu1  ;;  %v15540_v27 = vpop.f32.mrf.mxu2 }
 0xb43   : > { %v7566_v25 = vadd.f32 %v7565_v54, %v17044_v35  ;;  %v7690_v54 = vmax.f32 %v7646_v53, 0.0  ;;  %v17059_v53 = vld [vmem:[#allocation297_spill] sm:$0xff] }
 0xb44   : > { %v7714_v57 = vmax.f32 %v7661_v40, 0.0  ;;  %v15544_v40 = vpack.c.bf16 %v7689_v61, %v7685_v62  ;;  %v7528_v36 = vpop.f32.mrf.mxu0  ;;  %v7527_v61 = vadd.f32 %v7526_v59, %v5676_v49 }
 0xb45   : > { %v7717_v5 = vmax.f32 %v7566_v25, 0.0  ;;  %v7686_v25 = vmax.f32 %v15452_v0, 0.0  ;;  %v17055_v0 = vld [vmem:[#allocation314_spill] sm:$0xff] }
 0xb46   : > { %v15513_v10 = vpack.c.bf16 %v7714_v57, %v7710_v21  ;;  %v5678_v19 = vadd.f32 %v17055_v0, %v17024_v46  ;;  %v17062_v0 = vld [vmem:[#allocation333_spill] sm:$0xff] }
 0xb47   : > { %7858 = vmatmul.bf16.gmra.mxu1 %v15504_v15  ;;  %v15550_v39 = vpack.c.bf16 %v7690_v54, %v7686_v25  ;;  %v7524_v25 = vadd.f32 %v7523_v6, %v5673_v13 }
 0xb48   : > { %v7529_v14 = vadd.f32 %v7528_v36, %v5678_v19  ;;  %v5896_v19 = vadd.f32 %v17062_v0, %v17026_v45 }
 0xb49   : > { %v7663_v48 = vpop.f32.mrf.mxu3 }
 0xb4a   : > { %v7664_v44 = vadd.f32 %v7663_v48, %v17049_v38  ;;  %v7567_v58 = vpop.f32.mrf.mxu1  ;;  %v7624_v41 = vpop.f32.mrf.mxu2 }
 0xb4b   : > { %v7568_v2 = vadd.f32 %v7567_v58, %v7519_v47 }
 0xb4c   : > { %v7718_v28 = vmax.f32 %v7664_v44, 0.0  ;;  %v7531_v20 = vpop.f32.mrf.mxu0  ;;  %v17054_v44 = vld [vmem:[#allocation320_spill] sm:$0xff] }
 0xb4d   : > { %v7721_v7 = vmax.f32 %v7568_v2, 0.0  ;;  %v5681_v58 = vadd.f32 %v17054_v44, %v17022_v3 }
 0xb4f   : > { %v15532_v8 = vpack.c.bf16 %v7721_v7, %v7717_v5  ;;  %v5683_v5 = vadd.f32 %v17056_v63, %v17026_v45  ;;  %v7532_v7 = vadd.f32 %v7531_v20, %v5681_v58 }
 0xb50   : > { %7834 = vmatmul.bf16.gmra.mxu0 %v15527_v4 }
 0xb51   : > { %v7665_v24 = vpop.f32.mrf.mxu3 }
 0xb52   : > { %v7666_v42 = vadd.f32 %v7665_v24, %v7617_v1  ;;  %v7570_v32 = vpop.f32.mrf.mxu1  ;;  %v7626_v11 = vpop.f32.mrf.mxu2 }
 0xb54   : > { %v7722_v29 = vmax.f32 %v7666_v42, 0.0  ;;  %v7533_v2 = vpop.f32.mrf.mxu0 }
 0xb55   : > { %v7534_v37 = vadd.f32 %v7533_v2, %v5683_v5 }
 0xb56   : > { %v15542_v55 = vpack.c.bf16 %v7722_v29, %v7718_v28  ;;  %v5671_v28 = vadd.f32 %v17059_v53, %v17031_v30  ;;  %v17060_v29 = vld [vmem:[#allocation327_spill] sm:$0xff] }
 0xb57   : > { %7863 = vmatmul.bf16.gmra.mxu1 %v15527_v4  ;;  %v5894_v54 = vadd.f32 %v17060_v29, %v17022_v3  ;;  %v5889_v3 = vadd.f32 %v17063_v17, %v17028_v34 }
 0xb59   : > { %v15547_v35 = vpop.f32.mrf.mxu3  ;;  %v7625_v45 = vadd.f32 %v7624_v41, %v5889_v3 }
 0xb5a   : > { %v7572_v21 = vpop.f32.mrf.mxu1  ;;  %v7629_v38 = vpop.f32.mrf.mxu2 }
 0xb5b   : > { %v7630_v59 = vadd.f32 %v7629_v38, %v5894_v54  ;;  %v7573_v63 = vadd.f32 %v7572_v21, %v7524_v25 }
 0xb5d   : > { %v7729_v13 = vmax.f32 %v7573_v63, 0.0  ;;  %v17072_v63 = vld [vmem:[#allocation334_spill] sm:$0xff] }
 0xb61   : > { %v7670_v57 = vpop.f32.mrf.mxu3 }
 0xb62   : > { %v7575_v33 = vpop.f32.mrf.mxu1  ;;  %v7631_v20 = vpop.f32.mrf.mxu2 }
 0xb63   : > { %v7576_v44 = vadd.f32 %v7575_v33, %v7527_v61  ;;  %v7632_v49 = vadd.f32 %v7631_v20, %v5896_v19  ;;  %v17069_v19 = vld [vmem:[#allocation315_spill] sm:$0xff] }
 0xb69   : > { %v7673_v47 = vpop.f32.mrf.mxu3 }
 0xb6a   : > { %v7577_v48 = vpop.f32.mrf.mxu1 }
 0xb6b   : > { %v7578_v42 = vadd.f32 %v7577_v48, %v7529_v14  ;;  %v7522_v48 = vadd.f32 %v15511_v51, %v5671_v28  ;;  %v17065_v51 = vld [vmem:[#allocation305_spill] sm:$0xff] }
 0xb6c   : > { %v5884_v21 = vadd.f32 %v17065_v51, %v17031_v30 }
 0xb6d   : > { %v7737_v5 = vmax.f32 %v7578_v42, 0.0  ;;  %v7571_v14 = vadd.f32 %v7570_v32, %v7522_v48 }
 0xb6f   : > { %v7725_v32 = vmax.f32 %v7571_v14, 0.0 }
 0xb71   : > { %v7675_v56 = vpop.f32.mrf.mxu3  ;;  %v7769_v41 = vpack.c.bf16 %v7729_v13, %v7725_v32 }
 0xb72   : > { %v7580_v22 = vpop.f32.mrf.mxu1 }
 0xb73   : > { %v7581_v9 = vadd.f32 %v7580_v22, %v7532_v7  ;;  %v17061_v22 = vld [vmem:[#allocation321_spill] sm:$0xff] }
 0xb74   : > { %v5891_v2 = vadd.f32 %v17061_v22, %v17024_v46  ;;  %v17064_v46 = vld [vmem:[#allocation310_spill] sm:$0xff]  ;;  %v15605_v22 = vpop.permute.xlu1 %4729 }
 0xb75   : > { %v7741_v36 = vmax.f32 %v7581_v9, 0.0 }
 0xb76   : > { %v7627_v6 = vadd.f32 %v7626_v11, %v5891_v2  ;;  %v7674_v11 = vadd.f32 %v7673_v47, %v7625_v45 }
 0xb78   : > { %v7676_v38 = vadd.f32 %v7675_v56, %v7627_v6  ;;  %v7734_v29 = vmax.f32 %v7674_v11, 0.0 }
 0xb79   : > { %v7678_v1 = vpop.f32.mrf.mxu3 }
 0xb7a   : > { %v7582_v24 = vpop.f32.mrf.mxu1  ;;  %v7679_v33 = vadd.f32 %v7678_v1, %v7630_v59  ;;  %v7738_v28 = vmax.f32 %v7676_v38, 0.0  ;;  %v17070_v59 = vld [vmem:[#allocation338_spill] sm:$0xff] }
 0xb7b   : > { %v7583_v62 = vadd.f32 %v7582_v24, %v7534_v37  ;;  %v7733_v37 = vmax.f32 %v7576_v44, 0.0  ;;  %v5886_v24 = vadd.f32 %v17064_v46, %v14921_v52  ;;  %v5275_v48 = vadd.f32 %v17070_v59, %v17069_v19  ;;  %v17076_v46 = vld [vmem:[#allocation358_spill] sm:$0xff] }
 0xb7c   : > { %v7742_v42 = vmax.f32 %v7679_v33, 0.0  ;;  %v7774_v54 = vpack.c.bf16 %v7738_v28, %v7734_v29  ;;  %v15609_v0 = vpop.permute.xlu1 %4704  ;;  %v17074_v33 = vld [vmem:[#allocation354_spill] sm:$0xff] }
 0xb7d   : > { %v7745_v58 = vmax.f32 %v7583_v62, 0.0  ;;  %v7773_v61 = vpack.c.bf16 %v7737_v5, %v7733_v37  ;;  %v7622_v34 = vadd.f32 %v15540_v27, %v5886_v24  ;;  %v7620_v62 = vadd.f32 %v15521_v60, %v5884_v21  ;;  %v17066_v60 = vld [vmem:[#allocation330_spill] sm:$0xff]  ;;  %v17078_v21 = vld [vmem:[#allocation339_spill] sm:$0xff] }
 0xb7e   : > { %v17077_v24 = vld [vmem:[#allocation322_spill] sm:$0xff]  ;;  %v5488_v13 = vadd.f32 %v17078_v21, %v17069_v19 }
 0xb7f   : > { %v7777_v7 = vpack.c.bf16 %v7745_v58, %v7741_v36  ;;  %v7671_v53 = vadd.f32 %v7670_v57, %v7622_v34  ;;  %v7669_v56 = vadd.f32 %v15547_v35, %v7620_v62  ;;  %v17067_v35 = vld [vmem:[#allocation306_spill] sm:$0xff]  ;;  %v5267_v45 = vadd.f32 %v17077_v24, %v17076_v46  ;;  %v17080_v62 = vld [vmem:[#allocation335_spill] sm:$0xff] }
 0xb80   : > { %v5260_v57 = vadd.f32 %v17067_v35, %v17066_v60 }
 0xb81   : > { %v7680_v9 = vpop.f32.mrf.mxu3  ;;  %7869 = vmatpush.bf16.msrb.mxu2 %v7777_v7  ;;  %v7730_v30 = vmax.f32 %v7671_v53, 0.0  ;;  %v7726_v25 = vmax.f32 %v7669_v56, 0.0  ;;  %v17073_v7 = vld [vmem:[#allocation343_spill] sm:$0xff] }
 0xb82   : > { %v7681_v26 = vadd.f32 %v7680_v9, %v7632_v49  ;;  %v5277_v17 = vadd.f32 %v17073_v7, %v15605_v22 }
 0xb83   : > { %v7770_v27 = vpack.c.bf16 %v7730_v30, %v7726_v25  ;;  %v17083_v25 = vld [vmem:[#allocation329_spill] sm:$0xff] }
 0xb84   : > { %v7746_v1 = vmax.f32 %v7681_v26, 0.0  ;;  %v4700_v32 = vpop.permute.xlu1 %4699 }
 0xb85   : > { %7870 = vmatpush.bf16.msrb.mxu2 %v7773_v61  ;;  %v17079_v61 = vld [vmem:[#allocation317_spill] sm:$0xff] }
 0xb86   : > { %v7778_v52 = vpack.c.bf16 %v7746_v1, %v7742_v42  ;;  %v5265_v34 = vadd.f32 %v17079_v61, %v15609_v0  ;;  %v17089_v61 = vld [vmem:[#allocation337_spill] sm:$0xff] }
 0xb88   : > { %7898 = vmatpush.bf16.msrb.mxu3 %v7778_v52 }
 0xb89   : > { %7871 = vmatpush.bf16.msrb.mxu2 %v7769_v41  ;;  %v17082_v41 = vld [vmem:[#allocation311_spill] sm:$0xff] }
 0xb8a   : > { %v5262_v56 = vadd.f32 %v17082_v41, %v4700_v32 }
 0xb8c   : > { %7899 = vmatpush.bf16.msrb.mxu3 %v7774_v54 }
 0xb8d   : > { %7872 = vmatpush.bf16.msrb.mxu2 %v15532_v8 }
 0xb90   : > { %7900 = vmatpush.bf16.msrb.mxu3 %v7770_v27  ;;  %v5483_v27 = vadd.f32 %v17083_v25, %v17074_v33 }
 0xb91   : > { %7873 = vmatpush.bf16.msrb.mxu2 %v15506_v50 }
 0xb94   : > { %7901 = vmatpush.bf16.msrb.mxu3 %v15542_v55 }
 0xb95   : > { %7874 = vmatpush.bf16.msrb.mxu2 %v15491_v12  ;;  %v17068_v12 = vld [vmem:[#allocation307_spill] sm:$0xff] }
 0xb96   : > { %v5473_v50 = vadd.f32 %v17068_v12, %v17066_v60 }
 0xb98   : > { %7902 = vmatpush.bf16.msrb.mxu3 %v15513_v10 }
 0xb99   : > { %7875 = vmatpush.bf16.msrb.mxu2 %v15474_v43 }
 0xb9c   : > { %7903 = vmatpush.bf16.msrb.mxu3 %v15496_v18 }
 0xb9d   : > { %v7820_v47 = vpop.f32.mrf.mxu0  ;;  %7876 = vmatpush.bf16.msrb.mxu2 %v15544_v40 }
 0xb9e   : > { %v15590_v8 = vadd.f32 %v7820_v47, %v5260_v57 }
 0xba0   : > { %7904 = vmatpush.bf16.msrb.mxu3 %v15481_v23  ;;  %7877 = vmatmul.bf16.vlgmr.msrb.gmra.mxu2 %v15471_v31 }
 0xba4   : > { %v7849_v10 = vpop.f32.mrf.mxu1  ;;  %7905 = vmatpush.bf16.msrb.mxu3 %v15550_v39 }
 0xba5   : > { %v15597_v43 = vadd.f32 %v7849_v10, %v5473_v50  ;;  %v7822_v55 = vpop.f32.mrf.mxu0  ;;  %v17084_v50 = vld [vmem:[#allocation323_spill] sm:$0xff] }
 0xba6   : > { %v7823_v57 = vadd.f32 %v7822_v55, %v5262_v56  ;;  %v5480_v10 = vadd.f32 %v17084_v50, %v17076_v46  ;;  %v17091_v50 = vld [vmem:[#allocation356_spill] sm:$0xff] }
 0xba7   : > { %7906 = vmatmul.bf16.vlgmr.msrb.gmra.mxu3 %v15471_v31 }
 0xba8   : > { %v7931_v7 = vmax.f32 %v7823_v57, 0.0 }
 0xbac   : > { %v15600_v18 = vpop.f32.mrf.mxu1 }
 0xbad   : > { %v7825_v40 = vpop.f32.mrf.mxu0 }
 0xbae   : > { %v7826_v29 = vadd.f32 %v7825_v40, %v5265_v34  ;;  %v17085_v40 = vld [vmem:[#allocation318_spill] sm:$0xff] }
 0xbaf   : > { %v5478_v59 = vadd.f32 %v17085_v40, %v15609_v0 }
 0xbb0   : > { %7882 = vmatmul.bf16.gmra.mxu2 %v15489_v16 }
 0xbb4   : > { %v7854_v20 = vpop.f32.mrf.mxu1 }
 0xbb5   : > { %v7827_v23 = vpop.f32.mrf.mxu0 }
 0xbb6   : > { %v7828_v11 = vadd.f32 %v7827_v23, %v5267_v45  ;;  %v7928_v45 = vmax.f32 %v15597_v43, 0.0 }
 0xbb7   : > { %7911 = vmatmul.bf16.gmra.mxu3 %v15489_v16  ;;  %v17071_v16 = vld [vmem:[#allocation324_spill] sm:$0xff] }
 0xbb8   : > { %v5272_v5 = vadd.f32 %v17072_v63, %v17071_v16  ;;  %v5485_v53 = vadd.f32 %v17080_v62, %v17071_v16  ;;  %v7939_v47 = vmax.f32 %v7828_v11, 0.0 }
 0xbbc   : > { %v7856_v44 = vpop.f32.mrf.mxu1 }
 0xbbd   : > { %v7830_v36 = vpop.f32.mrf.mxu0 }
 0xbc0   : > { %7887 = vmatmul.bf16.gmra.mxu2 %v15504_v15 }
 0xbc4   : > { %v7859_v58 = vpop.f32.mrf.mxu1 }
 0xbc5   : > { %v7832_v39 = vpop.f32.mrf.mxu0  ;;  %v7860_v23 = vadd.f32 %v7859_v58, %v5483_v27 }
 0xbc6   : > { %v7833_v37 = vadd.f32 %v7832_v39, %v5272_v5 }
 0xbc7   : > { %7916 = vmatmul.bf16.gmra.mxu3 %v15504_v15  ;;  %v17075_v15 = vld [vmem:[#allocation328_spill] sm:$0xff] }
 0xbc8   : > { %v5270_v14 = vadd.f32 %v17075_v15, %v17074_v33  ;;  %v7947_v42 = vmax.f32 %v7833_v37, 0.0 }
 0xbca   : > { %v7831_v38 = vadd.f32 %v7830_v36, %v5270_v14 }
 0xbcc   : > { %v7861_v31 = vpop.f32.mrf.mxu1  ;;  %v7943_v30 = vmax.f32 %v7831_v38, 0.0  ;;  %v17087_v38 = vld [vmem:[#allocation331_spill] sm:$0xff] }
 0xbcd   : > { %v7835_v2 = vpop.f32.mrf.mxu0  ;;  %v7862_v60 = vadd.f32 %v7861_v31, %v5485_v53  ;;  %v17090_v53 = vld [vmem:[#allocation342_spill] sm:$0xff] }
 0xbce   : > { %v7836_v3 = vadd.f32 %v7835_v2, %v5275_v48  ;;  %v7967_v12 = vpack.c.bf16 %v7947_v42, %v7943_v30  ;;  %v7935_v2 = vmax.f32 %v7826_v29, 0.0  ;;  %v7857_v48 = vadd.f32 %v7856_v44, %v5480_v10  ;;  %v15643_v44 = vld [vmem:[%s15743_s11] sm:$0x3] }
 0xbcf   : > { %v7948_v63 = vmax.f32 %v7862_v60, 0.0  ;;  %v5701_v10 = vadd.f32 %v17091_v50, %v17069_v19  ;;  %v17104_v50 = vld [vmem:[#allocation348_spill] sm:$0xff] }
 0xbd0   : > { %7892 = vmatmul.bf16.gmra.mxu2 %v15527_v4  ;;  %v7951_v26 = vmax.f32 %v7836_v3, 0.0  ;;  %v7963_v31 = vpack.c.bf16 %v7939_v47, %v7935_v2  ;;  %v7855_v3 = vadd.f32 %v7854_v20, %v5478_v59  ;;  %v7940_v15 = vmax.f32 %v7857_v48, 0.0  ;;  %v17094_v48 = vld [vmem:[#allocation350_spill] sm:$0xff] }
 0xbd4   : > { %v7864_v6 = vpop.f32.mrf.mxu1 }
 0xbd5   : > { %v7837_v49 = vpop.f32.mrf.mxu0  ;;  %v7865_v52 = vadd.f32 %v7864_v6, %v5488_v13  ;;  %v7944_v6 = vmax.f32 %v7860_v23, 0.0 }
 0xbd6   : > { %v7838_v9 = vadd.f32 %v7837_v49, %v5277_v17  ;;  %v17086_v17 = vld [vmem:[#allocation312_spill] sm:$0xff]  ;;  %v7927_v49 = vmax.f32 %v15590_v8, 0.0 }
 0xbd7   : > { %7921 = vmatmul.bf16.gmra.mxu3 %v15527_v4  ;;  %v17081_v4 = vld [vmem:[#allocation344_spill] sm:$0xff]  ;;  %v7952_v36 = vmax.f32 %v7865_v52, 0.0  ;;  %v5475_v55 = vadd.f32 %v17086_v17, %v4700_v32  ;;  %v7968_v14 = vpack.c.bf16 %v7948_v63, %v7944_v6  ;;  %v5696_v63 = vadd.f32 %v17094_v48, %v17074_v33 }
 0xbd8   : > { %v7955_v51 = vmax.f32 %v7838_v9, 0.0  ;;  %v5490_v28 = vadd.f32 %v17081_v4, %v15605_v22  ;;  %v7959_v37 = vpack.c.bf16 %v7931_v7, %v7927_v49  ;;  %v7936_v9 = vmax.f32 %v7855_v3, 0.0  ;;  %v17096_v49 = vld [vmem:[#allocation360_spill] sm:$0xff] }
 0xbd9   : > { %v7852_v58 = vadd.f32 %v15600_v18, %v5475_v55  ;;  %v5901_v4 = vadd.f32 %v17090_v53, %v4700_v32 }
 0xbda   : > { %v7971_v1 = vpack.c.bf16 %v7955_v51, %v7951_v26  ;;  %v7964_v20 = vpack.c.bf16 %v7940_v15, %v7936_v9  ;;  %v17088_v51 = vld [vmem:[#allocation336_spill] sm:$0xff]  ;;  %v17097_v15 = vld [vmem:[#allocation341_spill] sm:$0xff] }
 0xbdb   : > { %v7932_v24 = vmax.f32 %v7852_v58, 0.0  ;;  %v5688_v21 = vadd.f32 %v17088_v51, %v4700_v32  ;;  %v17092_v32 = vld [vmem:[#allocation353_spill] sm:$0xff]  ;;  %v5914_v58 = vadd.f32 %v17096_v49, %v17069_v19 }
 0xbdc   : > { %v7866_v54 = vpop.f32.mrf.mxu1  ;;  %7983 = vmatpush.bf16.msra.mxu0 %v7971_v1  ;;  %v5698_v23 = vadd.f32 %v17092_v32, %v17071_v16 }
 0xbdd   : > { %v7867_v35 = vadd.f32 %v7866_v54, %v5490_v28  ;;  %v7960_v8 = vpack.c.bf16 %v7932_v24, %v7928_v45 }
 0xbdf   : > { %v7956_v39 = vmax.f32 %v7867_v35, 0.0 }
 0xbe0   : > { %7984 = vmatpush.bf16.msra.mxu0 %v7967_v12 }
 0xbe1   : > { %v7972_v5 = vpack.c.bf16 %v7956_v39, %v7952_v36  ;;  %v17093_v36 = vld [vmem:[#allocation359_spill] sm:$0xff] }
 0xbe2   : > { %v5703_v39 = vadd.f32 %v17093_v36, %v15605_v22 }
 0xbe3   : > { %7996 = vmatpush.bf16.msra.mxu1 %v7972_v5 }
 0xbe4   : > { %7985 = vmatpush.bf16.msra.mxu0 %v7963_v31  ;;  %v17095_v31 = vld [vmem:[#allocation346_spill] sm:$0xff] }
 0xbe5   : > { %v5693_v17 = vadd.f32 %v17095_v31, %v17076_v46 }
 0xbe7   : > { %7997 = vmatpush.bf16.msra.mxu1 %v7968_v14  ;;  %v5691_v14 = vadd.f32 %v17097_v15, %v15609_v0 }
 0xbe8   : > { %7986 = vmatpush.bf16.msra.mxu0 %v7959_v37 }
 0xbeb   : > { %7998 = vmatpush.bf16.msra.mxu1 %v7964_v20  ;;  %8832 = vmatmul.msk.bf16.vlgmr.msra.gmra.mxu0 %vm6202_vm1, %v15643_v44  ;;  %v17098_v20 = vld [vmem:[#allocation357_spill] sm:$0xff] }
 0xbec   : > { %v5911_v45 = vadd.f32 %v17098_v20, %v17071_v16 }
 0xbef   : > { %7999 = vmatpush.bf16.msra.mxu1 %v7960_v8  ;;  %v17099_v8 = vld [vmem:[#allocation363_spill] sm:$0xff] }
 0xbf2   : > { %8833 = vmatmul.msk.bf16.vlgmr.msra.gmra.mxu1 %vm6202_vm1, %v15643_v44 }
 0xc23   : > { %v7878_v18 = vpop.f32.mrf.mxu2 }
 0xc24   : > { %v7879_v26 = vadd.f32 %v7878_v18, %v17087_v38  ;;  %v5916_v18 = vadd.f32 %v17099_v8, %v15605_v22  ;;  %v17102_v22 = vld [vmem:[#allocation347_spill] sm:$0xff] }
 0xc26   : > { %v7929_v43 = vmax.f32 %v7879_v26, 0.0 }
 0xc2a   : > { %v7907_v13 = vpop.f32.mrf.mxu3 }
 0xc2b   : > { %v7908_v34 = vadd.f32 %v7907_v13, %v17089_v61  ;;  %v7880_v11 = vpop.f32.mrf.mxu2  ;;  %v17100_v13 = vld [vmem:[#allocation355_spill] sm:$0xff] }
 0xc2c   : > { %v7881_v42 = vadd.f32 %v7880_v11, %v5688_v21  ;;  %v5909_v19 = vadd.f32 %v17100_v13, %v17074_v33 }
 0xc2d   : > { %v7930_v56 = vmax.f32 %v7908_v34, 0.0 }
 0xc2e   : > { %v7933_v1 = vmax.f32 %v7881_v42, 0.0 }
 0xc30   : > { %v15653_v62 = vpack.c.bf16 %v7933_v1, %v7929_v43  ;;  %v17101_v43 = vld [vmem:[#allocation352_spill] sm:$0xff] }
 0xc31   : > { %v5906_v1 = vadd.f32 %v17101_v43, %v17076_v46 }
 0xc32   : > { %v7909_v28 = vpop.f32.mrf.mxu3 }
 0xc33   : > { %v7910_v52 = vadd.f32 %v7909_v28, %v5901_v4  ;;  %v7883_v41 = vpop.f32.mrf.mxu2 }
 0xc34   : > { %v7884_v26 = vadd.f32 %v7883_v41, %v5691_v14 }
 0xc35   : > { %v7934_v29 = vmax.f32 %v7910_v52, 0.0  ;;  %v5904_v52 = vadd.f32 %v17102_v22, %v15609_v0  ;;  %v17105_v0 = vld [vmem:[#allocation349_spill] sm:$0xff] }
 0xc36   : > { %v7937_v28 = vmax.f32 %v7884_v26, 0.0 }
 0xc37   : > { %v15656_v30 = vpack.c.bf16 %v7934_v29, %v7930_v56 }
 0xc3a   : > { %v7912_v54 = vpop.f32.mrf.mxu3 }
 0xc3b   : > { %v7885_v25 = vpop.f32.mrf.mxu2 }
 0xc3c   : > { %v7886_v37 = vadd.f32 %v7885_v25, %v5693_v17  ;;  %v17107_v17 = vld [vmem:[#allocation364_spill] sm:$0xff] }
 0xc3e   : > { %v7941_v11 = vmax.f32 %v7886_v37, 0.0 }
 0xc40   : > { %v7965_v33 = vpack.c.bf16 %v7941_v11, %v7937_v28 }
 0xc42   : > { %v7914_v27 = vpop.f32.mrf.mxu3 }
 0xc43   : > { %v7888_v60 = vpop.f32.mrf.mxu2  ;;  %v7915_v41 = vadd.f32 %v7914_v27, %v5906_v1 }
 0xc44   : > { %v7889_v55 = vadd.f32 %v7888_v60, %v5696_v63  ;;  %v7913_v60 = vadd.f32 %v7912_v54, %v5904_v52 }
 0xc45   : > { %v7942_v46 = vmax.f32 %v7915_v41, 0.0 }
 0xc46   : > { %v7945_v51 = vmax.f32 %v7889_v55, 0.0 }
 0xc4a   : > { %v7917_v35 = vpop.f32.mrf.mxu3 }
 0xc4b   : > { %v7890_v57 = vpop.f32.mrf.mxu2  ;;  %v7918_v53 = vadd.f32 %v7917_v35, %v5909_v19 }
 0xc4c   : > { %v7891_v5 = vadd.f32 %v7890_v57, %v5698_v23 }
 0xc4d   : > { %v7946_v57 = vmax.f32 %v7918_v53, 0.0 }
 0xc4e   : > { %v7949_v9 = vmax.f32 %v7891_v5, 0.0 }
 0xc50   : > { %v7969_v42 = vpack.c.bf16 %v7949_v9, %v7945_v51 }
 0xc52   : > { %v7919_v47 = vpop.f32.mrf.mxu3 }
 0xc53   : > { %v7893_v12 = vpop.f32.mrf.mxu2  ;;  %v7920_v61 = vadd.f32 %v7919_v47, %v5911_v45  ;;  %v7938_v47 = vmax.f32 %v7913_v60, 0.0 }
 0xc54   : > { %v7894_v2 = vadd.f32 %v7893_v12, %v5701_v10  ;;  %v17103_v12 = vld [vmem:[#allocation361_spill] sm:$0xff] }
 0xc55   : > { %v7950_v56 = vmax.f32 %v7920_v61, 0.0  ;;  %v5280_v10 = vadd.f32 %v17104_v50, %v17103_v12  ;;  %v5493_v27 = vadd.f32 %v17105_v0, %v17103_v12  ;;  %v7966_v32 = vpack.c.bf16 %v7942_v46, %v7938_v47 }
 0xc56   : > { %v7953_v3 = vmax.f32 %v7894_v2, 0.0 }
 0xc57   : > { %v7970_v35 = vpack.c.bf16 %v7950_v56, %v7946_v57 }
 0xc5a   : > { %v7922_v40 = vpop.f32.mrf.mxu3 }
 0xc5b   : > { %v7895_v59 = vpop.f32.mrf.mxu2  ;;  %v7923_v38 = vadd.f32 %v7922_v40, %v5914_v58 }
 0xc5c   : > { %v7896_v7 = vadd.f32 %v7895_v59, %v5703_v39 }
 0xc5d   : > { %v7954_v16 = vmax.f32 %v7923_v38, 0.0 }
 0xc5e   : > { %v7957_v6 = vmax.f32 %v7896_v7, 0.0  ;;  %v17106_v7 = vld [vmem:[#allocation362_spill] sm:$0xff] }
 0xc60   : > { %v7973_v24 = vpack.c.bf16 %v7957_v6, %v7953_v3 }
 0xc62   : > { %v7924_v21 = vpop.f32.mrf.mxu3  ;;  %8009 = vmatpush.bf16.msra.mxu2 %v7973_v24 }
 0xc63   : > { %v7925_v34 = vadd.f32 %v7924_v21, %v5916_v18 }
 0xc65   : > { %v7958_v4 = vmax.f32 %v7925_v34, 0.0 }
 0xc66   : > { %8010 = vmatpush.bf16.msra.mxu2 %v7969_v42 }
 0xc67   : > { %v7974_v29 = vpack.c.bf16 %v7958_v4, %v7954_v16 }
 0xc68   : > { %v7988_v25 = vpop.f32.mrf.mxu0 }
 0xc69   : > { %8022 = vmatpush.bf16.msra.mxu3 %v7974_v29  ;;  %v7989_v54 = vadd.f32 %v7988_v25, %v5280_v10 }
 0xc6a   : > { %8011 = vmatpush.bf16.msra.mxu2 %v7965_v33 }
 0xc6b   : > { %v8031_v40 = vmax.f32 %v7989_v54, 0.0 }
 0xc6d   : > { %8023 = vmatpush.bf16.msra.mxu3 %v7970_v35 }
 0xc6e   : > { %8012 = vmatpush.bf16.msra.mxu2 %v15653_v62 }
 0xc6f   : > { %v8001_v23 = vpop.f32.mrf.mxu1 }
 0xc70   : > { %v8002_v36 = vadd.f32 %v8001_v23, %v5493_v27  ;;  %v7990_v39 = vpop.f32.mrf.mxu0 }
 0xc71   : > { %8024 = vmatpush.bf16.msra.mxu3 %v7966_v32  ;;  %8834 = vmatmul.msk.bf16.vlgmr.msra.gmra.mxu2 %vm6202_vm1, %v15643_v44 }
 0xc72   : > { %v8032_v2 = vmax.f32 %v8002_v36, 0.0 }
 0xc74   : > { %v8039_v59 = vrot.slane %v8032_v2, 4 }
 0xc75   : > { %8025 = vmatpush.bf16.msra.mxu3 %v15656_v30 }
 0xc76   : > { %v8042_v62 = vsel %vm8041_vm14, %v8031_v40, %v8039_v59 }
 0xc77   : > { %v8003_v48 = vpop.f32.mrf.mxu1  ;;  %8046 = vst [vmem:[%s421_s15] sm:$0x77] %v8042_v62 }
 0xc78   : > { %8835 = vmatmul.msk.bf16.vlgmr.msra.gmra.mxu3 %vm6202_vm1, %v15643_v44 }
 0xcf4   : > { %v8014_v63 = vpop.f32.mrf.mxu2 }
 0xcf5   : > { %v8015_v31 = vadd.f32 %v8014_v63, %v17106_v7 }
 0xcf7   : > { %v8033_v6 = vmax.f32 %v8015_v31, 0.0 }
 0xcfb   : > { %v8027_v5 = vpop.f32.mrf.mxu3 }
 0xcfc   : > { %v8028_v30 = vadd.f32 %v8027_v5, %v17107_v17  ;;  %v8016_v55 = vpop.f32.mrf.mxu2 }
 0xcfe   : > { %v8034_v3 = vmax.f32 %v8028_v30, 0.0 }
 0xd00   : > { %v8040_v49 = vrot.slane %v8034_v3, 4 }
 0xd02   : > { %v8043_v44 = vsel %vm8041_vm14, %v8033_v6, %v8040_v49 }
 0xd03   : > { %v8029_v58 = vpop.f32.mrf.mxu3  ;;  %8047 = vst [vmem:[%s421_s15 + $0x8] sm:$0x77] %v8043_v44 }
 0xd04   : > { %9116 = shalt.err (!%p9113_p3)
}
 0xd05   : > { %8937 = dma.vmem_to_hbm [thread:$0]  (%p9265_p5), %s8063_s20, 256, %s8065_s26, %s8049_s25  }
 0xd06 PF: > { %p8943_p4 = scmp.ge.s32.totalorder %s9151_s24, 2  ;;  %s8076_s19 = sand.u32 1, %s9139_s21  }
 0xd07   : > { %s8077_s15 = scalar_lea.sflag [#allocation3], %s8076_s19 }
 0xd08   : > { %p8940_p7 = pnand %p8943_p4, %p9269_p6 }
 0xd0a   : > { %p8941_p8 = pneg %p8940_p7 }
 0xd0c   : > { %9134 = dma.done.wait (%p8941_p8), %s8077_s15, 256  }
 0xd0d   : > { %9136 = vsyncadd (%p8941_p8), %s8077_s15, 4294967040  ;;  %s17108_s0 = sld [smem:[#allocation5_spill]]  ;;  %p22_p9 = scmp.ge.s32.totalorder %s9252_s27, 6  }
 0xd0e   : > { %s17109_s21 = smov %s9143_s22  ;;  %s17110_s22 = smov %s9147_s23 }
 0xd0f   : > { %s17112_s24 = smov %s9252_s27  ;;  %24 = sbr.rel (!%p22_p9) target bundleno = 5 (0x5), region = 106 }
 0xd13   : > { %s17111_s23 = smov %s17108_s0 }
 0xd14   :  { %8083 = vsyncpa [#allocation3], 1 }
 0xd15   :  { %8085 = vsyncpa [#allocation3 + $0x1], 1 }

</bundles_post_ra>
